<compile_context>
chip_gen: v7x
topology: tpu7x:2x2x1
jax: 0.10.0
libtpu: 0.0.40
codegen_flags: <defaults>
</compile_context>

<pallas_src>
import functools

import jax
import jax.numpy as jnp
from jax import lax
from jax.experimental import pallas as pl
from jax.experimental.pallas import tpu as pltpu

BN_EPS = 1e-5

# Target output rows (pixels) per grid step.  The per-step working set (halo'd input
# band + weight + z^T tile) is well under 1 MiB even at 2048 rows, so the tile is sized
# for DMA efficiency / per-step overhead, not VMEM (fine on v5e/v6e 128 MiB and v7x 64 MiB).
TARGET_ROWS_PER_TILE = 2048
VMEM_LIMIT_BYTES = 32 * 1024 * 1024


# ----------------------------- Pallas kernels --------------------------------
def _stats_kernel(xb_ref, w_ref, zt_ref, ss_ref, *, band_h, w_out, k, cin):
    # xb_ref: [1, band_h + k - 1, Wp, Cin]  halo'd input row band (compute dtype)
    # w_ref:  [K = k*k*Cin, C]              fused block weight (compute dtype)
    # zt_ref: [C, band_h * W]               lane-dense conv-output stash z^T
    # ss_ref: [1, C, 2] f32                 per-tile (sum z, sum z^2) partials
    xb = xb_ref[0]                                            # [band_h+k-1, Wp, Cin]
    # In-VMEM im2col: k*k statically shifted views, channels concatenated on lanes.
    cols = [xb[i:i + band_h, j:j + w_out, :] for i in range(k) for j in range(k)]
    patches = jnp.concatenate(cols, axis=2).reshape(band_h * w_out, k * k * cin)
    # z^T in one MXU call (contract K); result [C, rows] is already lane-dense.
    z_t = lax.dot_general(w_ref[...], patches,
                          dimension_numbers=(((0,), (1,)), ((), ())),
                          preferred_element_type=jnp.float32)
    s1 = jnp.sum(z_t, axis=1, keepdims=True)                  # [C, 1]
    s2 = jnp.sum(z_t * z_t, axis=1, keepdims=True)            # [C, 1]
    ss_ref[...] = jnp.concatenate([s1, s2], axis=1)[None]     # [1, C, 2]
    zt_ref[...] = z_t.astype(zt_ref.dtype)


def _apply_kernel(zt_ref, ss_ref, o_ref):
    # zt_ref: [C, rows] (compute dtype)   ss_ref: [C, 2] f32 (col 0 = scale, col 1 = shift)
    z = zt_ref[...].astype(jnp.float32)
    scale = ss_ref[:, 0:1]
    shift = ss_ref[:, 1:2]
    o_ref[...] = jnp.maximum(z * scale + shift, 0.0).astype(o_ref.dtype)


def _run_stats(x_bands, w_mat, *, band_h, w_out, k, cin, n_tiles):
    K, C = w_mat.shape
    rows = band_h * w_out
    kern = functools.partial(_stats_kernel, band_h=band_h, w_out=w_out, k=k, cin=cin)
    return pl.pallas_call(
        kern,
        out_shape=(jax.ShapeDtypeStruct((C, n_tiles * rows), x_bands.dtype),
                   jax.ShapeDtypeStruct((n_tiles, C, 2), jnp.float32)),
        grid=(n_tiles,),
        in_specs=[
            pl.BlockSpec((1, x_bands.shape[1], x_bands.shape[2], cin),
                         lambda t: (t, 0, 0, 0)),
            pl.BlockSpec((K, C), lambda t: (0, 0)),           # tiny, resident weight
        ],
        out_specs=(
            pl.BlockSpec((C, rows), lambda t: (0, t)),        # lane-dense z^T stash
            pl.BlockSpec((1, C, 2), lambda t: (t, 0, 0)),     # packed sum/sumsq partials
        ),
        compiler_params=pltpu.CompilerParams(
            dimension_semantics=("parallel",),
            vmem_limit_bytes=VMEM_LIMIT_BYTES),
    )(x_bands, w_mat)


def _run_apply(z_t, scale_shift, *, rows, n_tiles, out_dtype):
    C = z_t.shape[0]
    return pl.pallas_call(
        _apply_kernel,
        out_shape=jax.ShapeDtypeStruct((C, n_tiles * rows), out_dtype),
        grid=(n_tiles,),
        in_specs=[
            pl.BlockSpec((C, rows), lambda t: (0, t)),
            pl.BlockSpec((C, 2), lambda t: (0, 0)),
        ],
        out_specs=pl.BlockSpec((C, rows), lambda t: (0, t)),
        compiler_params=pltpu.CompilerParams(
            dimension_semantics=("parallel",),
            vmem_limit_bytes=VMEM_LIMIT_BYTES),
    )(z_t, scale_shift)


# ------------------------------- JAX glue -------------------------------------
def _pick_band_h(H, W, N):
    """Largest divisor of H whose row band stays near the target rows/tile."""
    cap = max(1, TARGET_ROWS_PER_TILE // max(W, 1))
    band_h = 1
    for d in range(1, H + 1):
        if H % d == 0 and d <= cap:
            band_h = d
    # Prefer >= 2 tiles so both v7x TensorCores get work under "parallel".
    if N * (H // band_h) < 2:
        for d in range(band_h - 1, 0, -1):
            if H % d == 0 and H // d >= 2:
                band_h = d
                break
    # Lane-density constraint on z^T / output blocks: rows/tile must be a multiple
    # of 128 unless there is only one tile; fall back to one band per image.
    if N * (H // band_h) > 1 and (band_h * W) % 128 != 0:
        band_h = H
    return band_h


@functools.partial(jax.jit, static_argnums=(2,), static_argnames=("compute_dtype",))
def inception_block_forward(x_nchw, stream_weights, stream_cfg, *,
                            compute_dtype=jnp.bfloat16):
    """stream_weights: tuple of {"w","b","gamma","beta"} (one single-conv-layer stream each).
       stream_cfg:     tuple of (kernel_size, padding) Python ints per stream."""
    N, Cin, H, W = x_nchw.shape

    # --- fold every stream into one 'same' conv of the maximum kernel size ---
    k_max = max(k for k, _ in stream_cfg)
    pad_max = (k_max - 1) // 2
    w_cols, gammas, betas = [], [], []
    for layer, (k, pad) in zip(stream_weights, stream_cfg):
        # TODO(synk): only stride=1 / dilation=1 / groups=1, single-layer, 'same'-padded
        # odd-kernel streams are fused here; other conv_block options are not lowered.
        assert 2 * pad == k - 1, "fused path requires 'same' odd-kernel convolutions"
        off = (k_max - k) // 2
        w = layer["w"]                                             # (Cout, Cin, k, k)
        w_emb = jnp.zeros((w.shape[0], Cin, k_max, k_max), w.dtype)
        w_emb = w_emb.at[:, :, off:off + k, off:off + k].set(w)
        # (Cout, Cin, KH, KW) -> (KH, KW, Cin, Cout) -> (K, Cout)
        w_cols.append(jnp.transpose(w_emb, (2, 3, 1, 0)).reshape(k_max * k_max * Cin, -1))
        gammas.append(layer["gamma"])
        betas.append(layer["beta"])
    w_mat = jnp.concatenate(w_cols, axis=1)                        # [K, C_total]
    gamma = jnp.concatenate(gammas)
    beta = jnp.concatenate(betas)
    C = w_mat.shape[1]

    # --- choose a row band (output rows per grid step) ---
    band_h = _pick_band_h(H, W, N)
    n_bands = H // band_h
    n_tiles = N * n_bands
    rows = band_h * W
    assert n_tiles == 1 or rows % 128 == 0, (
        "TODO(synk): pad rows-per-tile to a lane multiple for this (H, W)")

    # --- pad the input once (NHWC, compute dtype) and cut halo'd row bands ---
    x_nhwc = jnp.transpose(x_nchw, (0, 2, 3, 1)).astype(compute_dtype)
    xp = jnp.pad(x_nhwc, ((0, 0), (pad_max, pad_max), (pad_max, pad_max), (0, 0)))
    Wp = W + 2 * pad_max
    if n_bands == 1:
        x_bands = xp                                               # [N, H+2p, Wp, Cin]
    else:
        # Tiny halo duplication ((band_h + 2p)/band_h) instead of a 25x im2col blowup.
        slabs = [xp[:, b * band_h: b * band_h + band_h + 2 * pad_max]
                 for b in range(n_bands)]
        x_bands = jnp.stack(slabs, axis=1).reshape(
            n_tiles, band_h + 2 * pad_max, Wp, Cin)
    w_c = w_mat.astype(compute_dtype)

    # Pass A: lane-dense z^T stash + packed per-tile (sum, sumsq) partials.
    z_t, ss = _run_stats(x_bands, w_c, band_h=band_h, w_out=W, k=k_max,
                         cin=Cin, n_tiles=n_tiles)
    M = N * H * W
    mean_z = jnp.sum(ss[:, :, 0], axis=0) / M
    var_z = jnp.maximum(jnp.sum(ss[:, :, 1], axis=0) / M - mean_z * mean_z, 0.0)

    # Fold conv bias + BN mean/var + affine into one per-channel scale/shift.
    # (The conv bias only shifts the batch mean, so it cancels exactly.)
    scale = gamma * lax.rsqrt(var_z + BN_EPS)
    shift = beta - mean_z * scale
    scale_shift = jnp.stack([scale, shift], axis=1).astype(jnp.float32)   # [C, 2]

    # Pass B: y^T = relu(z^T * scale + shift); reads only the stash (no re-matmul).
    y_t = _run_apply(z_t, scale_shift, rows=rows, n_tiles=n_tiles,
                     out_dtype=compute_dtype)

    # [C, N*H*W] (columns are (n, h, w) row-major since n_bands * band_h == H) -> NCHW
    # via a cheap leading-axis permute.
    return jnp.transpose(y_t.reshape(C, N, H, W), (1, 0, 2, 3))


# --------------------------- pure-JAX reference --------------------------------
def _reference_forward(x, stream_weights, stream_cfg):
    outs = []
    for layer, (k, pad) in zip(stream_weights, stream_cfg):
        y = jax.lax.conv_general_dilated(
            x, layer["w"], window_strides=(1, 1),
            padding=[(pad, pad), (pad, pad)],
            dimension_numbers=("NCHW", "OIHW", "NCHW"))
        y = y + layer["b"].reshape(1, -1, 1, 1)
        m = jnp.mean(y, axis=(0, 2, 3), keepdims=True)
        v = jnp.mean((y - m) ** 2, axis=(0, 2, 3), keepdims=True)
        y = (y - m) / jnp.sqrt(v + BN_EPS)
        y = y * layer["gamma"].reshape(1, -1, 1, 1) + layer["beta"].reshape(1, -1, 1, 1)
        outs.append(jnp.maximum(y, 0.0))
    return jnp.concatenate(outs, axis=1)


# ---------------------------------- main ----------------------------------------
if __name__ == "__main__":
    # InceptionBlock(input=4, filters=[[8],[8],[8]], kernel_sizes=[[1],[3],[5]],
    #                stride=[[1],[1],[1]], padding=[[0],[1],[2]])
    # -> 3 streams of Conv2d(4->8) + BatchNorm2d(8) + ReLU, concat -> 24 channels.
    key = jax.random.PRNGKey(0)
    key, kx = jax.random.split(key)

    N, Cin, H, W = 2, 4, 16, 16
    x = jax.random.normal(kx, (N, Cin, H, W), dtype=jnp.float32)

    stream_spec = ((8, 1, 0), (8, 3, 1), (8, 5, 2))   # (Cout, kernel, padding)
    weights, cfg = [], []
    for cout, k, pad in stream_spec:
        key, kw_, kb_ = jax.random.split(key, 3)
        weights.append({
            "w": jax.random.normal(kw_, (cout, Cin, k, k), dtype=jnp.float32) * 0.1,
            "b": jax.random.normal(kb_, (cout,), dtype=jnp.float32) * 0.1,
            "gamma": jnp.ones((cout,), dtype=jnp.float32),   # PyTorch BN init
            "beta": jnp.zeros((cout,), dtype=jnp.float32),
        })
        cfg.append((k, pad))
    weights, cfg = tuple(weights), tuple(cfg)

    # TODO(synk): dropout=0 (default) -> the module emits no Dropout2d layer; nothing to lower.
    ref = jax.block_until_ready(_reference_forward(x, weights, cfg))

    # float32 path: tight numerical check against the XLA reference.
    out_f32 = jax.block_until_ready(
        inception_block_forward(x, weights, cfg, compute_dtype=jnp.float32))
    assert out_f32.shape == (N, sum(c for c, _, _ in stream_spec), H, W), out_f32.shape
    err_f32 = float(jnp.max(jnp.abs(out_f32 - ref)))
    assert err_f32 < 2e-4, err_f32

    # bf16 path (perf default; f32 accumulation + f32 BN stats, bf16 z stash / output).
    out_bf16 = jax.block_until_ready(
        inception_block_forward(x, weights, cfg, compute_dtype=jnp.bfloat16))
    err_bf16 = float(jnp.max(jnp.abs(out_bf16.astype(jnp.float32) - ref)))
    assert err_bf16 < 1e-1, err_bf16

    print("KERNEL_OK")
</pallas_src>

<mosaic_0001>
module attributes {stable_mosaic.version = 11 : i64} {
  func.func @_stats_kernel(%arg0: i32, %arg1: memref<1x20x20x4xf32, #tpu.memory_space<vmem>>, %arg2: memref<100x24xf32, #tpu.memory_space<vmem>>, %arg3: memref<24x256xf32, #tpu.memory_space<vmem>>, %arg4: memref<1x24x2xf32, #tpu.memory_space<vmem>>) attributes {dimension_semantics = [#tpu.dimension_semantics<parallel>], iteration_bounds = array<i64: 2>, scalar_prefetch = 0 : i64, scratch_operands = 0 : i64, tpu.core_type = #tpu.core_type<tc>, window_params = [{transform_indices = @transform_0, window_bounds = array<i64: 1, 20, 20, 4>}, {pipeline_mode = #tpu.pipeline_mode<synchronous>, transform_indices = @transform_1, window_bounds = array<i64: 100, 24>}, {transform_indices = @transform_2, window_bounds = array<i64: 24, 256>}, {transform_indices = @transform_3, window_bounds = array<i64: 1, 24, 2>}]} {
    %c0 = arith.constant 0 : index
    %c0_0 = arith.constant 0 : index
    %c0_1 = arith.constant 0 : index
    %c0_2 = arith.constant 0 : index
    %0 = vector.load %arg1[%c0, %c0_0, %c0_1, %c0_2] : memref<1x20x20x4xf32, #tpu.memory_space<vmem>>, vector<1x20x20x4xf32>
    %1 = vector.shape_cast %0 : vector<1x20x20x4xf32> to vector<20x20x4xf32>
    %2 = vector.extract_strided_slice %1 {offsets = [0, 0, 0], sizes = [16, 16, 4], strides = [1, 1, 1]} : vector<20x20x4xf32> to vector<16x16x4xf32>
    %3 = vector.extract_strided_slice %1 {offsets = [0, 1, 0], sizes = [16, 16, 4], strides = [1, 1, 1]} : vector<20x20x4xf32> to vector<16x16x4xf32>
    %4 = vector.extract_strided_slice %1 {offsets = [0, 2, 0], sizes = [16, 16, 4], strides = [1, 1, 1]} : vector<20x20x4xf32> to vector<16x16x4xf32>
    %5 = vector.extract_strided_slice %1 {offsets = [0, 3, 0], sizes = [16, 16, 4], strides = [1, 1, 1]} : vector<20x20x4xf32> to vector<16x16x4xf32>
    %6 = vector.extract_strided_slice %1 {offsets = [0, 4, 0], sizes = [16, 16, 4], strides = [1, 1, 1]} : vector<20x20x4xf32> to vector<16x16x4xf32>
    %7 = vector.extract_strided_slice %1 {offsets = [1, 0, 0], sizes = [16, 16, 4], strides = [1, 1, 1]} : vector<20x20x4xf32> to vector<16x16x4xf32>
    %8 = vector.extract_strided_slice %1 {offsets = [1, 1, 0], sizes = [16, 16, 4], strides = [1, 1, 1]} : vector<20x20x4xf32> to vector<16x16x4xf32>
    %9 = vector.extract_strided_slice %1 {offsets = [1, 2, 0], sizes = [16, 16, 4], strides = [1, 1, 1]} : vector<20x20x4xf32> to vector<16x16x4xf32>
    %10 = vector.extract_strided_slice %1 {offsets = [1, 3, 0], sizes = [16, 16, 4], strides = [1, 1, 1]} : vector<20x20x4xf32> to vector<16x16x4xf32>
    %11 = vector.extract_strided_slice %1 {offsets = [1, 4, 0], sizes = [16, 16, 4], strides = [1, 1, 1]} : vector<20x20x4xf32> to vector<16x16x4xf32>
    %12 = vector.extract_strided_slice %1 {offsets = [2, 0, 0], sizes = [16, 16, 4], strides = [1, 1, 1]} : vector<20x20x4xf32> to vector<16x16x4xf32>
    %13 = vector.extract_strided_slice %1 {offsets = [2, 1, 0], sizes = [16, 16, 4], strides = [1, 1, 1]} : vector<20x20x4xf32> to vector<16x16x4xf32>
    %14 = vector.extract_strided_slice %1 {offsets = [2, 2, 0], sizes = [16, 16, 4], strides = [1, 1, 1]} : vector<20x20x4xf32> to vector<16x16x4xf32>
    %15 = vector.extract_strided_slice %1 {offsets = [2, 3, 0], sizes = [16, 16, 4], strides = [1, 1, 1]} : vector<20x20x4xf32> to vector<16x16x4xf32>
    %16 = vector.extract_strided_slice %1 {offsets = [2, 4, 0], sizes = [16, 16, 4], strides = [1, 1, 1]} : vector<20x20x4xf32> to vector<16x16x4xf32>
    %17 = vector.extract_strided_slice %1 {offsets = [3, 0, 0], sizes = [16, 16, 4], strides = [1, 1, 1]} : vector<20x20x4xf32> to vector<16x16x4xf32>
    %18 = vector.extract_strided_slice %1 {offsets = [3, 1, 0], sizes = [16, 16, 4], strides = [1, 1, 1]} : vector<20x20x4xf32> to vector<16x16x4xf32>
    %19 = vector.extract_strided_slice %1 {offsets = [3, 2, 0], sizes = [16, 16, 4], strides = [1, 1, 1]} : vector<20x20x4xf32> to vector<16x16x4xf32>
    %20 = vector.extract_strided_slice %1 {offsets = [3, 3, 0], sizes = [16, 16, 4], strides = [1, 1, 1]} : vector<20x20x4xf32> to vector<16x16x4xf32>
    %21 = vector.extract_strided_slice %1 {offsets = [3, 4, 0], sizes = [16, 16, 4], strides = [1, 1, 1]} : vector<20x20x4xf32> to vector<16x16x4xf32>
    %22 = vector.extract_strided_slice %1 {offsets = [4, 0, 0], sizes = [16, 16, 4], strides = [1, 1, 1]} : vector<20x20x4xf32> to vector<16x16x4xf32>
    %23 = vector.extract_strided_slice %1 {offsets = [4, 1, 0], sizes = [16, 16, 4], strides = [1, 1, 1]} : vector<20x20x4xf32> to vector<16x16x4xf32>
    %24 = vector.extract_strided_slice %1 {offsets = [4, 2, 0], sizes = [16, 16, 4], strides = [1, 1, 1]} : vector<20x20x4xf32> to vector<16x16x4xf32>
    %25 = vector.extract_strided_slice %1 {offsets = [4, 3, 0], sizes = [16, 16, 4], strides = [1, 1, 1]} : vector<20x20x4xf32> to vector<16x16x4xf32>
    %26 = vector.extract_strided_slice %1 {offsets = [4, 4, 0], sizes = [16, 16, 4], strides = [1, 1, 1]} : vector<20x20x4xf32> to vector<16x16x4xf32>
    %27 = tpu.concatenate %2, %3, %4, %5, %6, %7, %8, %9, %10, %11, %12, %13, %14, %15, %16, %17 in 2 : vector<16x16x4xf32>, vector<16x16x4xf32>, vector<16x16x4xf32>, vector<16x16x4xf32>, vector<16x16x4xf32>, vector<16x16x4xf32>, vector<16x16x4xf32>, vector<16x16x4xf32>, vector<16x16x4xf32>, vector<16x16x4xf32>, vector<16x16x4xf32>, vector<16x16x4xf32>, vector<16x16x4xf32>, vector<16x16x4xf32>, vector<16x16x4xf32>, vector<16x16x4xf32> -> vector<16x16x64xf32>
    %28 = tpu.concatenate %18, %19, %20, %21, %22, %23, %24, %25, %26 in 2 : vector<16x16x4xf32>, vector<16x16x4xf32>, vector<16x16x4xf32>, vector<16x16x4xf32>, vector<16x16x4xf32>, vector<16x16x4xf32>, vector<16x16x4xf32>, vector<16x16x4xf32>, vector<16x16x4xf32> -> vector<16x16x36xf32>
    %29 = tpu.concatenate %27, %28 in 2 : vector<16x16x64xf32>, vector<16x16x36xf32> -> vector<16x16x100xf32>
    %30 = vector.shape_cast %29 : vector<16x16x100xf32> to vector<256x100xf32>
    %c0_3 = arith.constant 0 : index
    %c0_4 = arith.constant 0 : index
    %31 = vector.load %arg2[%c0_3, %c0_4] : memref<100x24xf32, #tpu.memory_space<vmem>>, vector<100x24xf32>
    %cst = arith.constant dense<0.000000e+00> : vector<24x256xf32>
    %32 = tpu.matmul %31, %30, %cst {dimension_numbers = #tpu.dot_dimension_numbers<[0], [1], [1], [0], [0, 1, 1, 0], [], []>} : vector<100x24xf32>, vector<256x100xf32>, vector<24x256xf32> -> vector<24x256xf32>
    %cst_5 = arith.constant dense<0.000000e+00> : vector<24xf32>
    %33 = vector.multi_reduction <add>, %32, %cst_5 [1] : vector<24x256xf32> to vector<24xf32>
    %34 = vector.shape_cast %33 : vector<24xf32> to vector<24x1xf32>
    %35 = arith.mulf %32, %32 : vector<24x256xf32>
    %cst_6 = arith.constant dense<0.000000e+00> : vector<24xf32>
    %36 = vector.multi_reduction <add>, %35, %cst_6 [1] : vector<24x256xf32> to vector<24xf32>
    %37 = vector.shape_cast %36 : vector<24xf32> to vector<24x1xf32>
    %38 = tpu.concatenate %34, %37 in 1 : vector<24x1xf32>, vector<24x1xf32> -> vector<24x2xf32>
    %39 = vector.shape_cast %38 : vector<24x2xf32> to vector<1x24x2xf32>
    %c0_7 = arith.constant 0 : index
    %c0_8 = arith.constant 0 : index
    %c0_9 = arith.constant 0 : index
    %40 = vector.load %arg4[%c0_7, %c0_8, %c0_9] : memref<1x24x2xf32, #tpu.memory_space<vmem>>, vector<1x24x2xf32>
    tpu.vector_store %arg4[%c0_7, %c0_8, %c0_9], %39 {strides = array<i32>} : memref<1x24x2xf32, #tpu.memory_space<vmem>>, vector<1x24x2xf32>,
    %c0_10 = arith.constant 0 : index
    %c0_11 = arith.constant 0 : index
    %41 = vector.load %arg3[%c0_10, %c0_11] : memref<24x256xf32, #tpu.memory_space<vmem>>, vector<24x256xf32>
    tpu.vector_store %arg3[%c0_10, %c0_11], %32 {strides = array<i32>} : memref<24x256xf32, #tpu.memory_space<vmem>>, vector<24x256xf32>,
    return
  }
  func.func @transform_0(%arg0: i32) -> (i32, i32, i32, i32) {
    %c0_i32 = arith.constant 0 : i32
    %c0_i32_0 = arith.constant 0 : i32
    %c0_i32_1 = arith.constant 0 : i32
    %c0_i32_2 = arith.constant 0 : i32
    return %arg0, %c0_i32, %c0_i32_0, %c0_i32_1 : i32, i32, i32, i32
  }
  func.func @transform_1(%arg0: i32) -> (i32, i32) {
    %c0_i32 = arith.constant 0 : i32
    %c0_i32_0 = arith.constant 0 : i32
    %c0_i32_1 = arith.constant 0 : i32
    return %c0_i32, %c0_i32_0 : i32, i32
  }
  func.func @transform_2(%arg0: i32) -> (i32, i32) {
    %c0_i32 = arith.constant 0 : i32
    %c0_i32_0 = arith.constant 0 : i32
    return %c0_i32, %arg0 : i32, i32
  }
  func.func @transform_3(%arg0: i32) -> (i32, i32, i32) {
    %c0_i32 = arith.constant 0 : i32
    %c0_i32_0 = arith.constant 0 : i32
    %c0_i32_1 = arith.constant 0 : i32
    return %arg0, %c0_i32, %c0_i32_0 : i32, i32, i32
  }
}

module attributes {stable_mosaic.version = 11 : i64} {
  func.func @_apply_kernel(%arg0: i32, %arg1: memref<24x256xf32, #tpu.memory_space<vmem>>, %arg2: memref<24x2xf32, #tpu.memory_space<vmem>>, %arg3: memref<24x256xf32, #tpu.memory_space<vmem>>) attributes {dimension_semantics = [#tpu.dimension_semantics<parallel>], iteration_bounds = array<i64: 2>, scalar_prefetch = 0 : i64, scratch_operands = 0 : i64, tpu.core_type = #tpu.core_type<tc>, window_params = [{transform_indices = @transform_0, window_bounds = array<i64: 24, 256>}, {pipeline_mode = #tpu.pipeline_mode<synchronous>, transform_indices = @transform_1, window_bounds = array<i64: 24, 2>}, {transform_indices = @transform_2, window_bounds = array<i64: 24, 256>}]} {
    %c0 = arith.constant 0 : index
    %c0_0 = arith.constant 0 : index
    %0 = vector.load %arg1[%c0, %c0_0] : memref<24x256xf32, #tpu.memory_space<vmem>>, vector<24x256xf32>
    %c0_1 = arith.constant 0 : index
    %c0_2 = arith.constant 0 : index
    %1 = vector.load %arg2[%c0_1, %c0_2] : memref<24x2xf32, #tpu.memory_space<vmem>>, vector<24x1xf32>
    %c0_3 = arith.constant 0 : index
    %c1 = arith.constant 1 : index
    %2 = vector.load %arg2[%c0_3, %c1] : memref<24x2xf32, #tpu.memory_space<vmem>>, vector<24x1xf32>
    %3 = vector.broadcast %1 : vector<24x1xf32> to vector<24x256xf32>
    %4 = arith.mulf %0, %3 : vector<24x256xf32>
    %5 = vector.broadcast %2 : vector<24x1xf32> to vector<24x256xf32>
    %6 = arith.addf %4, %5 : vector<24x256xf32>
    %cst = arith.constant 0.000000e+00 : f32
    %7 = vector.broadcast %cst : f32 to vector<24x256xf32>
    %8 = arith.maximumf %6, %7 : vector<24x256xf32>
    %c0_4 = arith.constant 0 : index
    %c0_5 = arith.constant 0 : index
    %9 = vector.load %arg3[%c0_4, %c0_5] : memref<24x256xf32, #tpu.memory_space<vmem>>, vector<24x256xf32>
    tpu.vector_store %arg3[%c0_4, %c0_5], %8 {strides = array<i32>} : memref<24x256xf32, #tpu.memory_space<vmem>>, vector<24x256xf32>,
    return
  }
  func.func @transform_0(%arg0: i32) -> (i32, i32) {
    %c0_i32 = arith.constant 0 : i32
    %c0_i32_0 = arith.constant 0 : i32
    return %c0_i32, %arg0 : i32, i32
  }
  func.func @transform_1(%arg0: i32) -> (i32, i32) {
    %c0_i32 = arith.constant 0 : i32
    %c0_i32_0 = arith.constant 0 : i32
    %c0_i32_1 = arith.constant 0 : i32
    return %c0_i32, %c0_i32_0 : i32, i32
  }
  func.func @transform_2(%arg0: i32) -> (i32, i32) {
    %c0_i32 = arith.constant 0 : i32
    %c0_i32_0 = arith.constant 0 : i32
    return %c0_i32, %arg0 : i32, i32
  }
}

</mosaic_0001>

<bundles_post_ra>
// kernel: inception_block_forward.3
= control target key start
LH: loop header
LB: loop body
LE: loop exit
PB: predicated region body
PF: predicated region fallthrough
CT: control target
= control target key end

     0   :  { %s409_s9 = smov 0   ;;  %s411_s10 = smov 0   ;;  %s478_s0 = inlined_call_operand.vmem [shape: f32[24,512], index: 0, kind: input, shape index: {}]   ;;  %s479_s1 = inlined_call_operand.vmem [shape: f32[24,2], index: 1, kind: input, shape index: {}]   ;;  %s480_s2 = inlined_call_operand.vmem [shape: f32[24,512], index: 2, kind: output, shape index: {}]  }
   0x1   :  { %s413_s11 = smov 0  }
   0x2 LB: > { %s323_s12 = sadd.s32 4294967295, %s390_s11   ;;  %s426_s13 = sadd.s32 1, %s390_s11   ;;  %s390_s11 = sphi %s413_s11, %s484_s11   ;;  %s386_s10 = sphi %s411_s10, %s483_s10   ;;  %s382_s9 = sphi %s409_s9, %s482_s9  }
   0x3   : > { %s16_s14 = ssub.s32 %s390_s11, %s426_s13  ;;  %s19_s15 = sadd.s32 1, %s386_s10 }
   0x4   : > { %p17_p0 = scmp.eq.s32.totalorder %s16_s14, 0  ;;  %p26_p1 = scmp.ne.s32.totalorder %s386_s10, %s382_s9 }
   0x5   : > { %p27_p2 = scmp.eq.s32.totalorder %s390_s11, 0  ;;  %p77_p3 = scmp.eq.s32.totalorder %s323_s12, 1 }
   0x6   : > { %s437_s16 = scalar_select %p17_p0, %s386_s10, %s19_s15  }
   0x7   : > { %p28_p4 = por %p27_p2, %p26_p1  ;;  %p439_p5 = por %p77_p3, %p26_p1 }
   0x8   : > { %p326_p6 = scmp.ge.s32.totalorder %s390_s11, 2 }
   0xa   : > { %102 = sbr.rel (%p326_p6) target bundleno = 24 (0x18), region = 20 }
  0x11   : > { %105 = sbr.rel (!%p28_p4) target bundleno = 24 (0x18), region = 24  ;;  %s107_s18 = sand.u32 (%p28_p4), 1, %s386_s10  }
  0x12   : > { %s334_s19 = sshll.u32 (%p28_p4), %s390_s11, 4  ;;  %s336_s20 = smul.u32 (%p28_p4), 48, %s107_s18 }
  0x13   : > { %s112_s23 = scalar_lea.vmem (%p28_p4), %s478_s0, %s334_s19 }
  0x14   : > { %v125_v0 = vld [vmem:[%s112_s23] sm:$0xff] (%p28_p4)  ;;  %v127_v1 = vld [vmem:[%s112_s23 + $0x8] sm:$0xff] (%p28_p4)  ;;  %s109_s24 = scalar_lea.vmem (%p28_p4), [#allocation2], %s336_s20 }
  0x15   : > { %v129_v2 = vld [vmem:[%s112_s23 + $0x20] sm:$0xff] (%p28_p4)  ;;  %v131_v3 = vld [vmem:[%s112_s23 + $0x28] sm:$0xff] (%p28_p4)  ;;  %126 = vst [vmem:[%s109_s24] sm:$0xff] (%p28_p4), %v125_v0  ;;  %128 = vst [vmem:[%s109_s24 + $0x8] sm:$0xff] (%p28_p4), %v127_v1 }
  0x16   : > { %v133_v4 = vld [vmem:[%s112_s23 + $0x40] sm:$0xff] (%p28_p4)  ;;  %v135_v5 = vld [vmem:[%s112_s23 + $0x48] sm:$0xff] (%p28_p4)  ;;  %130 = vst [vmem:[%s109_s24 + $0x10] sm:$0xff] (%p28_p4), %v129_v2  ;;  %132 = vst [vmem:[%s109_s24 + $0x18] sm:$0xff] (%p28_p4), %v131_v3 }
  0x17   : > { %134 = vst [vmem:[%s109_s24 + $0x20] sm:$0xff] (%p28_p4), %v133_v4  ;;  %136 = vst [vmem:[%s109_s24 + $0x28] sm:$0xff] (%p28_p4), %v135_v5 }
  0x18 PF: > { %p329_p7 = scmp.ge.s32.totalorder %s390_s11, 1  ;;  %p141_p8 = scmp.lt.s32.totalorder %s390_s11, 3 }
  0x1a   : > { %p142_p9 = pnand %p329_p7, %p141_p8 }
  0x1b   : > { %v178_v6 = vld [vmem:[%s479_s1 + $0x10] sm:$0xff] (!%p142_p9)  ;;  %v176_v7 = vld [vmem:[%s479_s1] sm:$0xff] (!%p142_p9)  ;;  %v392_v8 = vmov (!%p142_p9), 0   ;;  %v177_v9 = vld [vmem:[%s479_s1 + $0x8] sm:$0xff] (!%p142_p9)  ;;  %v393_v10 = vmov (!%p142_p9), 1   ;;  %s148_s3 = sand.u32 (!%p142_p9), 1, %s382_s9  }
  0x1c   : > { %145 = sbr.rel (%p142_p9) target bundleno = 180 (0xb4), region = 47  ;;  %365 = vset.pattern.permute.xlu1 (!%p142_p9), %v392_v8  ;;  %364 = vset.pattern.permute.xlu0 (!%p142_p9), %v392_v8 }
  0x1d   : > { %191 = vperm.xlu1 (!%p142_p9), %365, %v178_v6   ;;  %181 = vperm.xlu0 (!%p142_p9), %364, %v176_v7   ;;  %s337_s4 = smul.u32 (!%p142_p9), 48, %s148_s3 }
  0x1f   : > { %s150_s5 = scalar_lea.vmem (!%p142_p9), [#allocation2], %s337_s4  ;;  %s167_s6 = scalar_lea.vmem (!%p142_p9), [#allocation3], %s337_s4 }
  0x20   : > { %v170_v13 = vld [vmem:[%s150_s5] sm:$0xff] (!%p142_p9)  ;;  %v171_v14 = vld [vmem:[%s150_s5 + $0x8] sm:$0xff] (!%p142_p9)  ;;  %v172_v20 = vld [vmem:[%s150_s5 + $0x10] sm:$0xff] (!%p142_p9) }
  0x21   : > { %366 = vset.pattern.permute.xlu1 (!%p142_p9), %v393_v10  ;;  %186 = vperm.xlu0 (!%p142_p9), %364, %v177_v9   ;;  %v174_v15 = vld [vmem:[%s150_s5 + $0x20] sm:$0xff] (!%p142_p9)  ;;  %v175_v16 = vld [vmem:[%s150_s5 + $0x28] sm:$0xff] (!%p142_p9)  ;;  %v173_v21 = vld [vmem:[%s150_s5 + $0x18] sm:$0xff] (!%p142_p9) }
  0x22   : > { %201 = vperm.xlu1 (!%p142_p9), %366, %v176_v7  }
  0x23   : > { %s335_s7 = sshll.u32 (%p439_p5), %s323_s12, 4 }
  0x24   : > { %s239_s14 = scalar_lea.vmem (%p439_p5), %s480_s2, %s335_s7 }
  0x25   : > { %367 = vset.pattern.permute.xlu0 %v393_v10 }
  0x26   : > { %209 = vperm.xlu1 %366, %v178_v6   ;;  %205 = vperm.xlu0 %367, %v177_v9  }
  0x9c   : > { %v192_v11 = vpop.permute.xlu1 %191  ;;  %v182_v12 = vpop.permute.xlu0 %181 }
  0x9d   : > { %v194_v17 = vmul.f32 %v182_v12, %v170_v13  ;;  %v195_v18 = vmul.f32 %v182_v12, %v171_v14  ;;  %v198_v25 = vmul.f32 %v192_v11, %v174_v15  ;;  %v199_v26 = vmul.f32 %v192_v11, %v175_v16 }
  0xa0   : > { %v187_v19 = vpop.permute.xlu0 %186 }
  0xa1   : > { %v202_v22 = vpop.permute.xlu1 %201  ;;  %v196_v27 = vmul.f32 %v187_v19, %v172_v20  ;;  %v197_v28 = vmul.f32 %v187_v19, %v173_v21 }
  0xa2   : > { %v212_v23 = vadd.f32 %v202_v22, %v194_v17  ;;  %v213_v24 = vadd.f32 %v202_v22, %v195_v18 }
  0xa4   : > { %v218_v29 = vmax.f32 %v212_v23, 0.0  ;;  %v219_v30 = vmax.f32 %v213_v24, 0.0 }
  0xa5   : > { %v210_v31 = vpop.permute.xlu1 %209  ;;  %v206_v32 = vpop.permute.xlu0 %205  ;;  %236 = sbr.rel (!%p439_p5) target bundleno = 180 (0xb4), region = 55 }
  0xa6   : > { %224 = vst [vmem:[%s167_s6] sm:$0xff] %v218_v29  ;;  %225 = vst [vmem:[%s167_s6 + $0x8] sm:$0xff] %v219_v30  ;;  %v216_v33 = vadd.f32 %v210_v31, %v198_v25  ;;  %v217_v34 = vadd.f32 %v210_v31, %v199_v26  ;;  %v214_v35 = vadd.f32 %v206_v32, %v196_v27 }
  0xa7   : > { %v215_v36 = vadd.f32 %v206_v32, %v197_v28 }
  0xa8   : > { %v222_v37 = vmax.f32 %v216_v33, 0.0  ;;  %v223_v38 = vmax.f32 %v217_v34, 0.0  ;;  %v220_v39 = vmax.f32 %v214_v35, 0.0 }
  0xa9   : > { %v221_v40 = vmax.f32 %v215_v36, 0.0 }
  0xaa   : > { %228 = vst [vmem:[%s167_s6 + $0x20] sm:$0xff] %v222_v37  ;;  %229 = vst [vmem:[%s167_s6 + $0x28] sm:$0xff] %v223_v38 }
  0xab   : > { %226 = vst [vmem:[%s167_s6 + $0x10] sm:$0xff] %v220_v39  ;;  %227 = vst [vmem:[%s167_s6 + $0x18] sm:$0xff] %v221_v40 }
  0xad   : > { %v252_v41 = vld [vmem:[%s167_s6] sm:$0xff]  ;;  %v254_v42 = vld [vmem:[%s167_s6 + $0x8] sm:$0xff] }
  0xae   : > { %253 = vst [vmem:[%s239_s14] sm:$0xff] %v252_v41  ;;  %255 = vst [vmem:[%s239_s14 + $0x8] sm:$0xff] %v254_v42 }
  0xb1   : > { %v260_v45 = vld [vmem:[%s167_s6 + $0x20] sm:$0xff]  ;;  %v262_v46 = vld [vmem:[%s167_s6 + $0x28] sm:$0xff] }
  0xb2   : > { %v256_v43 = vld [vmem:[%s167_s6 + $0x10] sm:$0xff]  ;;  %v258_v44 = vld [vmem:[%s167_s6 + $0x18] sm:$0xff]  ;;  %261 = vst [vmem:[%s239_s14 + $0x40] sm:$0xff] %v260_v45  ;;  %263 = vst [vmem:[%s239_s14 + $0x48] sm:$0xff] %v262_v46 }
  0xb3   : > { %257 = vst [vmem:[%s239_s14 + $0x20] sm:$0xff] %v256_v43  ;;  %259 = vst [vmem:[%s239_s14 + $0x28] sm:$0xff] %v258_v44 }
  0xb4 PF: > { %p9_p10 = scmp.ge.s32.totalorder %s426_s13, 4   ;;  %s482_s9 = smov %s386_s10 }
  0xb5   : > { %s483_s10 = smov %s437_s16  ;;  %s484_s11 = smov %s426_s13 }
  0xb6   :  { %11 = sbr.rel (!%p9_p10) target bundleno = 2 (0x2), region = 109 }

// kernel: inception_block_forward.2
= control target key start
LH: loop header
LB: loop body
LE: loop exit
PB: predicated region body
PF: predicated region fallthrough
CT: control target
= control target key end

     0   :  { %s6383_s12 = smov 0   ;;  %s6385_s13 = smov 0   ;;  %s11868_s0 = inlined_call_operand.vmem [shape: f32[2,20,20,4], index: 0, kind: input, shape index: {}]   ;;  %s11869_s1 = inlined_call_operand.vmem [shape: f32[100,24], index: 1, kind: input, shape index: {}]   ;;  %s11870_s2 = inlined_call_operand.vmem [shape: f32[24,512], index: 2, kind: output, shape index: {0}]   ;;  %s11871_s3 = inlined_call_operand.vmem [shape: f32[2,24,2], index: 3, kind: output, shape index: {1}]  }
   0x1   :  { %s6387_s14 = smov 0  }
   0x2 LB: > { %s6396_s15 = sadd.s32 4294967295, %s6345_s14   ;;  %s6398_s16 = sadd.s32 1, %s6345_s14   ;;  %s6345_s14 = sphi %s6387_s14, %s13551_s14   ;;  %s6341_s13 = sphi %s6385_s13, %s13550_s13   ;;  %s6337_s12 = sphi %s6383_s12, %s13549_s12  }
   0x3   : > { %s65_s17 = ssub.s32 %s6345_s14, %s6398_s16  ;;  %s68_s18 = sadd.s32 1, %s6341_s13 }
   0x4   : > { %p66_p0 = scmp.eq.s32.totalorder %s65_s17, 0  ;;  %p78_p1 = scmp.ne.s32.totalorder %s6341_s13, %s6337_s12 }
   0x5   : > { %p79_p2 = scmp.eq.s32.totalorder %s6396_s15, 1  ;;  %p4242_p3 = scmp.ge.s32.totalorder %s6345_s14, 1 }
   0x6   : > { %s6406_s19 = scalar_select %p66_p0, %s6341_s13, %s68_s18  }
   0x7   : > { %p6408_p4 = por %p79_p2, %p78_p1  ;;  %p140_p5 = scmp.lt.s32.totalorder %s6345_s14, 3 }
   0x9   : > { %p141_p6 = pnand %p4242_p3, %p140_p5 }
   0xb   : > { %144 = sbr.rel (%p141_p6) target bundleno = 1419 (0x58b), region = 28 }
  0x12   : > { %p168_p7 = scmp.lt.s32.totalorder %s6396_s15, 1  ;;  %vm287_vm0 = vcmask 1046528   ;;  %s6347_s26 = smov 4   ;;  %vm464_vm1 = vcmask 1045504   ;;  %vm641_vm2 = vcmask 1044480   ;;  %vm818_vm3 = vcmask 1043456  }
  0x13   : > { %s6348_s27 = smov 8   ;;  %s6349_s28 = smov 12   ;;  %vm2099_vm4 = vcmask 31744   ;;  %vm2132_vm5 = vcmask 64512   ;;  %vm2165_vm6 = vcmask 97280   ;;  %vm2198_vm7 = vcmask 130048  }
  0x14   : > { %s6414_s21 = scalar_select %p168_p7, %s6396_s15, 1  ;;  %vm2231_vm8 = vcmask 162816   ;;  %vm2264_vm9 = vcmask 195584   ;;  %vm2297_vm10 = vcmask 228352   ;;  %vm2330_vm11 = vcmask 261120  }
  0x15   : > { %s6350_s29 = smov 16   ;;  %s6351_s30 = smov 20   ;;  %vm2363_vm12 = vcmask 293888   ;;  %vm2396_vm13 = vcmask 326656   ;;  %vm2429_vm14 = vcmask 359424   ;;  %vm12317_vm15 = vcmask 392192  }
  0x16   : > { %s4388_s22 = smul.u32 480, %s6414_s21  ;;  %s6352_s4 = smov 24  }
  0x17   : > { %s6353_s5 = smov 28   ;;  %s6354_s6 = smov 32  }
  0x18   : > { %s6420_s25 = scalar_lea.vmem %s11868_s0, %s4388_s22  ;;  %s6355_s7 = smov 36  }
  0x19   : > { %v6423_v0 = vld [vmem:[%s6420_s25 + $0x30] sm:$0xff]  ;;  %v6426_v1 = vld [vmem:[%s6420_s25 + $0x38] sm:$0xff]  ;;  %v6429_v2 = vld [vmem:[%s6420_s25 + $0x40] sm:$0xf]  ;;  %s6356_s8 = smov 40   ;;  %s6357_s9 = smov 44  }
  0x1a   : > { %v298_v3 = vrot.slane %v6423_v0, 1  ;;  %v299_v4 = vrot.slane %v6426_v1, 1  ;;  %v301_v5 = vrot.slane %v6429_v2, 1  ;;  %v6435_v6 = vld [vmem:[%s6420_s25] sm:$0xff]  ;;  %v6438_v7 = vld [vmem:[%s6420_s25 + $0x8] sm:$0xff]  ;;  %v6449_v12 = vld [vmem:[%s6420_s25 + $0x50] sm:$0xff] }
  0x1b   : > { %v6441_v8 = vld [vmem:[%s6420_s25 + $0x48] sm:$0xff]  ;;  %v6444_v9 = vld [vmem:[%s6420_s25 + $0x10] sm:$0xf]  ;;  %v288_v10 = vrot.slane %v6435_v6, 1  ;;  %v289_v11 = vrot.slane %v6438_v7, 1  ;;  %v304_v18 = vrot.slane %v6449_v12, 1 }
  0x1c   : > { %v303_v13 = vrot.slane %v6441_v8, 1  ;;  %v300_v14 = vsel %vm287_vm0, %v298_v3, %v299_v4  ;;  %v302_v15 = vsel %vm287_vm0, %v299_v4, %v301_v5  ;;  %v291_v16 = vrot.slane %v6444_v9, 1  ;;  %v6456_v17 = vld [vmem:[%s6420_s25 + $0x58] sm:$0xf]  ;;  %v6463_v20 = vld [vmem:[%s6420_s25 + $0x20] sm:$0xff]  ;;  %v6489_v33 = vld [vmem:[%s6420_s25 + $0x68] sm:$0xff] }
  0x1d   : > { %12404 = vst [vmem:[#allocation3_spill] sm:$0xff] %v6456_v17  ;;  %v6460_v19 = vld [vmem:[%s6420_s25 + $0x18] sm:$0xff]  ;;  %12406 = vst [vmem:[#allocation5_spill] sm:$0xff] %v6463_v20  ;;  %v6465_v21 = vpack.i.bf16 %v302_v15, %v300_v14  ;;  %v290_v22 = vsel %vm287_vm0, %v288_v10, %v289_v11  ;;  %v11872_v23 = vrot.slane %v6456_v17, 1  ;;  %v6470_v24 = vld [vmem:[%s6420_s25 + $0x28] sm:$0xf] }
  0x1e   : > { %12405 = vst [vmem:[#allocation4_spill] sm:$0xff] %v6460_v19  ;;  %v6473_v25 = vld [vmem:[%s6420_s25 + $0x78] sm:$0xff]  ;;  %v6476_v26 = vld [vmem:[%s6420_s25 + $0x80] sm:$0xff]  ;;  %v292_v27 = vsel %vm287_vm0, %v289_v11, %v291_v16  ;;  %v305_v28 = vsel %vm287_vm0, %v303_v13, %v304_v18  ;;  %v293_v29 = vrot.slane %v6460_v19, 1  ;;  %v294_v30 = vrot.slane %v6463_v20, 1  ;;  %v6502_v39 = vld [vmem:[%s6420_s25 + $0xa8] sm:$0xff] }
  0x1f   : > { %12407 = vst [vmem:[#allocation6_spill] sm:$0xff] %v6465_v21  ;;  %v6483_v31 = vld [vmem:[%s6420_s25 + $0x88] sm:$0xf]  ;;  %v6486_v32 = vld [vmem:[%s6420_s25 + $0x60] sm:$0xff]  ;;  %4442 = vrot.lane.b32.xlu1 %v6465_v21, %s6347_s26  ;;  %v4431_v34 = vpack.i.bf16 %v292_v27, %v290_v22  ;;  %v307_v35 = vsel %vm287_vm0, %v304_v18, %v11872_v23  ;;  %v296_v36 = vrot.slane %v6470_v24, 1  ;;  %v313_v37 = vrot.slane %v6473_v25, 1 }
  0x20   : > { %12408 = vst [vmem:[#allocation7_spill] sm:$0xff] %v6483_v31  ;;  %v6499_v38 = vld [vmem:[%s6420_s25 + $0x70] sm:$0xf]  ;;  %v6504_v40 = vpack.i.bf16 %v307_v35, %v305_v28  ;;  %v295_v41 = vsel %vm287_vm0, %v293_v29, %v294_v30  ;;  %v314_v42 = vrot.slane %v6476_v26, 1  ;;  %v6509_v43 = vrot.slane %v6483_v31, 1  ;;  %v6528_v51 = vld [vmem:[%s6420_s25 + $0x98] sm:$0xff] }
  0x21   : > { %12409 = vst [vmem:[#allocation8_spill] sm:$0xff] %v6499_v38  ;;  %v6512_v44 = vld [vmem:[%s6420_s25 + $0xb0] sm:$0xff]  ;;  %v6515_v45 = vld [vmem:[%s6420_s25 + $0xb8] sm:$0xf]  ;;  %4432 = vrot.lane.b32.xlu0 %v4431_v34, %s6347_s26  ;;  %v297_v46 = vsel %vm287_vm0, %v294_v30, %v296_v36  ;;  %v308_v47 = vrot.slane %v6486_v32, 1  ;;  %v309_v48 = vrot.slane %v6489_v33, 1 }
  0x22   : > { %12410 = vst [vmem:[#allocation9_spill] sm:$0xff] %v6504_v40  ;;  %12411 = vst [vmem:[#allocation10_spill] sm:$0xff] %v6509_v43  ;;  %v6522_v49 = vrot.slane %v6499_v38, 1  ;;  %v6525_v50 = vld [vmem:[%s6420_s25 + $0x90] sm:$0xff]  ;;  %v6530_v52 = vpack.i.bf16 %v297_v46, %v295_v41  ;;  %v315_v53 = vsel %vm287_vm0, %v313_v37, %v314_v42  ;;  %v317_v54 = vsel %vm287_vm0, %v314_v42, %v6509_v43  ;;  %v6537_v56 = vld [vmem:[%s6420_s25 + $0xa0] sm:$0xf] }
  0x23   : > { %12412 = vst [vmem:[#allocation11_spill] sm:$0xff] %v6515_v45  ;;  %v323_v55 = vrot.slane %v6502_v39, 1  ;;  %12415 = vst [vmem:[#allocation14_spill] sm:$0xff] %v6537_v56  ;;  %v6540_v57 = vld [vmem:[%s6420_s25 + $0xd8] sm:$0xff]  ;;  %v6543_v58 = vld [vmem:[%s6420_s25 + $0xe0] sm:$0xff]  ;;  %4447 = vrot.lane.b32.xlu1 %v6504_v40, %s6347_s26  ;;  %v6547_v59 = vpack.i.bf16 %v317_v54, %v315_v53  ;;  %v310_v60 = vsel %vm287_vm0, %v308_v47, %v309_v48  ;;  %v324_v62 = vrot.slane %v6512_v44, 1 }
  0x24   : > { %12413 = vst [vmem:[#allocation12_spill] sm:$0xff] %v6522_v49  ;;  %12414 = vst [vmem:[#allocation13_spill] sm:$0xff] %v6530_v52  ;;  %v312_v61 = vsel %vm287_vm0, %v309_v48, %v6522_v49  ;;  %v6554_v63 = vld [vmem:[%s6420_s25 + $0xe8] sm:$0xf]  ;;  %v6557_v3 = vld [vmem:[%s6420_s25 + $0xc0] sm:$0xff]  ;;  %v6562_v5 = vrot.slane %v6515_v45, 1 }
  0x25   : > { %12416 = vst [vmem:[#allocation15_spill] sm:$0xff] %v6547_v59  ;;  %12417 = vst [vmem:[#allocation16_spill] sm:$0xff] %v6554_v63  ;;  %v6559_v4 = vpack.i.bf16 %v312_v61, %v310_v60  ;;  %v318_v10 = vrot.slane %v6525_v50, 1  ;;  %v319_v11 = vrot.slane %v6528_v51, 1  ;;  %v6567_v13 = vld [vmem:[%s6420_s25 + $0xc8] sm:$0xff]  ;;  %4437 = vrot.lane.b32.xlu0 %v6530_v52, %s6347_s26  ;;  %v325_v14 = vsel %vm287_vm0, %v323_v55, %v324_v62  ;;  %v6591_v35 = vld [vmem:[%s6420_s25 + $0x110] sm:$0xff] }
  0x26   : > { %12419 = vst [vmem:[#allocation18_spill] sm:$0xff] %v6562_v5  ;;  %v6573_v15 = vrot.slane %v6537_v56, 1  ;;  %v333_v16 = vrot.slane %v6540_v57, 1  ;;  %v334_v18 = vrot.slane %v6543_v58, 1  ;;  %v6578_v22 = vld [vmem:[%s6420_s25 + $0xd0] sm:$0xf]  ;;  %v327_v28 = vsel %vm287_vm0, %v324_v62, %v6562_v5 }
  0x27   : > { %12418 = vst [vmem:[#allocation17_spill] sm:$0xff] %v6559_v4  ;;  %12421 = vst [vmem:[#allocation20_spill] sm:$0xff] %v6578_v22  ;;  %v6581_v27 = vld [vmem:[%s6420_s25 + $0x108] sm:$0xff]  ;;  %v320_v29 = vsel %vm287_vm0, %v318_v10, %v319_v11  ;;  %v6587_v30 = vrot.slane %v6554_v63, 1  ;;  %v328_v34 = vrot.slane %v6557_v3, 1  ;;  %4457 = vrot.lane.b32.xlu1 %v6547_v59, %s6347_s26  ;;  %v6598_v37 = vpack.i.bf16 %v327_v28, %v325_v14  ;;  %v6604_v46 = vld [vmem:[%s6420_s25 + $0xf0] sm:$0xff] }
  0x28   : > { %12420 = vst [vmem:[#allocation19_spill] sm:$0xff] %v6573_v15  ;;  %v6594_v36 = vld [vmem:[%s6420_s25 + $0x118] sm:$0xf]  ;;  %v322_v41 = vsel %vm287_vm0, %v319_v11, %v6573_v15  ;;  %v329_v42 = vrot.slane %v6567_v13, 1  ;;  %v6610_v48 = vld [vmem:[%s6420_s25 + $0x100] sm:$0xf]  ;;  %v335_v53 = vsel %vm287_vm0, %v333_v16, %v334_v18 }
  0x29   : > { %12422 = vst [vmem:[#allocation21_spill] sm:$0xff] %v6587_v30  ;;  %12423 = vst [vmem:[#allocation22_spill] sm:$0xff] %v6598_v37  ;;  %v6607_v47 = vld [vmem:[%s6420_s25 + $0xf8] sm:$0xff]  ;;  %v337_v54 = vsel %vm287_vm0, %v334_v18, %v6587_v30  ;;  %v6616_v55 = vrot.slane %v6578_v22, 1  ;;  %v343_v60 = vrot.slane %v6581_v27, 1  ;;  %4452 = vrot.lane.b32.xlu0 %v6559_v4, %s6347_s26  ;;  %v6624_v62 = vpack.i.bf16 %v322_v41, %v320_v29  ;;  %v6632_v16 = vld [vmem:[%s6420_s25 + $0x140] sm:$0xff] }
  0x2a   : > { %12424 = vst [vmem:[#allocation23_spill] sm:$0xff] %v6607_v47  ;;  %12425 = vst [vmem:[#allocation24_spill] sm:$0xff] %v6610_v48  ;;  %v6620_v61 = vld [vmem:[%s6420_s25 + $0x138] sm:$0xff]  ;;  %v330_v10 = vsel %vm287_vm0, %v328_v34, %v329_v42  ;;  %v344_v11 = vrot.slane %v6591_v35, 1  ;;  %v6629_v14 = vrot.slane %v6594_v36, 1  ;;  %v6635_v18 = vld [vmem:[%s6420_s25 + $0x120] sm:$0xff]  ;;  %v6652_v30 = vpack.i.bf16 %v337_v54, %v335_v53 }
  0x2b   : > { %12426 = vst [vmem:[#allocation25_spill] sm:$0xff] %v6616_v55  ;;  %12427 = vst [vmem:[#allocation26_spill] sm:$0xff] %v6620_v61  ;;  %v332_v28 = vsel %vm287_vm0, %v329_v42, %v6616_v55  ;;  %v338_v23 = vrot.slane %v6604_v46, 1  ;;  %v339_v29 = vrot.slane %v6607_v47, 1  ;;  %v6642_v41 = vrot.slane %v6610_v48, 1  ;;  %v6648_v5 = vld [vmem:[%s6420_s25 + $0x128] sm:$0xff]  ;;  %4467 = vrot.lane.b32.xlu1 %v6598_v37, %s6347_s26 }
  0x2c   : > { %12428 = vst [vmem:[#allocation27_spill] sm:$0xff] %v6624_v62  ;;  %12429 = vst [vmem:[#allocation28_spill] sm:$0xff] %v6629_v14  ;;  %v6645_v34 = vld [vmem:[%s6420_s25 + $0x148] sm:$0xf]  ;;  %v345_v42 = vsel %vm287_vm0, %v343_v60, %v344_v11  ;;  %v353_v55 = vrot.slane %v6620_v61, 1  ;;  %v347_v15 = vsel %vm287_vm0, %v344_v11, %v6629_v14  ;;  %v354_v37 = vrot.slane %v6632_v16, 1 }
  0x2d   : > { %12430 = vst [vmem:[#allocation29_spill] sm:$0xff] %v6632_v16  ;;  %12431 = vst [vmem:[#allocation30_spill] sm:$0xff] %v6635_v18  ;;  %v6657_v49 = vld [vmem:[%s6420_s25 + $0x130] sm:$0xf]  ;;  %v340_v43 = vsel %vm287_vm0, %v338_v23, %v339_v29  ;;  %v342_v59 = vsel %vm287_vm0, %v339_v29, %v6642_v41  ;;  %v6666_v53 = vld [vmem:[%s6420_s25 + $0x168] sm:$0xff]  ;;  %4462 = vrot.lane.b32.xlu0 %v6624_v62, %s6347_s26  ;;  %v6670_v54 = vpack.i.bf16 %v332_v28, %v330_v10  ;;  %s6358_s10 = smov 48  }
  0x2e   : > { %12432 = vst [vmem:[#allocation31_spill] sm:$0xff] %v6642_v41  ;;  %12433 = vst [vmem:[#allocation32_spill] sm:$0xff] %v6645_v34  ;;  %v6673_v60 = vrot.slane %v6645_v34, 1  ;;  %v348_v11 = vrot.slane %v6635_v18, 1  ;;  %v349_v23 = vrot.slane %v6648_v5, 1  ;;  %v6678_v14 = vld [vmem:[%s6420_s25 + $0x170] sm:$0xff]  ;;  %v6694_v10 = vpack.i.bf16 %v347_v15, %v345_v42 }
  0x2f   : > { %12434 = vst [vmem:[#allocation33_spill] sm:$0xff] %v6648_v5  ;;  %12435 = vst [vmem:[#allocation34_spill] sm:$0xff] %v6652_v30  ;;  %v6681_v29 = vld [vmem:[%s6420_s25 + $0x178] sm:$0xf]  ;;  %v6684_v41 = vrot.slane %v6657_v49, 1  ;;  %v6687_v40 = vld [vmem:[%s6420_s25 + $0x150] sm:$0xff]  ;;  %4477 = vrot.lane.b32.xlu1 %v6652_v30, %s6347_s26  ;;  %v6696_v28 = vpack.i.bf16 %v342_v59, %v340_v43  ;;  %v355_v62 = vsel %vm287_vm0, %v353_v55, %v354_v37 }
  0x30   : > { %12436 = vst [vmem:[#allocation35_spill] sm:$0xff] %v6657_v49  ;;  %12437 = vst [vmem:[#allocation36_spill] sm:$0xff] %v6670_v54  ;;  %v6690_v4 = vld [vmem:[%s6420_s25 + $0x158] sm:$0xff]  ;;  %v6700_v52 = vld [vmem:[%s6420_s25 + $0x160] sm:$0xf]  ;;  %v357_v21 = vsel %vm287_vm0, %v354_v37, %v6673_v60  ;;  %v363_v49 = vrot.slane %v6666_v53, 1  ;;  %v350_v43 = vsel %vm287_vm0, %v348_v11, %v349_v23 }
  0x31   : > { %12438 = vst [vmem:[#allocation37_spill] sm:$0xff] %v6673_v60  ;;  %12439 = vst [vmem:[#allocation38_spill] sm:$0xff] %v6681_v29  ;;  %v364_v5 = vrot.slane %v6678_v14, 1  ;;  %v6707_v18 = vrot.slane %v6681_v29, 1  ;;  %4472 = vrot.lane.b32.xlu0 %v6670_v54, %s6347_s26  ;;  %v352_v59 = vsel %vm287_vm0, %v349_v23, %v6684_v41  ;;  %v358_v15 = vrot.slane %v6687_v40, 1  ;;  %s6359_s11 = smov 52  }
  0x32   : > { %12440 = vst [vmem:[#allocation39_spill] sm:$0xff] %v6684_v41  ;;  %12441 = vst [vmem:[#allocation40_spill] sm:$0xff] %v6687_v40  ;;  %v359_v55 = vrot.slane %v6690_v4, 1  ;;  %v6717_v37 = vrot.slane %v6700_v52, 1  ;;  %v470_v42 = vrot.slane %v6460_v19, 2  ;;  %v471_v60 = vrot.slane %v6463_v20, 2 }
  0x33   : > { %12442 = vst [vmem:[#allocation41_spill] sm:$0xff] %v6690_v4  ;;  %12443 = vst [vmem:[#allocation42_spill] sm:$0xff] %v6694_v10  ;;  %v473_v30 = vrot.slane %v6470_v24, 2  ;;  %4487 = vrot.lane.b32.xlu1 %v6694_v10, %s6347_s26  ;;  %v6724_v11 = vpack.i.bf16 %v357_v21, %v355_v62  ;;  %v365_v23 = vsel %vm287_vm0, %v363_v49, %v364_v5  ;;  %v465_v4 = vrot.slane %v6435_v6, 2  ;;  %s6360_s14 = smov 56   ;;  %s6361_s17 = smov 60  }
  0x34   : > { %12444 = vst [vmem:[#allocation43_spill] sm:$0xff] %v6696_v28  ;;  %12445 = vst [vmem:[#allocation44_spill] sm:$0xff] %v6700_v52  ;;  %v367_v41 = vsel %vm287_vm0, %v364_v5, %v6707_v18  ;;  %v6731_v54 = vpack.i.bf16 %v352_v59, %v350_v43  ;;  %v360_v52 = vsel %vm287_vm0, %v358_v15, %v359_v55  ;;  %v466_v40 = vrot.slane %v6438_v7, 2  ;;  %s6362_s18 = smov 64  }
  0x35   : > { %12446 = vst [vmem:[#allocation45_spill] sm:$0xff] %v6707_v18  ;;  %12447 = vst [vmem:[#allocation46_spill] sm:$0xff] %v6717_v37  ;;  %4482 = vrot.lane.b32.xlu0 %v6696_v28, %s6347_s26  ;;  %v362_v21 = vsel %vm287_vm0, %v359_v55, %v6717_v37  ;;  %v472_v62 = vsel %vm464_vm1, %v470_v42, %v471_v60  ;;  %v474_v49 = vsel %vm464_vm1, %v471_v60, %v473_v30 }
  0x36   : > { %12448 = vst [vmem:[#allocation47_spill] sm:$0xff] %v6724_v11  ;;  %12449 = vst [vmem:[#allocation48_spill] sm:$0xff] %v6731_v54  ;;  %v468_v5 = vrot.slane %v6444_v9, 2  ;;  %v6743_v43 = vpack.i.bf16 %v367_v41, %v365_v23  ;;  %v480_v59 = vrot.slane %v6441_v8, 2  ;;  %v481_v15 = vrot.slane %v6449_v12, 2 }
  0x37   : > { %4497 = vrot.lane.b32.xlu1 %v6724_v11, %s6347_s26  ;;  %v6750_v55 = vpack.i.bf16 %v362_v21, %v360_v52  ;;  %v6752_v42 = vpack.i.bf16 %v474_v49, %v472_v62  ;;  %v467_v30 = vsel %vm464_vm1, %v465_v4, %v466_v40  ;;  %v475_v41 = vrot.slane %v6423_v0, 2 }
  0x38   : > { %12450 = vst [vmem:[#allocation49_spill] sm:$0xff] %v6743_v43  ;;  %v469_v60 = vsel %vm464_vm1, %v466_v40, %v468_v5  ;;  %v476_v23 = vrot.slane %v6426_v1, 2  ;;  %v478_v37 = vrot.slane %v6429_v2, 2  ;;  %v482_v18 = vsel %vm464_vm1, %v480_v59, %v481_v15 }
  0x39   : > { %4492 = vrot.lane.b32.xlu0 %v6731_v54, %s6347_s26  ;;  %12451 = vst [vmem:[#allocation50_spill] sm:$0xff] %v6750_v55  ;;  %12452 = vst [vmem:[#allocation51_spill] sm:$0xff] %v6752_v42  ;;  %v12453_v52 = vrot.slane %v6456_v17, 2  ;;  %v490_v62 = vrot.slane %v6473_v25, 2  ;;  %v491_v4 = vrot.slane %v6476_v26, 2  ;;  %v6768_v40 = vrot.slane %v6483_v31, 2 }
  0x3a   : > { %v485_v49 = vrot.slane %v6486_v32, 2  ;;  %v486_v5 = vrot.slane %v6489_v33, 2  ;;  %v6773_v11 = vrot.slane %v6499_v38, 2  ;;  %v4511_v59 = vpack.i.bf16 %v469_v60, %v467_v30 }
  0x3b   : > { %4507 = vrot.lane.b32.xlu1 %v6743_v43, %s6347_s26  ;;  %v484_v21 = vsel %vm464_vm1, %v481_v15, %v12453_v52  ;;  %12454 = vst [vmem:[#allocation52_spill] sm:$0xff] %v6768_v40  ;;  %v477_v15 = vsel %vm464_vm1, %v475_v41, %v476_v23  ;;  %v479_v52 = vsel %vm464_vm1, %v476_v23, %v478_v37  ;;  %v500_v54 = vrot.slane %v6502_v39, 2 }
  0x3c   : > { %12455 = vst [vmem:[#allocation53_spill] sm:$0xff] %v6773_v11  ;;  %v6781_v43 = vpack.i.bf16 %v484_v21, %v482_v18  ;;  %v492_v10 = vsel %vm464_vm1, %v490_v62, %v491_v4  ;;  %v501_v28 = vrot.slane %v6512_v44, 2  ;;  %v487_v30 = vsel %vm464_vm1, %v485_v49, %v486_v5 }
  0x3d   : > { %4502 = vrot.lane.b32.xlu0 %v6750_v55, %s6347_s26  ;;  %v494_v55 = vsel %vm464_vm1, %v491_v4, %v6768_v40  ;;  %v489_v37 = vsel %vm464_vm1, %v486_v5, %v6773_v11  ;;  %v6792_v60 = vrot.slane %v6515_v45, 2  ;;  %v6795_v18 = vpack.i.bf16 %v479_v52, %v477_v15 }
  0x3e   : > { %12456 = vst [vmem:[#allocation54_spill] sm:$0xff] %v6781_v43  ;;  %v495_v41 = vrot.slane %v6525_v50, 2  ;;  %v496_v23 = vrot.slane %v6528_v51, 2  ;;  %v6800_v21 = vrot.slane %v6537_v56, 2  ;;  %v6804_v62 = vpack.i.bf16 %v494_v55, %v492_v10 }
  0x3f   : > { %4517 = vrot.lane.b32.xlu1 %v6752_v42, %s6348_s27  ;;  %12457 = vst [vmem:[#allocation55_spill] sm:$0xff] %v6792_v60  ;;  %12458 = vst [vmem:[#allocation56_spill] sm:$0xff] %v6795_v18  ;;  %v6806_v4 = vpack.i.bf16 %v489_v37, %v487_v30  ;;  %v502_v49 = vsel %vm464_vm1, %v500_v54, %v501_v28  ;;  %v504_v5 = vsel %vm464_vm1, %v501_v28, %v6792_v60 }
  0x40   : > { %12459 = vst [vmem:[#allocation57_spill] sm:$0xff] %v6800_v21  ;;  %12460 = vst [vmem:[#allocation58_spill] sm:$0xff] %v6804_v62  ;;  %v511_v15 = vrot.slane %v6543_v58, 2  ;;  %v497_v40 = vsel %vm464_vm1, %v495_v41, %v496_v23  ;;  %v499_v10 = vsel %vm464_vm1, %v496_v23, %v6800_v21  ;;  %v505_v55 = vrot.slane %v6557_v3, 2 }
  0x41   : > { %4512 = vrot.lane.b32.xlu0 %v4511_v59, %s6348_s27  ;;  %12461 = vst [vmem:[#allocation59_spill] sm:$0xff] %v6806_v4  ;;  %v510_v59 = vrot.slane %v6540_v57, 2  ;;  %v506_v54 = vrot.slane %v6567_v13, 2  ;;  %v6824_v30 = vpack.i.bf16 %v504_v5, %v502_v49  ;;  %v520_v37 = vrot.slane %v6581_v27, 2 }
  0x42   : > { %v521_v52 = vrot.slane %v6591_v35, 2  ;;  %v6828_v41 = vpack.i.bf16 %v499_v10, %v497_v40  ;;  %v12464_v21 = vrot.slane %v6554_v63, 2  ;;  %v6835_v28 = vrot.slane %v6594_v36, 2 }
  0x43   : > { %4527 = vrot.lane.b32.xlu1 %v6781_v43, %s6348_s27  ;;  %12462 = vst [vmem:[#allocation60_spill] sm:$0xff] %v6824_v30  ;;  %v512_v23 = vsel %vm464_vm1, %v510_v59, %v511_v15  ;;  %v507_v49 = vsel %vm464_vm1, %v505_v55, %v506_v54  ;;  %v515_v5 = vrot.slane %v6604_v46, 2  ;;  %v647_v11 = vrot.slane %v6460_v19, 3 }
  0x44   : > { %12463 = vst [vmem:[#allocation61_spill] sm:$0xff] %v6828_v41  ;;  %v514_v60 = vsel %vm464_vm1, %v511_v15, %v12464_v21  ;;  %12465 = vst [vmem:[#allocation62_spill] sm:$0xff] %v6835_v28  ;;  %v648_v40 = vrot.slane %v6463_v20, 3  ;;  %v12466_v59 = vrot.slane %v6578_v22, 2  ;;  %v516_v21 = vrot.slane %v6607_v47, 2 }
  0x45   : > { %4522 = vrot.lane.b32.xlu0 %v6795_v18, %s6348_s27  ;;  %v6851_v55 = vpack.i.bf16 %v514_v60, %v512_v23  ;;  %v522_v43 = vsel %vm464_vm1, %v520_v37, %v521_v52  ;;  %v531_v42 = vrot.slane %v6632_v16, 2  ;;  %v12470_v37 = vld [vmem:[#allocation30_spill] sm:$0xff] }
  0x46   : > { %v509_v10 = vsel %vm464_vm1, %v506_v54, %v12466_v59  ;;  %v524_v54 = vsel %vm464_vm1, %v521_v52, %v6835_v28  ;;  %v6859_v59 = vrot.slane %v6645_v34, 2  ;;  %v649_v15 = vsel %vm641_vm2, %v647_v11, %v648_v40  ;;  %v12474_v11 = vld [vmem:[#allocation35_spill] sm:$0xff] }
  0x47   : > { %4537 = vrot.lane.b32.xlu1 %v6804_v62, %s6348_s27  ;;  %v650_v62 = vrot.slane %v6470_v24, 3  ;;  %12467 = vst [vmem:[#allocation63_spill] sm:$0xff] %v6851_v55  ;;  %v6865_v60 = vpack.i.bf16 %v509_v10, %v507_v49  ;;  %v525_v23 = vrot.slane %v12470_v37, 2  ;;  %v517_v52 = vsel %vm464_vm1, %v515_v5, %v516_v21 }
  0x48   : > { %12468 = vst [vmem:[#allocation64_spill] sm:$0xff] %v6859_v59  ;;  %v12473_v28 = vrot.slane %v6610_v48, 2  ;;  %v6876_v47 = vrot.slane %v12474_v11, 2  ;;  %v541_v5 = vrot.slane %v6678_v14, 2  ;;  %v6888_v10 = vrot.slane %v6681_v29, 2 }
  0x49   : > { %4532 = vrot.lane.b32.xlu0 %v6806_v4, %s6348_s27  ;;  %v530_v4 = vrot.slane %v6620_v61, 2  ;;  %v651_v18 = vsel %vm641_vm2, %v648_v40, %v650_v62  ;;  %12469 = vst [vmem:[#allocation65_spill] sm:$0xff] %v6865_v60  ;;  %v6880_v62 = vpack.i.bf16 %v524_v54, %v522_v43  ;;  %v540_v40 = vrot.slane %v6666_v53, 2 }
  0x4a   : > { %v6869_v16 = vpack.i.bf16 %v651_v18, %v649_v15  ;;  %v519_v34 = vsel %vm464_vm1, %v516_v21, %v12473_v28  ;;  %v534_v18 = vsel %vm464_vm1, %v531_v42, %v6859_v59  ;;  %12477 = vst [vmem:[#allocation67_spill] sm:$0xff] %v6888_v10  ;;  %v12479_v21 = vld [vmem:[#allocation40_spill] sm:$0xff] }
  0x4b   : > { %4547 = vrot.lane.b32.xlu1 %v6824_v30, %s6348_s27  ;;  %v12471_v30 = vld [vmem:[#allocation33_spill] sm:$0xff]  ;;  %12476 = vst [vmem:[#allocation66_spill] sm:$0xff] %v6880_v62  ;;  %v532_v49 = vsel %vm464_vm1, %v530_v4, %v531_v42  ;;  %v6892_v28 = vpack.i.bf16 %v519_v34, %v517_v52  ;;  %v535_v15 = vrot.slane %v12479_v21, 2  ;;  %v12481_v59 = vld [vmem:[#allocation44_spill] sm:$0xff]  ;;  %v642_v34 = vrot.slane %v6435_v6, 3 }
  0x4c   : > { %v526_v61 = vrot.slane %v12471_v30, 2  ;;  %12472 = vst [vmem:[#allocation30_spill] sm:$0xff] %v6869_v16  ;;  %12475 = vst [vmem:[#allocation33_spill] sm:$0xff] %v6876_v47  ;;  %v12480_v42 = vld [vmem:[#allocation41_spill] sm:$0xff]  ;;  %v643_v52 = vrot.slane %v6438_v7, 3 }
  0x4d   : > { %4542 = vrot.lane.b32.xlu0 %v6828_v41, %s6348_s27  ;;  %12478 = vst [vmem:[#allocation68_spill] sm:$0xff] %v6892_v28  ;;  %v536_v54 = vrot.slane %v12480_v42, 2  ;;  %v6904_v41 = vpack.i.bf16 %v534_v18, %v532_v49 }
  0x4e   : > { %v527_v43 = vsel %vm464_vm1, %v525_v23, %v526_v61  ;;  %v529_v4 = vsel %vm464_vm1, %v526_v61, %v6876_v47  ;;  %v542_v23 = vsel %vm464_vm1, %v540_v40, %v541_v5  ;;  %v544_v61 = vsel %vm464_vm1, %v541_v5, %v6888_v10 }
  0x4f   : > { %4557 = vrot.lane.b32.xlu1 %v6851_v55, %s6348_s27  ;;  %v6900_v55 = vrot.slane %v12481_v59, 2  ;;  %12483 = vst [vmem:[#allocation41_spill] sm:$0xff] %v6904_v41  ;;  %v645_v47 = vrot.slane %v6444_v9, 3  ;;  %v6921_v18 = vpack.i.bf16 %v544_v61, %v542_v23  ;;  %v644_v40 = vsel %vm641_vm2, %v642_v34, %v643_v52 }
  0x50   : > { %v657_v5 = vrot.slane %v6441_v8, 3  ;;  %v658_v10 = vrot.slane %v6449_v12, 3  ;;  %v655_v23 = vrot.slane %v6429_v2, 3 }
  0x51   : > { %4552 = vrot.lane.b32.xlu0 %v6865_v60, %s6348_s27  ;;  %12482 = vst [vmem:[#allocation40_spill] sm:$0xff] %v6900_v55  ;;  %v6914_v60 = vpack.i.bf16 %v529_v4, %v527_v43  ;;  %v539_v49 = vsel %vm464_vm1, %v536_v54, %v6900_v55  ;;  %12485 = vst [vmem:[#allocation70_spill] sm:$0xff] %v6921_v18  ;;  %v11987_v43 = vrot.slane %v6456_v17, 3  ;;  %v652_v4 = vrot.slane %v6423_v0, 3 }
  0x52   : > { %v659_v61 = vsel %vm641_vm2, %v657_v5, %v658_v10  ;;  %v11999_v5 = vrot.slane %v6515_v45, 3 }
  0x53   : > { %4567 = vrot.lane.b32.xlu1 %v6880_v62, %s6348_s27  ;;  %12484 = vst [vmem:[#allocation69_spill] sm:$0xff] %v6914_v60  ;;  %v537_v62 = vsel %vm464_vm1, %v535_v15, %v536_v54  ;;  %v653_v15 = vrot.slane %v6426_v1, 3 }
  0x54   : > { %v6932_v54 = vpack.i.bf16 %v539_v49, %v537_v62 }
  0x55   : > { %4562 = vrot.lane.b32.xlu0 %v6892_v28, %s6348_s27  ;;  %v646_v28 = vsel %vm641_vm2, %v643_v52, %v645_v47  ;;  %v667_v47 = vrot.slane %v6473_v25, 3  ;;  %v661_v52 = vsel %vm641_vm2, %v658_v10, %v11987_v43  ;;  %v654_v55 = vsel %vm641_vm2, %v652_v4, %v653_v15 }
  0x56   : > { %12486 = vst [vmem:[#allocation71_spill] sm:$0xff] %v6932_v54  ;;  %v4591_v34 = vpack.i.bf16 %v646_v28, %v644_v40  ;;  %v656_v49 = vsel %vm641_vm2, %v653_v15, %v655_v23  ;;  %v662_v28 = vrot.slane %v6486_v32, 3  ;;  %v663_v40 = vrot.slane %v6489_v33, 3 }
  0x57   : > { %4577 = vrot.lane.b32.xlu1 %v6904_v41, %s6348_s27  ;;  %v668_v41 = vrot.slane %v6476_v26, 3  ;;  %v6953_v10 = vpack.i.bf16 %v661_v52, %v659_v61  ;;  %v677_v4 = vrot.slane %v6502_v39, 3  ;;  %v678_v43 = vrot.slane %v6512_v44, 3 }
  0x58   : > { %v6957_v62 = vpack.i.bf16 %v656_v49, %v654_v55  ;;  %v12489_v23 = vrot.slane %v6483_v31, 3  ;;  %v664_v61 = vsel %vm641_vm2, %v662_v28, %v663_v40  ;;  %v12490_v52 = vrot.slane %v6499_v38, 3 }
  0x59   : > { %4572 = vrot.lane.b32.xlu0 %v6914_v60, %s6348_s27  ;;  %12487 = vst [vmem:[#allocation72_spill] sm:$0xff] %v6953_v10  ;;  %v669_v15 = vsel %vm641_vm2, %v667_v47, %v668_v41  ;;  %v824_v55 = vrot.slane %v6460_v19, 4  ;;  %v673_v47 = vrot.slane %v6528_v51, 3  ;;  %v679_v28 = vsel %vm641_vm2, %v677_v4, %v678_v43 }
  0x5a   : > { %12488 = vst [vmem:[#allocation73_spill] sm:$0xff] %v6957_v62  ;;  %v681_v60 = vsel %vm641_vm2, %v678_v43, %v11999_v5  ;;  %v12000_v49 = vrot.slane %v6554_v63, 3  ;;  %v682_v4 = vrot.slane %v6557_v3, 3  ;;  %v12493_v43 = vrot.slane %v6537_v56, 3 }
  0x5b   : > { %4587 = vrot.lane.b32.xlu1 %v6921_v18, %s6348_s27  ;;  %v671_v18 = vsel %vm641_vm2, %v668_v41, %v12489_v23  ;;  %v825_v41 = vrot.slane %v6463_v20, 4  ;;  %v827_v23 = vrot.slane %v6470_v24, 4 }
  0x5c   : > { %v676_v5 = vsel %vm641_vm2, %v673_v47, %v12493_v43 }
  0x5d   : > { %4582 = vrot.lane.b32.xlu0 %v6932_v54, %s6348_s27  ;;  %v672_v54 = vrot.slane %v6525_v50, 3  ;;  %v826_v20 = vsel %vm818_vm3, %v824_v55, %v825_v41  ;;  %v828_v24 = vsel %vm818_vm3, %v825_v41, %v827_v23  ;;  %v12005_v55 = vrot.slane %v6578_v22, 3 }
  0x5e   : > { %v7003_v41 = vpack.i.bf16 %v681_v60, %v679_v28  ;;  %v7012_v23 = vrot.slane %v6594_v36, 3 }
  0x5f   : > { %4597 = vrot.lane.b32.xlu1 %v6869_v16, %s6349_s28  ;;  %v666_v16 = vsel %vm641_vm2, %v663_v40, %v12490_v52  ;;  %v687_v40 = vrot.slane %v6540_v57, 3  ;;  %v688_v52 = vrot.slane %v6543_v58, 3  ;;  %v674_v19 = vsel %vm641_vm2, %v672_v54, %v673_v47 }
  0x60   : > { %12494 = vst [vmem:[#allocation76_spill] sm:$0xff] %v7003_v41  ;;  %v698_v54 = vrot.slane %v6591_v35, 3  ;;  %12495 = vst [vmem:[#allocation77_spill] sm:$0xff] %v7012_v23  ;;  %v7016_v47 = vpack.i.bf16 %v676_v5, %v674_v19  ;;  %v12499_v5 = vld [vmem:[#allocation29_spill] sm:$0xff] }
  0x61   : > { %4592 = vrot.lane.b32.xlu0 %v4591_v34, %s6349_s28  ;;  %v6977_v34 = vpack.i.bf16 %v671_v18, %v669_v15  ;;  %v6990_v18 = vpack.i.bf16 %v666_v16, %v664_v61  ;;  %v683_v15 = vrot.slane %v6567_v13, 3  ;;  %v689_v16 = vsel %vm641_vm2, %v687_v40, %v688_v52 }
  0x62   : > { %v697_v61 = vrot.slane %v6581_v27, 3  ;;  %12496 = vst [vmem:[#allocation78_spill] sm:$0xff] %v7016_v47  ;;  %v692_v40 = vrot.slane %v6604_v46, 3 }
  0x63   : > { %4607 = vrot.lane.b32.xlu1 %v6953_v10, %s6349_s28  ;;  %12491 = vst [vmem:[#allocation74_spill] sm:$0xff] %v6977_v34  ;;  %12492 = vst [vmem:[#allocation75_spill] sm:$0xff] %v6990_v18  ;;  %v6994_v10 = vpack.i.bf16 %v828_v24, %v826_v20  ;;  %v691_v20 = vsel %vm641_vm2, %v688_v52, %v12000_v49  ;;  %v684_v60 = vsel %vm641_vm2, %v682_v4, %v683_v15  ;;  %v12497_v52 = vld [vmem:[#allocation23_spill] sm:$0xff] }
  0x64   : > { %v686_v28 = vsel %vm641_vm2, %v683_v15, %v12005_v55  ;;  %v693_v24 = vrot.slane %v12497_v52, 3  ;;  %v7027_v49 = vpack.i.bf16 %v691_v20, %v689_v16  ;;  %v699_v4 = vsel %vm641_vm2, %v697_v61, %v698_v54  ;;  %v12500_v55 = vld [vmem:[#allocation32_spill] sm:$0xff] }
  0x65   : > { %4602 = vrot.lane.b32.xlu0 %v6957_v62, %s6349_s28  ;;  %v701_v15 = vsel %vm641_vm2, %v698_v54, %v7012_v23  ;;  %v12014_v62 = vrot.slane %v12500_v55, 3  ;;  %v7037_v43 = vpack.i.bf16 %v686_v28, %v684_v60  ;;  %v703_v16 = vrot.slane %v12471_v30, 3 }
  0x66   : > { %v694_v20 = vsel %vm641_vm2, %v692_v40, %v693_v24  ;;  %v7048_v54 = vpack.i.bf16 %v701_v15, %v699_v4  ;;  %v717_v23 = vrot.slane %v6666_v53, 3  ;;  %v718_v40 = vrot.slane %v6678_v14, 3 }
  0x67   : > { %4617 = vrot.lane.b32.xlu1 %v6977_v34, %s6349_s28  ;;  %v12498_v34 = vld [vmem:[#allocation26_spill] sm:$0xff]  ;;  %12501 = vst [vmem:[#allocation23_spill] sm:$0xff] %v7037_v43  ;;  %v712_v4 = vrot.slane %v12479_v21, 3 }
  0x68   : > { %v707_v19 = vrot.slane %v12498_v34, 3  ;;  %v12015_v34 = vrot.slane %v12474_v11, 3  ;;  %12503 = vst [vmem:[#allocation79_spill] sm:$0xff] %v7048_v54 }
  0x69   : > { %4612 = vrot.lane.b32.xlu0 %v6990_v18, %s6349_s28  ;;  %v708_v18 = vrot.slane %v12499_v5, 3  ;;  %v12502_v5 = vrot.slane %v6610_v48, 3 }
  0x6b   : > { %4627 = vrot.lane.b32.xlu1 %v7003_v41, %s6349_s28  ;;  %v702_v41 = vrot.slane %v12470_v37, 3  ;;  %v696_v61 = vsel %vm641_vm2, %v693_v24, %v12502_v5  ;;  %v709_v60 = vsel %vm641_vm2, %v707_v19, %v708_v18  ;;  %v711_v28 = vsel %vm641_vm2, %v708_v18, %v12014_v62 }
  0x6c   : > { %v7059_v24 = vpack.i.bf16 %v696_v61, %v694_v20  ;;  %v706_v19 = vsel %vm641_vm2, %v703_v16, %v12015_v34  ;;  %v713_v18 = vrot.slane %v12480_v42, 3  ;;  %v7070_v62 = vpack.i.bf16 %v711_v28, %v709_v60 }
  0x6d   : > { %4622 = vrot.lane.b32.xlu0 %v7016_v47, %s6349_s28  ;;  %v12016_v47 = vrot.slane %v6681_v29, 3  ;;  %v704_v5 = vsel %vm641_vm2, %v702_v41, %v703_v16  ;;  %v719_v20 = vsel %vm641_vm2, %v717_v23, %v718_v40  ;;  %v819_v61 = vrot.slane %v6435_v6, 4 }
  0x6e   : > { %12504 = vst [vmem:[#allocation80_spill] sm:$0xff] %v7059_v24  ;;  %12505 = vst [vmem:[#allocation81_spill] sm:$0xff] %v7070_v62  ;;  %v7078_v16 = vpack.i.bf16 %v706_v19, %v704_v5  ;;  %v820_v34 = vrot.slane %v6438_v7, 4  ;;  %v714_v15 = vsel %vm641_vm2, %v712_v4, %v713_v18  ;;  %v12507_v60 = vrot.slane %v12481_v59, 3 }
  0x6f   : > { %4637 = vrot.lane.b32.xlu1 %v7027_v49, %s6349_s28  ;;  %v721_v41 = vsel %vm641_vm2, %v718_v40, %v12016_v47  ;;  %v822_v23 = vrot.slane %v6444_v9, 4  ;;  %v834_v5 = vrot.slane %v6441_v8, 4  ;;  %v835_v19 = vrot.slane %v6449_v12, 4 }
  0x70   : > { %12506 = vst [vmem:[#allocation82_spill] sm:$0xff] %v7078_v16  ;;  %v716_v28 = vsel %vm641_vm2, %v713_v18, %v12507_v60  ;;  %v7089_v40 = vpack.i.bf16 %v721_v41, %v719_v20  ;;  %v837_v6 = vrot.slane %v6456_v17, 4  ;;  %v821_v4 = vsel %vm818_vm3, %v819_v61, %v820_v34 }
  0x71   : > { %4632 = vrot.lane.b32.xlu0 %v7037_v43, %s6349_s28  ;;  %v7096_v7 = vpack.i.bf16 %v716_v28, %v714_v15  ;;  %v823_v9 = vsel %vm818_vm3, %v820_v34, %v822_v23  ;;  %v829_v18 = vrot.slane %v6423_v0, 4  ;;  %v830_v20 = vrot.slane %v6426_v1, 4 }
  0x72   : > { %12508 = vst [vmem:[#allocation83_spill] sm:$0xff] %v7089_v40  ;;  %v832_v41 = vrot.slane %v6429_v2, 4  ;;  %v844_v60 = vrot.slane %v6473_v25, 4  ;;  %v845_v47 = vrot.slane %v6476_v26, 4  ;;  %v836_v15 = vsel %vm818_vm3, %v834_v5, %v835_v19 }
  0x73   : > { %4647 = vrot.lane.b32.xlu1 %v7048_v54, %s6349_s28  ;;  %12509 = vst [vmem:[#allocation84_spill] sm:$0xff] %v7096_v7  ;;  %v838_v28 = vsel %vm818_vm3, %v835_v19, %v837_v6  ;;  %v847_v61 = vrot.slane %v6483_v31, 4  ;;  %v4671_v34 = vpack.i.bf16 %v823_v9, %v821_v4  ;;  %v839_v23 = vrot.slane %v6486_v32, 4 }
  0x74   : > { %v840_v2 = vrot.slane %v6489_v33, 4  ;;  %v831_v17 = vsel %vm818_vm3, %v829_v18, %v830_v20  ;;  %v7119_v5 = vpack.i.bf16 %v838_v28, %v836_v15  ;;  %v846_v19 = vsel %vm818_vm3, %v844_v60, %v845_v47 }
  0x75   : > { %4642 = vrot.lane.b32.xlu0 %v7059_v24, %s6349_s28  ;;  %v848_v6 = vsel %vm818_vm3, %v845_v47, %v847_v61  ;;  %v854_v4 = vrot.slane %v6502_v39, 4  ;;  %v855_v9 = vrot.slane %v6512_v44, 4  ;;  %v857_v18 = vrot.slane %v6515_v45, 4 }
  0x76   : > { %12510 = vst [vmem:[#allocation85_spill] sm:$0xff] %v7119_v5  ;;  %v849_v15 = vrot.slane %v6525_v50, 4  ;;  %v850_v60 = vrot.slane %v6528_v51, 4  ;;  %v852_v47 = vrot.slane %v6537_v56, 4  ;;  %v7136_v28 = vpack.i.bf16 %v848_v6, %v846_v19 }
  0x77   : > { %4657 = vrot.lane.b32.xlu1 %v7070_v62, %s6349_s28  ;;  %v842_v62 = vrot.slane %v6499_v38, 4  ;;  %v864_v61 = vrot.slane %v6540_v57, 4  ;;  %v860_v19 = vrot.slane %v6567_v13, 4  ;;  %v862_v56 = vrot.slane %v6578_v22, 4  ;;  %v12518_v22 = vld [vmem:[#allocation29_spill] sm:$0xff] }
  0x78   : > { %12512 = vst [vmem:[#allocation87_spill] sm:$0xff] %v7136_v28  ;;  %v851_v6 = vsel %vm818_vm3, %v849_v15, %v850_v60  ;;  %v853_v45 = vsel %vm818_vm3, %v850_v60, %v852_v47 }
  0x79   : > { %4652 = vrot.lane.b32.xlu0 %v7078_v16, %s6349_s28  ;;  %v843_v31 = vsel %vm818_vm3, %v840_v2, %v842_v62  ;;  %v867_v62 = vrot.slane %v6554_v63, 4  ;;  %v877_v63 = vrot.slane %v6594_v36, 4  ;;  %v7163_v15 = vpack.i.bf16 %v853_v45, %v851_v6  ;;  %v12517_v36 = vld [vmem:[#allocation26_spill] sm:$0xff] }
  0x7a   : > { %v863_v47 = vsel %vm818_vm3, %v860_v19, %v862_v56  ;;  %v885_v45 = vrot.slane %v12518_v22, 4  ;;  %v887_v56 = vrot.slane %v12500_v55, 4  ;;  %v897_v55 = vrot.slane %v6681_v29, 4 }
  0x7b   : > { %4667 = vrot.lane.b32.xlu1 %v7089_v40, %s6349_s28  ;;  %v833_v40 = vsel %vm818_vm3, %v830_v20, %v832_v41  ;;  %v841_v41 = vsel %vm818_vm3, %v839_v23, %v840_v2  ;;  %v859_v2 = vrot.slane %v6557_v3, 4  ;;  %12515 = vst [vmem:[#allocation90_spill] sm:$0xff] %v7163_v15 }
  0x7c   : > { %v7127_v20 = vpack.i.bf16 %v833_v40, %v831_v17  ;;  %v865_v17 = vrot.slane %v6543_v58, 4  ;;  %v856_v40 = vsel %vm818_vm3, %v854_v4, %v855_v9  ;;  %v7145_v23 = vpack.i.bf16 %v843_v31, %v841_v41 }
  0x7d   : > { %4662 = vrot.lane.b32.xlu0 %v7096_v7, %s6349_s28  ;;  %v875_v41 = vrot.slane %v6591_v35, 4  ;;  %v861_v60 = vsel %vm818_vm3, %v859_v2, %v860_v19 }
  0x7e   : > { %12511 = vst [vmem:[#allocation86_spill] sm:$0xff] %v7127_v20  ;;  %12513 = vst [vmem:[#allocation88_spill] sm:$0xff] %v7145_v23  ;;  %v868_v31 = vsel %vm818_vm3, %v865_v17, %v867_v62  ;;  %v884_v62 = vrot.slane %v12517_v36, 4  ;;  %v7181_v19 = vpack.i.bf16 %v863_v47, %v861_v60  ;;  %v894_v60 = vrot.slane %v6666_v53, 4 }
  0x7f   : > { %4677 = vrot.lane.b32.xlu1 %v6994_v10, %s6350_s29  ;;  %v878_v2 = vsel %vm818_vm3, %v875_v41, %v877_v63  ;;  %v895_v47 = vrot.slane %v6678_v14, 4 }
  0x80   : > { %12519 = vst [vmem:[#allocation26_spill] sm:$0xff] %v7181_v19 }
  0x81   : > { %4672 = vrot.lane.b32.xlu0 %v4671_v34, %s6350_s29  ;;  %v858_v34 = vsel %vm818_vm3, %v855_v9, %v857_v18  ;;  %v866_v9 = vsel %vm818_vm3, %v864_v61, %v865_v17  ;;  %v874_v18 = vrot.slane %v6581_v27, 4  ;;  %v870_v61 = vrot.slane %v12497_v52, 4 }
  0x82   : > { %v7154_v4 = vpack.i.bf16 %v858_v34, %v856_v40  ;;  %v869_v40 = vrot.slane %v6604_v46, 4  ;;  %v872_v17 = vrot.slane %v6610_v48, 4  ;;  %v7172_v34 = vpack.i.bf16 %v868_v31, %v866_v9 }
  0x83   : > { %4687 = vrot.lane.b32.xlu1 %v7119_v5, %s6350_s29  ;;  %v876_v6 = vsel %vm818_vm3, %v874_v18, %v875_v41  ;;  %v879_v48 = vrot.slane %v12470_v37, 4  ;;  %v880_v9 = vrot.slane %v12471_v30, 4  ;;  %v886_v18 = vsel %vm818_vm3, %v884_v62, %v885_v45 }
  0x84   : > { %12514 = vst [vmem:[#allocation89_spill] sm:$0xff] %v7154_v4  ;;  %12516 = vst [vmem:[#allocation91_spill] sm:$0xff] %v7172_v34  ;;  %v871_v31 = vsel %vm818_vm3, %v869_v40, %v870_v61  ;;  %v873_v38 = vsel %vm818_vm3, %v870_v61, %v872_v17  ;;  %v7190_v63 = vpack.i.bf16 %v878_v2, %v876_v6  ;;  %v889_v62 = vrot.slane %v12479_v21, 4 }
  0x85   : > { %4682 = vrot.lane.b32.xlu0 %v7127_v20, %s6350_s29  ;;  %v888_v41 = vsel %vm818_vm3, %v885_v45, %v887_v56  ;;  %v7201_v61 = vpack.i.bf16 %v873_v38, %v871_v31  ;;  %v881_v17 = vsel %vm818_vm3, %v879_v48, %v880_v9  ;;  %v890_v45 = vrot.slane %v12480_v42, 4 }
  0x86   : > { %12520 = vst [vmem:[#allocation29_spill] sm:$0xff] %v7190_v63  ;;  %v892_v2 = vrot.slane %v12481_v59, 4  ;;  %v7212_v29 = vpack.i.bf16 %v888_v41, %v886_v18  ;;  %v896_v38 = vsel %vm818_vm3, %v894_v60, %v895_v47  ;;  %v898_v31 = vsel %vm818_vm3, %v895_v47, %v897_v55 }
  0x87   : > { %4697 = vrot.lane.b32.xlu1 %v7136_v28, %s6350_s29  ;;  %12522 = vst [vmem:[#allocation93_spill] sm:$0xff] %v7201_v61  ;;  %v7228_v18 = vpack.i.bf16 %v898_v31, %v896_v38  ;;  %v4756_v47 = vpack.i.bf16 %v6426_v1, %v6423_v0  ;;  %v4761_v0 = vpack.i.bf16 %v6449_v12, %v6441_v8 }
  0x88   : > { %12524 = vst [vmem:[#allocation95_spill] sm:$0xff] %v7212_v29  ;;  %v893_v59 = vsel %vm818_vm3, %v890_v45, %v892_v2  ;;  %v4776_v31 = vpack.i.bf16 %v6528_v51, %v6525_v50  ;;  %v4786_v8 = vpack.i.bf16 %v6567_v13, %v6557_v3  ;;  %v4781_v50 = vpack.i.bf16 %v6512_v44, %v6502_v39 }
  0x89   : > { %4692 = vrot.lane.b32.xlu0 %v7145_v23, %s6350_s29  ;;  %12528 = vst [vmem:[#allocation99_spill] sm:$0xff] %v7228_v18  ;;  %v4791_v3 = vpack.i.bf16 %v6543_v58, %v6540_v57  ;;  %v4806_v39 = vpack.i.bf16 %v12471_v30, %v12470_v37  ;;  %v4816_v57 = vpack.i.bf16 %v12480_v42, %v12479_v21  ;;  %v7304_v58 = vld [vmem:[%s6420_s25 + $0x180] sm:$0xff] }
  0x8a   : > { %v4811_v37 = vpack.i.bf16 %v12518_v22, %v12517_v36  ;;  %v4821_v21 = vpack.i.bf16 %v6678_v14, %v6666_v53 }
  0x8b   : > { %4707 = vrot.lane.b32.xlu1 %v7154_v4, %s6350_s29  ;;  %v882_v4 = vrot.slane %v12474_v11, 4 }
  0x8d   : > { %4702 = vrot.lane.b32.xlu0 %v7163_v15, %s6350_s29  ;;  %v883_v6 = vsel %vm818_vm3, %v880_v9, %v882_v4  ;;  %v891_v9 = vsel %vm818_vm3, %v889_v62, %v890_v45  ;;  %v12532_v62 = vld [vmem:[#allocation5_spill] sm:$0xff] }
  0x8e   : > { %v7220_v4 = vpack.i.bf16 %v883_v6, %v881_v17  ;;  %v7234_v41 = vpack.i.bf16 %v893_v59, %v891_v9  ;;  %v12531_v6 = vld [vmem:[#allocation4_spill] sm:$0xff]  ;;  %v4766_v59 = vpack.i.bf16 %v6489_v33, %v6486_v32  ;;  %v4771_v32 = vpack.i.bf16 %v6476_v26, %v6473_v25 }
  0x8f   : > { %4717 = vrot.lane.b32.xlu1 %v7172_v34, %s6350_s29  ;;  %v4751_v45 = vpack.i.bf16 %v12532_v62, %v12531_v6  ;;  %v4796_v25 = vpack.i.bf16 %v12497_v52, %v6604_v46  ;;  %v4801_v46 = vpack.i.bf16 %v6591_v35, %v6581_v27  ;;  %v12547_v62 = vld [vmem:[#allocation6_spill] sm:$0xff] }
  0x90   : > { %12526 = vst [vmem:[#allocation97_spill] sm:$0xff] %v7220_v4  ;;  %12529 = vst [vmem:[#allocation100_spill] sm:$0xff] %v7234_v41 }
  0x91   : > { %4712 = vrot.lane.b32.xlu0 %v7181_v19, %s6350_s29  ;;  %v7199_v40 = vpop.permute.xlu1 %4442 }
  0x92   : > { %12521 = vst [vmem:[#allocation92_spill] sm:$0xff] %v7199_v40  ;;  %v12591_v40 = vld [vmem:[#allocation58_spill] sm:$0xff] }
  0x93   : > { %v7208_v56 = vpop.permute.xlu0 %4432  ;;  %4727 = vrot.lane.b32.xlu1 %v7190_v63, %s6350_s29 }
  0x94   : > { %12523 = vst [vmem:[#allocation94_spill] sm:$0xff] %v7208_v56  ;;  %v12590_v56 = vld [vmem:[#allocation61_spill] sm:$0xff] }
  0x95   : > { %4722 = vrot.lane.b32.xlu0 %v7201_v61, %s6350_s29  ;;  %v7218_v48 = vpop.permute.xlu1 %4447 }
  0x96   : > { %12525 = vst [vmem:[#allocation96_spill] sm:$0xff] %v7218_v48 }
  0x97   : > { %v7224_v11 = vpop.permute.xlu0 %4437  ;;  %4737 = vrot.lane.b32.xlu1 %v7212_v29, %s6350_s29 }
  0x98   : > { %12527 = vst [vmem:[#allocation98_spill] sm:$0xff] %v7224_v11 }
  0x99   : > { %4732 = vrot.lane.b32.xlu0 %v7220_v4, %s6350_s29  ;;  %v7232_v55 = vpop.permute.xlu1 %4457 }
  0x9b   : > { %v7236_v60 = vpop.permute.xlu0 %4452  ;;  %4747 = vrot.lane.b32.xlu1 %v7228_v18, %s6350_s29 }
  0x9c   : > { %12530 = vst [vmem:[#allocation101_spill] sm:$0xff] %v7236_v60  ;;  %v12587_v60 = vld [vmem:[#allocation54_spill] sm:$0xff] }
  0x9d   : > { %4742 = vrot.lane.b32.xlu0 %v7234_v41, %s6350_s29  ;;  %v7244_v17 = vpop.permute.xlu1 %4467 }
  0x9f   : > { %v7248_v2 = vpop.permute.xlu0 %4462  ;;  %4757 = vrot.lane.b32.xlu1 %v4756_v47, %s6351_s30  ;;  %v7307_v47 = vld [vmem:[%s6420_s25 + $0x188] sm:$0xff] }
  0xa0   : > { %v7319_v27 = vpack.i.bf16 %v7307_v47, %v7304_v58 }
  0xa1   : > { %4752 = vrot.lane.b32.xlu0 %v4751_v45, %s6351_s30  ;;  %v7254_v38 = vpop.permute.xlu1 %4477  ;;  %v12548_v45 = vld [vmem:[#allocation13_spill] sm:$0xff] }
  0xa2   : > { %12533 = vst [vmem:[#allocation4_spill] sm:$0xff] %v7254_v38  ;;  %v12586_v38 = vld [vmem:[#allocation59_spill] sm:$0xff] }
  0xa3   : > { %v7258_v1 = vpop.permute.xlu0 %4472  ;;  %4767 = vrot.lane.b32.xlu1 %v4766_v59, %s6351_s30  ;;  %v12551_v59 = vld [vmem:[#allocation17_spill] sm:$0xff] }
  0xa4   : > { %12534 = vst [vmem:[#allocation5_spill] sm:$0xff] %v7258_v1 }
  0xa5   : > { %4762 = vrot.lane.b32.xlu0 %v4761_v0, %s6351_s30  ;;  %v7264_v9 = vpop.permute.xlu1 %4487  ;;  %v12552_v0 = vld [vmem:[#allocation9_spill] sm:$0xff] }
  0xa6   : > { %12535 = vst [vmem:[#allocation102_spill] sm:$0xff] %v7264_v9 }
  0xa7   : > { %v7268_v33 = vpop.permute.xlu0 %4482  ;;  %4777 = vrot.lane.b32.xlu1 %v4776_v31, %s6351_s30 }
  0xa8   : > { %12536 = vst [vmem:[#allocation103_spill] sm:$0xff] %v7268_v33 }
  0xa9   : > { %4772 = vrot.lane.b32.xlu0 %v4771_v32, %s6351_s30  ;;  %v7274_v12 = vpop.permute.xlu1 %4497 }
  0xab   : > { %v7278_v51 = vpop.permute.xlu0 %4492  ;;  %4787 = vrot.lane.b32.xlu1 %v4786_v8, %s6351_s30  ;;  %v12555_v8 = vld [vmem:[#allocation27_spill] sm:$0xff] }
  0xac   : > { %12537 = vst [vmem:[#allocation104_spill] sm:$0xff] %v7278_v51 }
  0xad   : > { %4782 = vrot.lane.b32.xlu0 %v4781_v50, %s6351_s30  ;;  %v7284_v26 = vpop.permute.xlu1 %4507  ;;  %v12556_v50 = vld [vmem:[#allocation15_spill] sm:$0xff] }
  0xaf   : > { %v7288_v13 = vpop.permute.xlu0 %4502  ;;  %4797 = vrot.lane.b32.xlu1 %v4796_v25, %s6351_s30 }
  0xb0   : > { %12538 = vst [vmem:[#allocation105_spill] sm:$0xff] %v7288_v13 }
  0xb1   : > { %4792 = vrot.lane.b32.xlu0 %v4791_v3, %s6351_s30  ;;  %v7294_v44 = vpop.permute.xlu1 %4517 }
  0xb2   : > { %12539 = vst [vmem:[#allocation106_spill] sm:$0xff] %v7294_v44  ;;  %v12572_v44 = vld [vmem:[#allocation42_spill] sm:$0xff] }
  0xb3   : > { %v7298_v52 = vpop.permute.xlu0 %4512  ;;  %4807 = vrot.lane.b32.xlu1 %v4806_v39, %s6351_s30  ;;  %v12559_v39 = vld [vmem:[#allocation36_spill] sm:$0xff] }
  0xb4   : > { %12540 = vst [vmem:[#allocation107_spill] sm:$0xff] %v7298_v52 }
  0xb5   : > { %4802 = vrot.lane.b32.xlu0 %v4801_v46, %s6351_s30  ;;  %v7310_v30 = vpop.permute.xlu1 %4527  ;;  %v12560_v46 = vld [vmem:[#allocation22_spill] sm:$0xff] }
  0xb6   : > { %12541 = vst [vmem:[#allocation108_spill] sm:$0xff] %v7310_v30 }
  0xb7   : > { %v7314_v6 = vpop.permute.xlu0 %4522  ;;  %4817 = vrot.lane.b32.xlu1 %v4816_v57, %s6351_s30 }
  0xb8   : > { %12542 = vst [vmem:[#allocation109_spill] sm:$0xff] %v7314_v6  ;;  %v12569_v6 = vld [vmem:[#allocation48_spill] sm:$0xff] }
  0xb9   : > { %4812 = vrot.lane.b32.xlu0 %v4811_v37, %s6351_s30  ;;  %v7322_v35 = vpop.permute.xlu1 %4537  ;;  %v7366_v37 = vld [vmem:[%s6420_s25 + $0x190] sm:$0xf] }
  0xba   : > { %12543 = vst [vmem:[#allocation110_spill] sm:$0xff] %v7322_v35  ;;  %12562 = vst [vmem:[#allocation22_spill] sm:$0xff] %v7366_v37 }
  0xbb   : > { %v7326_v42 = vpop.permute.xlu0 %4532  ;;  %4827 = vrot.lane.b32.xlu1 %v7319_v27, %s6351_s30 }
  0xbc   : > { %12544 = vst [vmem:[#allocation111_spill] sm:$0xff] %v7326_v42 }
  0xbd   : > { %4822 = vrot.lane.b32.xlu0 %v4821_v21, %s6351_s30  ;;  %v7331_v22 = vpop.permute.xlu1 %4547 }
  0xbe   : > { %12545 = vst [vmem:[#allocation112_spill] sm:$0xff] %v7331_v22 }
  0xbf   : > { %v7333_v36 = vpop.permute.xlu0 %4542  ;;  %4837 = vrot.lane.b32.xlu1 %v12547_v62, %s6352_s4 }
  0xc0   : > { %12546 = vst [vmem:[#allocation113_spill] sm:$0xff] %v7333_v36 }
  0xc1   : > { %4832 = vrot.lane.b32.xlu0 %v12548_v45, %s6352_s4  ;;  %v7339_v14 = vpop.permute.xlu1 %4557  ;;  %v12564_v45 = vld [vmem:[#allocation43_spill] sm:$0xff] }
  0xc2   : > { %12549 = vst [vmem:[#allocation6_spill] sm:$0xff] %v7339_v14 }
  0xc3   : > { %v7341_v53 = vpop.permute.xlu0 %4552  ;;  %4847 = vrot.lane.b32.xlu1 %v12551_v59, %s6352_s4 }
  0xc4   : > { %12550 = vst [vmem:[#allocation13_spill] sm:$0xff] %v7341_v53  ;;  %v12566_v53 = vld [vmem:[#allocation34_spill] sm:$0xff] }
  0xc5   : > { %4842 = vrot.lane.b32.xlu0 %v12552_v0, %s6352_s4  ;;  %v7347_v31 = vpop.permute.xlu1 %4567 }
  0xc6   : > { %12553 = vst [vmem:[#allocation17_spill] sm:$0xff] %v7347_v31  ;;  %v1095_v31 = vrot.slane %v7307_v47, 1 }
  0xc7   : > { %v7349_v32 = vpop.permute.xlu0 %4562  ;;  %4857 = vrot.lane.b32.xlu1 %v12555_v8, %s6352_s4 }
  0xc8   : > { %12554 = vst [vmem:[#allocation9_spill] sm:$0xff] %v7349_v32  ;;  %v1094_v32 = vrot.slane %v7304_v58, 1 }
  0xc9   : > { %4852 = vrot.lane.b32.xlu0 %v12556_v50, %s6352_s4  ;;  %v7355_v25 = vpop.permute.xlu1 %4577 }
  0xca   : > { %12557 = vst [vmem:[#allocation27_spill] sm:$0xff] %v7355_v25  ;;  %v7386_v30 = vsel %vm287_vm0, %v1094_v32, %v1095_v31  ;;  %v12576_v32 = vld [vmem:[#allocation47_spill] sm:$0xff] }
  0xcb   : > { %v7357_v3 = vpop.permute.xlu0 %4572  ;;  %4867 = vrot.lane.b32.xlu1 %v12559_v39, %s6352_s4  ;;  %12570 = vst [vmem:[#allocation48_spill] sm:$0xff] %v7386_v30 }
  0xcc   : > { %12558 = vst [vmem:[#allocation15_spill] sm:$0xff] %v7357_v3  ;;  %v7375_v3 = vrot.slane %v7366_v37, 1 }
  0xcd   : > { %4862 = vrot.lane.b32.xlu0 %v12560_v46, %s6352_s4  ;;  %v7363_v57 = vpop.permute.xlu1 %4587 }
  0xce   : > { %12561 = vst [vmem:[#allocation36_spill] sm:$0xff] %v7363_v57  ;;  %12565 = vst [vmem:[#allocation43_spill] sm:$0xff] %v7375_v3  ;;  %v7390_v52 = vsel %vm287_vm0, %v1095_v31, %v7375_v3  ;;  %v12579_v3 = vld [vmem:[#allocation49_spill] sm:$0xff] }
  0xcf   : > { %v7368_v21 = vpop.permute.xlu0 %4582  ;;  %4877 = vrot.lane.b32.xlu1 %v12564_v45, %s6352_s4  ;;  %12571 = vst [vmem:[#allocation116_spill] sm:$0xff] %v7390_v52 }
  0xd0   : > { %12563 = vst [vmem:[#allocation114_spill] sm:$0xff] %v7368_v21  ;;  %v1196_v21 = vrot.slane %v7307_v47, 2 }
  0xd1   : > { %4872 = vrot.lane.b32.xlu0 %v12566_v53, %s6352_s4  ;;  %v7379_v14 = vpop.permute.xlu1 %4597 }
  0xd2   : > { %12567 = vst [vmem:[#allocation34_spill] sm:$0xff] %v7379_v14  ;;  %v12575_v14 = vld [vmem:[#allocation50_spill] sm:$0xff] }
  0xd3   : > { %v7381_v42 = vpop.permute.xlu0 %4592  ;;  %4887 = vrot.lane.b32.xlu1 %v12569_v6, %s6352_s4 }
  0xd4   : > { %12568 = vst [vmem:[#allocation115_spill] sm:$0xff] %v7381_v42  ;;  %v7402_v42 = vpack.i.bf16 %v7390_v52, %v7386_v30  ;;  %v12582_v30 = vld [vmem:[#allocation56_spill] sm:$0xff]  ;;  %v12583_v52 = vld [vmem:[#allocation51_spill] sm:$0xff] }
  0xd5   : > { %4882 = vrot.lane.b32.xlu0 %v12572_v44, %s6352_s4  ;;  %v7394_v51 = vpop.permute.xlu1 %4607 }
  0xd6   : > { %12573 = vst [vmem:[#allocation42_spill] sm:$0xff] %v7394_v51 }
  0xd7   : > { %v7396_v33 = vpop.permute.xlu0 %4602  ;;  %4897 = vrot.lane.b32.xlu1 %v12575_v14, %s6352_s4 }
  0xd8   : > { %12574 = vst [vmem:[#allocation117_spill] sm:$0xff] %v7396_v33 }
  0xd9   : > { %4892 = vrot.lane.b32.xlu0 %v12576_v32, %s6352_s4  ;;  %v7406_v9 = vpop.permute.xlu1 %4617 }
  0xda   : > { %12577 = vst [vmem:[#allocation50_spill] sm:$0xff] %v7406_v9  ;;  %v1195_v9 = vrot.slane %v7304_v58, 2 }
  0xdb   : > { %v7408_v31 = vpop.permute.xlu0 %4612  ;;  %4907 = vrot.lane.b32.xlu1 %v7402_v42, %s6352_s4 }
  0xdc   : > { %12578 = vst [vmem:[#allocation47_spill] sm:$0xff] %v7408_v31 }
  0xdd   : > { %4902 = vrot.lane.b32.xlu0 %v12579_v3, %s6352_s4  ;;  %v7414_v33 = vpop.permute.xlu1 %4627 }
  0xde   : > { %12580 = vst [vmem:[#allocation49_spill] sm:$0xff] %v7414_v33 }
  0xdf   : > { %v7416_v51 = vpop.permute.xlu0 %4622  ;;  %4917 = vrot.lane.b32.xlu1 %v12582_v30, %s6353_s5 }
  0xe0   : > { %12581 = vst [vmem:[#allocation118_spill] sm:$0xff] %v7416_v51  ;;  %v12595_v51 = vld [vmem:[#allocation60_spill] sm:$0xff] }
  0xe1   : > { %4912 = vrot.lane.b32.xlu0 %v12583_v52, %s6353_s5  ;;  %v7422_v1 = vpop.permute.xlu1 %4637 }
  0xe2   : > { %12584 = vst [vmem:[#allocation56_spill] sm:$0xff] %v7422_v1 }
  0xe3   : > { %v7424_v31 = vpop.permute.xlu0 %4632  ;;  %4927 = vrot.lane.b32.xlu1 %v12586_v38, %s6353_s5 }
  0xe4   : > { %12585 = vst [vmem:[#allocation51_spill] sm:$0xff] %v7424_v31  ;;  %v12594_v31 = vld [vmem:[#allocation65_spill] sm:$0xff] }
  0xe5   : > { %4922 = vrot.lane.b32.xlu0 %v12587_v60, %s6353_s5  ;;  %v7430_v11 = vpop.permute.xlu1 %4647 }
  0xe6   : > { %12588 = vst [vmem:[#allocation59_spill] sm:$0xff] %v7430_v11 }
  0xe7   : > { %v7432_v48 = vpop.permute.xlu0 %4642  ;;  %4937 = vrot.lane.b32.xlu1 %v12590_v56, %s6353_s5 }
  0xe8   : > { %12589 = vst [vmem:[#allocation54_spill] sm:$0xff] %v7432_v48  ;;  %v12598_v48 = vld [vmem:[#allocation68_spill] sm:$0xff] }
  0xe9   : > { %4932 = vrot.lane.b32.xlu0 %v12591_v40, %s6353_s5  ;;  %v7438_v52 = vpop.permute.xlu1 %4657 }
  0xea   : > { %12592 = vst [vmem:[#allocation61_spill] sm:$0xff] %v7438_v52  ;;  %v12088_v52 = vrot.slane %v7366_v37, 2 }
  0xeb   : > { %v7440_v1 = vpop.permute.xlu0 %4652  ;;  %4947 = vrot.lane.b32.xlu1 %v12594_v31, %s6353_s5 }
  0xec   : > { %12593 = vst [vmem:[#allocation58_spill] sm:$0xff] %v7440_v1  ;;  %v12599_v1 = vld [vmem:[#allocation63_spill] sm:$0xff]  ;;  %v1199_v36 = vsel %vm464_vm1, %v1196_v21, %v12088_v52 }
  0xed   : > { %4942 = vrot.lane.b32.xlu0 %v12595_v51, %s6353_s5  ;;  %v7446_v33 = vpop.permute.xlu1 %4667 }
  0xee   : > { %12596 = vst [vmem:[#allocation65_spill] sm:$0xff] %v7446_v33  ;;  %v12602_v33 = vld [vmem:[#allocation69_spill] sm:$0xff] }
  0xef   : > { %v7448_v11 = vpop.permute.xlu0 %4662  ;;  %4957 = vrot.lane.b32.xlu1 %v12598_v48, %s6353_s5  ;;  %v12603_v48 = vld [vmem:[#allocation66_spill] sm:$0xff] }
  0xf0   : > { %12597 = vst [vmem:[#allocation60_spill] sm:$0xff] %v7448_v11  ;;  %v1197_v11 = vsel %vm464_vm1, %v1195_v9, %v1196_v21  ;;  %v12611_v21 = vld [vmem:[#allocation70_spill] sm:$0xff] }
  0xf1   : > { %4952 = vrot.lane.b32.xlu0 %v12599_v1, %s6353_s5  ;;  %v7457_v57 = vpop.permute.xlu1 %4677 }
  0xf2   : > { %12600 = vst [vmem:[#allocation63_spill] sm:$0xff] %v7457_v57  ;;  %v12606_v57 = vld [vmem:[#allocation71_spill] sm:$0xff] }
  0xf3   : > { %v7459_v25 = vpop.permute.xlu0 %4672  ;;  %4967 = vrot.lane.b32.xlu1 %v12602_v33, %s6353_s5  ;;  %v12608_v33 = vld [vmem:[#allocation41_spill] sm:$0xff] }
  0xf4   : > { %12601 = vst [vmem:[#allocation119_spill] sm:$0xff] %v7459_v25  ;;  %v7475_v25 = vpack.i.bf16 %v1199_v36, %v1197_v11  ;;  %v12614_v11 = vld [vmem:[#allocation73_spill] sm:$0xff]  ;;  %v12615_v36 = vld [vmem:[#allocation30_spill] sm:$0xff] }
  0xf5   : > { %4962 = vrot.lane.b32.xlu0 %v12603_v48, %s6353_s5  ;;  %v7469_v22 = vpop.permute.xlu1 %4687 }
  0xf6   : > { %12604 = vst [vmem:[#allocation66_spill] sm:$0xff] %v7469_v22  ;;  %12607 = vst [vmem:[#allocation121_spill] sm:$0xff] %v7475_v25 }
  0xf7   : > { %v7471_v35 = vpop.permute.xlu0 %4682  ;;  %4977 = vrot.lane.b32.xlu1 %v12606_v57, %s6353_s5  ;;  %v12622_v57 = vld [vmem:[#allocation78_spill] sm:$0xff] }
  0xf8   : > { %12605 = vst [vmem:[#allocation120_spill] sm:$0xff] %v7471_v35 }
  0xf9   : > { %4972 = vrot.lane.b32.xlu0 %v12608_v33, %s6353_s5  ;;  %v7479_v9 = vpop.permute.xlu1 %4697 }
  0xfa   : > { %12609 = vst [vmem:[#allocation41_spill] sm:$0xff] %v7479_v9  ;;  %v12618_v9 = vld [vmem:[#allocation75_spill] sm:$0xff] }
  0xfb   : > { %v7481_v13 = vpop.permute.xlu0 %4692  ;;  %4987 = vrot.lane.b32.xlu1 %v7475_v25, %s6353_s5  ;;  %v12619_v25 = vld [vmem:[#allocation72_spill] sm:$0xff] }
  0xfc   : > { %12610 = vst [vmem:[#allocation122_spill] sm:$0xff] %v7481_v13 }
  0xfd   : > { %4982 = vrot.lane.b32.xlu0 %v12611_v21, %s6353_s5  ;;  %v7487_v52 = vpop.permute.xlu1 %4707 }
  0xfe   : > { %12612 = vst [vmem:[#allocation70_spill] sm:$0xff] %v7487_v52 }
  0xff   : > { %v7489_v35 = vpop.permute.xlu0 %4702  ;;  %4997 = vrot.lane.b32.xlu1 %v12614_v11, %s6354_s6  ;;  %v12623_v11 = vld [vmem:[#allocation74_spill] sm:$0xff] }
 0x100   : > { %12613 = vst [vmem:[#allocation123_spill] sm:$0xff] %v7489_v35 }
 0x101   : > { %4992 = vrot.lane.b32.xlu0 %v12615_v36, %s6354_s6  ;;  %v7495_v22 = vpop.permute.xlu1 %4717 }
 0x102   : > { %12616 = vst [vmem:[#allocation30_spill] sm:$0xff] %v7495_v22 }
 0x103   : > { %v7497_v13 = vpop.permute.xlu0 %4712  ;;  %5007 = vrot.lane.b32.xlu1 %v12618_v9, %s6354_s6 }
 0x104   : > { %12617 = vst [vmem:[#allocation124_spill] sm:$0xff] %v7497_v13  ;;  %v12625_v13 = vld [vmem:[#allocation76_spill] sm:$0xff] }
 0x105   : > { %5002 = vrot.lane.b32.xlu0 %v12619_v25, %s6354_s6  ;;  %v7503_v52 = vpop.permute.xlu1 %4727 }
 0x106   : > { %12620 = vst [vmem:[#allocation72_spill] sm:$0xff] %v7503_v52 }
 0x107   : > { %v7505_v35 = vpop.permute.xlu0 %4722  ;;  %5017 = vrot.lane.b32.xlu1 %v12622_v57, %s6354_s6  ;;  %v1297_v57 = vrot.slane %v7307_v47, 3 }
 0x108   : > { %12621 = vst [vmem:[#allocation125_spill] sm:$0xff] %v7505_v35  ;;  %v1296_v35 = vrot.slane %v7304_v58, 3 }
 0x109   : > { %5012 = vrot.lane.b32.xlu0 %v12623_v11, %s6354_s6  ;;  %v7511_v36 = vpop.permute.xlu1 %4737  ;;  %v12109_v11 = vrot.slane %v7366_v37, 3 }
 0x10b   : > { %v7513_v22 = vpop.permute.xlu0 %4732  ;;  %5027 = vrot.lane.b32.xlu1 %v7037_v43, %s6354_s6 }
 0x10c   : > { %12624 = vst [vmem:[#allocation126_spill] sm:$0xff] %v7513_v22 }
 0x10d   : > { %5022 = vrot.lane.b32.xlu0 %v12625_v13, %s6354_s6  ;;  %v7519_v9 = vpop.permute.xlu1 %4747  ;;  %v1298_v13 = vsel %vm641_vm2, %v1296_v35, %v1297_v57 }
 0x10e   : > { %12626 = vst [vmem:[#allocation127_spill] sm:$0xff] %v7519_v9 }
 0x10f   : > { %v7521_v52 = vpop.permute.xlu0 %4742  ;;  %5037 = vrot.lane.b32.xlu1 %v7059_v24, %s6354_s6  ;;  %v1300_v24 = vsel %vm641_vm2, %v1297_v57, %v12109_v11  ;;  %v12636_v57 = vld [vmem:[#allocation83_spill] sm:$0xff] }
 0x110   : > { %12627 = vst [vmem:[#allocation128_spill] sm:$0xff] %v7521_v52 }
 0x111   : > { %5032 = vrot.lane.b32.xlu0 %v7027_v49, %s6354_s6  ;;  %v7530_v22 = vpop.permute.xlu1 %4757 }
 0x112   : > { %12628 = vst [vmem:[#allocation129_spill] sm:$0xff] %v7530_v22  ;;  %v12633_v22 = vld [vmem:[#allocation81_spill] sm:$0xff] }
 0x113   : > { %v7532_v43 = vpop.permute.xlu0 %4752  ;;  %5047 = vrot.lane.b32.xlu1 %v7078_v16, %s6354_s6 }
 0x114   : > { %12629 = vst [vmem:[#allocation130_spill] sm:$0xff] %v7532_v43  ;;  %v7548_v43 = vpack.i.bf16 %v1300_v24, %v1298_v13 }
 0x115   : > { %5042 = vrot.lane.b32.xlu0 %v7048_v54, %s6354_s6  ;;  %v7542_v52 = vpop.permute.xlu1 %4767 }
 0x116   : > { %12630 = vst [vmem:[#allocation131_spill] sm:$0xff] %v7542_v52  ;;  %12632 = vst [vmem:[#allocation133_spill] sm:$0xff] %v7548_v43 }
 0x117   : > { %v7544_v9 = vpop.permute.xlu0 %4762  ;;  %5057 = vrot.lane.b32.xlu1 %v7096_v7, %s6354_s6 }
 0x118   : > { %12631 = vst [vmem:[#allocation132_spill] sm:$0xff] %v7544_v9 }
 0x119   : > { %5052 = vrot.lane.b32.xlu0 %v12633_v22, %s6354_s6  ;;  %v7552_v35 = vpop.permute.xlu1 %4777  ;;  %v7723_v22 = vld [vmem:[%s6420_s25 + $0x198] sm:$0xff] }
 0x11a   : > { %12634 = vst [vmem:[#allocation134_spill] sm:$0xff] %v7552_v35 }
 0x11b   : > { %v7554_v16 = vpop.permute.xlu0 %4772  ;;  %5067 = vrot.lane.b32.xlu1 %v7548_v43, %s6354_s6 }
 0x11c   : > { %12635 = vst [vmem:[#allocation135_spill] sm:$0xff] %v7554_v16 }
 0x11d   : > { %5062 = vrot.lane.b32.xlu0 %v12636_v57, %s6354_s6  ;;  %v7560_v11 = vpop.permute.xlu1 %4787 }
 0x11e   : > { %12637 = vst [vmem:[#allocation136_spill] sm:$0xff] %v7560_v11 }
 0x11f   : > { %v7562_v9 = vpop.permute.xlu0 %4782  ;;  %5077 = vrot.lane.b32.xlu1 %v7127_v20, %s6355_s7  ;;  %v6230_v20 = vld [vmem:[%s6420_s25 + $0xc0] sm:$0xff] }
 0x120   : > { %12638 = vst [vmem:[#allocation137_spill] sm:$0xff] %v7562_v9 }
 0x121   : > { %5072 = vrot.lane.b32.xlu0 %v6994_v10, %s6355_s7  ;;  %v7568_v24 = vpop.permute.xlu1 %4797 }
 0x122   : > { %12639 = vst [vmem:[#allocation138_spill] sm:$0xff] %v7568_v24 }
 0x123   : > { %v7570_v13 = vpop.permute.xlu0 %4792  ;;  %5087 = vrot.lane.b32.xlu1 %v7145_v23, %s6355_s7 }
 0x124   : > { %12640 = vst [vmem:[#allocation139_spill] sm:$0xff] %v7570_v13  ;;  %v12645_v13 = vld [vmem:[#allocation89_spill] sm:$0xff] }
 0x125   : > { %5082 = vrot.lane.b32.xlu0 %v7119_v5, %s6355_s7  ;;  %v7576_v16 = vpop.permute.xlu1 %4807  ;;  %v6231_v5 = vld [vmem:[%s6420_s25 + $0xc8] sm:$0xff] }
 0x126   : > { %12641 = vst [vmem:[#allocation140_spill] sm:$0xff] %v7576_v16  ;;  %v5181_v43 = vpack.i.bf16 %v6231_v5, %v6230_v20  ;;  %v7699_v20 = vld [vmem:[%s6420_s25 + $0x138] sm:$0xff] }
 0x127   : > { %v7578_v52 = vpop.permute.xlu0 %4802  ;;  %5097 = vrot.lane.b32.xlu1 %v7163_v15, %s6355_s7  ;;  %v1398_v15 = vrot.slane %v7307_v47, 4 }
 0x128   : > { %12642 = vst [vmem:[#allocation141_spill] sm:$0xff] %v7578_v52  ;;  %v1397_v52 = vrot.slane %v7304_v58, 4 }
 0x129   : > { %5092 = vrot.lane.b32.xlu0 %v7136_v28, %s6355_s7  ;;  %v7584_v10 = vpop.permute.xlu1 %4817  ;;  %v1400_v28 = vrot.slane %v7366_v37, 4 }
 0x12a   : > { %12643 = vst [vmem:[#allocation142_spill] sm:$0xff] %v7584_v10 }
 0x12b   : > { %v7586_v24 = vpop.permute.xlu0 %4812  ;;  %5107 = vrot.lane.b32.xlu1 %v7181_v19, %s6355_s7  ;;  %v1401_v58 = vsel %vm818_vm3, %v1398_v15, %v1400_v28 }
 0x12c   : > { %12644 = vst [vmem:[#allocation143_spill] sm:$0xff] %v7586_v24 }
 0x12d   : > { %5102 = vrot.lane.b32.xlu0 %v12645_v13, %s6355_s7  ;;  %v7592_v23 = vpop.permute.xlu1 %4827  ;;  %v6229_v13 = vld [vmem:[%s6420_s25 + $0xe0] sm:$0xff] }
 0x12e   : > { %12646 = vst [vmem:[#allocation144_spill] sm:$0xff] %v7592_v23 }
 0x12f   : > { %v7594_v16 = vpop.permute.xlu0 %4822  ;;  %5117 = vrot.lane.b32.xlu1 %v7201_v61, %s6355_s7  ;;  %v1399_v61 = vsel %vm818_vm3, %v1397_v52, %v1398_v15  ;;  %v6216_v15 = vld [vmem:[%s6420_s25 + $0x48] sm:$0xff] }
 0x130   : > { %12647 = vst [vmem:[#allocation145_spill] sm:$0xff] %v7594_v16 }
 0x131   : > { %5112 = vrot.lane.b32.xlu0 %v7172_v34, %s6355_s7  ;;  %v7603_v24 = vpop.permute.xlu1 %4837  ;;  %v7668_v34 = vld [vmem:[%s6420_s25 + $0x90] sm:$0xff] }
 0x132   : > { %12648 = vst [vmem:[#allocation146_spill] sm:$0xff] %v7603_v24  ;;  %v6219_v24 = vld [vmem:[%s6420_s25 + $0x38] sm:$0xff] }
 0x133   : > { %v7605_v19 = vpop.permute.xlu0 %4832  ;;  %5127 = vrot.lane.b32.xlu1 %v7220_v4, %s6355_s7 }
 0x134   : > { %12649 = vst [vmem:[#allocation147_spill] sm:$0xff] %v7605_v19  ;;  %v7619_v19 = vpack.i.bf16 %v1401_v58, %v1399_v61  ;;  %v6218_v58 = vld [vmem:[%s6420_s25 + $0x30] sm:$0xff] }
 0x135   : > { %5122 = vrot.lane.b32.xlu0 %v7190_v63, %s6355_s7  ;;  %v7613_v47 = vpop.permute.xlu1 %4847  ;;  %v7660_v63 = vld [vmem:[%s6420_s25 + $0xb0] sm:$0xff] }
 0x136   : > { %12650 = vst [vmem:[#allocation148_spill] sm:$0xff] %v7613_v47  ;;  %12652 = vst [vmem:[#allocation150_spill] sm:$0xff] %v7619_v19 }
 0x137   : > { %v7615_v37 = vpop.permute.xlu0 %4842  ;;  %5137 = vrot.lane.b32.xlu1 %v7234_v41, %s6355_s7  ;;  %v5151_v41 = vpack.i.bf16 %v6219_v24, %v6218_v58  ;;  %v6222_v24 = vld [vmem:[%s6420_s25 + $0x60] sm:$0xff]  ;;  %v6223_v58 = vld [vmem:[%s6420_s25 + $0x68] sm:$0xff] }
 0x138   : > { %12651 = vst [vmem:[#allocation149_spill] sm:$0xff] %v7615_v37  ;;  %v6217_v37 = vld [vmem:[%s6420_s25 + $0x50] sm:$0xff] }
 0x139   : > { %5132 = vrot.lane.b32.xlu0 %v7212_v29, %s6355_s7  ;;  %v7623_v52 = vpop.permute.xlu1 %4857  ;;  %v5156_v47 = vpack.i.bf16 %v6217_v37, %v6216_v15  ;;  %v7644_v37 = vld [vmem:[%s6420_s25 + $0x80] sm:$0xff] }
 0x13a   : > { %12653 = vst [vmem:[#allocation151_spill] sm:$0xff] %v7623_v52 }
 0x13b   : > { %v7625_v28 = vpop.permute.xlu0 %4852  ;;  %5147 = vrot.lane.b32.xlu1 %v7619_v19, %s6355_s7 }
 0x13c   : > { %12654 = vst [vmem:[#allocation152_spill] sm:$0xff] %v7625_v28  ;;  %v7641_v28 = vld [vmem:[%s6420_s25 + $0x78] sm:$0xff] }
 0x13d   : > { %5142 = vrot.lane.b32.xlu0 %v7228_v18, %s6355_s7  ;;  %v7633_v61 = vpop.permute.xlu1 %4867  ;;  %v5166_v15 = vpack.i.bf16 %v7644_v37, %v7641_v28  ;;  %v5161_v18 = vpack.i.bf16 %v6223_v58, %v6222_v24  ;;  %v7671_v24 = vld [vmem:[%s6420_s25 + $0x98] sm:$0xff] }
 0x13e   : > { %12655 = vst [vmem:[#allocation153_spill] sm:$0xff] %v7633_v61 }
 0x13f   : > { %v7637_v4 = vpop.permute.xlu0 %4862  ;;  %5157 = vrot.lane.b32.xlu1 %v5156_v47, %s6356_s8  ;;  %v7657_v47 = vld [vmem:[%s6420_s25 + $0xa8] sm:$0xff] }
 0x140   : > { %12656 = vst [vmem:[#allocation154_spill] sm:$0xff] %v7637_v4  ;;  %v7726_v4 = vld [vmem:[%s6420_s25 + $0x1a0] sm:$0xff] }
 0x141   : > { %5152 = vrot.lane.b32.xlu0 %v5151_v41, %s6356_s8  ;;  %v7649_v19 = vpop.permute.xlu1 %4877  ;;  %v5176_v41 = vpack.i.bf16 %v7660_v63, %v7657_v47 }
 0x142   : > { %12657 = vst [vmem:[#allocation155_spill] sm:$0xff] %v7649_v19 }
 0x143   : > { %v7653_v29 = vpop.permute.xlu0 %4872  ;;  %5167 = vrot.lane.b32.xlu1 %v5166_v15, %s6356_s8  ;;  %v5171_v15 = vpack.i.bf16 %v7671_v24, %v7668_v34 }
 0x144   : > { %12658 = vst [vmem:[#allocation156_spill] sm:$0xff] %v7653_v29  ;;  %v6228_v29 = vld [vmem:[%s6420_s25 + $0xd8] sm:$0xff] }
 0x145   : > { %5162 = vrot.lane.b32.xlu0 %v5161_v18, %s6356_s8  ;;  %v7665_v19 = vpop.permute.xlu1 %4887  ;;  %v5186_v18 = vpack.i.bf16 %v6229_v13, %v6228_v29  ;;  %v6234_v13 = vld [vmem:[%s6420_s25 + $0xf0] sm:$0xff] }
 0x146   : > { %12659 = vst [vmem:[#allocation157_spill] sm:$0xff] %v7665_v19 }
 0x147   : > { %v7675_v58 = vpop.permute.xlu0 %4882  ;;  %5177 = vrot.lane.b32.xlu1 %v5176_v41, %s6356_s8  ;;  %v6232_v41 = vld [vmem:[%s6420_s25 + $0x108] sm:$0xff] }
 0x148   : > { %12660 = vst [vmem:[#allocation158_spill] sm:$0xff] %v7675_v58  ;;  %v6233_v58 = vld [vmem:[%s6420_s25 + $0x110] sm:$0xff] }
 0x149   : > { %5172 = vrot.lane.b32.xlu0 %v5171_v15, %s6356_s8  ;;  %v7681_v19 = vpop.permute.xlu1 %4897  ;;  %v5196_v57 = vpack.i.bf16 %v6233_v58, %v6232_v41  ;;  %v6235_v15 = vld [vmem:[%s6420_s25 + $0xf8] sm:$0xff]  ;;  %v6238_v41 = vld [vmem:[%s6420_s25 + $0x120] sm:$0xff] }
 0x14a   : > { %12661 = vst [vmem:[#allocation159_spill] sm:$0xff] %v7681_v19  ;;  %v5191_v19 = vpack.i.bf16 %v6235_v15, %v6234_v13  ;;  %v6239_v13 = vld [vmem:[%s6420_s25 + $0x128] sm:$0xff] }
 0x14b   : > { %v7685_v7 = vpop.permute.xlu0 %4892  ;;  %5187 = vrot.lane.b32.xlu1 %v5186_v18, %s6356_s8  ;;  %v7702_v18 = vld [vmem:[%s6420_s25 + $0x140] sm:$0xff]  ;;  %v5201_v15 = vpack.i.bf16 %v6239_v13, %v6238_v41  ;;  %v7732_v41 = vld [vmem:[%s6420_s25 + $0x150] sm:$0xff]  ;;  %v7735_v13 = vld [vmem:[%s6420_s25 + $0x158] sm:$0xff] }
 0x14c   : > { %12662 = vst [vmem:[#allocation160_spill] sm:$0xff] %v7685_v7 }
 0x14d   : > { %5182 = vrot.lane.b32.xlu0 %v5181_v43, %s6356_s8  ;;  %v7691_v29 = vpop.permute.xlu1 %4907  ;;  %v5206_v43 = vpack.i.bf16 %v7702_v18, %v7699_v20 }
 0x14e   : > { %12663 = vst [vmem:[#allocation161_spill] sm:$0xff] %v7691_v29 }
 0x14f   : > { %v7695_v5 = vpop.permute.xlu0 %4902  ;;  %5197 = vrot.lane.b32.xlu1 %v5196_v57, %s6356_s8  ;;  %v7715_v57 = vld [vmem:[%s6420_s25 + $0x168] sm:$0xff] }
 0x150   : > { %12664 = vst [vmem:[#allocation162_spill] sm:$0xff] %v7695_v5  ;;  %v7718_v5 = vld [vmem:[%s6420_s25 + $0x170] sm:$0xff] }
 0x151   : > { %5192 = vrot.lane.b32.xlu0 %v5191_v19, %s6356_s8  ;;  %v7707_v58 = vpop.permute.xlu1 %4917  ;;  %v5216_v29 = vpack.i.bf16 %v7718_v5, %v7715_v57 }
 0x152   : > { %12665 = vst [vmem:[#allocation163_spill] sm:$0xff] %v7707_v58  ;;  %v5226_v58 = vpack.i.bf16 %v7726_v4, %v7723_v22 }
 0x153   : > { %v7711_v7 = vpop.permute.xlu0 %4912  ;;  %5207 = vrot.lane.b32.xlu1 %v5206_v43, %s6356_s8  ;;  %v5211_v43 = vpack.i.bf16 %v7735_v13, %v7732_v41 }
 0x154   : > { %12666 = vst [vmem:[#allocation164_spill] sm:$0xff] %v7711_v7 }
 0x155   : > { %5202 = vrot.lane.b32.xlu0 %v5201_v15, %s6356_s8  ;;  %v7729_v19 = vpop.permute.xlu1 %4927 }
 0x156   : > { %12667 = vst [vmem:[#allocation165_spill] sm:$0xff] %v7729_v19 }
 0x157   : > { %v7739_v7 = vpop.permute.xlu0 %4922  ;;  %5217 = vrot.lane.b32.xlu1 %v5216_v29, %s6356_s8 }
 0x158   : > { %12668 = vst [vmem:[#allocation166_spill] sm:$0xff] %v7739_v7 }
 0x159   : > { %5212 = vrot.lane.b32.xlu0 %v5211_v43, %s6356_s8  ;;  %v7745_v54 = vpop.permute.xlu1 %4937 }
 0x15a   : > { %12669 = vst [vmem:[#allocation167_spill] sm:$0xff] %v7745_v54 }
 0x15b   : > { %v7747_v15 = vpop.permute.xlu0 %4932  ;;  %5227 = vrot.lane.b32.xlu1 %v5226_v58, %s6356_s8 }
 0x15c   : > { %12670 = vst [vmem:[#allocation168_spill] sm:$0xff] %v7747_v15 }
 0x15d   : > { %5222 = vrot.lane.b32.xlu0 %v7319_v27, %s6356_s8  ;;  %v7752_v19 = vpop.permute.xlu1 %4947 }
 0x15e   : > { %12671 = vst [vmem:[#allocation169_spill] sm:$0xff] %v7752_v19 }
 0x15f   : > { %v7754_v61 = vpop.permute.xlu0 %4942  ;;  %5237 = vrot.lane.b32.xlu1 %v12552_v0, %s6357_s9 }
 0x160   : > { %12672 = vst [vmem:[#allocation170_spill] sm:$0xff] %v7754_v61 }
 0x161   : > { %5232 = vrot.lane.b32.xlu0 %v12547_v62, %s6357_s9  ;;  %v7760_v29 = vpop.permute.xlu1 %4957 }
 0x162   : > { %12673 = vst [vmem:[#allocation171_spill] sm:$0xff] %v7760_v29 }
 0x163   : > { %v7762_v43 = vpop.permute.xlu0 %4952  ;;  %5247 = vrot.lane.b32.xlu1 %v12556_v50, %s6357_s9  ;;  %v7787_v50 = vld [vmem:[%s6420_s25 + $0x1a8] sm:$0xf] }
 0x164   : > { %12674 = vst [vmem:[#allocation172_spill] sm:$0xff] %v7762_v43  ;;  %12680 = vst [vmem:[#allocation178_spill] sm:$0xff] %v7787_v50 }
 0x165   : > { %5242 = vrot.lane.b32.xlu0 %v12551_v59, %s6357_s9  ;;  %v7768_v27 = vpop.permute.xlu1 %4967 }
 0x166   : > { %12675 = vst [vmem:[#allocation173_spill] sm:$0xff] %v7768_v27 }
 0x167   : > { %v7770_v58 = vpop.permute.xlu0 %4962  ;;  %5257 = vrot.lane.b32.xlu1 %v12560_v46, %s6357_s9  ;;  %v1598_v46 = vrot.slane %v7726_v4, 1 }
 0x168   : > { %12676 = vst [vmem:[#allocation174_spill] sm:$0xff] %v7770_v58 }
 0x169   : > { %5252 = vrot.lane.b32.xlu0 %v12555_v8, %s6357_s9  ;;  %v7776_v62 = vpop.permute.xlu1 %4977  ;;  %v1597_v8 = vrot.slane %v7723_v22, 1 }
 0x16a   : > { %12677 = vst [vmem:[#allocation175_spill] sm:$0xff] %v7776_v62 }
 0x16b   : > { %v7778_v0 = vpop.permute.xlu0 %4972  ;;  %5267 = vrot.lane.b32.xlu1 %v12566_v53, %s6357_s9  ;;  %v1599_v27 = vsel %vm287_vm0, %v1597_v8, %v1598_v46 }
 0x16c   : > { %12678 = vst [vmem:[#allocation176_spill] sm:$0xff] %v7778_v0  ;;  %v7796_v0 = vrot.slane %v7787_v50, 1 }
 0x16d   : > { %5262 = vrot.lane.b32.xlu0 %v12559_v39, %s6357_s9  ;;  %v7784_v59 = vpop.permute.xlu1 %4987 }
 0x16e   : > { %12679 = vst [vmem:[#allocation177_spill] sm:$0xff] %v7784_v59  ;;  %12682 = vst [vmem:[#allocation180_spill] sm:$0xff] %v7796_v0 }
 0x16f   : > { %v7789_v58 = vpop.permute.xlu0 %4982  ;;  %5277 = vrot.lane.b32.xlu1 %v12572_v44, %s6357_s9  ;;  %v1601_v44 = vsel %vm287_vm0, %v1598_v46, %v7796_v0 }
 0x170   : > { %12681 = vst [vmem:[#allocation179_spill] sm:$0xff] %v7789_v58 }
 0x171   : > { %5272 = vrot.lane.b32.xlu0 %v12564_v45, %s6357_s9  ;;  %v7800_v53 = vpop.permute.xlu1 %4997  ;;  %v7817_v45 = vpack.i.bf16 %v1601_v44, %v1599_v27  ;;  %v4470_v44 = vunpack.i.h.bf16 %v7244_v17 }
 0x172   : > { %12683 = vst [vmem:[#allocation181_spill] sm:$0xff] %v7800_v53 }
 0x173   : > { %v7802_v39 = vpop.permute.xlu0 %4992  ;;  %5287 = vrot.lane.b32.xlu1 %v12576_v32, %s6357_s9  ;;  %12687 = vst [vmem:[#allocation185_spill] sm:$0xff] %v7817_v45 }
 0x174   : > { %12684 = vst [vmem:[#allocation182_spill] sm:$0xff] %v7802_v39 }
 0x175   : > { %5282 = vrot.lane.b32.xlu0 %v12569_v6, %s6357_s9  ;;  %v7811_v43 = vpop.permute.xlu1 %5007 }
 0x176   : > { %12685 = vst [vmem:[#allocation183_spill] sm:$0xff] %v7811_v43 }
 0x177   : > { %v7813_v29 = vpop.permute.xlu0 %5002  ;;  %5297 = vrot.lane.b32.xlu1 %v12579_v3, %s6357_s9 }
 0x178   : > { %12686 = vst [vmem:[#allocation184_spill] sm:$0xff] %v7813_v29 }
 0x179   : > { %5292 = vrot.lane.b32.xlu0 %v12575_v14, %s6357_s9  ;;  %v7821_v32 = vpop.permute.xlu1 %5017 }
 0x17a   : > { %12688 = vst [vmem:[#allocation186_spill] sm:$0xff] %v7821_v32 }
 0x17b   : > { %v7823_v8 = vpop.permute.xlu0 %5012  ;;  %5307 = vrot.lane.b32.xlu1 %v7817_v45, %s6357_s9 }
 0x17c   : > { %12689 = vst [vmem:[#allocation187_spill] sm:$0xff] %v7823_v8  ;;  %v4509_v8 = vunpack.i.l.bf16 %v7284_v26 }
 0x17d   : > { %5302 = vrot.lane.b32.xlu0 %v7402_v42, %s6357_s9  ;;  %v7829_v6 = vpop.permute.xlu1 %5027 }
 0x17e   : > { %12690 = vst [vmem:[#allocation188_spill] sm:$0xff] %v7829_v6 }
 0x17f   : > { %v7831_v46 = vpop.permute.xlu0 %5022  ;;  %5317 = vrot.lane.b32.xlu1 %v12587_v60, %s6358_s10  ;;  %v4460_v60 = vunpack.i.h.bf16 %v7232_v55 }
 0x180   : > { %12691 = vst [vmem:[#allocation189_spill] sm:$0xff] %v7831_v46 }
 0x181   : > { %5312 = vrot.lane.b32.xlu0 %v12582_v30, %s6358_s10  ;;  %v7837_v14 = vpop.permute.xlu1 %5037  ;;  %v4459_v30 = vunpack.i.l.bf16 %v7232_v55  ;;  %v4510_v55 = vunpack.i.h.bf16 %v7284_v26 }
 0x182   : > { %12692 = vst [vmem:[#allocation190_spill] sm:$0xff] %v7837_v14 }
 0x183   : > { %v7839_v3 = vpop.permute.xlu0 %5032  ;;  %5327 = vrot.lane.b32.xlu1 %v12591_v40, %s6358_s10 }
 0x184   : > { %12693 = vst [vmem:[#allocation191_spill] sm:$0xff] %v7839_v3  ;;  %v4469_v3 = vunpack.i.l.bf16 %v7244_v17  ;;  %v2110_v17 = vsel %vm2099_vm4, %v7641_v28, %v4459_v30  ;;  %v1699_v30 = vrot.slane %v7726_v4, 2 }
 0x185   : > { %5322 = vrot.lane.b32.xlu0 %v12586_v38, %s6358_s10  ;;  %v7845_v42 = vpop.permute.xlu1 %5047  ;;  %v4465_v38 = vunpack.i.h.bf16 %v7248_v2 }
 0x186   : > { %12694 = vst [vmem:[#allocation192_spill] sm:$0xff] %v7845_v42  ;;  %v4499_v42 = vunpack.i.l.bf16 %v7274_v12 }
 0x187   : > { %v7847_v27 = vpop.permute.xlu0 %5042  ;;  %5337 = vrot.lane.b32.xlu1 %v12595_v51, %s6358_s10  ;;  %v4500_v51 = vunpack.i.h.bf16 %v7274_v12  ;;  %v2114_v12 = vsel %vm2099_vm4, %v7657_v47, %v4469_v3 }
 0x188   : > { %12695 = vst [vmem:[#allocation193_spill] sm:$0xff] %v7847_v27  ;;  %v4464_v27 = vunpack.i.l.bf16 %v7248_v2  ;;  %v2115_v2 = vsel %vm2099_vm4, %v7660_v63, %v4470_v44  ;;  %v2126_v26 = vsel %vm2099_vm4, %v7699_v20, %v4499_v42  ;;  %v12702_v42 = vld [vmem:[#allocation112_spill] sm:$0xff]  ;;  %v12705_v44 = vld [vmem:[#allocation113_spill] sm:$0xff] }
 0x189   : > { %5332 = vrot.lane.b32.xlu0 %v12590_v56, %s6358_s10  ;;  %v7857_v40 = vpop.permute.xlu1 %5057  ;;  %v2111_v56 = vsel %vm2099_vm4, %v7644_v37, %v4460_v60  ;;  %v12699_v37 = vld [vmem:[#allocation105_spill] sm:$0xff]  ;;  %v2127_v47 = vsel %vm2099_vm4, %v7702_v18, %v4500_v51  ;;  %v2130_v18 = vsel %vm2099_vm4, %v7715_v57, %v4509_v8  ;;  %v4544_v29 = vunpack.i.l.bf16 %v12705_v44  ;;  %v12706_v8 = vld [vmem:[#allocation27_spill] sm:$0xff] }
 0x18a   : > { %12696 = vst [vmem:[#allocation194_spill] sm:$0xff] %v7857_v40  ;;  %v2112_v28 = vsel %vm2099_vm4, %v7668_v34, %v4464_v27  ;;  %v4505_v60 = vunpack.i.h.bf16 %v12699_v37  ;;  %v4504_v63 = vunpack.i.l.bf16 %v12699_v37  ;;  %v1698_v27 = vrot.slane %v7723_v22, 2 }
 0x18b   : > { %v7864_v14 = vpop.permute.xlu0 %5052  ;;  %5347 = vrot.lane.b32.xlu1 %v12599_v1, %s6358_s10  ;;  %v2113_v1 = vsel %vm2099_vm4, %v7671_v24, %v4465_v38  ;;  %v12701_v24 = vld [vmem:[#allocation110_spill] sm:$0xff]  ;;  %v12703_v38 = vld [vmem:[#allocation68_spill] sm:$0xff]  ;;  %v4549_v37 = vunpack.i.l.bf16 %v12702_v42  ;;  %v4545_v57 = vunpack.i.h.bf16 %v12705_v44  ;;  %v4579_v43 = vunpack.i.l.bf16 %v12706_v8 }
 0x18c   : > { %12697 = vst [vmem:[#allocation195_spill] sm:$0xff] %v7864_v14  ;;  %v4540_v34 = vunpack.i.h.bf16 %v12701_v24  ;;  %v4539_v20 = vunpack.i.l.bf16 %v12701_v24  ;;  %v4580_v24 = vunpack.i.h.bf16 %v12706_v8 }
 0x18d   : > { %5342 = vrot.lane.b32.xlu0 %v12594_v31, %s6358_s10  ;;  %v7879_v14 = vpop.permute.xlu1 %5067  ;;  %v2131_v31 = vsel %vm2099_vm4, %v7718_v5, %v4510_v55  ;;  %v4550_v5 = vunpack.i.h.bf16 %v12702_v42  ;;  %v2128_v55 = vsel %vm2099_vm4, %v7732_v41, %v4504_v63  ;;  %v1700_v63 = vsel %vm464_vm1, %v1698_v27, %v1699_v30  ;;  %v12712_v27 = vld [vmem:[#allocation114_spill] sm:$0xff] }
 0x18e   : > { %12698 = vst [vmem:[#allocation196_spill] sm:$0xff] %v7879_v14  ;;  %v12709_v42 = vrot.slane %v7787_v50, 2  ;;  %v4585_v53 = vunpack.i.h.bf16 %v12712_v27  ;;  %v4584_v15 = vunpack.i.l.bf16 %v12712_v27 }
 0x18f   : > { %v7893_v3 = vpop.permute.xlu0 %5062  ;;  %5357 = vrot.lane.b32.xlu1 %v12603_v48, %s6358_s10  ;;  %v2129_v48 = vsel %vm2099_vm4, %v7735_v13, %v4505_v60  ;;  %v2144_v13 = vsel %vm2132_vm5, %v2111_v56, %v4540_v34  ;;  %v12708_v60 = vld [vmem:[#allocation36_spill] sm:$0xff]  ;;  %v2148_v8 = vsel %vm2132_vm5, %v2115_v2, %v4550_v5  ;;  %v2147_v56 = vsel %vm2132_vm5, %v2114_v12, %v4549_v37 }
 0x190   : > { %12700 = vst [vmem:[#allocation105_spill] sm:$0xff] %v7893_v3  ;;  %v4590_v41 = vunpack.i.h.bf16 %v12708_v60  ;;  %v1702_v44 = vsel %vm464_vm1, %v1699_v30, %v12709_v42  ;;  %v4589_v39 = vunpack.i.l.bf16 %v12708_v60  ;;  %v2145_v34 = vsel %vm2132_vm5, %v2112_v28, %v4544_v29  ;;  %v12715_v29 = vld [vmem:[#allocation50_spill] sm:$0xff] }
 0x191   : > { %5352 = vrot.lane.b32.xlu0 %v12703_v38, %s6358_s10  ;;  %v7907_v51 = vpop.permute.xlu1 %5077  ;;  %v2146_v30 = vsel %vm2132_vm5, %v2113_v1, %v4545_v57  ;;  %v2159_v2 = vsel %vm2132_vm5, %v2126_v26, %v4579_v43  ;;  %v7946_v5 = vpack.i.bf16 %v1702_v44, %v1700_v63  ;;  %v4620_v28 = vunpack.i.h.bf16 %v12715_v29  ;;  %v12717_v43 = vld [vmem:[#allocation118_spill] sm:$0xff]  ;;  %v12718_v57 = vld [vmem:[#allocation71_spill] sm:$0xff]  ;;  %v12719_v63 = vld [vmem:[#allocation61_spill] sm:$0xff] }
 0x192   : > { %12704 = vst [vmem:[#allocation110_spill] sm:$0xff] %v7907_v51  ;;  %v2143_v51 = vsel %vm2132_vm5, %v2110_v17, %v4539_v20  ;;  %v2160_v17 = vsel %vm2132_vm5, %v2127_v47, %v4580_v24  ;;  %v2164_v12 = vsel %vm2132_vm5, %v2131_v31, %v4590_v41  ;;  %v4619_v37 = vunpack.i.l.bf16 %v12715_v29 }
 0x193   : > { %v7918_v38 = vpop.permute.xlu0 %5072  ;;  %5367 = vrot.lane.b32.xlu1 %v12608_v33, %s6358_s10  ;;  %12714 = vst [vmem:[#allocation27_spill] sm:$0xff] %v7946_v5  ;;  %v2163_v1 = vsel %vm2132_vm5, %v2130_v18, %v4589_v39  ;;  %v4624_v26 = vunpack.i.l.bf16 %v12717_v43  ;;  %v2161_v31 = vsel %vm2132_vm5, %v2128_v55, %v4584_v15  ;;  %v2162_v24 = vsel %vm2132_vm5, %v2129_v48, %v4585_v53  ;;  %v12720_v18 = vld [vmem:[#allocation65_spill] sm:$0xff]  ;;  %v12725_v48 = vld [vmem:[#allocation60_spill] sm:$0xff] }
 0x194   : > { %12707 = vst [vmem:[#allocation112_spill] sm:$0xff] %v7918_v38  ;;  %v12710_v38 = vld [vmem:[#allocation69_spill] sm:$0xff]  ;;  %v4625_v41 = vunpack.i.h.bf16 %v12717_v43  ;;  %v4659_v42 = vunpack.i.l.bf16 %v12719_v63  ;;  %v4660_v39 = vunpack.i.h.bf16 %v12719_v63  ;;  %v4670_v44 = vunpack.i.h.bf16 %v12720_v18 }
 0x195   : > { %5362 = vrot.lane.b32.xlu0 %v12710_v38, %s6358_s10  ;;  %v7933_v33 = vpop.permute.xlu1 %5087  ;;  %v12716_v38 = vld [vmem:[#allocation49_spill] sm:$0xff]  ;;  %v4669_v27 = vunpack.i.l.bf16 %v12720_v18  ;;  %v7974_v15 = vsel %vm2165_vm6, %v2144_v13, %v4620_v28  ;;  %v4664_v55 = vunpack.i.l.bf16 %v12725_v48  ;;  %v4665_v63 = vunpack.i.h.bf16 %v12725_v48 }
 0x196   : > { %12711 = vst [vmem:[#allocation68_spill] sm:$0xff] %v7933_v33  ;;  %v4629_v60 = vunpack.i.l.bf16 %v12716_v38  ;;  %v4630_v47 = vunpack.i.h.bf16 %v12716_v38  ;;  %v7971_v38 = vsel %vm2165_vm6, %v2143_v51, %v4619_v37  ;;  %12723 = vst [vmem:[#allocation114_spill] sm:$0xff] %v7974_v15  ;;  %v12728_v18 = vld [vmem:[#allocation121_spill] sm:$0xff]  ;;  %v7992_v13 = vsel %vm2165_vm6, %v2146_v30, %v4625_v41  ;;  %v8627_v33 = vld [vmem:[%s6420_s25 + $0x120] sm:$0xff] }
 0x197   : > { %v7942_v20 = vpop.permute.xlu0 %5082  ;;  %5377 = vrot.lane.b32.xlu1 %v12611_v21, %s6358_s10  ;;  %12722 = vst [vmem:[#allocation69_spill] sm:$0xff] %v7971_v38  ;;  %12729 = vst [vmem:[#allocation71_spill] sm:$0xff] %v7992_v13  ;;  %v12731_v28 = vld [vmem:[#allocation41_spill] sm:$0xff]  ;;  %v8013_v30 = vsel %vm2165_vm6, %v2161_v31, %v4664_v55  ;;  %v4740_v55 = vunpack.i.h.bf16 %v7511_v36 }
 0x198   : > { %12713 = vst [vmem:[#allocation113_spill] sm:$0xff] %v7942_v20  ;;  %v7977_v53 = vsel %vm2165_vm6, %v2147_v56, %v4629_v60  ;;  %v7981_v43 = vsel %vm2165_vm6, %v2148_v8, %v4630_v47  ;;  %v7995_v56 = vsel %vm2165_vm6, %v2159_v2, %v4659_v42  ;;  %v4700_v37 = vunpack.i.h.bf16 %v12731_v28  ;;  %12735 = vst [vmem:[#allocation197_spill] sm:$0xff] %v8013_v30  ;;  %v12736_v2 = vld [vmem:[#allocation70_spill] sm:$0xff]  ;;  %v12737_v42 = vld [vmem:[#allocation123_spill] sm:$0xff] }
 0x199   : > { %5372 = vrot.lane.b32.xlu0 %v12718_v57, %s6358_s10  ;;  %v7957_v21 = vpop.permute.xlu1 %5097  ;;  %12724 = vst [vmem:[#allocation50_spill] sm:$0xff] %v7977_v53  ;;  %12726 = vst [vmem:[#allocation49_spill] sm:$0xff] %v7981_v43  ;;  %v7984_v57 = vsel %vm2165_vm6, %v2145_v34, %v4624_v26  ;;  %v4699_v8 = vunpack.i.l.bf16 %v12731_v28  ;;  %v8000_v34 = vsel %vm2165_vm6, %v2160_v17, %v4660_v39  ;;  %v4710_v41 = vunpack.i.h.bf16 %v12736_v2  ;;  %v12741_v28 = vld [vmem:[#allocation127_spill] sm:$0xff] }
 0x19a   : > { %12727 = vst [vmem:[#allocation118_spill] sm:$0xff] %v7984_v57  ;;  %12730 = vst [vmem:[#allocation61_spill] sm:$0xff] %v7995_v56  ;;  %v8003_v60 = vsel %vm2165_vm6, %v2163_v1, %v4669_v27  ;;  %v8006_v47 = vsel %vm2165_vm6, %v2164_v12, %v4670_v44  ;;  %v4709_v17 = vunpack.i.l.bf16 %v12736_v2  ;;  %v4704_v1 = vunpack.i.l.bf16 %v12737_v42  ;;  %v12739_v27 = vld [vmem:[#allocation73_spill] sm:$0xff]  ;;  %v12742_v2 = vld [vmem:[#allocation128_spill] sm:$0xff] }
 0x19b   : > { %v7966_v29 = vpop.permute.xlu0 %5092  ;;  %5387 = vrot.lane.b32.xlu1 %v7946_v5, %s6358_s10  ;;  %12732 = vst [vmem:[#allocation65_spill] sm:$0xff] %v8000_v34  ;;  %12733 = vst [vmem:[#allocation60_spill] sm:$0xff] %v8003_v60  ;;  %v8019_v39 = vsel %vm2165_vm6, %v2162_v24, %v4665_v63  ;;  %v4705_v12 = vunpack.i.h.bf16 %v12737_v42  ;;  %v4739_v44 = vunpack.i.l.bf16 %v7511_v36  ;;  %v2209_v31 = vsel %vm2198_vm7, %v7971_v38, %v4699_v8 }
 0x19c   : > { %12721 = vst [vmem:[#allocation36_spill] sm:$0xff] %v7966_v29  ;;  %12734 = vst [vmem:[#allocation41_spill] sm:$0xff] %v8006_v47  ;;  %v2210_v48 = vsel %vm2198_vm7, %v7974_v15, %v4700_v37  ;;  %v4749_v24 = vunpack.i.l.bf16 %v12741_v28  ;;  %v4750_v63 = vunpack.i.h.bf16 %v12741_v28  ;;  %v4745_v42 = vunpack.i.h.bf16 %v12742_v2 }
 0x19d   : > { %5382 = vrot.lane.b32.xlu0 %v12728_v18, %s6358_s10  ;;  %v7989_v51 = vpop.permute.xlu1 %5107  ;;  %12738 = vst [vmem:[#allocation70_spill] sm:$0xff] %v8019_v39  ;;  %v4744_v5 = vunpack.i.l.bf16 %v12742_v2  ;;  %v2213_v8 = vsel %vm2198_vm7, %v7977_v53, %v4709_v17  ;;  %v2214_v37 = vsel %vm2198_vm7, %v7981_v43, %v4710_v41  ;;  %v2211_v36 = vsel %vm2198_vm7, %v7984_v57, %v4704_v1 }
 0x19e   : > { %v2212_v15 = vsel %vm2198_vm7, %v7992_v13, %v4705_v12  ;;  %v2225_v2 = vsel %vm2198_vm7, %v7995_v56, %v4739_v44  ;;  %v2226_v41 = vsel %vm2198_vm7, %v8000_v34, %v4740_v55  ;;  %v2229_v1 = vsel %vm2198_vm7, %v8003_v60, %v4749_v24  ;;  %v12748_v55 = vld [vmem:[#allocation76_spill] sm:$0xff] }
 0x19f   : > { %v8008_v26 = vpop.permute.xlu0 %5102  ;;  %5397 = vrot.lane.b32.xlu1 %v12619_v25, %s6359_s11  ;;  %v2230_v44 = vsel %vm2198_vm7, %v8006_v47, %v4750_v63  ;;  %v2227_v38 = vsel %vm2198_vm7, %v8013_v30, %v4744_v5  ;;  %v12749_v24 = vunpack.i.l.bf16 %v7552_v35  ;;  %v12750_v5 = vunpack.i.h.bf16 %v7552_v35 }
 0x1a0   : > { %v12753_v63 = vunpack.i.h.bf16 %v7560_v11  ;;  %v1800_v60 = vrot.slane %v7726_v4, 3  ;;  %v12759_v47 = vunpack.i.l.bf16 %v7592_v23 }
 0x1a1   : > { %5392 = vrot.lane.b32.xlu0 %v12739_v27, %s6359_s11  ;;  %v8025_v25 = vpop.permute.xlu1 %5117  ;;  %v12744_v27 = vld [vmem:[#allocation74_spill] sm:$0xff]  ;;  %v2242_v28 = vsel %vm2231_vm8, %v2209_v31, %v12749_v24  ;;  %v12752_v31 = vunpack.i.l.bf16 %v7560_v11  ;;  %v12758_v11 = vunpack.i.h.bf16 %v7584_v10 }
 0x1a2   : > { %12740 = vst [vmem:[#allocation123_spill] sm:$0xff] %v8025_v25  ;;  %v2247_v12 = vsel %vm2231_vm8, %v2214_v37, %v12753_v63  ;;  %v12756_v37 = vunpack.i.h.bf16 %v7562_v9  ;;  %v12859_v25 = vld [vmem:[#allocation108_spill] sm:$0xff] }
 0x1a3   : > { %v8036_v18 = vpop.permute.xlu0 %5112  ;;  %5407 = vrot.lane.b32.xlu1 %v12744_v27, %s6359_s11  ;;  %v12745_v27 = vld [vmem:[#allocation75_spill] sm:$0xff]  ;;  %v2246_v24 = vsel %vm2231_vm8, %v2213_v8, %v12752_v31  ;;  %v12755_v8 = vunpack.i.l.bf16 %v7562_v9  ;;  %v8117_v13 = vsel %vm2231_vm8, %v2226_v41, %v12758_v11  ;;  %v12762_v11 = vunpack.i.l.bf16 %v7594_v16 }
 0x1a4   : > { %12743 = vst [vmem:[#allocation73_spill] sm:$0xff] %v8036_v18  ;;  %v2245_v63 = vsel %vm2231_vm8, %v2212_v15, %v12756_v37  ;;  %v12760_v15 = vld [vmem:[#allocation23_spill] sm:$0xff]  ;;  %v4530_v29 = vunpack.i.h.bf16 %v12859_v25  ;;  %v4529_v20 = vunpack.i.l.bf16 %v12859_v25 }
 0x1a5   : > { %5402 = vrot.lane.b32.xlu0 %v12745_v27, %s6359_s11  ;;  %v8054_v17 = vpop.permute.xlu1 %5127  ;;  %v2228_v27 = vsel %vm2198_vm7, %v8019_v39, %v4745_v42  ;;  %v2243_v42 = vsel %vm2231_vm8, %v2210_v48, %v12750_v5  ;;  %v2244_v31 = vsel %vm2231_vm8, %v2211_v36, %v12755_v8  ;;  %v12757_v48 = vunpack.i.l.bf16 %v7584_v10  ;;  %v12764_v9 = vld [vmem:[#allocation79_spill] sm:$0xff]  ;;  %v12789_v10 = vld [vmem:[#allocation84_spill] sm:$0xff] }
 0x1a6   : > { %12746 = vst [vmem:[#allocation127_spill] sm:$0xff] %v8054_v17  ;;  %v8122_v36 = vsel %vm2231_vm8, %v2229_v1, %v12759_v47  ;;  %v8137_v41 = vsel %vm2231_vm8, %v2227_v38, %v12762_v11  ;;  %v12763_v1 = vld [vmem:[#allocation153_spill] sm:$0xff]  ;;  %v12766_v38 = vunpack.i.h.bf16 %v7594_v16  ;;  %v12767_v47 = vld [vmem:[#allocation154_spill] sm:$0xff]  ;;  %v12768_v39 = vunpack.i.l.bf16 %v7623_v52 }
 0x1a7   : > { %v8068_v53 = vpop.permute.xlu0 %5122  ;;  %5417 = vrot.lane.b32.xlu1 %v12748_v55, %s6359_s11  ;;  %v12751_v55 = vld [vmem:[#allocation78_spill] sm:$0xff]  ;;  %v8111_v43 = vsel %vm2231_vm8, %v2225_v2, %v12757_v48  ;;  %v12761_v2 = vunpack.i.h.bf16 %v7592_v23 }
 0x1a8   : > { %12747 = vst [vmem:[#allocation128_spill] sm:$0xff] %v8068_v53  ;;  %v8153_v11 = vsel %vm2231_vm8, %v2228_v27, %v12766_v38  ;;  %v12773_v38 = vunpack.i.l.bf16 %v12763_v1 }
 0x1a9   : > { %5412 = vrot.lane.b32.xlu0 %v12751_v55, %s6359_s11  ;;  %v8085_v57 = vpop.permute.xlu1 %5137  ;;  %v1799_v55 = vrot.slane %v7723_v22, 3  ;;  %v8132_v48 = vsel %vm2231_vm8, %v2230_v44, %v12761_v2  ;;  %v12765_v2 = vrot.slane %v7787_v50, 3 }
 0x1aa   : > { %v2279_v8 = vsel %vm2264_vm9, %v2246_v24, %v12773_v38  ;;  %v12778_v24 = vunpack.i.h.bf16 %v12767_v47  ;;  %v12779_v38 = vld [vmem:[#allocation82_spill] sm:$0xff] }
 0x1ab   : > { %v8095_v5 = vpop.permute.xlu0 %5132  ;;  %5427 = vrot.lane.b32.xlu1 %v7027_v49, %s6359_s11  ;;  %v1801_v44 = vsel %vm641_vm2, %v1799_v55, %v1800_v60  ;;  %v1803_v23 = vsel %vm641_vm2, %v1800_v60, %v12765_v2  ;;  %v12769_v55 = vld [vmem:[#allocation80_spill] sm:$0xff]  ;;  %v12771_v60 = vunpack.i.h.bf16 %v7623_v52  ;;  %v12774_v49 = vunpack.i.h.bf16 %v12763_v1  ;;  %v12782_v52 = vld [vmem:[#allocation161_spill] sm:$0xff]  ;;  %v12786_v1 = vld [vmem:[#allocation83_spill] sm:$0xff] }
 0x1ac   : > { %12754 = vst [vmem:[#allocation74_spill] sm:$0xff] %v8095_v5  ;;  %v8167_v27 = vpack.i.bf16 %v1803_v23, %v1801_v44  ;;  %v12777_v23 = vunpack.i.l.bf16 %v12767_v47 }
 0x1ad   : > { %5422 = vrot.lane.b32.xlu0 %v12760_v15, %s6359_s11  ;;  %v8127_v37 = vpop.permute.xlu1 %5147  ;;  %v2276_v2 = vsel %vm2264_vm9, %v2243_v42, %v12771_v60  ;;  %v12776_v42 = vld [vmem:[#allocation81_spill] sm:$0xff]  ;;  %v2278_v60 = vsel %vm2264_vm9, %v2245_v63, %v12778_v24  ;;  %v12784_v24 = vunpack.i.h.bf16 %v7745_v54 }
 0x1ae   : > { %12772 = vst [vmem:[#allocation76_spill] sm:$0xff] %v8167_v27  ;;  %v2277_v44 = vsel %vm2264_vm9, %v2244_v31, %v12777_v23  ;;  %v12783_v23 = vunpack.i.l.bf16 %v7745_v54 }
 0x1af   : > { %v8142_v15 = vpop.permute.xlu0 %5142  ;;  %5437 = vrot.lane.b32.xlu1 %v12764_v9, %s6359_s11  ;;  %v2275_v9 = vsel %vm2264_vm9, %v2242_v28, %v12768_v39  ;;  %v2280_v39 = vsel %vm2264_vm9, %v2247_v12, %v12774_v49  ;;  %v2309_v12 = vsel %vm2297_vm10, %v2276_v2, %v12784_v24  ;;  %v5099_v49 = vunpack.i.l.bf16 %v7957_v21 }
 0x1b0   : > { %v2308_v63 = vsel %vm2297_vm10, %v2275_v9, %v12783_v23  ;;  %v12787_v23 = vunpack.i.l.bf16 %v7821_v32  ;;  %v12788_v24 = vunpack.i.h.bf16 %v7821_v32  ;;  %v12792_v9 = vunpack.i.h.bf16 %v7752_v19 }
 0x1b1   : > { %5432 = vrot.lane.b32.xlu0 %v12769_v55, %s6359_s11  ;;  %v8162_v30 = vpop.permute.xlu1 %5157  ;;  %v12781_v55 = vld [vmem:[#allocation159_spill] sm:$0xff] }
 0x1b2   : > { %12770 = vst [vmem:[#allocation75_spill] sm:$0xff] %v8162_v30  ;;  %v2341_v2 = vsel %vm2330_vm11, %v2308_v63, %v12787_v23  ;;  %v6266_v30 = vld [vmem:[%s6420_s25 + $0xf8] sm:$0xff] }
 0x1b3   : > { %v8177_v16 = vpop.permute.xlu0 %5152  ;;  %5447 = vrot.lane.b32.xlu1 %v12776_v42, %s6359_s11  ;;  %v2374_v63 = vsel %vm2363_vm12, %v2341_v2, %v5099_v49 }
 0x1b4   : > { %12775 = vst [vmem:[#allocation78_spill] sm:$0xff] %v8177_v16  ;;  %v8586_v16 = vld [vmem:[%s6420_s25 + $0x108] sm:$0xff] }
 0x1b5   : > { %5442 = vrot.lane.b32.xlu0 %v12779_v38, %s6359_s11  ;;  %v8191_v28 = vpop.permute.xlu1 %5167  ;;  %v5100_v38 = vunpack.i.h.bf16 %v7957_v21  ;;  %v2342_v21 = vsel %vm2330_vm11, %v2309_v12, %v12788_v24  ;;  %v5110_v12 = vunpack.i.h.bf16 %v7989_v51  ;;  %v5109_v24 = vunpack.i.l.bf16 %v7989_v51 }
 0x1b6   : > { %12780 = vst [vmem:[#allocation23_spill] sm:$0xff] %v8191_v28  ;;  %v12793_v51 = vunpack.i.l.bf16 %v7754_v61  ;;  %v8579_v28 = vld [vmem:[%s6420_s25 + $0x110] sm:$0xff] }
 0x1b7   : > { %v8205_v47 = vpop.permute.xlu0 %5162  ;;  %5457 = vrot.lane.b32.xlu1 %v12786_v1, %s6359_s11  ;;  %v2375_v23 = vsel %vm2363_vm12, %v2342_v21, %v5100_v38  ;;  %v12794_v21 = vunpack.i.h.bf16 %v7754_v61 }
 0x1b8   : > { %12785 = vst [vmem:[#allocation79_spill] sm:$0xff] %v8205_v47  ;;  %v2310_v2 = vsel %vm2297_vm10, %v2277_v44, %v12793_v51  ;;  %v12854_v47 = vld [vmem:[#allocation106_spill] sm:$0xff] }
 0x1b9   : > { %5452 = vrot.lane.b32.xlu0 %v12789_v10, %s6359_s11  ;;  %v5178_v31 = vpop.permute.xlu1 %5177  ;;  %v12791_v10 = vunpack.i.l.bf16 %v7752_v19  ;;  %v2311_v1 = vsel %vm2297_vm10, %v2278_v60, %v12794_v21  ;;  %v12798_v60 = vunpack.i.l.bf16 %v7831_v46 }
 0x1ba   : > { %v5180_v35 = vunpack.i.h.bf16 %v5178_v31  ;;  %v5179_v56 = vunpack.i.l.bf16 %v5178_v31  ;;  %v2313_v31 = vsel %vm2297_vm10, %v2280_v39, %v12792_v9  ;;  %v12795_v39 = vld [vmem:[#allocation133_spill] sm:$0xff]  ;;  %v12796_v9 = vunpack.i.l.bf16 %v7829_v6 }
 0x1bb   : > { %v8229_v54 = vpop.permute.xlu0 %5172  ;;  %5467 = vrot.lane.b32.xlu1 %v8167_v27, %s6359_s11  ;;  %v2312_v42 = vsel %vm2297_vm10, %v2279_v8, %v12791_v10  ;;  %v5105_v8 = vunpack.i.h.bf16 %v8008_v26  ;;  %v5104_v10 = vunpack.i.l.bf16 %v8008_v26  ;;  %v2343_v21 = vsel %vm2330_vm11, %v2310_v2, %v12798_v60  ;;  %v6253_v27 = vld [vmem:[%s6420_s25 + $0x18] sm:$0xff] }
 0x1bc   : > { %12790 = vst [vmem:[#allocation80_spill] sm:$0xff] %v8229_v54  ;;  %v8240_v49 = vsel %vm2396_vm13, %v2374_v63, %v5179_v56  ;;  %v8243_v38 = vsel %vm2396_vm13, %v2375_v23, %v5180_v35  ;;  %v2345_v35 = vsel %vm2330_vm11, %v2312_v42, %v12796_v9  ;;  %v12797_v63 = vunpack.i.h.bf16 %v7829_v6  ;;  %v12800_v42 = vld [vmem:[#allocation85_spill] sm:$0xff] }
 0x1bd   : > { %5462 = vrot.lane.b32.xlu0 %v12795_v39, %s6359_s11  ;;  %v5188_v56 = vpop.permute.xlu1 %5187  ;;  %v12799_v26 = vunpack.i.h.bf16 %v7831_v46  ;;  %v2378_v61 = vsel %vm2363_vm12, %v2345_v35, %v5109_v24  ;;  %v2376_v24 = vsel %vm2363_vm12, %v2343_v21, %v5104_v10  ;;  %v12802_v35 = vld [vmem:[#allocation86_spill] sm:$0xff]  ;;  %v12805_v10 = vunpack.i.h.bf16 %v12781_v55 }
 0x1be   : > { %v2346_v44 = vsel %vm2330_vm11, %v2313_v31, %v12797_v63  ;;  %v5190_v23 = vunpack.i.h.bf16 %v5188_v56  ;;  %v5189_v51 = vunpack.i.l.bf16 %v5188_v56  ;;  %v12801_v63 = vld [vmem:[#allocation162_spill] sm:$0xff] }
 0x1bf   : > { %v2344_v19 = vsel %vm2330_vm11, %v2311_v1, %v12799_v26  ;;  %v2379_v32 = vsel %vm2363_vm12, %v2346_v44, %v5110_v12  ;;  %v5183_v34 = vpop.permute.xlu0 %5182  ;;  %5477 = vrot.lane.b32.xlu1 %v12800_v42, %s6360_s14  ;;  %v12212_v60 = vunpack.i.h.bf16 %v12801_v63  ;;  %v12213_v1 = vunpack.i.l.bf16 %v12801_v63  ;;  %v12807_v26 = vld [vmem:[#allocation87_spill] sm:$0xff] }
 0x1c0   : > { %v8272_v31 = vsel %vm2396_vm13, %v2378_v61, %v5189_v51  ;;  %v8275_v56 = vsel %vm2396_vm13, %v2379_v32, %v5190_v23  ;;  %v5185_v2 = vunpack.i.h.bf16 %v5183_v34  ;;  %v5184_v9 = vunpack.i.l.bf16 %v5183_v34 }
 0x1c1   : > { %v2377_v12 = vsel %vm2363_vm12, %v2344_v19, %v5105_v8  ;;  %5472 = vrot.lane.b32.xlu0 %v12802_v35, %s6360_s14  ;;  %v8283_v44 = vpop.permute.xlu1 %5197  ;;  %v12804_v34 = vunpack.i.l.bf16 %v12781_v55  ;;  %v2292_v19 = vsel %vm2264_vm9, %v8117_v13, %v12805_v10  ;;  %v12214_v8 = vunpack.i.h.bf16 %v7776_v62 }
 0x1c2   : > { %12803 = vst [vmem:[#allocation81_spill] sm:$0xff] %v8283_v44  ;;  %v8286_v61 = vsel %vm2396_vm13, %v2376_v24, %v5184_v9  ;;  %v8289_v32 = vsel %vm2396_vm13, %v2377_v12, %v5185_v2  ;;  %v12215_v51 = vunpack.i.l.bf16 %v7776_v62  ;;  %v12808_v42 = vunpack.i.l.bf16 %v12782_v52  ;;  %v6252_v62 = vld [vmem:[%s6420_s25 + $0x20] sm:$0xff]  ;;  %v6259_v44 = vld [vmem:[%s6420_s25 + $0xd8] sm:$0xff] }
 0x1c3   : > { %v2291_v23 = vsel %vm2264_vm9, %v8111_v43, %v12804_v34  ;;  %v8301_v21 = vpop.permute.xlu0 %5192  ;;  %5487 = vrot.lane.b32.xlu1 %v12807_v26, %s6360_s14  ;;  %v12809_v43 = vunpack.i.h.bf16 %v12782_v52  ;;  %v2293_v13 = vsel %vm2264_vm9, %v8137_v41, %v12213_v1  ;;  %v2294_v24 = vsel %vm2264_vm9, %v8153_v11, %v12212_v60 }
 0x1c4   : > { %12806 = vst [vmem:[#allocation82_spill] sm:$0xff] %v8301_v21  ;;  %v2295_v2 = vsel %vm2264_vm9, %v8122_v36, %v12808_v42  ;;  %v12219_v12 = vunpack.i.h.bf16 %v7857_v40  ;;  %v12218_v35 = vunpack.i.l.bf16 %v7857_v40  ;;  %v12810_v36 = vld [vmem:[#allocation88_spill] sm:$0xff]  ;;  %v1901_v10 = vrot.slane %v7726_v4, 4  ;;  %v6250_v40 = vld [vmem:[%s6420_s25 + $0x50] sm:$0xff]  ;;  %v8555_v21 = vld [vmem:[%s6420_s25 + $0xe0] sm:$0xff] }
 0x1c5   : > { %v2296_v9 = vsel %vm2264_vm9, %v8132_v48, %v12809_v43  ;;  %5482 = vrot.lane.b32.xlu0 %v12810_v36, %s6360_s14  ;;  %v8325_v34 = vpop.permute.xlu1 %5207  ;;  %v1900_v48 = vrot.slane %v7723_v22, 4  ;;  %v1903_v41 = vrot.slane %v7787_v50, 4  ;;  %v2324_v26 = vsel %vm2297_vm10, %v2291_v23, %v12215_v51  ;;  %v12813_v22 = vld [vmem:[#allocation89_spill] sm:$0xff]  ;;  %v12814_v51 = vld [vmem:[#allocation90_spill] sm:$0xff] }
 0x1c6   : > { %12811 = vst [vmem:[#allocation83_spill] sm:$0xff] %v8325_v34  ;;  %v2325_v11 = vsel %vm2297_vm10, %v2292_v19, %v12214_v8  ;;  %v5140_v42 = vunpack.i.h.bf16 %v8085_v57  ;;  %v5139_v43 = vunpack.i.l.bf16 %v8085_v57  ;;  %v2357_v19 = vsel %vm2330_vm11, %v2324_v26, %v12218_v35  ;;  %v12842_v50 = vld [vmem:[#allocation150_spill] sm:$0xff] }
 0x1c7   : > { %v8338_v36 = vpop.permute.xlu0 %5202  ;;  %5497 = vrot.lane.b32.xlu1 %v12813_v22, %s6360_s14  ;;  %v2358_v57 = vsel %vm2330_vm11, %v2325_v11, %v12219_v12  ;;  %v5150_v11 = vunpack.i.h.bf16 %v8127_v37  ;;  %v5149_v12 = vunpack.i.l.bf16 %v8127_v37  ;;  %v12816_v22 = vld [vmem:[#allocation91_spill] sm:$0xff]  ;;  %v12818_v23 = vunpack.i.h.bf16 %v7784_v59 }
 0x1c8   : > { %12812 = vst [vmem:[#allocation84_spill] sm:$0xff] %v8338_v36  ;;  %v2390_v26 = vsel %vm2363_vm12, %v2357_v19, %v5139_v43  ;;  %v2391_v35 = vsel %vm2363_vm12, %v2358_v57, %v5140_v42  ;;  %v12819_v37 = vunpack.i.l.bf16 %v7789_v58  ;;  %v12820_v57 = vunpack.i.h.bf16 %v7789_v58 }
 0x1c9   : > { %5492 = vrot.lane.b32.xlu0 %v12814_v51, %s6360_s14  ;;  %v5218_v4 = vpop.permute.xlu1 %5217  ;;  %v12817_v51 = vunpack.i.l.bf16 %v7784_v59 }
 0x1ca   : > { %v5220_v60 = vunpack.i.h.bf16 %v5218_v4  ;;  %v5219_v6 = vunpack.i.l.bf16 %v5218_v4  ;;  %v2329_v4 = vsel %vm2297_vm10, %v2296_v9, %v12818_v23  ;;  %v2326_v19 = vsel %vm2297_vm10, %v2293_v13, %v12819_v37  ;;  %v12821_v9 = vld [vmem:[#allocation26_spill] sm:$0xff] }
 0x1cb   : > { %v8362_v8 = vpop.permute.xlu0 %5212  ;;  %5507 = vrot.lane.b32.xlu1 %v12816_v22, %s6360_s14  ;;  %v2328_v1 = vsel %vm2297_vm10, %v2295_v2, %v12817_v51  ;;  %v2327_v22 = vsel %vm2297_vm10, %v2294_v24, %v12820_v57  ;;  %v5145_v2 = vunpack.i.h.bf16 %v8142_v15  ;;  %v5144_v51 = vunpack.i.l.bf16 %v8142_v15 }
 0x1cc   : > { %12815 = vst [vmem:[#allocation85_spill] sm:$0xff] %v8362_v8  ;;  %v8373_v43 = vsel %vm2396_vm13, %v2390_v26, %v5219_v6  ;;  %v8376_v42 = vsel %vm2396_vm13, %v2391_v35, %v5220_v60  ;;  %v12822_v23 = vunpack.i.l.bf16 %v7879_v14  ;;  %v12823_v35 = vunpack.i.h.bf16 %v7879_v14  ;;  %v12848_v8 = vld [vmem:[#allocation103_spill] sm:$0xff] }
 0x1cd   : > { %5502 = vrot.lane.b32.xlu0 %v12821_v9, %s6360_s14  ;;  %v5228_v6 = vpop.permute.xlu1 %5227  ;;  %v12824_v24 = vunpack.i.l.bf16 %v7893_v3  ;;  %v12825_v15 = vunpack.i.h.bf16 %v7893_v3  ;;  %v6246_v3 = vld [vmem:[%s6420_s25 + $0x8] sm:$0xff]  ;;  %v4485_v39 = vunpack.i.h.bf16 %v12848_v8 }
 0x1ce   : > { %v2361_v60 = vsel %vm2330_vm11, %v2328_v1, %v12822_v23  ;;  %v2362_v13 = vsel %vm2330_vm11, %v2329_v4, %v12823_v35  ;;  %v5230_v26 = vunpack.i.h.bf16 %v5228_v6  ;;  %v5229_v37 = vunpack.i.l.bf16 %v5228_v6  ;;  %v12826_v1 = vld [vmem:[#allocation29_spill] sm:$0xff] }
 0x1cf   : > { %v2359_v57 = vsel %vm2330_vm11, %v2326_v19, %v12824_v24  ;;  %v2360_v59 = vsel %vm2330_vm11, %v2327_v22, %v12825_v15  ;;  %v2394_v9 = vsel %vm2363_vm12, %v2361_v60, %v5149_v12  ;;  %v2395_v52 = vsel %vm2363_vm12, %v2362_v13, %v5150_v11  ;;  %v5223_v46 = vpop.permute.xlu0 %5222  ;;  %5517 = vrot.lane.b32.xlu1 %v12826_v1, %s6360_s14  ;;  %v12827_v12 = vld [vmem:[#allocation93_spill] sm:$0xff]  ;;  %v12834_v15 = vld [vmem:[#allocation94_spill] sm:$0xff] }
 0x1d0   : > { %v8405_v4 = vsel %vm2396_vm13, %v2394_v9, %v5229_v37  ;;  %v8408_v6 = vsel %vm2396_vm13, %v2395_v52, %v5230_v26  ;;  %v5225_v23 = vunpack.i.h.bf16 %v5223_v46  ;;  %v5224_v19 = vunpack.i.l.bf16 %v5223_v46  ;;  %v12830_v46 = vld [vmem:[#allocation95_spill] sm:$0xff]  ;;  %v12832_v37 = vld [vmem:[#allocation97_spill] sm:$0xff] }
 0x1d1   : > { %v2392_v35 = vsel %vm2363_vm12, %v2359_v57, %v5144_v51  ;;  %v2393_v22 = vsel %vm2363_vm12, %v2360_v59, %v5145_v2  ;;  %5512 = vrot.lane.b32.xlu0 %v12827_v12, %s6360_s14  ;;  %v8414_v11 = vpop.permute.xlu1 %5237  ;;  %v1902_v51 = vsel %vm818_vm3, %v1900_v48, %v1901_v10  ;;  %v1904_v59 = vsel %vm818_vm3, %v1901_v10, %v1903_v41  ;;  %v12831_v2 = vld [vmem:[#allocation92_spill] sm:$0xff]  ;;  %v12836_v48 = vld [vmem:[#allocation99_spill] sm:$0xff] }
 0x1d2   : > { %12828 = vst [vmem:[#allocation86_spill] sm:$0xff] %v8414_v11  ;;  %v8417_v60 = vsel %vm2396_vm13, %v2392_v35, %v5224_v19  ;;  %v8420_v13 = vsel %vm2396_vm13, %v2393_v22, %v5225_v23  ;;  %v4445_v26 = vunpack.i.h.bf16 %v12831_v2  ;;  %v4444_v57 = vunpack.i.l.bf16 %v12831_v2  ;;  %v12837_v41 = vld [vmem:[#allocation96_spill] sm:$0xff]  ;;  %v6244_v22 = vld [vmem:[%s6420_s25 + $0x38] sm:$0xff] }
 0x1d3   : > { %v8422_v52 = vpop.permute.xlu0 %5232  ;;  %5527 = vrot.lane.b32.xlu1 %v12830_v46, %s6360_s14  ;;  %v4435_v9 = vunpack.i.h.bf16 %v12834_v15  ;;  %v4434_v1 = vunpack.i.l.bf16 %v12834_v15  ;;  %v5546_v10 = vpack.i.bf16 %v1904_v59, %v1902_v51  ;;  %v4450_v19 = vunpack.i.h.bf16 %v12837_v41  ;;  %v12838_v46 = vld [vmem:[#allocation98_spill] sm:$0xff]  ;;  %v12839_v15 = vld [vmem:[#allocation100_spill] sm:$0xff]  ;;  %v6245_v51 = vld [vmem:[%s6420_s25 + $0x30] sm:$0xff] }
 0x1d4   : > { %12829 = vst [vmem:[#allocation87_spill] sm:$0xff] %v8422_v52  ;;  %v4449_v35 = vunpack.i.l.bf16 %v12837_v41  ;;  %v8444_v12 = vsel %vm2099_vm4, %v6244_v22, %v4445_v26  ;;  %v4440_v2 = vunpack.i.h.bf16 %v12838_v46  ;;  %v8452_v59 = vsel %vm2099_vm4, %v6245_v51, %v4444_v57  ;;  %v12840_v41 = vld [vmem:[#allocation101_spill] sm:$0xff]  ;;  %v8467_v57 = vld [vmem:[%s6420_s25 + $0x60] sm:$0xff]  ;;  %v8470_v51 = vld [vmem:[%s6420_s25 + $0x68] sm:$0xff] }
 0x1d5   : > { %5522 = vrot.lane.b32.xlu0 %v12832_v37, %s6360_s14  ;;  %v8431_v24 = vpop.permute.xlu1 %5247  ;;  %v4439_v37 = vunpack.i.l.bf16 %v12838_v46  ;;  %v4455_v14 = vunpack.i.h.bf16 %v12840_v41  ;;  %v8457_v58 = vsel %vm2099_vm4, %v6246_v3, %v4435_v9  ;;  %v6247_v46 = vld [vmem:[%s6420_s25] sm:$0xff]  ;;  %v8476_v3 = vsel %vm2099_vm4, %v6250_v40, %v4450_v19  ;;  %v6251_v9 = vld [vmem:[%s6420_s25 + $0x48] sm:$0xff]  ;;  %v12847_v52 = vld [vmem:[#allocation102_spill] sm:$0xff] }
 0x1d6   : > { %12833 = vst [vmem:[#allocation88_spill] sm:$0xff] %v8431_v24  ;;  %v8492_v55 = vsel %vm2099_vm4, %v6252_v62, %v4440_v2  ;;  %v4489_v11 = vunpack.i.l.bf16 %v12847_v52  ;;  %v8606_v5 = vsel %vm2099_vm4, %v6266_v30, %v4485_v39  ;;  %vm2810_vm3 = vcmask 1040384  }
 0x1d7   : > { %v8436_v23 = vpop.permute.xlu0 %5242  ;;  %5537 = vrot.lane.b32.xlu1 %v12836_v48, %s6360_s14  ;;  %v8496_v19 = vsel %vm2099_vm4, %v6253_v27, %v4439_v37  ;;  %v12844_v27 = vld [vmem:[#allocation5_spill] sm:$0xff] }
 0x1d8   : > { %12835 = vst [vmem:[#allocation89_spill] sm:$0xff] %v8436_v23  ;;  %v4475_v37 = vunpack.i.h.bf16 %v12844_v27  ;;  %v4474_v24 = vunpack.i.l.bf16 %v12844_v27 }
 0x1d9   : > { %5532 = vrot.lane.b32.xlu0 %v12839_v15, %s6360_s14  ;;  %v5258_v48 = vpop.permute.xlu1 %5257  ;;  %v8461_v15 = vsel %vm2099_vm4, %v6247_v46, %v4434_v1  ;;  %v8480_v1 = vsel %vm2099_vm4, %v6251_v9, %v4449_v35  ;;  %v4454_v35 = vunpack.i.l.bf16 %v12840_v41 }
 0x1da   : > { %v5260_v26 = vunpack.i.h.bf16 %v5258_v48  ;;  %v5259_v22 = vunpack.i.l.bf16 %v5258_v48  ;;  %v5556_v48 = vpack.i.bf16 %v8470_v51, %v8467_v57 }
 0x1db   : > { %v8463_v63 = vpop.permute.xlu0 %5252  ;;  %5547 = vrot.lane.b32.xlu1 %v5546_v10, %s6360_s14 }
 0x1dc   : > { %12841 = vst [vmem:[#allocation90_spill] sm:$0xff] %v8463_v63  ;;  %v8484_v46 = vsel %vm2429_vm14, %v8240_v49, %v5259_v22  ;;  %v8488_v10 = vsel %vm2429_vm14, %v8243_v38, %v5260_v26  ;;  %v5551_v22 = vpack.i.bf16 %v6250_v40, %v6251_v9  ;;  %v8503_v38 = vsel %vm2099_vm4, %v8470_v51, %v4455_v14  ;;  %v12843_v26 = vld [vmem:[#allocation4_spill] sm:$0xff]  ;;  %v8514_v14 = vld [vmem:[%s6420_s25 + $0x98] sm:$0xff] }
 0x1dd   : > { %5542 = vrot.lane.b32.xlu0 %v12842_v50, %s6360_s14  ;;  %v5268_v49 = vpop.permute.xlu1 %5267  ;;  %v4480_v62 = vunpack.i.h.bf16 %v12843_v26  ;;  %v4479_v23 = vunpack.i.l.bf16 %v12843_v26  ;;  %v8511_v50 = vld [vmem:[%s6420_s25 + $0x90] sm:$0xff]  ;;  %12846 = vst [vmem:[#allocation26_spill] sm:$0xff] %v8514_v14 }
 0x1de   : > { %v5270_v2 = vunpack.i.h.bf16 %v5268_v49  ;;  %v5269_v63 = vunpack.i.l.bf16 %v5268_v49  ;;  %12845 = vst [vmem:[#allocation91_spill] sm:$0xff] %v8511_v50  ;;  %v5566_v40 = vpack.i.bf16 %v8514_v14, %v8511_v50 }
 0x1df   : > { %v5263_v41 = vpop.permute.xlu0 %5262  ;;  %5557 = vrot.lane.b32.xlu1 %v5556_v48, %s6361_s17  ;;  %v4490_v48 = vunpack.i.h.bf16 %v12847_v52 }
 0x1e0   : > { %v8520_v9 = vsel %vm2429_vm14, %v8272_v31, %v5269_v63  ;;  %v8524_v49 = vsel %vm2429_vm14, %v8275_v56, %v5270_v2  ;;  %v5265_v26 = vunpack.i.h.bf16 %v5263_v41  ;;  %v5264_v27 = vunpack.i.l.bf16 %v5263_v41  ;;  %v8533_v31 = vld [vmem:[%s6420_s25 + $0x78] sm:$0xff]  ;;  %v8536_v56 = vld [vmem:[%s6420_s25 + $0x80] sm:$0xff]  ;;  %v12852_v41 = vld [vmem:[#allocation104_spill] sm:$0xff] }
 0x1e1   : > { %5552 = vrot.lane.b32.xlu0 %v5551_v22, %s6361_s17  ;;  %v8530_v36 = vpop.permute.xlu1 %5277  ;;  %12850 = vst [vmem:[#allocation93_spill] sm:$0xff] %v8533_v31  ;;  %12851 = vst [vmem:[#allocation95_spill] sm:$0xff] %v8536_v56  ;;  %v5561_v63 = vpack.i.bf16 %v8536_v56, %v8533_v31  ;;  %v4484_v2 = vunpack.i.l.bf16 %v12848_v8  ;;  %v4495_v34 = vunpack.i.h.bf16 %v12852_v41  ;;  %v8559_v8 = vsel %vm2099_vm4, %v8555_v21, %v4480_v62 }
 0x1e2   : > { %12849 = vst [vmem:[#allocation29_spill] sm:$0xff] %v8530_v36  ;;  %v8544_v52 = vsel %vm2429_vm14, %v8286_v61, %v5264_v27  ;;  %v8548_v22 = vsel %vm2429_vm14, %v8289_v32, %v5265_v26  ;;  %v8552_v36 = vsel %vm2099_vm4, %v8467_v57, %v4454_v35  ;;  %v8563_v61 = vsel %vm2099_vm4, %v6259_v44, %v4479_v23  ;;  %v6260_v32 = vld [vmem:[%s6420_s25 + $0xc0] sm:$0xff]  ;;  %v6261_v35 = vld [vmem:[%s6420_s25 + $0xc8] sm:$0xff] }
 0x1e3   : > { %v8565_v27 = vpop.permute.xlu0 %5272  ;;  %5567 = vrot.lane.b32.xlu1 %v5566_v40, %s6361_s17  ;;  %v5576_v26 = vpack.i.bf16 %v6261_v35, %v6260_v32  ;;  %v8571_v54 = vsel %vm2099_vm4, %v6261_v35, %v4475_v37  ;;  %v8574_v62 = vsel %vm2099_vm4, %v6260_v32, %v4474_v24  ;;  %v4494_v23 = vunpack.i.l.bf16 %v12852_v41  ;;  %v8597_v32 = vld [vmem:[%s6420_s25 + $0xa8] sm:$0xff]  ;;  %v8600_v35 = vld [vmem:[%s6420_s25 + $0xb0] sm:$0xff] }
 0x1e4   : > { %12853 = vst [vmem:[#allocation92_spill] sm:$0xff] %v8565_v27  ;;  %v4519_v27 = vunpack.i.l.bf16 %v12854_v47  ;;  %v8583_v40 = vsel %vm2099_vm4, %v8579_v28, %v4490_v48  ;;  %v8590_v37 = vsel %vm2099_vm4, %v8586_v16, %v4489_v11  ;;  %v4520_v24 = vunpack.i.h.bf16 %v12854_v47  ;;  %12856 = vst [vmem:[#allocation94_spill] sm:$0xff] %v8597_v32  ;;  %v6267_v11 = vld [vmem:[%s6420_s25 + $0xf0] sm:$0xff]  ;;  %v8613_v47 = vld [vmem:[%s6420_s25 + $0x128] sm:$0xff] }
 0x1e5   : > { %5562 = vrot.lane.b32.xlu0 %v5561_v63, %s6361_s17  ;;  %v8594_v41 = vpop.permute.xlu1 %5287  ;;  %12857 = vst [vmem:[#allocation99_spill] sm:$0xff] %v8600_v35  ;;  %v5571_v48 = vpack.i.bf16 %v8600_v35, %v8597_v32  ;;  %v8610_v53 = vsel %vm2099_vm4, %v6267_v11, %v4484_v2  ;;  %v8617_v63 = vsel %vm2099_vm4, %v8613_v47, %v4495_v34 }
 0x1e6   : > { %12855 = vst [vmem:[#allocation97_spill] sm:$0xff] %v8594_v41  ;;  %v12858_v41 = vld [vmem:[#allocation107_spill] sm:$0xff]  ;;  %v5586_v2 = vpack.i.bf16 %v6266_v30, %v6267_v11  ;;  %v8631_v35 = vsel %vm2099_vm4, %v8627_v33, %v4494_v23  ;;  %v8635_v34 = vsel %vm2132_vm5, %v8496_v19, %v4519_v27  ;;  %v8641_v25 = vsel %vm2132_vm5, %v8492_v55, %v4520_v24  ;;  %v12863_v27 = vld [vmem:[#allocation6_spill] sm:$0xff] }
 0x1e7   : > { %v4514_v17 = vunpack.i.l.bf16 %v12858_v41  ;;  %v4515_v18 = vunpack.i.h.bf16 %v12858_v41  ;;  %v8623_v39 = vpop.permute.xlu0 %5282  ;;  %5577 = vrot.lane.b32.xlu1 %v5576_v26, %s6361_s17  ;;  %v12861_v41 = vld [vmem:[#allocation109_spill] sm:$0xff]  ;;  %v12862_v26 = vld [vmem:[#allocation111_spill] sm:$0xff]  ;;  %v4560_v7 = vunpack.i.h.bf16 %v12863_v27  ;;  %v8658_v24 = vsel %vm2132_vm5, %v8476_v3, %v4530_v29 }
 0x1e8   : > { %12860 = vst [vmem:[#allocation96_spill] sm:$0xff] %v8623_v39  ;;  %v4525_v32 = vunpack.i.h.bf16 %v12861_v41  ;;  %v4524_v14 = vunpack.i.l.bf16 %v12861_v41  ;;  %v4535_v30 = vunpack.i.h.bf16 %v12862_v26  ;;  %v4534_v11 = vunpack.i.l.bf16 %v12862_v26  ;;  %v12865_v3 = vld [vmem:[#allocation13_spill] sm:$0xff] }
 0x1e9   : > { %5572 = vrot.lane.b32.xlu0 %v5571_v48, %s6361_s17  ;;  %v5298_v23 = vpop.permute.xlu1 %5297  ;;  %v5581_v39 = vpack.i.bf16 %v8555_v21, %v6259_v44  ;;  %v8649_v19 = vsel %vm2132_vm5, %v8461_v15, %v4514_v17  ;;  %v8654_v55 = vsel %vm2132_vm5, %v8457_v58, %v4515_v18  ;;  %v8662_v48 = vsel %vm2132_vm5, %v8480_v1, %v4529_v20 }
 0x1ea   : > { %v5300_v41 = vunpack.i.h.bf16 %v5298_v23  ;;  %v5299_v50 = vunpack.i.l.bf16 %v5298_v23  ;;  %v5596_v17 = vpack.i.bf16 %v8613_v47, %v8627_v33  ;;  %v8671_v21 = vsel %vm2132_vm5, %v8444_v12, %v4525_v32  ;;  %v12869_v23 = vld [vmem:[#allocation9_spill] sm:$0xff] }
 0x1eb   : > { %v8664_v44 = vpop.permute.xlu0 %5292  ;;  %5587 = vrot.lane.b32.xlu1 %v5586_v2, %s6361_s17  ;;  %v8675_v58 = vsel %vm2132_vm5, %v8452_v59, %v4524_v14  ;;  %v8687_v18 = vsel %vm2132_vm5, %v8552_v36, %v4534_v11  ;;  %v8691_v12 = vsel %vm2132_vm5, %v8503_v38, %v4535_v30  ;;  %v4559_v59 = vunpack.i.l.bf16 %v12863_v27  ;;  %v12866_v38 = vld [vmem:[#allocation17_spill] sm:$0xff] }
 0x1ec   : > { %12864 = vst [vmem:[#allocation98_spill] sm:$0xff] %v8664_v44  ;;  %v8679_v29 = vsel %vm2429_vm14, %v8373_v43, %v5299_v50  ;;  %v8683_v20 = vsel %vm2429_vm14, %v8376_v42, %v5300_v41  ;;  %v5591_v15 = vpack.i.bf16 %v8579_v28, %v8586_v16  ;;  %v8699_v42 = vsel %vm2132_vm5, %v8559_v8, %v4560_v7  ;;  %v8707_v16 = vld [vmem:[%s6420_s25 + $0x150] sm:$0xff]  ;;  %v8710_v28 = vld [vmem:[%s6420_s25 + $0x158] sm:$0xff] }
 0x1ed   : > { %5582 = vrot.lane.b32.xlu0 %v5581_v39, %s6361_s17  ;;  %v5308_v43 = vpop.permute.xlu1 %5307  ;;  %v4555_v36 = vunpack.i.h.bf16 %v12865_v3  ;;  %v4554_v14 = vunpack.i.l.bf16 %v12865_v3  ;;  %v4570_v32 = vunpack.i.h.bf16 %v12866_v38  ;;  %v4569_v2 = vunpack.i.l.bf16 %v12866_v38  ;;  %12867 = vst [vmem:[#allocation100_spill] sm:$0xff] %v8707_v16  ;;  %12868 = vst [vmem:[#allocation101_spill] sm:$0xff] %v8710_v28  ;;  %v12874_v38 = vld [vmem:[#allocation34_spill] sm:$0xff] }
 0x1ee   : > { %v5310_v1 = vunpack.i.h.bf16 %v5308_v43  ;;  %v5309_v50 = vunpack.i.l.bf16 %v5308_v43  ;;  %v5606_v7 = vpack.i.bf16 %v8710_v28, %v8707_v16  ;;  %v4565_v27 = vunpack.i.h.bf16 %v12869_v23 }
 0x1ef   : > { %v5303_v39 = vpop.permute.xlu0 %5302  ;;  %5597 = vrot.lane.b32.xlu1 %v5596_v17, %s6361_s17  ;;  %v4564_v41 = vunpack.i.l.bf16 %v12869_v23  ;;  %v12870_v17 = vld [vmem:[#allocation15_spill] sm:$0xff]  ;;  %v8750_v44 = vsel %vm2132_vm5, %v8574_v62, %v4554_v14  ;;  %v8770_v62 = vsel %vm2132_vm5, %v8583_v40, %v4570_v32  ;;  %v8796_v32 = vld [vmem:[%s6420_s25 + $0x168] sm:$0xff] }
 0x1f0   : > { %v8716_v8 = vsel %vm2429_vm14, %v8405_v4, %v5309_v50  ;;  %v8720_v26 = vsel %vm2429_vm14, %v8408_v6, %v5310_v1  ;;  %v5305_v30 = vunpack.i.h.bf16 %v5303_v39  ;;  %v5304_v11 = vunpack.i.l.bf16 %v5303_v39  ;;  %v8729_v4 = vld [vmem:[%s6420_s25 + $0x138] sm:$0xff]  ;;  %v8732_v50 = vld [vmem:[%s6420_s25 + $0x140] sm:$0xff]  ;;  %12880 = vst [vmem:[#allocation107_spill] sm:$0xff] %v8796_v32 }
 0x1f1   : > { %v4575_v43 = vunpack.i.h.bf16 %v12870_v17  ;;  %5592 = vrot.lane.b32.xlu0 %v5591_v15, %s6361_s17  ;;  %v8726_v3 = vpop.permute.xlu1 %5317  ;;  %12872 = vst [vmem:[#allocation4_spill] sm:$0xff] %v8729_v4  ;;  %12873 = vst [vmem:[#allocation5_spill] sm:$0xff] %v8732_v50  ;;  %v5601_v6 = vpack.i.bf16 %v8732_v50, %v8729_v4  ;;  %v4574_v1 = vunpack.i.l.bf16 %v12870_v17  ;;  %v4599_v39 = vunpack.i.l.bf16 %v12874_v38 }
 0x1f2   : > { %12871 = vst [vmem:[#allocation150_spill] sm:$0xff] %v8726_v3  ;;  %v8740_v23 = vsel %vm2429_vm14, %v8417_v60, %v5304_v11  ;;  %v8744_v15 = vsel %vm2429_vm14, %v8420_v13, %v5305_v30  ;;  %v2151_v3 = vsel %vm2132_vm5, %v8563_v61, %v4559_v59  ;;  %v4600_v17 = vunpack.i.h.bf16 %v12874_v38  ;;  %v8757_v60 = vld [vmem:[%s6420_s25 + $0x180] sm:$0xff]  ;;  %v8760_v11 = vld [vmem:[%s6420_s25 + $0x188] sm:$0xff]  ;;  %v8775_v30 = vld [vmem:[%s6420_s25 + $0x1b0] sm:$0xff] }
 0x1f3   : > { %v8753_v16 = vpop.permute.xlu0 %5312  ;;  %5607 = vrot.lane.b32.xlu1 %v5606_v7, %s6361_s17  ;;  %12876 = vst [vmem:[#allocation103_spill] sm:$0xff] %v8757_v60  ;;  %12877 = vst [vmem:[#allocation104_spill] sm:$0xff] %v8760_v11  ;;  %v5616_v13 = vpack.i.bf16 %v8760_v11, %v8757_v60  ;;  %v8766_v61 = vsel %vm2132_vm5, %v8571_v54, %v4555_v36  ;;  %v12878_v59 = vld [vmem:[#allocation115_spill] sm:$0xff]  ;;  %v8778_v38 = vld [vmem:[%s6420_s25 + $0x1b8] sm:$0xff]  ;;  %v8786_v54 = vsel %vm2132_vm5, %v8610_v53, %v4564_v41 }
 0x1f4   : > { %12875 = vst [vmem:[#allocation102_spill] sm:$0xff] %v8753_v16  ;;  %v4595_v14 = vunpack.i.h.bf16 %v12878_v59  ;;  %v4594_v7 = vunpack.i.l.bf16 %v12878_v59  ;;  %v8782_v16 = vsel %vm2132_vm5, %v8590_v37, %v4569_v2  ;;  %v8790_v40 = vsel %vm2132_vm5, %v8606_v5, %v4565_v27  ;;  %v8799_v59 = vld [vmem:[%s6420_s25 + $0x170] sm:$0xff]  ;;  %v12882_v27 = vld [vmem:[#allocation42_spill] sm:$0xff] }
 0x1f5   : > { %5602 = vrot.lane.b32.xlu0 %v5601_v6, %s6361_s17  ;;  %v8793_v36 = vpop.permute.xlu1 %5327  ;;  %12881 = vst [vmem:[#allocation108_spill] sm:$0xff] %v8799_v59  ;;  %v5611_v37 = vpack.i.bf16 %v8799_v59, %v8796_v32  ;;  %v8805_v2 = vsel %vm2132_vm5, %v8631_v35, %v4574_v1  ;;  %v8809_v53 = vsel %vm2132_vm5, %v8617_v63, %v4575_v43  ;;  %v4609_v41 = vunpack.i.l.bf16 %v12882_v27  ;;  %v12883_v35 = vld [vmem:[#allocation117_spill] sm:$0xff]  ;;  %v6278_v32 = vld [vmem:[%s6420_s25 + $0x198] sm:$0xff] }
 0x1f6   : > { %12879 = vst [vmem:[#allocation106_spill] sm:$0xff] %v8793_v36  ;;  %v8813_v5 = vsel %vm2165_vm6, %v8635_v34, %v4599_v39  ;;  %v8818_v6 = vsel %vm2165_vm6, %v8641_v25, %v4600_v17  ;;  %v4610_v36 = vunpack.i.h.bf16 %v12882_v27  ;;  %v4604_v1 = vunpack.i.l.bf16 %v12883_v35  ;;  %v12885_v39 = vld [vmem:[#allocation47_spill] sm:$0xff] }
 0x1f7   : > { %v8822_v11 = vpop.permute.xlu0 %5322  ;;  %5617 = vrot.lane.b32.xlu1 %v5616_v13, %s6361_s17  ;;  %v5626_v63 = vpack.i.bf16 %v8778_v38, %v8775_v30  ;;  %v8829_v34 = vsel %vm2165_vm6, %v8649_v19, %v4594_v7  ;;  %v8833_v25 = vsel %vm2165_vm6, %v8654_v55, %v4595_v14  ;;  %v4605_v43 = vunpack.i.h.bf16 %v12883_v35  ;;  %v6279_v19 = vld [vmem:[%s6420_s25 + $0x1a0] sm:$0xff] }
 0x1f8   : > { %12884 = vst [vmem:[#allocation109_spill] sm:$0xff] %v8822_v11  ;;  %v4614_v17 = vunpack.i.l.bf16 %v12885_v39  ;;  %v4615_v27 = vunpack.i.h.bf16 %v12885_v39  ;;  %v12886_v11 = vld [vmem:[#allocation56_spill] sm:$0xff]  ;;  %v5621_v7 = vpack.i.bf16 %v6279_v19, %v6278_v32  ;;  %v8845_v55 = vsel %vm2165_vm6, %v8662_v48, %v4609_v41  ;;  %v12888_v14 = vld [vmem:[#allocation51_spill] sm:$0xff]  ;;  %v12891_v32 = vld [vmem:[#allocation10_spill] sm:$0xff] }
 0x1f9   : > { %v4640_v60 = vunpack.i.h.bf16 %v12886_v11  ;;  %v4639_v13 = vunpack.i.l.bf16 %v12886_v11  ;;  %5612 = vrot.lane.b32.xlu0 %v5611_v37, %s6361_s17  ;;  %v5338_v59 = vpop.permute.xlu1 %5337  ;;  %12887 = vst [vmem:[#allocation111_spill] sm:$0xff] %v8845_v55  ;;  %v4634_v35 = vunpack.i.l.bf16 %v12888_v14  ;;  %v8850_v39 = vsel %vm2165_vm6, %v8658_v24, %v4610_v36  ;;  %v12892_v48 = vld [vmem:[#allocation19_spill] sm:$0xff] }
 0x1fa   : > { %v5340_v28 = vunpack.i.h.bf16 %v5338_v59  ;;  %v5339_v56 = vunpack.i.l.bf16 %v5338_v59  ;;  %12889 = vst [vmem:[#allocation6_spill] sm:$0xff] %v8850_v39  ;;  %v8854_v11 = vsel %vm2165_vm6, %v8675_v58, %v4604_v1  ;;  %v5636_v41 = vpack.i.bf16 %v12892_v48, %v12891_v32  ;;  %v12904_v48 = vld [vmem:[#allocation31_spill] sm:$0xff]  ;;  %v12905_v32 = vld [vmem:[#allocation58_spill] sm:$0xff] }
 0x1fb   : > { %v8856_v37 = vpop.permute.xlu0 %5332  ;;  %5627 = vrot.lane.b32.xlu1 %v5626_v63, %s6361_s17  ;;  %v8863_v19 = vsel %vm2165_vm6, %v8671_v21, %v4605_v43  ;;  %v8867_v24 = vsel %vm2165_vm6, %v8687_v18, %v4614_v17  ;;  %v8879_v59 = vsel %vm2165_vm6, %v8691_v12, %v4615_v27  ;;  %v8882_v1 = vsel %vm2165_vm6, %v2151_v3, %v4639_v13  ;;  %v12899_v63 = vld [vmem:[#allocation12_spill] sm:$0xff]  ;;  %v12901_v17 = vld [vmem:[#allocation59_spill] sm:$0xff] }
 0x1fc   : > { %12890 = vst [vmem:[#allocation13_spill] sm:$0xff] %v8856_v37  ;;  %12893 = vst [vmem:[#allocation17_spill] sm:$0xff] %v8867_v24  ;;  %v8871_v58 = vsel %vm12317_vm15, %v8484_v46, %v5339_v56  ;;  %v8875_v36 = vsel %vm12317_vm15, %v8488_v10, %v5340_v28  ;;  %v8886_v21 = vsel %vm2165_vm6, %v8699_v42, %v4640_v60  ;;  %v12897_v46 = vld [vmem:[#allocation3_spill] sm:$0xff]  ;;  %v4635_v10 = vunpack.i.h.bf16 %v12888_v14  ;;  %v12902_v60 = vld [vmem:[#allocation54_spill] sm:$0xff] }
 0x1fd   : > { %12894 = vst [vmem:[#allocation9_spill] sm:$0xff] %v8879_v59  ;;  %12895 = vst [vmem:[#allocation15_spill] sm:$0xff] %v8882_v1  ;;  %5622 = vrot.lane.b32.xlu0 %v5621_v7, %s6361_s17  ;;  %v5348_v18 = vpop.permute.xlu1 %5347  ;;  %v12898_v56 = vrot.slane %v12897_v46, 1  ;;  %v8895_v12 = vsel %vm2165_vm6, %v8750_v44, %v4634_v35  ;;  %v4650_v27 = vunpack.i.h.bf16 %v12901_v17  ;;  %v4649_v42 = vunpack.i.l.bf16 %v12901_v17  ;;  %v12903_v37 = vld [vmem:[#allocation21_spill] sm:$0xff] }
 0x1fe   : > { %12896 = vst [vmem:[#allocation34_spill] sm:$0xff] %v8886_v21  ;;  %12900 = vst [vmem:[#allocation115_spill] sm:$0xff] %v8895_v12  ;;  %v5350_v28 = vunpack.i.h.bf16 %v5348_v18  ;;  %v5349_v3 = vunpack.i.l.bf16 %v5348_v18  ;;  %v4644_v13 = vunpack.i.l.bf16 %v12902_v60  ;;  %v4645_v17 = vunpack.i.h.bf16 %v12902_v60 }
 0x1ff   : > { %v5631_v43 = vpack.i.bf16 %v12899_v63, %v12898_v56  ;;  %v5343_v7 = vpop.permute.xlu0 %5342  ;;  %5637 = vrot.lane.b32.xlu1 %v5636_v41, %s6347_s26  ;;  %v5646_v56 = vpack.i.bf16 %v12904_v48, %v12903_v37  ;;  %v4655_v31 = vunpack.i.h.bf16 %v12905_v32  ;;  %v4654_v4 = vunpack.i.l.bf16 %v12905_v32  ;;  %v12907_v48 = vld [vmem:[#allocation18_spill] sm:$0xff]  ;;  %v12908_v37 = vld [vmem:[#allocation25_spill] sm:$0xff] }
 0x200   : > { %v8905_v14 = vsel %vm12317_vm15, %v8520_v9, %v5349_v3  ;;  %v8909_v44 = vsel %vm12317_vm15, %v8524_v49, %v5350_v28  ;;  %v5345_v35 = vunpack.i.h.bf16 %v5343_v7  ;;  %v5344_v18 = vunpack.i.l.bf16 %v5343_v7  ;;  %v12909_v3 = vld [vmem:[#allocation63_spill] sm:$0xff] }
 0x201   : > { %5632 = vrot.lane.b32.xlu0 %v5631_v43, %s6347_s26  ;;  %v8915_v41 = vpop.permute.xlu1 %5357  ;;  %v5641_v9 = vpack.i.bf16 %v12908_v37, %v12907_v48  ;;  %v4680_v50 = vunpack.i.h.bf16 %v12909_v3  ;;  %v4679_v49 = vunpack.i.l.bf16 %v12909_v3  ;;  %v8931_v32 = vsel %vm2165_vm6, %v8766_v61, %v4635_v10  ;;  %v12917_v61 = vld [vmem:[#allocation119_spill] sm:$0xff] }
 0x202   : > { %12906 = vst [vmem:[#allocation42_spill] sm:$0xff] %v8915_v41  ;;  %v8923_v28 = vsel %vm12317_vm15, %v8544_v52, %v5344_v18  ;;  %v8927_v60 = vsel %vm12317_vm15, %v8548_v22, %v5345_v35  ;;  %12911 = vst [vmem:[#allocation47_spill] sm:$0xff] %v8931_v32  ;;  %v8935_v43 = vsel %vm2165_vm6, %v8782_v16, %v4649_v42  ;;  %v12914_v52 = vld [vmem:[#allocation37_spill] sm:$0xff]  ;;  %v12915_v18 = vld [vmem:[#allocation46_spill] sm:$0xff]  ;;  %v4674_v10 = vunpack.i.l.bf16 %v12917_v61 }
 0x203   : > { %12910 = vst [vmem:[#allocation117_spill] sm:$0xff] %v8927_v60  ;;  %12912 = vst [vmem:[#allocation56_spill] sm:$0xff] %v8935_v43  ;;  %v8939_v7 = vsel %vm2165_vm6, %v8770_v62, %v4650_v27  ;;  %v8941_v3 = vpop.permute.xlu0 %5352  ;;  %5647 = vrot.lane.b32.xlu1 %v5646_v56, %s6347_s26  ;;  %v5656_v22 = vpack.i.bf16 %v12915_v18, %v12914_v52  ;;  %v8948_v35 = vsel %vm2165_vm6, %v8786_v54, %v4644_v13  ;;  %v12919_v56 = vld [vmem:[#allocation66_spill] sm:$0xff]  ;;  %v12921_v54 = vld [vmem:[#allocation28_spill] sm:$0xff] }
 0x204   : > { %12913 = vst [vmem:[#allocation51_spill] sm:$0xff] %v8941_v3  ;;  %12916 = vst [vmem:[#allocation3_spill] sm:$0xff] %v8948_v35  ;;  %v2595_v16 = vrot.slane %v8775_v30, 1  ;;  %v2596_v42 = vrot.slane %v8778_v38, 1  ;;  %v8955_v62 = vsel %vm2165_vm6, %v8790_v40, %v4645_v17  ;;  %v4675_v27 = vunpack.i.h.bf16 %v12917_v61  ;;  %v12922_v13 = vld [vmem:[#allocation39_spill] sm:$0xff]  ;;  %v12925_v61 = vld [vmem:[#allocation120_spill] sm:$0xff] }
 0x205   : > { %12918 = vst [vmem:[#allocation12_spill] sm:$0xff] %v8955_v62  ;;  %v4689_v3 = vunpack.i.l.bf16 %v12919_v56  ;;  %5642 = vrot.lane.b32.xlu0 %v5641_v9, %s6347_s26  ;;  %v8960_v41 = vpop.permute.xlu1 %5367  ;;  %v5651_v37 = vpack.i.bf16 %v12922_v13, %v12921_v54  ;;  %v8966_v30 = vsel %vm2165_vm6, %v8805_v2, %v4654_v4  ;;  %v8970_v38 = vsel %vm2165_vm6, %v8809_v53, %v4655_v31  ;;  %v12927_v31 = vld [vmem:[#allocation116_spill] sm:$0xff]  ;;  %v12928_v2 = vld [vmem:[#allocation43_spill] sm:$0xff] }
 0x206   : > { %12920 = vst [vmem:[#allocation59_spill] sm:$0xff] %v8960_v41  ;;  %12923 = vst [vmem:[#allocation54_spill] sm:$0xff] %v8966_v30  ;;  %v8974_v40 = vsel %vm2198_vm7, %v8813_v5, %v4679_v49  ;;  %v8978_v17 = vsel %vm2198_vm7, %v8818_v6, %v4680_v50  ;;  %v4690_v9 = vunpack.i.h.bf16 %v12919_v56  ;;  %v4685_v41 = vunpack.i.h.bf16 %v12925_v61  ;;  %v235_v48 = vld [vmem:[%s6420_s25 + $0x1c0] sm:$0xf]  ;;  %v12929_v50 = vld [vmem:[#allocation122_spill] sm:$0xff] }
 0x207   : > { %12924 = vst [vmem:[#allocation58_spill] sm:$0xff] %v8970_v38  ;;  %v4684_v54 = vunpack.i.l.bf16 %v12925_v61  ;;  %v8983_v4 = vpop.permute.xlu0 %5362  ;;  %5657 = vrot.lane.b32.xlu1 %v5656_v22, %s6347_s26  ;;  %v5666_v53 = vpack.i.bf16 %v12928_v2, %v12927_v31  ;;  %v8991_v5 = vsel %vm2198_vm7, %v8829_v34, %v4674_v10  ;;  %v4695_v6 = vunpack.i.h.bf16 %v12929_v50  ;;  %v12931_v31 = vld [vmem:[#allocation30_spill] sm:$0xff]  ;;  %v12932_v10 = vld [vmem:[#allocation45_spill] sm:$0xff]  ;;  %v12933_v2 = vld [vmem:[#allocation48_spill] sm:$0xff] }
 0x208   : > { %12926 = vst [vmem:[#allocation63_spill] sm:$0xff] %v8983_v4  ;;  %v4694_v49 = vunpack.i.l.bf16 %v12929_v50  ;;  %v8996_v56 = vsel %vm287_vm0, %v2595_v16, %v2596_v42  ;;  %v9000_v61 = vsel %vm2198_vm7, %v8833_v25, %v4675_v27  ;;  %v9004_v22 = vsel %vm2198_vm7, %v8845_v55, %v4689_v3 }
 0x209   : > { %12930 = vst [vmem:[#allocation119_spill] sm:$0xff] %v8996_v56  ;;  %v4719_v4 = vunpack.i.l.bf16 %v12931_v31  ;;  %5652 = vrot.lane.b32.xlu0 %v5651_v37, %s6347_s26  ;;  %v5378_v34 = vpop.permute.xlu1 %5377  ;;  %v5661_v18 = vpack.i.bf16 %v12933_v2, %v12932_v10  ;;  %v4720_v50 = vunpack.i.h.bf16 %v12931_v31  ;;  %v9011_v60 = vrot.slane %v235_v48, 1 }
 0x20a   : > { %v5380_v16 = vunpack.i.h.bf16 %v5378_v34  ;;  %v5379_v52 = vunpack.i.l.bf16 %v5378_v34  ;;  %v9015_v25 = vsel %vm2198_vm7, %v8850_v39, %v4690_v9  ;;  %v9019_v3 = vsel %vm2198_vm7, %v8854_v11, %v4684_v54  ;;  %v12936_v54 = vld [vmem:[#allocation124_spill] sm:$0xff] }
 0x20b   : > { %12934 = vst [vmem:[#allocation66_spill] sm:$0xff] %v9011_v60  ;;  %v9023_v37 = vsel %vm2198_vm7, %v8863_v19, %v4685_v41  ;;  %v9025_v27 = vpop.permute.xlu0 %5372  ;;  %5667 = vrot.lane.b32.xlu1 %v5666_v53, %s6347_s26  ;;  %v5676_v48 = vpack.i.bf16 %v8996_v56, %v7796_v0  ;;  %v9032_v2 = vsel %vm2198_vm7, %v8867_v24, %v4694_v49  ;;  %v4715_v53 = vunpack.i.h.bf16 %v12936_v54  ;;  %v12938_v34 = vld [vmem:[#allocation72_spill] sm:$0xff]  ;;  %v12946_v24 = vld [vmem:[#allocation62_spill] sm:$0xff] }
 0x20c   : > { %12935 = vst [vmem:[#allocation39_spill] sm:$0xff] %v9025_v27  ;;  %v9036_v9 = vsel %vm2198_vm7, %v8879_v59, %v4695_v6  ;;  %v9040_v11 = vsel %vm12317_vm15, %v8679_v29, %v5379_v52  ;;  %v9044_v19 = vsel %vm12317_vm15, %v8683_v20, %v5380_v16  ;;  %v9048_v41 = vsel %vm2198_vm7, %v8882_v1, %v4719_v4  ;;  %v12940_v1 = vld [vmem:[#allocation53_spill] sm:$0xff]  ;;  %v12954_v0 = vld [vmem:[#allocation132_spill] sm:$0xff] }
 0x20d   : > { %v4714_v49 = vunpack.i.l.bf16 %v12936_v54  ;;  %5662 = vrot.lane.b32.xlu0 %v5661_v18, %s6347_s26  ;;  %v5388_v6 = vpop.permute.xlu1 %5387  ;;  %v9055_v31 = vsel %vm2198_vm7, %v8886_v21, %v4720_v50  ;;  %v9059_v20 = vsel %vm287_vm0, %v2596_v42, %v9011_v60  ;;  %v4729_v4 = vunpack.i.l.bf16 %v12938_v34 }
 0x20e   : > { %v5390_v29 = vunpack.i.h.bf16 %v5388_v6  ;;  %v5389_v52 = vunpack.i.l.bf16 %v5388_v6  ;;  %12937 = vst [vmem:[#allocation120_spill] sm:$0xff] %v9059_v20  ;;  %v12939_v54 = vrot.slane %v12897_v46, 2  ;;  %v2835_v27 = vrot.slane %v8627_v33, 7 }
 0x20f   : > { %v5383_v16 = vpop.permute.xlu0 %5382  ;;  %5677 = vrot.lane.b32.xlu1 %v5676_v48, %s6347_s26  ;;  %v9078_v48 = vsel %vm2198_vm7, %v8895_v12, %v4714_v49  ;;  %v2812_v55 = vrot.slane %v8470_v51, 7 }
 0x210   : > { %v5686_v18 = vpack.i.bf16 %v12940_v1, %v12939_v54  ;;  %v9070_v6 = vsel %vm12317_vm15, %v8716_v8, %v5389_v52  ;;  %v9074_v42 = vsel %vm12317_vm15, %v8720_v26, %v5390_v29  ;;  %v5385_v21 = vunpack.i.h.bf16 %v5383_v16  ;;  %v12942_v29 = vld [vmem:[#allocation125_spill] sm:$0xff] }
 0x211   : > { %v5384_v59 = vunpack.i.l.bf16 %v5383_v16  ;;  %v9082_v54 = vsel %vm2198_vm7, %v8931_v32, %v4715_v53  ;;  %5672 = vrot.lane.b32.xlu0 %v7817_v45, %s6347_s26  ;;  %v9086_v33 = vpop.permute.xlu1 %5397  ;;  %v5681_v8 = vpack.i.bf16 %v9011_v60, %v9059_v20  ;;  %v4730_v26 = vunpack.i.h.bf16 %v12938_v34  ;;  %v12945_v34 = vld [vmem:[#allocation55_spill] sm:$0xff] }
 0x212   : > { %12941 = vst [vmem:[#allocation116_spill] sm:$0xff] %v9086_v33  ;;  %v4724_v52 = vunpack.i.l.bf16 %v12942_v29  ;;  %v9098_v53 = vsel %vm12317_vm15, %v8744_v15, %v5385_v21  ;;  %v9102_v16 = vsel %vm2198_vm7, %v8935_v43, %v4729_v4  ;;  %v4725_v50 = vunpack.i.h.bf16 %v12942_v29  ;;  %v12943_v33 = vld [vmem:[#allocation126_spill] sm:$0xff]  ;;  %v12948_v29 = vld [vmem:[#allocation129_spill] sm:$0xff] }
 0x213   : > { %v9094_v49 = vsel %vm12317_vm15, %v8740_v23, %v5384_v59  ;;  %v4735_v32 = vunpack.i.h.bf16 %v12943_v33  ;;  %v9106_v12 = vpop.permute.xlu0 %5392  ;;  %5687 = vrot.lane.b32.xlu1 %v5686_v18, %s6348_s27  ;;  %v5696_v23 = vpack.i.bf16 %v12946_v24, %v12945_v34  ;;  %v4734_v59 = vunpack.i.l.bf16 %v12943_v33  ;;  %v12951_v24 = vld [vmem:[#allocation52_spill] sm:$0xff]  ;;  %v12952_v33 = vld [vmem:[#allocation57_spill] sm:$0xff] }
 0x214   : > { %12944 = vst [vmem:[#allocation122_spill] sm:$0xff] %v9106_v12  ;;  %v12947_v15 = vrot.slane %v8613_v47, 7  ;;  %v2811_v4 = vrot.slane %v8467_v57, 7  ;;  %v4760_v39 = vunpack.i.h.bf16 %v12948_v29  ;;  %v4759_v43 = vunpack.i.l.bf16 %v12948_v29  ;;  %v12949_v12 = vld [vmem:[#allocation130_spill] sm:$0xff]  ;;  %v12953_v29 = vld [vmem:[#allocation131_spill] sm:$0xff] }
 0x215   : > { %v4754_v20 = vunpack.i.l.bf16 %v12949_v12  ;;  %5682 = vrot.lane.b32.xlu0 %v5681_v8, %s6347_s26  ;;  %v9121_v18 = vpop.permute.xlu1 %5407  ;;  %v5691_v56 = vpack.i.bf16 %v12952_v33, %v12951_v24  ;;  %v9131_v57 = vsel %vm2198_vm7, %v8948_v35, %v4724_v52  ;;  %v4755_v51 = vunpack.i.h.bf16 %v12949_v12 }
 0x216   : > { %v2837_v21 = vsel %vm2810_vm3, %v2835_v27, %v12947_v15  ;;  %12950 = vst [vmem:[#allocation30_spill] sm:$0xff] %v9121_v18  ;;  %v9127_v15 = vsel %vm2198_vm7, %v8939_v7, %v4730_v26  ;;  %v9137_v8 = vsel %vm2198_vm7, %v8955_v62, %v4725_v50  ;;  %v4764_v45 = vunpack.i.l.bf16 %v12954_v0 }
 0x217   : > { %v9141_v34 = vpop.permute.xlu0 %5402  ;;  %5697 = vrot.lane.b32.xlu1 %v5696_v23, %s6348_s27  ;;  %v5706_v26 = vpack.i.bf16 %v2837_v21, %v2835_v27  ;;  %v9146_v52 = vsel %vm2198_vm7, %v8966_v30, %v4734_v59  ;;  %v9150_v12 = vsel %vm2198_vm7, %v8970_v38, %v4735_v32  ;;  %v4765_v50 = vunpack.i.h.bf16 %v12954_v0  ;;  %v12956_v59 = vld [vmem:[#allocation77_spill] sm:$0xff] }
 0x218   : > { %12955 = vst [vmem:[#allocation45_spill] sm:$0xff] %v9141_v34  ;;  %v2813_v60 = vsel %vm2810_vm3, %v2811_v4, %v2812_v55  ;;  %v9156_v18 = vsel %vm2231_vm8, %v8974_v40, %v4759_v43  ;;  %v9160_v23 = vsel %vm2231_vm8, %v8978_v17, %v4760_v39  ;;  %v9164_v27 = vsel %vm2231_vm8, %v8991_v5, %v4754_v20 }
 0x219   : > { %5692 = vrot.lane.b32.xlu0 %v5691_v56, %s6348_s27  ;;  %v5418_v32 = vpop.permute.xlu1 %5417  ;;  %v12957_v0 = vrot.slane %v12897_v46, 3  ;;  %v9172_v62 = vsel %vm2231_vm8, %v9000_v61, %v4755_v51  ;;  %v12958_v43 = vunpack.i.l.bf16 %v12953_v29  ;;  %v12959_v5 = vunpack.i.h.bf16 %v12953_v29  ;;  %v12961_v51 = vld [vmem:[#allocation135_spill] sm:$0xff] }
 0x21a   : > { %v5420_v40 = vunpack.i.h.bf16 %v5418_v32  ;;  %v5419_v17 = vunpack.i.l.bf16 %v5418_v32  ;;  %v9188_v46 = vsel %vm2231_vm8, %v9019_v3, %v4764_v45  ;;  %vm12348_vm15 = vcmask 424960   ;;  %v12966_v3 = vld [vmem:[#allocation141_spill] sm:$0xff] }
 0x21b   : > { %v5701_v21 = vpack.i.bf16 %v12957_v0, %v12956_v59  ;;  %v9178_v39 = vsel %vm2231_vm8, %v9004_v22, %v12958_v43  ;;  %v9184_v56 = vsel %vm2231_vm8, %v9015_v25, %v12959_v5  ;;  %v9190_v61 = vpop.permute.xlu0 %5412  ;;  %5707 = vrot.lane.b32.xlu1 %v5706_v26, %s6350_s29  ;;  %v5716_v20 = vpack.i.bf16 %v2812_v55, %v2813_v60  ;;  %v12962_v0 = vld [vmem:[#allocation138_spill] sm:$0xff] }
 0x21c   : > { %12960 = vst [vmem:[#allocation48_spill] sm:$0xff] %v9190_v61  ;;  %v9195_v22 = vsel %vm2231_vm8, %v9023_v37, %v4765_v50  ;;  %v9200_v25 = vsel %vm12348_vm15, %v8871_v58, %v5419_v17  ;;  %v9204_v45 = vsel %vm12348_vm15, %v8875_v36, %v5420_v40  ;;  %v12963_v37 = vrot.slane %v8613_v47, 7  ;;  %v12964_v50 = vld [vmem:[#allocation139_spill] sm:$0xff]  ;;  %v12965_v36 = vld [vmem:[#allocation140_spill] sm:$0xff] }
 0x21d   : > { %5702 = vrot.lane.b32.xlu0 %v5701_v21, %s6349_s28  ;;  %v5428_v60 = vpop.permute.xlu1 %5427  ;;  %v12319_v5 = vunpack.i.h.bf16 %v12964_v50  ;;  %v12320_v58 = vunpack.i.l.bf16 %v12964_v50  ;;  %v12321_v43 = vunpack.i.l.bf16 %v12965_v36  ;;  %v5726_v47 = vpack.i.bf16 %v12899_v63, %v12922_v13 }
 0x21e   : > { %v5711_v26 = vpack.i.bf16 %v2811_v4, %v12963_v37  ;;  %v5430_v17 = vunpack.i.h.bf16 %v5428_v60  ;;  %v5429_v32 = vunpack.i.l.bf16 %v5428_v60  ;;  %v12967_v40 = vunpack.i.l.bf16 %v12961_v51 }
 0x21f   : > { %v5423_v61 = vpop.permute.xlu0 %5422  ;;  %5717 = vrot.lane.b32.xlu1 %v5716_v20, %s6350_s29  ;;  %v12968_v20 = vunpack.i.h.bf16 %v12961_v51 }
 0x220   : > { %v9222_v4 = vsel %vm12348_vm15, %v8905_v14, %v5429_v32  ;;  %v9226_v21 = vsel %vm12348_vm15, %v8909_v44, %v5430_v17  ;;  %v5425_v60 = vunpack.i.h.bf16 %v5423_v61  ;;  %v5424_v37 = vunpack.i.l.bf16 %v5423_v61  ;;  %v6280_v61 = vld [vmem:[%s6420_s25 + $0x70] sm:$0xf] }
 0x221   : > { %v9232_v55 = vsel %vm2231_vm8, %v9032_v2, %v12967_v40  ;;  %v9238_v63 = vsel %vm2231_vm8, %v9036_v9, %v12968_v20  ;;  %v12969_v14 = vunpack.i.l.bf16 %v12962_v0  ;;  %5712 = vrot.lane.b32.xlu0 %v5711_v26, %s6350_s29  ;;  %v9247_v13 = vpop.permute.xlu1 %5437  ;;  %v6281_v32 = vld [vmem:[%s6420_s25 + $0x130] sm:$0xf]  ;;  %v12971_v17 = vunpack.i.h.bf16 %v12962_v0 }
 0x222   : > { %12970 = vst [vmem:[#allocation124_spill] sm:$0xff] %v9247_v13  ;;  %v5721_v2 = vpack.i.bf16 %v6280_v61, %v6281_v32  ;;  %v9260_v20 = vsel %vm12348_vm15, %v8923_v28, %v5424_v37  ;;  %v9282_v28 = vsel %vm2231_vm8, %v9102_v16, %v12321_v43  ;;  %v12974_v37 = vld [vmem:[#allocation35_spill] sm:$0xff]  ;;  %v12988_v13 = vld [vmem:[#allocation148_spill] sm:$0xff] }
 0x223   : > { %v9244_v44 = vsel %vm2231_vm8, %v9048_v41, %v12969_v14  ;;  %v9255_v40 = vsel %vm2231_vm8, %v9055_v31, %v12971_v17  ;;  %v12972_v41 = vld [vmem:[#allocation117_spill] sm:$0xff]  ;;  %v9270_v14 = vsel %vm2231_vm8, %v9078_v48, %v12320_v58  ;;  %v9276_v31 = vsel %vm2231_vm8, %v9082_v54, %v12319_v5  ;;  %5727 = vrot.lane.b32.xlu1 %v5726_v47, %s6352_s4  ;;  %v12976_v48 = vld [vmem:[#allocation8_spill] sm:$0xff]  ;;  %v12980_v58 = vld [vmem:[#allocation143_spill] sm:$0xff] }
 0x224   : > { %v9264_v26 = vsel %vm12348_vm15, %v12972_v41, %v5425_v60  ;;  %v9284_v60 = vpop.permute.xlu0 %5432  ;;  %v12975_v61 = vrot.slane %v12974_v37, 3  ;;  %v12977_v32 = vrot.slane %v12976_v48, 3  ;;  %v12978_v41 = vunpack.i.h.bf16 %v12965_v36  ;;  %v12981_v37 = vld [vmem:[#allocation146_spill] sm:$0xff]  ;;  %v12982_v48 = vld [vmem:[#allocation147_spill] sm:$0xff]  ;;  %v12986_v47 = vld [vmem:[#allocation5_spill] sm:$0xff] }
 0x225   : > { %12973 = vst [vmem:[#allocation72_spill] sm:$0xff] %v9284_v60  ;;  %v12979_v5 = vunpack.i.l.bf16 %v12966_v3  ;;  %v4840_v9 = vunpack.i.h.bf16 %v12981_v37  ;;  %5722 = vrot.lane.b32.xlu0 %v5721_v2, %s6351_s30  ;;  %v4835_v43 = vunpack.i.h.bf16 %v12982_v48  ;;  %v2839_v34 = vrot.slane %v12986_v47, 7 }
 0x226   : > { %v5736_v17 = vpack.i.bf16 %v12977_v32, %v12975_v61  ;;  %v9295_v54 = vsel %vm2231_vm8, %v9127_v15, %v12978_v41  ;;  %v4839_v61 = vunpack.i.l.bf16 %v12981_v37  ;;  %v4834_v32 = vunpack.i.l.bf16 %v12982_v48  ;;  %v9309_v15 = vpop.permute.xlu1 %5447  ;;  %v12984_v41 = vld [vmem:[#allocation33_spill] sm:$0xff]  ;;  %v12987_v37 = vld [vmem:[#allocation4_spill] sm:$0xff] }
 0x227   : > { %v9301_v16 = vsel %vm2231_vm8, %v9131_v57, %v12979_v5  ;;  %12983 = vst [vmem:[#allocation53_spill] sm:$0xff] %v9309_v15  ;;  %v5731_v35 = vpack.i.bf16 %v12940_v1, %v12984_v41  ;;  %v12985_v57 = vunpack.i.h.bf16 %v12966_v3  ;;  %v2838_v60 = vrot.slane %v12987_v37, 7  ;;  %v12990_v1 = vld [vmem:[#allocation93_spill] sm:$0xff] }
 0x228   : > { %v9324_v15 = vpop.permute.xlu0 %5442  ;;  %5737 = vrot.lane.b32.xlu1 %v5736_v17, %s6354_s6  ;;  %v2814_v3 = vrot.slane %v12990_v1, 7  ;;  %v12991_v50 = vunpack.i.l.bf16 %v12980_v58  ;;  %v12992_v47 = vunpack.i.h.bf16 %v12980_v58  ;;  %v9344_v2 = vsel %vm2264_vm9, %v9156_v18, %v4839_v61  ;;  %v12995_v18 = vld [vmem:[#allocation95_spill] sm:$0xff] }
 0x229   : > { %v9317_v5 = vsel %vm2231_vm8, %v9137_v8, %v12985_v57  ;;  %12989 = vst [vmem:[#allocation125_spill] sm:$0xff] %v9324_v15  ;;  %v12993_v57 = vld [vmem:[#allocation149_spill] sm:$0xff]  ;;  %v9348_v1 = vsel %vm2264_vm9, %v9160_v23, %v4840_v9  ;;  %5732 = vrot.lane.b32.xlu0 %v5731_v35, %s6353_s5  ;;  %v2840_v58 = vsel %vm2810_vm3, %v2838_v60, %v2839_v34  ;;  %v2815_v61 = vrot.slane %v12995_v18, 7  ;;  %v12999_v18 = vld [vmem:[#allocation152_spill] sm:$0xff] }
 0x22a   : > { %v9332_v8 = vsel %vm2231_vm8, %v9146_v52, %v12991_v50  ;;  %v9338_v48 = vsel %vm2231_vm8, %v9150_v12, %v12992_v47  ;;  %v4845_v37 = vunpack.i.h.bf16 %v12993_v57  ;;  %v4844_v0 = vunpack.i.l.bf16 %v12993_v57  ;;  %v5458_v12 = vpop.permute.xlu1 %5457  ;;  %v12994_v50 = vld [vmem:[#allocation64_spill] sm:$0xff] }
 0x22b   : > { %v9352_v52 = vsel %vm2264_vm9, %v9164_v27, %v4834_v32  ;;  %v5741_v47 = vpack.i.bf16 %v12994_v50, %v12984_v41  ;;  %v5460_v15 = vunpack.i.h.bf16 %v5458_v12  ;;  %v5459_v57 = vunpack.i.l.bf16 %v5458_v12 }
 0x22c   : > { %v9361_v23 = vsel %vm2264_vm9, %v9172_v62, %v4835_v43  ;;  %v12996_v9 = vunpack.i.l.bf16 %v12988_v13  ;;  %v12997_v35 = vunpack.i.h.bf16 %v12988_v13  ;;  %v9375_v41 = vpop.permute.xlu0 %5452  ;;  %5747 = vrot.lane.b32.xlu1 %v5736_v17, %s6349_s28  ;;  %v5756_v12 = vpack.i.bf16 %v2814_v3, %v2839_v34  ;;  %v13002_v17 = vld [vmem:[#allocation157_spill] sm:$0xff] }
 0x22d   : > { %12998 = vst [vmem:[#allocation126_spill] sm:$0xff] %v9375_v41  ;;  %v9380_v62 = vsel %vm2264_vm9, %v9188_v46, %v4844_v0  ;;  %v9384_v43 = vsel %vm2264_vm9, %v9195_v22, %v4845_v37  ;;  %v12335_v34 = vunpack.i.l.bf16 %v12999_v18  ;;  %v13000_v46 = vld [vmem:[#allocation155_spill] sm:$0xff]  ;;  %5742 = vrot.lane.b32.xlu0 %v5741_v47, %s6348_s27  ;;  %v5751_v37 = vpack.i.bf16 %v2840_v58, %v2838_v60  ;;  %v9405_v0 = vld [vmem:[%s6420_s25 + $0x88] sm:$0xf] }
 0x22e   : > { %v9367_v27 = vsel %vm2264_vm9, %v9178_v39, %v12996_v9  ;;  %v9373_v32 = vsel %vm2264_vm9, %v9184_v56, %v12997_v35  ;;  %v9388_v39 = vsel %vm12348_vm15, %v9040_v11, %v5459_v57  ;;  %v9392_v56 = vsel %vm12348_vm15, %v9044_v19, %v5460_v15  ;;  %v5468_v22 = vpop.permute.xlu1 %5467  ;;  %v13001_v19 = vld [vmem:[#allocation156_spill] sm:$0xff] }
 0x22f   : > { %v12336_v9 = vunpack.i.l.bf16 %v13000_v46  ;;  %v5470_v11 = vunpack.i.h.bf16 %v5468_v22  ;;  %v5469_v57 = vunpack.i.l.bf16 %v5468_v22  ;;  %v2816_v35 = vsel %vm2810_vm3, %v2814_v3, %v2815_v61  ;;  %v6283_v47 = vld [vmem:[%s6420_s25 + $0x148] sm:$0xf] }
 0x230   : > { %v5463_v30 = vpop.permute.xlu0 %5462  ;;  %5757 = vrot.lane.b32.xlu1 %v5756_v12, %s6350_s29  ;;  %v5766_v58 = vpack.i.bf16 %v9405_v0, %v6283_v47  ;;  %v9421_v12 = vsel %vm2264_vm9, %v9232_v55, %v12335_v34  ;;  %v13003_v38 = vunpack.i.h.bf16 %v12999_v18  ;;  %v13035_v18 = vld [vmem:[#allocation172_spill] sm:$0xff] }
 0x231   : > { %v9411_v60 = vsel %vm12348_vm15, %v9070_v6, %v5469_v57  ;;  %v9415_v3 = vsel %vm12348_vm15, %v9074_v42, %v5470_v11  ;;  %v5465_v22 = vunpack.i.h.bf16 %v5463_v30  ;;  %v5464_v15 = vunpack.i.l.bf16 %v5463_v30  ;;  %5752 = vrot.lane.b32.xlu0 %v5751_v37, %s6350_s29  ;;  %v13005_v30 = vld [vmem:[#allocation158_spill] sm:$0xff] }
 0x232   : > { %v9427_v47 = vsel %vm2264_vm9, %v9238_v63, %v13003_v38  ;;  %v12337_v6 = vunpack.i.h.bf16 %v13002_v17  ;;  %v9431_v42 = vpop.permute.xlu1 %5477  ;;  %v5761_v11 = vpack.i.bf16 %v2815_v61, %v2816_v35  ;;  %v12345_v57 = vunpack.i.h.bf16 %v13005_v30 }
 0x233   : > { %13004 = vst [vmem:[#allocation129_spill] sm:$0xff] %v9431_v42  ;;  %v12340_v41 = vunpack.i.l.bf16 %v13005_v30  ;;  %v9437_v55 = vsel %vm12348_vm15, %v9094_v49, %v5464_v15  ;;  %v9441_v34 = vsel %vm12348_vm15, %v9098_v53, %v5465_v22  ;;  %v9447_v38 = vsel %vm2264_vm9, %v9244_v44, %v12336_v9 }
 0x234   : > { %v13006_v63 = vunpack.i.h.bf16 %v13000_v46  ;;  %v13007_v37 = vunpack.i.l.bf16 %v13001_v19  ;;  %v9461_v53 = vpop.permute.xlu0 %5472  ;;  %5767 = vrot.lane.b32.xlu1 %v5766_v58, %s6351_s30  ;;  %v5776_v44 = vpack.i.bf16 %v12951_v24, %v12994_v50  ;;  %v13009_v35 = vunpack.i.h.bf16 %v13001_v19  ;;  %v13012_v50 = vld [vmem:[#allocation163_spill] sm:$0xff] }
 0x235   : > { %13008 = vst [vmem:[#allocation130_spill] sm:$0xff] %v9461_v53  ;;  %v9484_v24 = vsel %vm2264_vm9, %v9295_v54, %v12337_v6  ;;  %v4920_v58 = vunpack.i.h.bf16 %v13012_v50  ;;  %5762 = vrot.lane.b32.xlu0 %v5761_v11, %s6350_s29  ;;  %v9503_v54 = vsel %vm2264_vm9, %v9317_v5, %v12345_v57  ;;  %v13017_v11 = vld [vmem:[#allocation100_spill] sm:$0xff]  ;;  %v13022_v53 = vld [vmem:[#allocation7_spill] sm:$0xff]  ;;  %vm12383_vm15 = vcmask 457728  }
 0x236   : > { %v9453_v61 = vsel %vm2264_vm9, %v9255_v40, %v13006_v63  ;;  %v9459_v49 = vsel %vm2264_vm9, %v9270_v14, %v13007_v37  ;;  %v9470_v15 = vsel %vm2264_vm9, %v9276_v31, %v13009_v35  ;;  %v13010_v40 = vunpack.i.l.bf16 %v13002_v17  ;;  %v13011_v14 = vld [vmem:[#allocation160_spill] sm:$0xff]  ;;  %v9489_v35 = vpop.permute.xlu1 %5487  ;;  %v13024_v19 = vld [vmem:[#allocation91_spill] sm:$0xff] }
 0x237   : > { %v4919_v31 = vunpack.i.l.bf16 %v13012_v50  ;;  %13013 = vst [vmem:[#allocation52_spill] sm:$0xff] %v9489_v35  ;;  %v9497_v63 = vsel %vm2264_vm9, %v9301_v16, %v12340_v41  ;;  %v13016_v50 = vld [vmem:[#allocation101_spill] sm:$0xff]  ;;  %v2841_v37 = vrot.slane %v13017_v11, 7  ;;  %v13018_v35 = vld [vmem:[#allocation164_spill] sm:$0xff]  ;;  %v13023_v30 = vrot.slane %v13022_v53, 3 }
 0x238   : > { %v9476_v22 = vsel %vm2264_vm9, %v9282_v28, %v13010_v40  ;;  %v13014_v28 = vld [vmem:[#allocation37_spill] sm:$0xff]  ;;  %v13015_v40 = vld [vmem:[#allocation10_spill] sm:$0xff]  ;;  %v2842_v6 = vrot.slane %v13016_v50, 7  ;;  %v4915_v42 = vunpack.i.h.bf16 %v13018_v35  ;;  %5777 = vrot.lane.b32.xlu1 %v5776_v44, %s6353_s5  ;;  %v13020_v16 = vld [vmem:[#allocation32_spill] sm:$0xff]  ;;  %v2817_v5 = vrot.slane %v13024_v19, 7 }
 0x239   : > { %v5771_v9 = vpack.i.bf16 %v13015_v40, %v13014_v28  ;;  %v4914_v28 = vunpack.i.l.bf16 %v13018_v35  ;;  %v9509_v40 = vpop.permute.xlu0 %5482  ;;  %v13021_v41 = vrot.slane %v13020_v16, 3  ;;  %v13025_v57 = vunpack.i.l.bf16 %v13011_v14  ;;  %v13027_v44 = vld [vmem:[#allocation165_spill] sm:$0xff] }
 0x23a   : > { %13019 = vst [vmem:[#allocation57_spill] sm:$0xff] %v9509_v40  ;;  %v13026_v11 = vunpack.i.h.bf16 %v13011_v14  ;;  %v9537_v19 = vsel %vm2297_vm10, %v9348_v1, %v4920_v58  ;;  %v13029_v40 = vld [vmem:[#allocation26_spill] sm:$0xff]  ;;  %v13031_v58 = vunpack.i.l.bf16 %v13027_v44 }
 0x23b   : > { %v5786_v46 = vpack.i.bf16 %v13023_v30, %v13021_v41  ;;  %v9521_v50 = vsel %vm2264_vm9, %v9332_v8, %v13025_v57  ;;  %v9533_v41 = vsel %vm2297_vm10, %v9344_v2, %v4919_v31  ;;  %v13028_v8 = vld [vmem:[#allocation166_spill] sm:$0xff]  ;;  %5772 = vrot.lane.b32.xlu0 %v5771_v9, %s6352_s4  ;;  %v5498_v57 = vpop.permute.xlu1 %5497  ;;  %v2818_v14 = vrot.slane %v13029_v40, 7 }
 0x23c   : > { %v9527_v35 = vsel %vm2264_vm9, %v9338_v48, %v13026_v11  ;;  %v4924_v30 = vunpack.i.l.bf16 %v13028_v8  ;;  %v5500_v53 = vunpack.i.h.bf16 %v5498_v57  ;;  %v5499_v48 = vunpack.i.l.bf16 %v5498_v57 }
 0x23d   : > { %v2843_v11 = vsel %vm2810_vm3, %v2841_v37, %v2842_v6  ;;  %v9545_v16 = vsel %vm2297_vm10, %v9352_v52, %v4914_v28  ;;  %v9549_v2 = vsel %vm2297_vm10, %v9361_v23, %v4915_v42  ;;  %v9551_v1 = vpop.permute.xlu0 %5492  ;;  %5787 = vrot.lane.b32.xlu1 %v5786_v46, %s6349_s28  ;;  %v5796_v9 = vpack.i.bf16 %v2817_v5, %v2842_v6  ;;  %v13033_v28 = vld [vmem:[#allocation168_spill] sm:$0xff] }
 0x23e   : > { %13030 = vst [vmem:[#allocation132_spill] sm:$0xff] %v9551_v1  ;;  %v9558_v31 = vsel %vm2297_vm10, %v9367_v27, %v13031_v58  ;;  %v13032_v40 = vunpack.i.h.bf16 %v13027_v44  ;;  %v9568_v23 = vsel %vm12383_vm15, %v9200_v25, %v5499_v48  ;;  %v9572_v42 = vsel %vm12383_vm15, %v9204_v45, %v5500_v53  ;;  %v13034_v53 = vld [vmem:[#allocation171_spill] sm:$0xff]  ;;  %v13039_v44 = vld [vmem:[#allocation174_spill] sm:$0xff] }
 0x23f   : > { %v4925_v6 = vunpack.i.h.bf16 %v13028_v8  ;;  %v9577_v27 = vsel %vm2297_vm10, %v9380_v62, %v4924_v30  ;;  %5782 = vrot.lane.b32.xlu0 %v5786_v46, %s6354_s6  ;;  %v5791_v58 = vpack.i.bf16 %v2843_v11, %v2841_v37  ;;  %v2819_v45 = vsel %vm2810_vm3, %v2817_v5, %v2818_v14  ;;  %v9588_v30 = vld [vmem:[%s6420_s25 + $0xa0] sm:$0xf]  ;;  %v13037_v8 = vld [vmem:[#allocation173_spill] sm:$0xff] }
 0x240   : > { %v9564_v52 = vsel %vm2297_vm10, %v9373_v32, %v13032_v40  ;;  %v5508_v32 = vpop.permute.xlu1 %5507  ;;  %v9591_v46 = vld [vmem:[%s6420_s25 + $0x160] sm:$0xf]  ;;  %v12354_v1 = vunpack.i.h.bf16 %v13035_v18 }
 0x241   : > { %v5510_v48 = vunpack.i.h.bf16 %v5508_v32  ;;  %v5509_v40 = vunpack.i.l.bf16 %v5508_v32  ;;  %v5503_v62 = vpop.permute.xlu0 %5502  ;;  %5797 = vrot.lane.b32.xlu1 %v5796_v9, %s6350_s29  ;;  %13036 = vst [vmem:[#allocation77_spill] sm:$0xff] %v9591_v46  ;;  %v5806_v37 = vpack.i.bf16 %v9588_v30, %v9591_v46  ;;  %v9605_v9 = vsel %vm2297_vm10, %v9384_v43, %v4925_v6 }
 0x242   : > { %v5505_v32 = vunpack.i.h.bf16 %v5503_v62  ;;  %v5504_v51 = vunpack.i.l.bf16 %v5503_v62  ;;  %v13040_v6 = vunpack.i.l.bf16 %v13033_v28  ;;  %v13042_v62 = vunpack.i.l.bf16 %v13034_v53 }
 0x243   : > { %v9597_v11 = vsel %vm12383_vm15, %v9222_v4, %v5509_v40  ;;  %v9601_v5 = vsel %vm12383_vm15, %v9226_v21, %v5510_v48  ;;  %5792 = vrot.lane.b32.xlu0 %v5791_v58, %s6350_s29  ;;  %v5801_v4 = vpack.i.bf16 %v2818_v14, %v2819_v45  ;;  %v13041_v14 = vunpack.i.h.bf16 %v13033_v28  ;;  %v13048_v21 = vld [vmem:[#allocation108_spill] sm:$0xff]  ;;  %v13062_v28 = vld [vmem:[#allocation99_spill] sm:$0xff] }
 0x244   : > { %v9610_v25 = vpop.permute.xlu1 %5517  ;;  %v9616_v48 = vsel %vm12383_vm15, %v9260_v20, %v5504_v51  ;;  %v9620_v43 = vsel %vm12383_vm15, %v9264_v26, %v5505_v32  ;;  %v9626_v58 = vsel %vm2297_vm10, %v9421_v12, %v13040_v6  ;;  %v9638_v51 = vsel %vm2297_vm10, %v9447_v38, %v13042_v62  ;;  %v13044_v26 = vld [vmem:[#allocation40_spill] sm:$0xff]  ;;  %v13047_v38 = vld [vmem:[#allocation107_spill] sm:$0xff] }
 0x245   : > { %13038 = vst [vmem:[#allocation140_spill] sm:$0xff] %v9610_v25  ;;  %v9632_v45 = vsel %vm2297_vm10, %v9427_v47, %v13041_v14  ;;  %v9640_v20 = vpop.permute.xlu0 %5512  ;;  %5807 = vrot.lane.b32.xlu1 %v5806_v37, %s6351_s30  ;;  %v5816_v12 = vpack.i.bf16 %v12952_v33, %v13044_v26  ;;  %v13045_v32 = vunpack.i.h.bf16 %v13034_v53  ;;  %v13046_v47 = vunpack.i.l.bf16 %v13035_v18 }
 0x246   : > { %13043 = vst [vmem:[#allocation117_spill] sm:$0xff] %v9640_v20  ;;  %v2844_v62 = vrot.slane %v13047_v38, 7  ;;  %v9663_v33 = vsel %vm2297_vm10, %v9470_v15, %v12354_v1  ;;  %v13053_v38 = vunpack.i.l.bf16 %v13037_v8  ;;  %v13054_v15 = vunpack.i.h.bf16 %v13037_v8 }
 0x247   : > { %v9649_v6 = vsel %vm2297_vm10, %v9453_v61, %v13045_v32  ;;  %v9655_v14 = vsel %vm2297_vm10, %v9459_v49, %v13046_v47  ;;  %v13049_v61 = vld [vmem:[#allocation176_spill] sm:$0xff]  ;;  %5802 = vrot.lane.b32.xlu0 %v5801_v4, %s6350_s29  ;;  %v13051_v49 = vld [vmem:[#allocation46_spill] sm:$0xff]  ;;  %v13052_v47 = vld [vmem:[#allocation19_spill] sm:$0xff]  ;;  %v13055_v32 = vunpack.i.l.bf16 %v13039_v44  ;;  %v2821_v13 = vrot.slane %v13062_v28, 7 }
 0x248   : > { %v9668_v40 = vpop.permute.xlu1 %5527  ;;  %v5811_v20 = vpack.i.bf16 %v13052_v47, %v13051_v49  ;;  %v9676_v57 = vsel %vm2297_vm10, %v9476_v22, %v13053_v38  ;;  %v9682_v1 = vsel %vm2297_vm10, %v9484_v24, %v13054_v15  ;;  %v13056_v47 = vld [vmem:[#allocation181_spill] sm:$0xff]  ;;  %v13057_v22 = vld [vmem:[#allocation182_spill] sm:$0xff]  ;;  %v13059_v24 = vld [vmem:[#allocation67_spill] sm:$0xff]  ;;  %v13070_v46 = vunpack.i.h.bf16 %v13049_v61 }
 0x249   : > { %13050 = vst [vmem:[#allocation35_spill] sm:$0xff] %v9668_v40  ;;  %v9688_v4 = vsel %vm2297_vm10, %v9497_v63, %v13055_v32  ;;  %v5000_v37 = vunpack.i.h.bf16 %v13056_v47  ;;  %v4999_v40 = vunpack.i.l.bf16 %v13056_v47  ;;  %v4994_v38 = vunpack.i.l.bf16 %v13057_v22  ;;  %v9694_v25 = vpop.permute.xlu0 %5522  ;;  %5817 = vrot.lane.b32.xlu1 %v5816_v12, %s6353_s5  ;;  %v13061_v49 = vld [vmem:[#allocation94_spill] sm:$0xff] }
 0x24a   : > { %13058 = vst [vmem:[#allocation8_spill] sm:$0xff] %v9694_v25  ;;  %v5826_v15 = vpack.i.bf16 %v13059_v24, %v13044_v26  ;;  %v4995_v53 = vunpack.i.h.bf16 %v13057_v22  ;;  %v13060_v63 = vrot.slane %v13048_v21, 7  ;;  %v2820_v18 = vrot.slane %v13061_v49, 7  ;;  %v13065_v22 = vld [vmem:[#allocation183_spill] sm:$0xff]  ;;  %v13066_v49 = vld [vmem:[#allocation44_spill] sm:$0xff]  ;;  %v13068_v28 = vld [vmem:[#allocation14_spill] sm:$0xff] }
 0x24b   : > { %v13063_v47 = vunpack.i.h.bf16 %v13039_v44  ;;  %v13064_v12 = vunpack.i.l.bf16 %v13049_v61  ;;  %5812 = vrot.lane.b32.xlu0 %v5811_v20, %s6352_s4  ;;  %v13067_v29 = vrot.slane %v13066_v49, 3  ;;  %v13069_v17 = vrot.slane %v13068_v28, 3  ;;  %v13075_v49 = vld [vmem:[#allocation190_spill] sm:$0xff]  ;;  %v6289_v61 = vld [vmem:[%s6420_s25 + $0xc8] sm:$0xff] }
 0x24c   : > { %v2846_v32 = vsel %vm2810_vm3, %v2844_v62, %v13060_v63  ;;  %v5538_v63 = vpop.permute.xlu1 %5537  ;;  %v9732_v8 = vsel %vm2330_vm11, %v9533_v41, %v4999_v40  ;;  %v9736_v20 = vsel %vm2330_vm11, %v9537_v19, %v5000_v37  ;;  %v13072_v40 = vunpack.i.l.bf16 %v13065_v22 }
 0x24d   : > { %v9709_v25 = vsel %vm2297_vm10, %v9503_v54, %v13063_v47  ;;  %v9715_v26 = vsel %vm2297_vm10, %v9521_v50, %v13064_v12  ;;  %v5821_v44 = vpack.i.bf16 %v13069_v17, %v13067_v29  ;;  %v9727_v54 = vsel %vm2297_vm10, %v9527_v35, %v13070_v46  ;;  %v9742_v17 = vpop.permute.xlu0 %5532  ;;  %5827 = vrot.lane.b32.xlu1 %v5826_v15, %s6348_s27 }
 0x24e   : > { %v12367_v47 = vunpack.i.h.bf16 %v13065_v22  ;;  %v5540_v50 = vunpack.i.h.bf16 %v5538_v63  ;;  %v5539_v12 = vunpack.i.l.bf16 %v5538_v63  ;;  %v9740_v29 = vsel %vm2330_vm11, %v9545_v16, %v4994_v38  ;;  %13071 = vst [vmem:[#allocation146_spill] sm:$0xff] %v9742_v17  ;;  %v13089_v17 = vld [vmem:[#allocation110_spill] sm:$0xff] }
 0x24f   : > { %v5836_v35 = vpack.i.bf16 %v2846_v32, %v2844_v62  ;;  %v9747_v46 = vsel %vm2330_vm11, %v9549_v2, %v4995_v53  ;;  %v2822_v16 = vsel %vm2810_vm3, %v2820_v18, %v2821_v13  ;;  %v9762_v37 = vsel %vm2330_vm11, %v9558_v31, %v13072_v40  ;;  %v13073_v62 = vld [vmem:[#allocation184_spill] sm:$0xff]  ;;  %5822 = vrot.lane.b32.xlu0 %v5821_v44, %s6354_s6  ;;  %v13074_v53 = vld [vmem:[#allocation187_spill] sm:$0xff] }
 0x250   : > { %v9751_v41 = vsel %vm12383_vm15, %v9388_v39, %v5539_v12  ;;  %v9755_v19 = vsel %vm12383_vm15, %v9392_v56, %v5540_v50  ;;  %v5005_v38 = vunpack.i.h.bf16 %v13073_v62  ;;  %v5004_v2 = vunpack.i.l.bf16 %v13073_v62  ;;  %v5548_v39 = vpop.permute.xlu1 %5547 }
 0x251   : > { %v9771_v56 = vsel %vm2330_vm11, %v9564_v52, %v12367_v47  ;;  %v5550_v32 = vunpack.i.h.bf16 %v5548_v39  ;;  %v5549_v63 = vunpack.i.l.bf16 %v5548_v39  ;;  %v12368_v31 = vunpack.i.l.bf16 %v13074_v53  ;;  %v5543_v12 = vpop.permute.xlu0 %5542  ;;  %5837 = vrot.lane.b32.xlu1 %v5836_v35, %s6350_s29  ;;  %v13076_v35 = vld [vmem:[#allocation191_spill] sm:$0xff] }
 0x252   : > { %v12369_v50 = vunpack.i.l.bf16 %v13075_v49  ;;  %v5846_v40 = vpack.i.bf16 %v2821_v13, %v2822_v16  ;;  %v5545_v47 = vunpack.i.h.bf16 %v5543_v12  ;;  %v5544_v39 = vunpack.i.l.bf16 %v5543_v12 }
 0x253   : > { %v9780_v62 = vsel %vm12383_vm15, %v9411_v60, %v5549_v63  ;;  %v9784_v52 = vsel %vm12383_vm15, %v9415_v3, %v5550_v32  ;;  %v9788_v15 = vsel %vm2330_vm11, %v9577_v27, %v5004_v2  ;;  %v9792_v28 = vsel %vm2330_vm11, %v9605_v9, %v5005_v38  ;;  %5832 = vrot.lane.b32.xlu0 %v5821_v44, %s6349_s28  ;;  %v13079_v63 = vld [vmem:[#allocation192_spill] sm:$0xff] }
 0x254   : > { %v12370_v13 = vunpack.i.l.bf16 %v13076_v35  ;;  %v9796_v60 = vpop.permute.xlu1 %5557  ;;  %v13078_v16 = vrot.slane %v13048_v21, 7  ;;  %v12373_v32 = vunpack.i.h.bf16 %v13076_v35  ;;  %v12374_v12 = vunpack.i.l.bf16 %v13079_v63 }
 0x255   : > { %13077 = vst [vmem:[#allocation147_spill] sm:$0xff] %v9796_v60  ;;  %v9804_v27 = vsel %vm12383_vm15, %v9437_v55, %v5544_v39  ;;  %v9808_v9 = vsel %vm12383_vm15, %v9441_v34, %v5545_v47  ;;  %v9814_v44 = vsel %vm2330_vm11, %v9626_v58, %v12368_v31  ;;  %v12379_v55 = vunpack.i.h.bf16 %v13079_v63  ;;  %v9823_v38 = vpop.permute.xlu0 %5552  ;;  %5847 = vrot.lane.b32.xlu1 %v5846_v40, %s6350_s29  ;;  %v13082_v34 = vld [vmem:[#allocation18_spill] sm:$0xff]  ;;  %v13084_v39 = vld [vmem:[#allocation103_spill] sm:$0xff]  ;;  %v13086_v40 = vld [vmem:[#allocation193_spill] sm:$0xff] }
 0x256   : > { %v5841_v3 = vpack.i.bf16 %v2820_v18, %v13078_v16  ;;  %v13080_v18 = vunpack.i.h.bf16 %v13074_v53  ;;  %13081 = vst [vmem:[#allocation33_spill] sm:$0xff] %v9823_v38  ;;  %v5856_v47 = vpack.i.bf16 %v13082_v34, %v12932_v10  ;;  %v9832_v58 = vsel %vm2330_vm11, %v9638_v51, %v12369_v50  ;;  %v13093_v60 = vld [vmem:[#allocation11_spill] sm:$0xff]  ;;  %v13095_v51 = vld [vmem:[#allocation112_spill] sm:$0xff] }
 0x257   : > { %v13083_v2 = vunpack.i.h.bf16 %v13075_v49  ;;  %v2847_v16 = vrot.slane %v13084_v39, 7  ;;  %v9846_v10 = vsel %vm2330_vm11, %v9655_v14, %v12370_v13  ;;  %v9865_v14 = vsel %vm2330_vm11, %v9663_v33, %v12373_v32  ;;  %v13088_v13 = vld [vmem:[#allocation195_spill] sm:$0xff] }
 0x258   : > { %v9820_v21 = vsel %vm2330_vm11, %v9632_v45, %v13080_v18  ;;  %v13085_v18 = vld [vmem:[#allocation104_spill] sm:$0xff]  ;;  %5842 = vrot.lane.b32.xlu0 %v5841_v3, %s6350_s29  ;;  %v9851_v50 = vpop.permute.xlu1 %5567  ;;  %v9871_v3 = vsel %vm2330_vm11, %v9676_v57, %v12374_v12  ;;  %v9879_v31 = vsel %vm2330_vm11, %v9682_v1, %v12379_v55  ;;  %v5079_v33 = vunpack.i.l.bf16 %v13089_v17  ;;  %v13091_v57 = vld [vmem:[#allocation38_spill] sm:$0xff]  ;;  %v6288_v55 = vld [vmem:[%s6420_s25 + $0xc0] sm:$0xff] }
 0x259   : > { %v9838_v45 = vsel %vm2330_vm11, %v9649_v6, %v13083_v2  ;;  %13087 = vst [vmem:[#allocation5_spill] sm:$0xff] %v9851_v50  ;;  %v9854_v6 = vld [vmem:[%s6420_s25 + $0xb8] sm:$0xf]  ;;  %v5080_v50 = vunpack.i.h.bf16 %v13089_v17  ;;  %v9883_v32 = vpop.permute.xlu0 %5562  ;;  %5857 = vrot.lane.b32.xlu1 %v5856_v47, %s6352_s4  ;;  %v13092_v12 = vrot.slane %v13091_v57, 3  ;;  %v13094_v34 = vrot.slane %v13093_v60, 3 }
 0x25a   : > { %v9857_v2 = vld [vmem:[%s6420_s25 + $0x178] sm:$0xf]  ;;  %13090 = vst [vmem:[#allocation4_spill] sm:$0xff] %v9883_v32  ;;  %v5074_v49 = vunpack.i.l.bf16 %v13095_v51  ;;  %v13096_v35 = vrot.slane %v13085_v18, 7  ;;  %v2823_v53 = vrot.slane %v6288_v55, 7  ;;  %v2824_v22 = vrot.slane %v6289_v61, 7 }
 0x25b   : > { %v5851_v39 = vpack.i.bf16 %v9854_v6, %v9857_v2  ;;  %v5866_v38 = vpack.i.bf16 %v13094_v34, %v13092_v12  ;;  %v13097_v17 = vunpack.i.l.bf16 %v13086_v40  ;;  %v13098_v57 = vunpack.i.h.bf16 %v13086_v40  ;;  %v13099_v55 = vld [vmem:[#allocation55_spill] sm:$0xff] }
 0x25c   : > { %v2849_v1 = vsel %vm2810_vm3, %v2847_v16, %v13096_v35  ;;  %v5075_v12 = vunpack.i.h.bf16 %v13095_v51  ;;  %v5578_v35 = vpop.permute.xlu1 %5577  ;;  %v5861_v61 = vpack.i.bf16 %v13099_v55, %v13059_v24  ;;  %v13100_v34 = vunpack.i.l.bf16 %v13088_v13 }
 0x25d   : > { %v9900_v47 = vsel %vm2330_vm11, %v9688_v4, %v13097_v17  ;;  %v9906_v60 = vsel %vm2330_vm11, %v9709_v25, %v13098_v57  ;;  %5852 = vrot.lane.b32.xlu0 %v5851_v39, %s6351_s30  ;;  %v13101_v17 = vunpack.i.h.bf16 %v13088_v13  ;;  %v5580_v57 = vunpack.i.h.bf16 %v5578_v35  ;;  %v9932_v55 = vpop.permute.xlu0 %5572  ;;  %5867 = vrot.lane.b32.xlu1 %v5866_v38, %s6354_s6 }
 0x25e   : > { %v9916_v4 = vsel %vm2330_vm11, %v9715_v26, %v13100_v34  ;;  %v5579_v51 = vunpack.i.l.bf16 %v5578_v35  ;;  %v9926_v39 = vsel %vm2363_vm12, %v9732_v8, %v5079_v33  ;;  %v9930_v24 = vsel %vm2363_vm12, %v9736_v20, %v5080_v50  ;;  %13102 = vst [vmem:[#allocation93_spill] sm:$0xff] %v9932_v55  ;;  %v13105_v33 = vld [vmem:[#allocation68_spill] sm:$0xff] }
 0x25f   : > { %v9922_v25 = vsel %vm2330_vm11, %v9727_v54, %v13101_v17  ;;  %vm2561_vm15 = vcmask 490496   ;;  %v5876_v26 = vpack.i.bf16 %v2849_v1, %v2847_v16  ;;  %v9937_v54 = vsel %vm2363_vm12, %v9740_v29, %v5074_v49  ;;  %v13106_v49 = vld [vmem:[#allocation113_spill] sm:$0xff] }
 0x260   : > { %v9941_v35 = vsel %vm2561_vm15, %v9568_v23, %v5579_v51  ;;  %v9945_v8 = vsel %vm2561_vm15, %v9572_v42, %v5580_v57  ;;  %v2825_v20 = vsel %vm2810_vm3, %v2823_v53, %v2824_v22  ;;  %v9950_v50 = vsel %vm2363_vm12, %v9747_v46, %v5075_v12  ;;  %v5588_v29 = vpop.permute.xlu1 %5587  ;;  %v13107_v57 = vld [vmem:[#allocation36_spill] sm:$0xff] }
 0x261   : > { %13103 = vst [vmem:[#allocation149_spill] sm:$0xff] %v9941_v35  ;;  %13104 = vst [vmem:[#allocation64_spill] sm:$0xff] %v9945_v8  ;;  %v5090_v16 = vunpack.i.h.bf16 %v13105_v33  ;;  %v5089_v1 = vunpack.i.l.bf16 %v13105_v33  ;;  %5862 = vrot.lane.b32.xlu0 %v5861_v61, %s6353_s5  ;;  %v5085_v23 = vunpack.i.h.bf16 %v13106_v49  ;;  %v5084_v34 = vunpack.i.l.bf16 %v13106_v49  ;;  %v13108_v8 = vld [vmem:[#allocation123_spill] sm:$0xff]  ;;  %v5583_v12 = vpop.permute.xlu0 %5582  ;;  %5877 = vrot.lane.b32.xlu1 %v5876_v26, %s6350_s29 }
 0x262   : > { %v5590_v17 = vunpack.i.h.bf16 %v5588_v29  ;;  %v5589_v42 = vunpack.i.l.bf16 %v5588_v29  ;;  %v5095_v51 = vunpack.i.h.bf16 %v13107_v57  ;;  %v5094_v35 = vunpack.i.l.bf16 %v13107_v57 }
 0x263   : > { %v5119_v46 = vunpack.i.l.bf16 %v13108_v8  ;;  %v5886_v55 = vpack.i.bf16 %v2824_v22, %v2825_v20  ;;  %v5585_v49 = vunpack.i.h.bf16 %v5583_v12  ;;  %v5584_v29 = vunpack.i.l.bf16 %v5583_v12  ;;  %v13113_v20 = vld [vmem:[#allocation73_spill] sm:$0xff] }
 0x264   : > { %v9963_v61 = vsel %vm2561_vm15, %v9597_v11, %v5589_v42  ;;  %v9967_v33 = vsel %vm2561_vm15, %v9601_v5, %v5590_v17  ;;  %v2370_v32 = vsel %vm2363_vm12, %v9762_v37, %v5089_v1  ;;  %v2371_v57 = vsel %vm2363_vm12, %v9771_v56, %v5090_v16  ;;  %v9975_v22 = vpop.permute.xlu1 %5597  ;;  %v6291_v12 = vld [vmem:[%s6420_s25 + $0x190] sm:$0xf] }
 0x265   : > { %13109 = vst [vmem:[#allocation95_spill] sm:$0xff] %v9963_v61  ;;  %13110 = vst [vmem:[#allocation163_spill] sm:$0xff] %v9967_v33  ;;  %v5120_v40 = vunpack.i.h.bf16 %v13108_v8  ;;  %5872 = vrot.lane.b32.xlu0 %v5866_v38, %s6349_s28  ;;  %v13112_v11 = vrot.slane %v13085_v18, 7  ;;  %v5115_v5 = vunpack.i.h.bf16 %v13113_v20  ;;  %v5114_v17 = vunpack.i.l.bf16 %v13113_v20  ;;  %5887 = vrot.lane.b32.xlu1 %v5886_v55, %s6350_s29  ;;  %v13118_v18 = vld [vmem:[#allocation25_spill] sm:$0xff]  ;;  %v13120_v55 = vld [vmem:[#allocation128_spill] sm:$0xff] }
 0x266   : > { %13111 = vst [vmem:[#allocation37_spill] sm:$0xff] %v9975_v22  ;;  %v9983_v42 = vsel %vm2561_vm15, %v9616_v48, %v5584_v29  ;;  %v9987_v37 = vsel %vm2561_vm15, %v9620_v43, %v5585_v49  ;;  %v9991_v56 = vsel %vm2363_vm12, %v9788_v15, %v5084_v34  ;;  %v9999_v38 = vsel %vm2363_vm12, %v9814_v44, %v5094_v35  ;;  %v10001_v48 = vpop.permute.xlu0 %5592  ;;  %v13117_v43 = vld [vmem:[#allocation43_spill] sm:$0xff] }
 0x267   : > { %v5881_v26 = vpack.i.bf16 %v2823_v53, %v13112_v11  ;;  %13114 = vst [vmem:[#allocation10_spill] sm:$0xff] %v9983_v42  ;;  %13115 = vst [vmem:[#allocation101_spill] sm:$0xff] %v9987_v37  ;;  %v9995_v53 = vsel %vm2363_vm12, %v9792_v28, %v5085_v23  ;;  %v5896_v8 = vpack.i.bf16 %v13118_v18, %v13117_v43  ;;  %v13119_v28 = vld [vmem:[#allocation127_spill] sm:$0xff]  ;;  %v5125_v23 = vunpack.i.h.bf16 %v13120_v55  ;;  %v13124_v43 = vld [vmem:[#allocation78_spill] sm:$0xff] }
 0x268   : > { %13116 = vst [vmem:[#allocation100_spill] sm:$0xff] %v10001_v48  ;;  %v10008_v15 = vsel %vm2363_vm12, %v9820_v21, %v5095_v51  ;;  %v10012_v16 = vsel %vm2363_vm12, %v9832_v58, %v5119_v46  ;;  %v5130_v1 = vunpack.i.h.bf16 %v13119_v28  ;;  %v5129_v44 = vunpack.i.l.bf16 %v13119_v28  ;;  %v10023_v21 = vpop.permute.xlu1 %5607  ;;  %v6290_v51 = vld [vmem:[%s6420_s25 + $0xd0] sm:$0xf]  ;;  %v13123_v11 = vld [vmem:[#allocation75_spill] sm:$0xff] }
 0x269   : > { %v10018_v35 = vsel %vm2363_vm12, %v9838_v45, %v5120_v40  ;;  %v5124_v34 = vunpack.i.l.bf16 %v13120_v55  ;;  %5882 = vrot.lane.b32.xlu0 %v5881_v26, %s6350_s29  ;;  %13121 = vst [vmem:[#allocation164_spill] sm:$0xff] %v10023_v21  ;;  %v5891_v58 = vpack.i.bf16 %v6290_v51, %v6291_v12  ;;  %v10029_v46 = vsel %vm2363_vm12, %v9846_v10, %v5114_v17  ;;  %v13122_v45 = vld [vmem:[#allocation74_spill] sm:$0xff]  ;;  %v13128_v55 = vld [vmem:[#allocation20_spill] sm:$0xff] }
 0x26a   : > { %v10033_v49 = vsel %vm2363_vm12, %v9865_v14, %v5115_v5  ;;  %v5135_v40 = vunpack.i.h.bf16 %v13122_v45  ;;  %v5134_v29 = vunpack.i.l.bf16 %v13122_v45  ;;  %v5160_v20 = vunpack.i.h.bf16 %v13123_v11  ;;  %v10040_v28 = vpop.permute.xlu0 %5602  ;;  %5897 = vrot.lane.b32.xlu1 %v5896_v8, %s6352_s4  ;;  %v13126_v10 = vld [vmem:[#allocation22_spill] sm:$0xff] }
 0x26b   : > { %v5159_v26 = vunpack.i.l.bf16 %v13123_v11  ;;  %v5154_v18 = vunpack.i.l.bf16 %v13124_v43  ;;  %13125 = vst [vmem:[#allocation32_spill] sm:$0xff] %v10040_v28  ;;  %v13127_v17 = vrot.slane %v13126_v10, 3  ;;  %v13129_v51 = vrot.slane %v13128_v55, 3  ;;  %v13130_v11 = vld [vmem:[#allocation23_spill] sm:$0xff] }
 0x26c   : > { %v10049_v5 = vsel %vm2363_vm12, %v9871_v3, %v5129_v44  ;;  %v10053_v12 = vsel %vm2363_vm12, %v9879_v31, %v5130_v1  ;;  %v5155_v45 = vunpack.i.h.bf16 %v13124_v43  ;;  %v5169_v61 = vunpack.i.l.bf16 %v13130_v11  ;;  %v5618_v3 = vpop.permute.xlu1 %5617 }
 0x26d   : > { %v5906_v14 = vpack.i.bf16 %v13129_v51, %v13127_v17  ;;  %v10059_v8 = vsel %vm2363_vm12, %v9900_v47, %v5124_v34  ;;  %v10063_v33 = vsel %vm2363_vm12, %v9906_v60, %v5125_v23  ;;  %v5170_v17 = vunpack.i.h.bf16 %v13130_v11  ;;  %5892 = vrot.lane.b32.xlu0 %v5891_v58, %s6351_s30  ;;  %v13137_v51 = vld [vmem:[#allocation80_spill] sm:$0xff] }
 0x26e   : > { %v13131_v31 = vrot.slane %v13126_v10, 2  ;;  %v13132_v1 = vrot.slane %v13128_v55, 2  ;;  %v10073_v43 = vsel %vm2363_vm12, %v9916_v4, %v5134_v29  ;;  %v10077_v47 = vsel %vm2363_vm12, %v9922_v25, %v5135_v40  ;;  %v10091_v4 = vpop.permute.xlu0 %5612  ;;  %v13136_v29 = vld [vmem:[#allocation79_spill] sm:$0xff]  ;;  %v10120_v55 = vld [vmem:[%s6420_s25 + $0x198] sm:$0xff] }
 0x26f   : > { %v5620_v60 = vunpack.i.h.bf16 %v5618_v3  ;;  %v5619_v23 = vunpack.i.l.bf16 %v5618_v3  ;;  %v10081_v34 = vsel %vm2396_vm13, %v9926_v39, %v5159_v26  ;;  %v10085_v58 = vsel %vm2396_vm13, %v9930_v24, %v5160_v20  ;;  %13133 = vst [vmem:[#allocation7_spill] sm:$0xff] %v10091_v4  ;;  %5907 = vrot.lane.b32.xlu1 %v5906_v14, %s6354_s6 }
 0x270   : > { %v5901_v44 = vpack.i.bf16 %v13132_v1, %v13131_v31  ;;  %v10089_v10 = vsel %vm2396_vm13, %v9937_v54, %v5154_v18  ;;  %v10096_v25 = vsel %vm2396_vm13, %v9950_v50, %v5155_v45  ;;  %v10099_v39 = vsel %vm2396_vm13, %v2370_v32, %v5169_v61  ;;  %v5628_v32 = vpop.permute.xlu1 %5627  ;;  %v10116_v18 = vld [vmem:[%s6420_s25 + $0x1a0] sm:$0xff] }
 0x271   : > { %v10103_v24 = vsel %vm2561_vm15, %v9751_v41, %v5619_v23  ;;  %v10107_v54 = vsel %vm2561_vm15, %v9755_v19, %v5620_v60  ;;  %v10110_v40 = vsel %vm2396_vm13, %v2371_v57, %v5170_v17  ;;  %v5165_v20 = vunpack.i.h.bf16 %v13136_v29  ;;  %v6294_v17 = vld [vmem:[%s6420_s25 + $0xd8] sm:$0xff] }
 0x272   : > { %13134 = vst [vmem:[#allocation91_spill] sm:$0xff] %v10103_v24  ;;  %13135 = vst [vmem:[#allocation166_spill] sm:$0xff] %v10107_v54  ;;  %v5164_v50 = vunpack.i.l.bf16 %v13136_v29  ;;  %5902 = vrot.lane.b32.xlu0 %v5901_v44, %s6353_s5  ;;  %v5630_v61 = vunpack.i.h.bf16 %v5628_v32  ;;  %v5629_v26 = vunpack.i.l.bf16 %v5628_v32  ;;  %v2851_v41 = vrot.slane %v10116_v18, 7  ;;  %v5623_v11 = vpop.permute.xlu0 %5622  ;;  %v13141_v32 = vld [vmem:[#allocation81_spill] sm:$0xff] }
 0x273   : > { %v2850_v19 = vrot.slane %v10120_v55, 7  ;;  %v5175_v57 = vunpack.i.h.bf16 %v13137_v51  ;;  %v5174_v45 = vunpack.i.l.bf16 %v13137_v51  ;;  %5917 = vrot.lane.b32.xlu1 %v5901_v44, %s6348_s27  ;;  %v2826_v3 = vrot.slane %v6294_v17, 7  ;;  %v13142_v17 = vld [vmem:[#allocation121_spill] sm:$0xff] }
 0x274   : > { %v10129_v31 = vsel %vm2561_vm15, %v9780_v62, %v5629_v26  ;;  %v10133_v1 = vsel %vm2561_vm15, %v9784_v52, %v5630_v61  ;;  %v5625_v60 = vunpack.i.h.bf16 %v5623_v11  ;;  %v5624_v23 = vunpack.i.l.bf16 %v5623_v11  ;;  %v10143_v42 = vpop.permute.xlu1 %5637  ;;  %v13146_v11 = vld [vmem:[#allocation82_spill] sm:$0xff] }
 0x275   : > { %13138 = vst [vmem:[#allocation26_spill] sm:$0xff] %v10129_v31  ;;  %13139 = vst [vmem:[#allocation40_spill] sm:$0xff] %v10133_v1  ;;  %v10137_v29 = vsel %vm2396_vm13, %v9991_v56, %v5164_v50  ;;  %v5200_v51 = vunpack.i.h.bf16 %v13141_v32  ;;  %v5199_v44 = vunpack.i.l.bf16 %v13141_v32  ;;  %v2852_v56 = vsel %vm2810_vm3, %v2850_v19, %v2851_v41  ;;  %v6295_v50 = vld [vmem:[%s6420_s25 + $0xe0] sm:$0xff]  ;;  %v13155_v1 = vld [vmem:[#allocation85_spill] sm:$0xff] }
 0x276   : > { %13140 = vst [vmem:[#allocation107_spill] sm:$0xff] %v10137_v29  ;;  %5912 = vrot.lane.b32.xlu0 %v13142_v17, %s6348_s27  ;;  %v10147_v62 = vsel %vm2561_vm15, %v9804_v27, %v5624_v23  ;;  %v10151_v52 = vsel %vm2561_vm15, %v9808_v9, %v5625_v60  ;;  %v2827_v61 = vrot.slane %v6295_v50, 7  ;;  %v10157_v26 = vsel %vm2396_vm13, %v9995_v53, %v5165_v20  ;;  %v10161_v31 = vpop.permute.xlu0 %5632  ;;  %v13149_v23 = vld [vmem:[#allocation83_spill] sm:$0xff] }
 0x277   : > { %13143 = vst [vmem:[#allocation108_spill] sm:$0xff] %v10147_v62  ;;  %13144 = vst [vmem:[#allocation46_spill] sm:$0xff] %v10151_v52  ;;  %v5195_v32 = vunpack.i.h.bf16 %v13146_v11  ;;  %v5194_v17 = vunpack.i.l.bf16 %v13146_v11  ;;  %5927 = vrot.lane.b32.xlu1 %v5906_v14, %s6349_s28  ;;  %v5936_v27 = vpack.i.bf16 %v2826_v3, %v2851_v41  ;;  %v10166_v9 = vsel %vm2396_vm13, %v9999_v38, %v5174_v45  ;;  %v13152_v41 = vld [vmem:[#allocation84_spill] sm:$0xff]  ;;  %v13153_v38 = vld [vmem:[#allocation133_spill] sm:$0xff] }
 0x278   : > { %13145 = vst [vmem:[#allocation19_spill] sm:$0xff] %v10157_v26  ;;  %13147 = vst [vmem:[#allocation181_spill] sm:$0xff] %v10166_v9  ;;  %v10170_v60 = vsel %vm2396_vm13, %v10008_v15, %v5175_v57  ;;  %v5210_v53 = vunpack.i.h.bf16 %v13149_v23  ;;  %v5209_v20 = vunpack.i.l.bf16 %v13149_v23  ;;  %v10176_v50 = vsel %vm2396_vm13, %v10012_v16, %v5199_v44  ;;  %v10185_v45 = vpop.permute.xlu1 %5647  ;;  %v13158_v44 = vld [vmem:[#allocation86_spill] sm:$0xff]  ;;  %v13202_v9 = vld [vmem:[#allocation56_spill] sm:$0xff] }
 0x279   : > { %13148 = vst [vmem:[#allocation182_spill] sm:$0xff] %v10170_v60  ;;  %13150 = vst [vmem:[#allocation67_spill] sm:$0xff] %v10176_v50  ;;  %v10180_v14 = vsel %vm2396_vm13, %v10018_v35, %v5200_v51  ;;  %v5205_v11 = vunpack.i.h.bf16 %v13152_v41  ;;  %v5931_v15 = vpack.i.bf16 %v2852_v56, %v2850_v19  ;;  %v5204_v57 = vunpack.i.l.bf16 %v13152_v41  ;;  %v10414_v26 = vld [vmem:[%s6420_s25 + $0x118] sm:$0xf] }
 0x27a   : > { %13151 = vst [vmem:[#allocation94_spill] sm:$0xff] %v10180_v14  ;;  %5922 = vrot.lane.b32.xlu0 %v13153_v38, %s6349_s28  ;;  %13154 = vst [vmem:[#allocation99_spill] sm:$0xff] %v10185_v45  ;;  %v5215_v23 = vunpack.i.h.bf16 %v13155_v1  ;;  %v5214_v62 = vunpack.i.l.bf16 %v13155_v1  ;;  %v2828_v16 = vsel %vm2810_vm3, %v2826_v3, %v2827_v61  ;;  %v10193_v35 = vsel %vm2396_vm13, %v10029_v46, %v5194_v17  ;;  %v10200_v52 = vpop.permute.xlu0 %5642  ;;  %v13162_v1 = vld [vmem:[#allocation87_spill] sm:$0xff]  ;;  %v13163_v17 = vld [vmem:[#allocation88_spill] sm:$0xff] }
 0x27b   : > { %13156 = vst [vmem:[#allocation44_spill] sm:$0xff] %v10193_v35  ;;  %v10197_v51 = vsel %vm2396_vm13, %v10033_v49, %v5195_v32  ;;  %v5239_v38 = vunpack.i.l.bf16 %v13158_v44  ;;  %13159 = vst [vmem:[#allocation184_spill] sm:$0xff] %v10200_v52  ;;  %5937 = vrot.lane.b32.xlu1 %v5936_v27, %s6350_s29  ;;  %v5946_v19 = vpack.i.bf16 %v10116_v18, %v10120_v55  ;;  %v5240_v49 = vunpack.i.h.bf16 %v13158_v44 }
 0x27c   : > { %13157 = vst [vmem:[#allocation14_spill] sm:$0xff] %v10197_v51  ;;  %v10207_v3 = vsel %vm2396_vm13, %v10049_v5, %v5209_v20  ;;  %v10211_v46 = vsel %vm2396_vm13, %v10053_v12, %v5210_v53  ;;  %v5234_v56 = vunpack.i.l.bf16 %v13162_v1  ;;  %v5235_v32 = vunpack.i.h.bf16 %v13162_v1  ;;  %v10219_v5 = vpop.permute.xlu1 %5657 }
 0x27d   : > { %13160 = vst [vmem:[#allocation192_spill] sm:$0xff] %v10207_v3  ;;  %13161 = vst [vmem:[#allocation18_spill] sm:$0xff] %v10211_v46  ;;  %v5250_v27 = vunpack.i.h.bf16 %v13163_v17  ;;  %v5249_v18 = vunpack.i.l.bf16 %v13163_v17  ;;  %v5941_v55 = vpack.i.bf16 %v2827_v61, %v2828_v16  ;;  %v10223_v12 = vsel %vm2396_vm13, %v10059_v8, %v5204_v57  ;;  %v10245_v8 = vld [vmem:[%s6420_s25 + $0x1b0] sm:$0xff]  ;;  %v6305_v46 = vld [vmem:[%s6420_s25 + $0x108] sm:$0xff] }
 0x27e   : > { %5932 = vrot.lane.b32.xlu0 %v5931_v15, %s6350_s29  ;;  %13164 = vst [vmem:[#allocation103_spill] sm:$0xff] %v10223_v12  ;;  %v10227_v53 = vsel %vm2396_vm13, %v10063_v33, %v5205_v11  ;;  %v10231_v20 = vsel %vm2396_vm13, %v10073_v43, %v5214_v62  ;;  %v10235_v41 = vsel %vm2396_vm13, %v10077_v47, %v5215_v23  ;;  %v10241_v15 = vpop.permute.xlu0 %5652  ;;  %v2853_v33 = vrot.slane %v10245_v8, 7  ;;  %v10249_v43 = vld [vmem:[%s6420_s25 + $0x1b8] sm:$0xff]  ;;  %v6298_v11 = vld [vmem:[%s6420_s25 + $0xf0] sm:$0xff] }
 0x27f   : > { %13165 = vst [vmem:[#allocation104_spill] sm:$0xff] %v10227_v53  ;;  %13166 = vst [vmem:[#allocation195_spill] sm:$0xff] %v10231_v20  ;;  %v10239_v61 = vsel %vm2429_vm14, %v10081_v34, %v5239_v38  ;;  %5947 = vrot.lane.b32.xlu1 %v5946_v19, %s6351_s30  ;;  %v2854_v62 = vrot.slane %v10249_v43, 7  ;;  %v10254_v47 = vsel %vm2429_vm14, %v10085_v58, %v5240_v49  ;;  %v2829_v57 = vrot.slane %v6298_v11, 7  ;;  %v6299_v23 = vld [vmem:[%s6420_s25 + $0xf8] sm:$0xff]  ;;  %v13197_v20 = vld [vmem:[#allocation24_spill] sm:$0xff] }
 0x280   : > { %13167 = vst [vmem:[#allocation110_spill] sm:$0xff] %v10235_v41  ;;  %13168 = vst [vmem:[#allocation38_spill] sm:$0xff] %v10239_v61  ;;  %v10258_v34 = vsel %vm2429_vm14, %v10089_v10, %v5234_v56  ;;  %v2830_v16 = vrot.slane %v6299_v23, 7  ;;  %v10264_v44 = vsel %vm2429_vm14, %v10096_v25, %v5235_v32  ;;  %v10268_v38 = vsel %vm2429_vm14, %v10099_v39, %v5249_v18  ;;  %v10275_v10 = vpop.permute.xlu1 %5667  ;;  %v6300_v19 = vld [vmem:[%s6420_s25 + $0xe8] sm:$0xf]  ;;  %v13182_v25 = vld [vmem:[#allocation178_spill] sm:$0xff] }
 0x281   : > { %13169 = vst [vmem:[#allocation11_spill] sm:$0xff] %v10254_v47  ;;  %13170 = vst [vmem:[#allocation112_spill] sm:$0xff] %v10258_v34  ;;  %v10272_v58 = vsel %vm2429_vm14, %v10110_v40, %v5250_v27  ;;  %v6301_v49 = vld [vmem:[%s6420_s25 + $0x1a8] sm:$0xf]  ;;  %v13178_v40 = vld [vmem:[#allocation185_spill] sm:$0xff]  ;;  %v2855_v37 = vsel %vm2810_vm3, %v2853_v33, %v2854_v62  ;;  %v2666_v11 = vrot.slane %v10245_v8, 2  ;;  %v5635_v29 = vunpack.i.h.bf16 %v10161_v31 }
 0x282   : > { %13171 = vst [vmem:[#allocation55_spill] sm:$0xff] %v10264_v44  ;;  %13172 = vst [vmem:[#allocation68_spill] sm:$0xff] %v10268_v38  ;;  %5942 = vrot.lane.b32.xlu0 %v5941_v55, %s6350_s29  ;;  %v5951_v1 = vpack.i.bf16 %v6300_v19, %v6301_v49  ;;  %v10283_v18 = vpop.permute.xlu0 %5662  ;;  %v13179_v27 = vld [vmem:[#allocation180_spill] sm:$0xff]  ;;  %v13180_v55 = vld [vmem:[#allocation21_spill] sm:$0xff]  ;;  %v2831_v19 = vsel %vm2810_vm3, %v2829_v57, %v2830_v16  ;;  %v2667_v39 = vrot.slane %v10249_v43, 2  ;;  %v2737_v21 = vrot.slane %v10245_v8, 3 }
 0x283   : > { %13173 = vst [vmem:[#allocation113_spill] sm:$0xff] %v10272_v58  ;;  %13174 = vst [vmem:[#allocation36_spill] sm:$0xff] %v10275_v10  ;;  %5957 = vrot.lane.b32.xlu1 %v13178_v40, %s6352_s4  ;;  %v5961_v23 = vpack.i.bf16 %v13180_v55, %v13179_v27  ;;  %v10292_v49 = vld [vmem:[%s6420_s25 + $0x1c0] sm:$0xf]  ;;  %v13183_v27 = vrot.slane %v13182_v25, 2  ;;  %v13184_v55 = vld [vmem:[#allocation16_spill] sm:$0xff]  ;;  %v10324_v10 = vpack.i.bf16 %v2830_v16, %v2831_v19 }
 0x284   : > { %13177 = vst [vmem:[#allocation123_spill] sm:$0xff] %v10283_v18  ;;  %v2669_v17 = vrot.slane %v10292_v49, 2  ;;  %v10298_v40 = vpop.permute.xlu1 %5677  ;;  %v13185_v24 = vrot.slane %v13184_v55, 2  ;;  %v2740_v4 = vrot.slane %v10292_v49, 3  ;;  %v2738_v28 = vrot.slane %v10249_v43, 3  ;;  %v10329_v38 = vld [vmem:[%s6420_s25 + $0x1c8] sm:$0xff] }
 0x285   : > { %13181 = vst [vmem:[#allocation73_spill] sm:$0xff] %v10298_v40  ;;  %v13186_v22 = vrot.slane %v13182_v25, 3  ;;  %v13187_v48 = vrot.slane %v13184_v55, 3  ;;  %v10316_v40 = vld [vmem:[%s6420_s25 + $0x1d0] sm:$0xff]  ;;  %v10326_v58 = vpack.i.bf16 %v2829_v57, %v2854_v62  ;;  %v10332_v25 = vld [vmem:[%s6420_s25 + $0x100] sm:$0xf]  ;;  %v2668_v55 = vsel %vm464_vm1, %v2666_v11, %v2667_v39 }
 0x286   : > { %5952 = vrot.lane.b32.xlu0 %v5951_v1, %s6351_s30  ;;  %v10304_v54 = vpack.i.bf16 %v13185_v24, %v13183_v27  ;;  %v10318_v45 = vpop.permute.xlu0 %5672  ;;  %v13189_v24 = vld [vmem:[#allocation27_spill] sm:$0xff]  ;;  %v10322_v27 = vpack.i.bf16 %v2855_v37, %v2853_v33  ;;  %v2670_v37 = vsel %vm464_vm1, %v2667_v39, %v2669_v17  ;;  %v10341_v33 = vld [vmem:[%s6420_s25 + $0x1d8] sm:$0xf]  ;;  %v2856_v11 = vrot.slane %v10329_v38, 7  ;;  %v6304_v44 = vld [vmem:[%s6420_s25 + $0x110] sm:$0xff] }
 0x287   : > { %v10313_v1 = vpack.i.bf16 %v13187_v48, %v13186_v22  ;;  %13188 = vst [vmem:[#allocation43_spill] sm:$0xff] %v10318_v45  ;;  %5967 = vrot.lane.b32.xlu1 %v13189_v24, %s6353_s5  ;;  %13190 = vst [vmem:[#allocation25_spill] sm:$0xff] %v10341_v33  ;;  %v13191_v57 = vld [vmem:[#allocation66_spill] sm:$0xff]  ;;  %v13192_v16 = vld [vmem:[#allocation31_spill] sm:$0xff]  ;;  %v2739_v45 = vsel %vm641_vm2, %v2737_v21, %v2738_v28  ;;  %v2741_v22 = vsel %vm641_vm2, %v2738_v28, %v2740_v4 }
 0x288   : > { %v10344_v62 = vpop.permute.xlu1 %5687  ;;  %v2857_v48 = vrot.slane %v10316_v40, 7  ;;  %v2833_v39 = vrot.slane %v6304_v44, 7  ;;  %v3070_v34 = vrot.slane %v10329_v38, 1  ;;  %v13194_v61 = vld [vmem:[#allocation76_spill] sm:$0xff]  ;;  %v13195_v19 = vld [vmem:[#allocation119_spill] sm:$0xff]  ;;  %v13198_v28 = vrot.slane %v13197_v20, 2 }
 0x289   : > { %v13196_v41 = vld [vmem:[#allocation120_spill] sm:$0xff]  ;;  %v10365_v12 = vpack.i.bf16 %v2670_v37, %v2668_v55  ;;  %v3073_v44 = vrot.slane %v10341_v33, 1  ;;  %v2832_v3 = vrot.slane %v6305_v46, 7  ;;  %v3141_v51 = vrot.slane %v10329_v38, 2 }
 0x28a   : > { %5962 = vrot.lane.b32.xlu0 %v5961_v23, %s6352_s4  ;;  %v3071_v23 = vrot.slane %v10316_v40, 1  ;;  %v10355_v47 = vpop.permute.xlu0 %5682  ;;  %v10363_v53 = vpack.i.bf16 %v13198_v28, %v2669_v17  ;;  %v3144_v35 = vrot.slane %v10341_v33, 2  ;;  %v13199_v17 = vrot.slane %v13197_v20, 3 }
 0x28b   : > { %13193 = vst [vmem:[#allocation127_spill] sm:$0xff] %v10355_v47  ;;  %5977 = vrot.lane.b32.xlu1 %v13194_v61, %s6354_s6  ;;  %v3142_v47 = vrot.slane %v10316_v40, 2  ;;  %v10380_v55 = vpack.i.bf16 %v2741_v22, %v2739_v45  ;;  %v2858_v37 = vsel %vm2810_vm3, %v2856_v11, %v2857_v48  ;;  %v2834_v46 = vsel %vm2810_vm3, %v2832_v3, %v2833_v39 }
 0x28c   : > { %v10374_v21 = vpop.permute.xlu1 %5697  ;;  %v10378_v28 = vpack.i.bf16 %v13199_v17, %v2740_v4  ;;  %v10385_v14 = vsel %vm287_vm0, %v3070_v34, %v3071_v23  ;;  %v10392_v60 = vsel %vm287_vm0, %v3071_v23, %v3073_v44  ;;  %v3212_v4 = vrot.slane %v10329_v38, 3 }
 0x28d   : > { %13200 = vst [vmem:[#allocation128_spill] sm:$0xff] %v10385_v14  ;;  %v3213_v45 = vrot.slane %v10316_v40, 3  ;;  %v3215_v20 = vrot.slane %v10341_v33, 3  ;;  %v10397_v22 = vpack.i.bf16 %v2832_v3, %v2857_v48  ;;  %v10400_v17 = vsel %vm464_vm1, %v3141_v51, %v3142_v47 }
 0x28e   : > { %5972 = vrot.lane.b32.xlu0 %v10304_v54, %s6353_s5  ;;  %v10387_v50 = vpop.permute.xlu0 %5692  ;;  %v10403_v34 = vsel %vm464_vm1, %v3142_v47, %v3144_v35  ;;  %v10407_v23 = vpack.i.bf16 %v2858_v37, %v2856_v11  ;;  %v10411_v32 = vpack.i.bf16 %v2833_v39, %v2834_v46  ;;  %v5640_v3 = vunpack.i.h.bf16 %v10143_v42  ;;  %v13201_v39 = vld [vmem:[#allocation28_spill] sm:$0xff] }
 0x28f   : > { %5987 = vrot.lane.b32.xlu1 %v13189_v24, %s6348_s27  ;;  %v10428_v37 = vpack.i.bf16 %v13201_v39, %v3073_v44  ;;  %v10431_v46 = vsel %vm641_vm2, %v3212_v4, %v3213_v45  ;;  %v10434_v51 = vsel %vm641_vm2, %v3213_v45, %v3215_v20  ;;  %v5634_v11 = vunpack.i.l.bf16 %v10161_v31 }
 0x290   : > { %v5708_v24 = vpop.permute.xlu1 %5707  ;;  %v5644_v44 = vunpack.i.l.bf16 %v10200_v52  ;;  %v5660_v4 = vunpack.i.h.bf16 %v10219_v5  ;;  %v5655_v39 = vunpack.i.h.bf16 %v10241_v15  ;;  %v13209_v52 = vld [vmem:[#allocation77_spill] sm:$0xff]  ;;  %vm13389_vm1 = vcmask 392192  }
 0x291   : > { %v5710_v47 = vunpack.i.h.bf16 %v5708_v24  ;;  %v5709_v48 = vunpack.i.l.bf16 %v5708_v24  ;;  %v5639_v24 = vunpack.i.l.bf16 %v10143_v42  ;;  %vm13391_vm2 = vmmov %vm13389_vm1 }
 0x292   : > { %5982 = vrot.lane.b32.xlu0 %v10313_v1, %s6354_s6  ;;  %v10421_v56 = vpop.permute.xlu0 %5702  ;;  %vm13394_vm12 = vmmov %vm13389_vm1 }
 0x293   : > { %5997 = vrot.lane.b32.xlu1 %v13194_v61, %s6349_s28  ;;  %v3373_v33 = vsel %vm2198_vm7, %v13202_v9, %v5709_v48  ;;  %v13203_v61 = vld [vmem:[#allocation62_spill] sm:$0xff]  ;;  %v3374_v45 = vsel %vm2198_vm7, %v8939_v7, %v5710_v47  ;;  %v10452_v9 = vsel %vm2099_vm4, %v9588_v30, %v5640_v3  ;;  %v10458_v48 = vpack.i.bf16 %v12956_v59, %v3215_v20  ;;  %v6307_v59 = vld [vmem:[%s6420_s25 + $0x70] sm:$0xf]  ;;  %vm13396_vm13 = vmmov %vm13389_vm1 }
 0x294   : > { %v10441_v14 = vpack.i.bf16 %v13203_v61, %v3144_v35  ;;  %v5718_v42 = vpop.permute.xlu1 %5717  ;;  %v5659_v35 = vunpack.i.l.bf16 %v10219_v5  ;;  %v5654_v7 = vunpack.i.l.bf16 %v10241_v15  ;;  %v10469_v5 = vsel %vm2099_vm4, %v9405_v0, %v5639_v24  ;;  %v13211_v24 = vld [vmem:[#allocation6_spill] sm:$0xff]  ;;  %vm13400_vm3 = vmmov %vm13389_vm1 }
 0x295   : > { %13205 = vst [vmem:[#allocation75_spill] sm:$0xff] %v10458_v48  ;;  %v5719_v61 = vunpack.i.l.bf16 %v5718_v42  ;;  %v10473_v20 = vsel %vm2099_vm4, %v6307_v59, %v5635_v29  ;;  %v13207_v15 = vunpack.i.h.bf16 %v12965_v36  ;;  %v10486_v0 = vsel %vm2099_vm4, %v13209_v52, %v5660_v4  ;;  %v13214_v52 = vld [vmem:[#allocation111_spill] sm:$0xff] }
 0x296   : > { %13204 = vst [vmem:[#allocation74_spill] sm:$0xff] %v10441_v14  ;;  %5992 = vrot.lane.b32.xlu0 %v10304_v54, %s6348_s27  ;;  %v13206_v54 = vunpack.i.l.bf16 %v12965_v36  ;;  %v5713_v30 = vpop.permute.xlu0 %5712  ;;  %13210 = vst [vmem:[#allocation22_spill] sm:$0xff] %v10486_v0  ;;  %v5720_v0 = vunpack.i.h.bf16 %v5718_v42 }
 0x297   : > { %6007 = vrot.lane.b32.xlu1 %v10322_v27, %s6350_s29  ;;  %v3422_v3 = vsel %vm2231_vm8, %v3374_v45, %v13207_v15  ;;  %v10482_v27 = vsel %vm2099_vm4, %v9854_v6, %v5644_v44  ;;  %v3350_v29 = vsel %vm2198_vm7, %v13211_v24, %v5719_v61  ;;  %v6309_v45 = vld [vmem:[%s6420_s25 + $0x148] sm:$0xf]  ;;  %v13212_v6 = vld [vmem:[#allocation157_spill] sm:$0xff]  ;;  %v5700_v24 = vunpack.i.h.bf16 %v10374_v21 }
 0x298   : > { %v3421_v47 = vsel %vm2231_vm8, %v3373_v33, %v13206_v54  ;;  %v5715_v33 = vunpack.i.h.bf16 %v5713_v30  ;;  %v6308_v54 = vld [vmem:[%s6420_s25 + $0x58] sm:$0xf]  ;;  %13208 = vst [vmem:[#allocation78_spill] sm:$0xff] %v10482_v27  ;;  %v10492_v36 = vpop.permute.xlu1 %5727  ;;  %v10496_v59 = vsel %vm2099_vm4, %v6309_v45, %v5659_v35  ;;  %v13213_v44 = vunpack.i.l.bf16 %v13212_v6 }
 0x299   : > { %v3283_v31 = vsel %vm2099_vm4, %v6308_v54, %v5634_v11  ;;  %v5689_v11 = vunpack.i.l.bf16 %v10344_v62  ;;  %v6310_v54 = vld [vmem:[%s6420_s25 + $0x130] sm:$0xf]  ;;  %v13215_v35 = vunpack.i.h.bf16 %v13212_v6 }
 0x29a   : > { %6002 = vrot.lane.b32.xlu0 %v10313_v1, %s6349_s28  ;;  %v3469_v15 = vsel %vm2264_vm9, %v3421_v47, %v13213_v44  ;;  %v3349_v4 = vsel %vm2198_vm7, %v13214_v52, %v5715_v33  ;;  %v10506_v61 = vsel %vm2099_vm4, %v6310_v54, %v5655_v39  ;;  %v3291_v1 = vsel %vm2099_vm4, %v10414_v26, %v5654_v7  ;;  %v5723_v27 = vpop.permute.xlu0 %5722  ;;  %v13216_v44 = vld [vmem:[#allocation131_spill] sm:$0xff]  ;;  %v13218_v54 = vld [vmem:[#allocation173_spill] sm:$0xff] }
 0x29b   : > { %v3470_v45 = vsel %vm2264_vm9, %v3422_v3, %v13215_v35  ;;  %6017 = vrot.lane.b32.xlu1 %v10324_v10, %s6350_s29  ;;  %v5664_v47 = vunpack.i.l.bf16 %v10283_v18  ;;  %v5705_v33 = vunpack.i.h.bf16 %v10421_v56  ;;  %v5704_v39 = vunpack.i.l.bf16 %v10421_v56 }
 0x29c   : > { %v13217_v52 = vunpack.i.h.bf16 %v13216_v44  ;;  %v13219_v48 = vunpack.i.l.bf16 %v13218_v54  ;;  %v13220_v3 = vunpack.i.l.bf16 %v13216_v44  ;;  %v5714_v10 = vunpack.i.l.bf16 %v5713_v30  ;;  %v10530_v18 = vpop.permute.xlu1 %5737 }
 0x29d   : > { %v5690_v56 = vunpack.i.h.bf16 %v10344_v62  ;;  %v3305_v14 = vsel %vm2132_vm5, %v3283_v31, %v5689_v11  ;;  %v3313_v42 = vsel %vm2132_vm5, %v3291_v1, %v5700_v24  ;;  %v13224_v62 = vpack.i.bf16 %v10332_v25, %v10292_v49 }
 0x29e   : > { %v3398_v7 = vsel %vm2231_vm8, %v3350_v29, %v13217_v52  ;;  %v3517_v6 = vsel %vm2297_vm10, %v3469_v15, %v13219_v48  ;;  %v3397_v35 = vsel %vm2231_vm8, %v3349_v4, %v13220_v3  ;;  %6012 = vrot.lane.b32.xlu0 %v10326_v58, %s6350_s29  ;;  %v13221_v29 = vunpack.i.h.bf16 %v13218_v54  ;;  %v13222_v4 = vld [vmem:[#allocation148_spill] sm:$0xff]  ;;  %v5733_v3 = vpop.permute.xlu0 %5732 }
 0x29f   : > { %v5725_v48 = vunpack.i.h.bf16 %v5723_v27  ;;  %v5695_v15 = vunpack.i.h.bf16 %v10387_v50  ;;  %v13223_v30 = vunpack.i.h.bf16 %v13222_v4  ;;  %v5724_v58 = vunpack.i.l.bf16 %v5723_v27  ;;  %6027 = vrot.lane.b32.xlu1 %v13224_v62, %s6351_s30 }
 0x2a0   : > { %v3518_v52 = vsel %vm2297_vm10, %v3470_v45, %v13221_v29  ;;  %v3327_v31 = vsel %vm2165_vm6, %v3305_v14, %v5705_v33  ;;  %v3335_v11 = vsel %vm2165_vm6, %v3313_v42, %v5704_v39  ;;  %v13225_v45 = vunpack.i.l.bf16 %v13222_v4  ;;  %v10561_v49 = vpop.permute.xlu1 %5747  ;;  %v13229_v39 = vld [vmem:[#allocation165_spill] sm:$0xff] }
 0x2a1   : > { %v3446_v44 = vsel %vm2264_vm9, %v3398_v7, %v13223_v30  ;;  %v13226_v24 = vunpack.i.l.bf16 %v13079_v63  ;;  %v3351_v27 = vsel %vm2198_vm7, %v3327_v31, %v5720_v0  ;;  %v3375_v7 = vsel %vm2198_vm7, %v3335_v11, %v5714_v10 }
 0x2a2   : > { %v3445_v1 = vsel %vm2264_vm9, %v3397_v35, %v13225_v45  ;;  %v5730_v29 = vunpack.i.h.bf16 %v10492_v36  ;;  %v13227_v14 = vpack.i.bf16 %v10249_v43, %v10245_v8  ;;  %v13228_v25 = vunpack.i.h.bf16 %v13079_v63 }
 0x2a3   : > { %v3565_v54 = vsel %vm2330_vm11, %v3517_v6, %v13226_v24  ;;  %v13230_v6 = vunpack.i.h.bf16 %v13229_v39  ;;  %v5729_v35 = vunpack.i.l.bf16 %v10492_v36  ;;  %v3399_v10 = vsel %vm2231_vm8, %v3351_v27, %v5725_v48 }
 0x2a4   : > { %6022 = vrot.lane.b32.xlu0 %v13227_v14, %s6351_s30  ;;  %v10566_v33 = vsel %vm2330_vm11, %v3518_v52, %v13228_v25  ;;  %v5735_v42 = vunpack.i.h.bf16 %v5733_v3  ;;  %v5694_v4 = vunpack.i.l.bf16 %v10387_v50  ;;  %v13231_v8 = vunpack.i.l.bf16 %v13229_v39  ;;  %v10578_v52 = vpop.permute.xlu0 %5742 }
 0x2a5   : > { %v3494_v0 = vsel %vm2297_vm10, %v3446_v44, %v13230_v6  ;;  %v3423_v63 = vsel %vm2231_vm8, %v3375_v7, %v5724_v58  ;;  %v5734_v30 = vunpack.i.l.bf16 %v5733_v3  ;;  %v13232_v44 = vpack.i.bf16 %v13192_v16, %v13191_v57  ;;  %v5758_v16 = vpop.permute.xlu1 %5757 }
 0x2a6   : > { %v3493_v43 = vsel %vm2297_vm10, %v3445_v1, %v13231_v8  ;;  %v10586_v36 = vsel %vm2099_vm4, %v9857_v2, %v5664_v47  ;;  %v3306_v50 = vsel %vm2132_vm5, %v10473_v20, %v5690_v56  ;;  %v3677_v48 = vrot.slane %v3565_v54, 1  ;;  %v13234_v2 = vld [vmem:[#allocation183_spill] sm:$0xff]  ;;  %v13240_v8 = vld [vmem:[#allocation54_spill] sm:$0xff] }
 0x2a7   : > { %6037 = vrot.lane.b32.xlu1 %v13232_v44, %s6352_s4  ;;  %v3678_v62 = vrot.slane %v10566_v33, 1  ;;  %v5740_v58 = vunpack.i.h.bf16 %v10530_v18  ;;  %v5739_v3 = vunpack.i.l.bf16 %v10530_v18  ;;  %v3447_v31 = vsel %vm2264_vm9, %v3399_v10, %v5730_v29  ;;  %v13237_v29 = vld [vmem:[#allocation17_spill] sm:$0xff]  ;;  %v13238_v10 = vld [vmem:[#allocation135_spill] sm:$0xff] }
 0x2a8   : > { %v13233_v57 = vpack.i.bf16 %v13196_v41, %v13195_v19  ;;  %v13235_v47 = vunpack.i.h.bf16 %v13234_v2  ;;  %v3471_v20 = vsel %vm2264_vm9, %v3423_v63, %v5729_v35  ;;  %v3495_v56 = vsel %vm2297_vm10, %v3447_v31, %v5735_v42  ;;  %v5753_v27 = vpop.permute.xlu0 %5752  ;;  %v13241_v63 = vld [vmem:[#allocation58_spill] sm:$0xff] }
 0x2a9   : > { %v5760_v45 = vunpack.i.h.bf16 %v5758_v16  ;;  %v13236_v18 = vunpack.i.l.bf16 %v13234_v2  ;;  %v5699_v24 = vunpack.i.l.bf16 %v10374_v21  ;;  %v10611_v41 = vsel %vm2132_vm5, %v10452_v9, %v5695_v15 }
 0x2aa   : > { %6032 = vrot.lane.b32.xlu0 %v13233_v57, %s6352_s4  ;;  %v10601_v11 = vsel %vm2330_vm11, %v3494_v0, %v13235_v47  ;;  %v10615_v19 = vsel %vm2132_vm5, %v10469_v5, %v5694_v4  ;;  %v3519_v54 = vsel %vm2297_vm10, %v3471_v20, %v5734_v30  ;;  %v5744_v7 = vunpack.i.l.bf16 %v10578_v52  ;;  %v5768_v5 = vpop.permute.xlu1 %5767 }
 0x2ab   : > { %v3541_v1 = vsel %vm2330_vm11, %v3493_v43, %v13236_v18  ;;  %6047 = vrot.lane.b32.xlu1 %v10363_v53, %s6353_s5  ;;  %v3352_v14 = vsel %vm2198_vm7, %v13237_v29, %v5760_v45  ;;  %v5755_v25 = vunpack.i.h.bf16 %v5753_v27  ;;  %v5754_v39 = vunpack.i.l.bf16 %v5753_v27 }
 0x2ac   : > { %v3543_v9 = vsel %vm2330_vm11, %v3495_v56, %v5740_v58  ;;  %v10629_v15 = vsel %vm287_vm0, %v3677_v48, %v3678_v62  ;;  %v3637_v6 = vrot.slane %v3541_v1, 1  ;;  %v3638_v0 = vrot.slane %v10601_v11, 1  ;;  %v13242_v58 = vld [vmem:[#allocation143_spill] sm:$0xff]  ;;  %v5763_v47 = vpop.permute.xlu0 %5762 }
 0x2ad   : > { %v3567_v35 = vsel %vm2330_vm11, %v3519_v54, %v5739_v3  ;;  %v13239_v42 = vunpack.i.l.bf16 %v13238_v10  ;;  %v3376_v43 = vsel %vm2198_vm7, %v13240_v8, %v5754_v39  ;;  %v3377_v30 = vsel %vm2198_vm7, %v13241_v63, %v5755_v25  ;;  %v13245_v54 = vld [vmem:[#allocation152_spill] sm:$0xff] }
 0x2ae   : > { %6042 = vrot.lane.b32.xlu0 %v10365_v12, %s6353_s5  ;;  %v5750_v44 = vunpack.i.h.bf16 %v10561_v49  ;;  %v5749_v48 = vunpack.i.l.bf16 %v10561_v49  ;;  %v13243_v31 = vunpack.i.l.bf16 %v13242_v58  ;;  %v13244_v3 = vunpack.i.h.bf16 %v13242_v58  ;;  %v13247_v25 = vld [vmem:[#allocation160_spill] sm:$0xff] }
 0x2af   : > { %v3400_v4 = vsel %vm2231_vm8, %v3352_v14, %v13239_v42  ;;  %6057 = vrot.lane.b32.xlu1 %v10378_v28, %s6354_s6  ;;  %v3640_v11 = vrot.slane %v3543_v9, 1  ;;  %v3314_v20 = vsel %vm2132_vm5, %v10506_v61, %v5744_v7  ;;  %v5765_v56 = vunpack.i.h.bf16 %v5763_v47  ;;  %v5778_v14 = vpop.permute.xlu1 %5777  ;;  %v13250_v42 = vld [vmem:[#allocation9_spill] sm:$0xff] }
 0x2b0   : > { %v3424_v57 = vsel %vm2231_vm8, %v3376_v43, %v13243_v31  ;;  %v3425_v2 = vsel %vm2231_vm8, %v3377_v30, %v13244_v3  ;;  %v5764_v45 = vunpack.i.l.bf16 %v5763_v47  ;;  %v3680_v18 = vrot.slane %v3567_v35, 1  ;;  %v5773_v43 = vpop.permute.xlu0 %5772  ;;  %v13251_v30 = vld [vmem:[#allocation168_spill] sm:$0xff] }
 0x2b1   : > { %v5745_v49 = vunpack.i.h.bf16 %v10578_v52  ;;  %v5759_v1 = vunpack.i.l.bf16 %v5758_v16  ;;  %v13246_v27 = vunpack.i.l.bf16 %v13245_v54  ;;  %v13248_v39 = vunpack.i.l.bf16 %v13247_v25 }
 0x2b2   : > { %6052 = vrot.lane.b32.xlu0 %v10380_v55, %s6354_s6  ;;  %v13249_v61 = vunpack.i.h.bf16 %v13247_v25  ;;  %v5769_v35 = vunpack.i.l.bf16 %v5768_v5  ;;  %v3353_v52 = vsel %vm2198_vm7, %v13250_v42, %v5764_v45  ;;  %v3328_v16 = vsel %vm2165_vm6, %v3306_v50, %v5750_v44 }
 0x2b3   : > { %v3448_v29 = vsel %vm2264_vm9, %v3400_v4, %v13246_v27  ;;  %v3472_v9 = vsel %vm2264_vm9, %v3424_v57, %v13248_v39  ;;  %v3336_v4 = vsel %vm2165_vm6, %v3314_v20, %v5749_v48  ;;  %v5770_v8 = vunpack.i.h.bf16 %v5768_v5  ;;  %6067 = vrot.lane.b32.xlu1 %v10363_v53, %s6348_s27  ;;  %v13254_v48 = vld [vmem:[#allocation176_spill] sm:$0xff] }
 0x2b4   : > { %v3473_v7 = vsel %vm2264_vm9, %v3425_v2, %v13249_v61  ;;  %v10671_v63 = vsel %vm287_vm0, %v3637_v6, %v3638_v0  ;;  %v13252_v58 = vunpack.i.l.bf16 %v13251_v30  ;;  %v3354_v57 = vsel %vm2198_vm7, %v3328_v16, %v5765_v56  ;;  %v5788_v56 = vpop.permute.xlu1 %5787 }
 0x2b5   : > { %v13253_v3 = vunpack.i.h.bf16 %v13238_v10  ;;  %v5775_v44 = vunpack.i.h.bf16 %v5773_v43  ;;  %v3378_v5 = vsel %vm2198_vm7, %v3336_v4, %v5759_v1  ;;  %v13255_v2 = vunpack.i.l.bf16 %v13254_v48 }
 0x2b6   : > { %v3496_v31 = vsel %vm2297_vm10, %v3448_v29, %v13252_v58  ;;  %v13256_v6 = vunpack.i.h.bf16 %v13254_v48  ;;  %v5774_v20 = vunpack.i.l.bf16 %v5773_v43  ;;  %6062 = vrot.lane.b32.xlu0 %v10365_v12, %s6348_s27  ;;  %v3315_v10 = vsel %vm2132_vm5, %v10496_v59, %v5745_v49  ;;  %v13258_v59 = vld [vmem:[#allocation187_spill] sm:$0xff] }
 0x2b7   : > { %v3401_v50 = vsel %vm2231_vm8, %v3353_v52, %v13253_v3  ;;  %v3520_v53 = vsel %vm2297_vm10, %v3472_v9, %v13255_v2  ;;  %v3426_v45 = vsel %vm2231_vm8, %v3378_v5, %v5769_v35  ;;  %v10695_v1 = vsel %vm287_vm0, %v3678_v62, %v3680_v18  ;;  %v5783_v9 = vpop.permute.xlu0 %5782  ;;  %6077 = vrot.lane.b32.xlu1 %v10378_v28, %s6349_s28  ;;  %v13263_v3 = vld [vmem:[#allocation69_spill] sm:$0xff] }
 0x2b8   : > { %v3521_v47 = vsel %vm2297_vm10, %v3473_v7, %v13256_v6  ;;  %v10698_v27 = vsel %vm287_vm0, %v3638_v0, %v3640_v11  ;;  %v13257_v29 = vunpack.i.h.bf16 %v13245_v54  ;;  %v5780_v39 = vunpack.i.h.bf16 %v5778_v14 }
 0x2b9   : > { %v3402_v12 = vsel %vm2231_vm8, %v3354_v57, %v5770_v8  ;;  %v13259_v49 = vunpack.i.l.bf16 %v13258_v59  ;;  %v5779_v62 = vunpack.i.l.bf16 %v5778_v14  ;;  %v13260_v11 = vunpack.i.l.bf16 %v13088_v13  ;;  %v5798_v14 = vpop.permute.xlu1 %5797 }
 0x2ba   : > { %v3449_v25 = vsel %vm2264_vm9, %v3401_v50, %v13257_v29  ;;  %v3450_v0 = vsel %vm2264_vm9, %v3402_v12, %v5775_v44  ;;  %v13261_v54 = vunpack.i.h.bf16 %v13088_v13  ;;  %v3474_v28 = vsel %vm2264_vm9, %v3426_v45, %v5774_v20  ;;  %6072 = vrot.lane.b32.xlu0 %v10380_v55, %s6349_s28  ;;  %v13265_v45 = vld [vmem:[#allocation65_spill] sm:$0xff]  ;;  %s158_s28 = sand.u32 1, %s6337_s12   ;;  %s4389_s12 = smul.u32 24, %s6414_s21 }
 0x2bb   : > { %v10709_v33 = vsel %vm2330_vm11, %v3496_v31, %v13259_v49  ;;  %v10715_v18 = vsel %vm2330_vm11, %v3520_v53, %v13260_v11  ;;  %v5790_v7 = vunpack.i.h.bf16 %v5788_v56  ;;  %v5789_v35 = vunpack.i.l.bf16 %v5788_v56  ;;  %v5793_v58 = vpop.permute.xlu0 %5792  ;;  %6087 = vrot.lane.b32.xlu1 %v10397_v22, %s6350_s29  ;;  %s4284_s21 = sshll.u32 (%p6408_p4), %s6396_s15, 4 }
 0x2bc   : > { %v10720_v61 = vsel %vm2330_vm11, %v3521_v47, %v13261_v54  ;;  %v6136_v42 = vpack.i.bf16 %v10695_v1, %v10629_v15  ;;  %v13262_v52 = vunpack.i.h.bf16 %v13251_v30  ;;  %v5784_v4 = vunpack.i.l.bf16 %v5783_v9  ;;  %s4132_s9 = scalar_lea.vmem (%p6408_p4), %s11870_s2, %s4284_s21 }
 0x2bd   : > { %v5800_v13 = vunpack.i.h.bf16 %v5798_v14  ;;  %v6141_v8 = vpack.i.bf16 %v10698_v27, %v10671_v63  ;;  %v3498_v43 = vsel %vm2297_vm10, %v3450_v0, %v5780_v39  ;;  %v3682_v55 = vrot.slane %v10715_v18, 1  ;;  %v5808_v22 = vpop.permute.xlu1 %5807  ;;  %v13273_v18 = vld [vmem:[#allocation159_spill] sm:$0xff] }
 0x2be   : > { %v3497_v16 = vsel %vm2297_vm10, %v3449_v25, %v13262_v52  ;;  %v3683_v31 = vrot.slane %v10720_v61, 1  ;;  %v3642_v57 = vrot.slane %v10709_v33, 1  ;;  %v3522_v30 = vsel %vm2297_vm10, %v3474_v28, %v5779_v62  ;;  %6082 = vrot.lane.b32.xlu0 %v10407_v23, %s6350_s29  ;;  %v13266_v25 = vld [vmem:[#allocation61_spill] sm:$0xff]  ;;  %v13269_v23 = vld [vmem:[#allocation142_spill] sm:$0xff] }
 0x2bf   : > { %v3355_v50 = vsel %vm2198_vm7, %v13263_v3, %v5800_v13  ;;  %v5795_v44 = vunpack.i.h.bf16 %v5793_v58  ;;  %v5794_v5 = vunpack.i.l.bf16 %v5793_v58  ;;  %v3329_v48 = vsel %vm2165_vm6, %v10615_v19, %v5790_v7  ;;  %v5803_v0 = vpop.permute.xlu0 %5802  ;;  %v13276_v58 = vld [vmem:[#allocation175_spill] sm:$0xff] }
 0x2c0   : > { %v3337_v2 = vsel %vm2165_vm6, %v3315_v10, %v5789_v35  ;;  %v5785_v53 = vunpack.i.h.bf16 %v5783_v9  ;;  %v13264_v6 = vunpack.i.h.bf16 %v13258_v59  ;;  %v3570_v20 = vsel %vm2330_vm11, %v3522_v30, %v5784_v4  ;;  %v13267_v10 = vld [vmem:[#allocation134_spill] sm:$0xff] }
 0x2c1   : > { %v5799_v56 = vunpack.i.l.bf16 %v5798_v14  ;;  %v3380_v29 = vsel %vm2198_vm7, %v13265_v45, %v5795_v44  ;;  %v3379_v19 = vsel %vm2198_vm7, %v13266_v25, %v5794_v5  ;;  %v13268_v39 = vunpack.i.l.bf16 %v13267_v10  ;;  %v5818_v13 = vpop.permute.xlu1 %5817  ;;  %v13283_v45 = vld [vmem:[#allocation128_spill] sm:$0xff] }
 0x2c2   : > { %v10749_v47 = vsel %vm2330_vm11, %v3497_v16, %v13264_v6  ;;  %v13270_v9 = vunpack.i.h.bf16 %v13269_v23  ;;  %v13271_v49 = vunpack.i.l.bf16 %v13269_v23  ;;  %v5809_v62 = vunpack.i.l.bf16 %v5808_v22  ;;  %6092 = vrot.lane.b32.xlu0 %v10411_v32, %s6350_s29  ;;  %v13286_v23 = vld [vmem:[#allocation167_spill] sm:$0xff]  ;;  %s4387_s29 = smul.u32 48, %s158_s28 }
 0x2c3   : > { %v3403_v12 = vsel %vm2231_vm8, %v3355_v50, %v13268_v39  ;;  %v13272_v11 = vpack.i.bf16 %v10316_v40, %v10329_v38  ;;  %v13274_v54 = vunpack.i.h.bf16 %v13273_v18  ;;  %v13275_v28 = vunpack.i.l.bf16 %v13273_v18  ;;  %v13278_v50 = vld [vmem:[#allocation114_spill] sm:$0xff] }
 0x2c4   : > { %v3428_v59 = vsel %vm2231_vm8, %v3380_v29, %v13270_v9  ;;  %v3427_v33 = vsel %vm2231_vm8, %v3379_v19, %v13271_v49  ;;  %v5805_v35 = vunpack.i.h.bf16 %v5803_v0  ;;  %v5804_v14 = vunpack.i.l.bf16 %v5803_v0  ;;  %v13290_v0 = vld [vmem:[#allocation194_spill] sm:$0xff] }
 0x2c5   : > { %6097 = vrot.lane.b32.xlu1 %v13272_v11, %s6351_s30  ;;  %v3476_v61 = vsel %vm2264_vm9, %v3428_v59, %v13274_v54  ;;  %v3475_v7 = vsel %vm2264_vm9, %v3427_v33, %v13275_v28  ;;  %v3546_v52 = vsel %vm2330_vm11, %v3498_v43, %v5785_v53  ;;  %v3685_v16 = vrot.slane %v3570_v20, 1  ;;  %v13279_v43 = vld [vmem:[#allocation151_spill] sm:$0xff]  ;;  %v13288_v33 = vld [vmem:[#allocation25_spill] sm:$0xff] }
 0x2c6   : > { %v5810_v4 = vunpack.i.h.bf16 %v5808_v22  ;;  %v3643_v38 = vrot.slane %v10749_v47, 1  ;;  %v3381_v40 = vsel %vm2198_vm7, %v3337_v2, %v5799_v56  ;;  %v13277_v30 = vunpack.i.l.bf16 %v13276_v58  ;;  %v5813_v56 = vpop.permute.xlu0 %5812 }
 0x2c7   : > { %v3356_v44 = vsel %vm2198_vm7, %v13278_v50, %v5804_v14  ;;  %v3357_v5 = vsel %vm2198_vm7, %v3329_v48, %v5805_v35  ;;  %v13280_v53 = vunpack.i.l.bf16 %v13279_v43  ;;  %v13281_v32 = vunpack.i.h.bf16 %v13276_v58 }
 0x2c8   : > { %v3523_v3 = vsel %vm2297_vm10, %v3475_v7, %v13277_v30  ;;  %v3429_v47 = vsel %vm2231_vm8, %v3381_v40, %v5809_v62  ;;  %v13282_v2 = vunpack.i.h.bf16 %v13267_v10  ;;  %v13284_v29 = vpack.i.bf16 %v10392_v60, %v13283_v45  ;;  %v10811_v60 = vpop.permute.xlu1 %5827 }
 0x2c9   : > { %v3451_v22 = vsel %vm2264_vm9, %v3403_v12, %v13280_v53  ;;  %v3524_v6 = vsel %vm2297_vm10, %v3476_v61, %v13281_v32  ;;  %v13285_v48 = vunpack.i.h.bf16 %v13279_v43  ;;  %v5820_v19 = vunpack.i.h.bf16 %v5818_v13 }
 0x2ca   : > { %v3404_v20 = vsel %vm2231_vm8, %v3356_v44, %v13282_v2  ;;  %6107 = vrot.lane.b32.xlu1 %v13284_v29, %s6352_s4  ;;  %v5815_v39 = vunpack.i.h.bf16 %v5813_v56  ;;  %v5814_v12 = vunpack.i.l.bf16 %v5813_v56  ;;  %v13287_v9 = vunpack.i.h.bf16 %v13286_v23  ;;  %v13295_v44 = vld [vmem:[#allocation186_spill] sm:$0xff] }
 0x2cb   : > { %v3452_v25 = vsel %vm2264_vm9, %v3404_v20, %v13285_v48  ;;  %v5819_v10 = vunpack.i.l.bf16 %v5818_v13  ;;  %v3405_v49 = vsel %vm2231_vm8, %v3357_v5, %v5810_v4  ;;  %v13289_v62 = vpack.i.bf16 %v10414_v26, %v13288_v33  ;;  %v5823_v13 = vpop.permute.xlu0 %5822 }
 0x2cc   : > { %v3500_v59 = vsel %vm2297_vm10, %v3452_v25, %v13287_v9  ;;  %v13291_v11 = vunpack.i.l.bf16 %v13290_v0  ;;  %v3453_v54 = vsel %vm2264_vm9, %v3405_v49, %v5815_v39  ;;  %v3477_v61 = vsel %vm2264_vm9, %v3429_v47, %v5814_v12  ;;  %v13299_v25 = vld [vmem:[#allocation197_spill] sm:$0xff]  ;;  %v13300_v39 = vld [vmem:[#allocation70_spill] sm:$0xff] }
 0x2cd   : > { %6102 = vrot.lane.b32.xlu0 %v13289_v62, %s6351_s30  ;;  %v10819_v28 = vsel %vm287_vm0, %v3682_v55, %v3683_v31  ;;  %v13292_v7 = vunpack.i.h.bf16 %v13290_v0  ;;  %v3645_v14 = vrot.slane %v3546_v52, 1  ;;  %v13293_v26 = vunpack.i.l.bf16 %v13286_v23  ;;  %v13304_v49 = vld [vmem:[#allocation74_spill] sm:$0xff]  ;;  %s11834_s30 = scalar_lea.vmem [#allocation2], %s4387_s29 }
 0x2ce   : > { %v3571_v18 = vsel %vm2330_vm11, %v3523_v3, %v13291_v11  ;;  %v13294_v40 = vpack.i.bf16 %v10403_v34, %v10400_v17  ;;  %v3686_v58 = vsel %vm287_vm0, %v3683_v31, %v3685_v16  ;;  %v10833_v55 = vsel %vm287_vm0, %v3642_v57, %v3643_v38  ;;  %v5838_v17 = vpop.permute.xlu1 %5837  ;;  %v13305_v62 = vld [vmem:[#allocation22_spill] sm:$0xff] }
 0x2cf   : > { %v3572_v35 = vsel %vm2330_vm11, %v3524_v6, %v13292_v7  ;;  %v3499_v4 = vsel %vm2297_vm10, %v3451_v22, %v13293_v26  ;;  %v5825_v30 = vunpack.i.h.bf16 %v5823_v13  ;;  %v5824_v3 = vunpack.i.l.bf16 %v5823_v13  ;;  %v5833_v6 = vpop.permute.xlu0 %5832 }
 0x2d0   : > { %6117 = vrot.lane.b32.xlu1 %v13294_v40, %s6353_s5  ;;  %v3687_v50 = vrot.slane %v3571_v18, 1  ;;  %v13296_v52 = vunpack.i.h.bf16 %v13295_v44  ;;  %v5829_v43 = vunpack.i.l.bf16 %v10811_v60  ;;  %v3501_v53 = vsel %vm2297_vm10, %v3453_v54, %v5820_v19 }
 0x2d1   : > { %v3525_v22 = vsel %vm2297_vm10, %v3477_v61, %v5819_v10  ;;  %6112 = vrot.lane.b32.xlu0 %v10428_v37, %s6352_s4  ;;  %v3688_v34 = vrot.slane %v3572_v35, 1  ;;  %v3549_v31 = vsel %vm2330_vm11, %v3501_v53, %v5825_v30  ;;  %v5840_v16 = vunpack.i.h.bf16 %v5838_v17  ;;  %v13306_v61 = vld [vmem:[#allocation162_spill] sm:$0xff] }
 0x2d2   : > { %v3548_v5 = vsel %vm2330_vm11, %v3500_v59, %v13296_v52  ;;  %v3573_v57 = vsel %vm2330_vm11, %v3525_v22, %v5824_v3  ;;  %v5839_v32 = vunpack.i.l.bf16 %v5838_v17  ;;  %v13297_v47 = vpack.i.bf16 %v10434_v51, %v10431_v46  ;;  %v13301_v51 = vld [vmem:[#allocation145_spill] sm:$0xff]  ;;  %v5848_v33 = vpop.permute.xlu1 %5847 }
 0x2d3   : > { %v6146_v2 = vpack.i.bf16 %v3686_v58, %v10819_v28  ;;  %v10851_v20 = vsel %vm287_vm0, %v3643_v38, %v3645_v14  ;;  %v13298_v37 = vunpack.i.l.bf16 %v13295_v44  ;;  %v3648_v45 = vrot.slane %v3548_v5, 1  ;;  %v5843_v13 = vpop.permute.xlu0 %5842  ;;  %v13309_v44 = vld [vmem:[#allocation71_spill] sm:$0xff] }
 0x2d4   : > { %6127 = vrot.lane.b32.xlu1 %v13297_v47, %s6354_s6  ;;  %v3650_v29 = vrot.slane %v3549_v31, 1  ;;  %v3690_v48 = vrot.slane %v3573_v57, 1  ;;  %v3382_v19 = vsel %vm2198_vm7, %v13299_v25, %v5839_v32  ;;  %v3383_v12 = vsel %vm2198_vm7, %v13300_v39, %v5840_v16  ;;  %v13310_v5 = vld [vmem:[#allocation75_spill] sm:$0xff]  ;;  %v13316_v57 = vld [vmem:[#allocation118_spill] sm:$0xff] }
 0x2d5   : > { %v3547_v56 = vsel %vm2330_vm11, %v3499_v4, %v13298_v37  ;;  %v13302_v46 = vunpack.i.l.bf16 %v13301_v51  ;;  %v13303_v38 = vunpack.i.h.bf16 %v13301_v51  ;;  %v5835_v59 = vunpack.i.h.bf16 %v5833_v6  ;;  %6122 = vrot.lane.b32.xlu0 %v13304_v49, %s6353_s5  ;;  %v13321_v51 = vld [vmem:[#allocation170_spill] sm:$0xff] }
 0x2d6   : > { %v5834_v10 = vunpack.i.l.bf16 %v5833_v6  ;;  %v3316_v0 = vsel %vm2132_vm5, %v13305_v62, %v5829_v43  ;;  %v3689_v11 = vsel %vm287_vm0, %v3687_v50, %v3688_v34  ;;  %v6151_v18 = vpack.i.bf16 %v10851_v20, %v10833_v55  ;;  %v5858_v15 = vpop.permute.xlu1 %5857  ;;  %v13317_v6 = vld [vmem:[#allocation154_spill] sm:$0xff]  ;;  %v13324_v62 = vld [vmem:[#allocation105_spill] sm:$0xff] }
 0x2d7   : > { %v3430_v23 = vsel %vm2231_vm8, %v3382_v19, %v13302_v46  ;;  %v3431_v9 = vsel %vm2231_vm8, %v3383_v12, %v13303_v38  ;;  %v3647_v54 = vrot.slane %v3547_v56, 1  ;;  %v13307_v28 = vunpack.i.l.bf16 %v13306_v61 }
 0x2d8   : > { %v13308_v35 = vunpack.i.h.bf16 %v13306_v61  ;;  %v5850_v26 = vunpack.i.h.bf16 %v5848_v33  ;;  %v5849_v4 = vunpack.i.l.bf16 %v5848_v33  ;;  %6137 = vrot.lane.b32.xlu1 %v6136_v42, %s6362_s18  ;;  %v5845_v40 = vunpack.i.h.bf16 %v5843_v13  ;;  %v13311_v42 = vld [vmem:[#allocation179_spill] sm:$0xff] }
 0x2d9   : > { %v3478_v7 = vsel %vm2264_vm9, %v3430_v23, %v13307_v28  ;;  %v5844_v58 = vunpack.i.l.bf16 %v5843_v13  ;;  %v3691_v55 = vsel %vm287_vm0, %v3688_v34, %v3690_v48  ;;  %v10885_v30 = vsel %vm287_vm0, %v3647_v54, %v3648_v45  ;;  %6132 = vrot.lane.b32.xlu0 %v13310_v5, %s6354_s6  ;;  %s178_s6 = scalar_lea.vmem %s11871_s3, %s4389_s12 }
 0x2da   : > { %v3479_v14 = vsel %vm2264_vm9, %v3431_v9, %v13308_v35  ;;  %v3330_v3 = vsel %vm2165_vm6, %v10611_v41, %v5835_v59  ;;  %v3338_v50 = vsel %vm2165_vm6, %v3316_v0, %v5834_v10  ;;  %v3359_v52 = vsel %vm2198_vm7, %v13309_v44, %v5849_v4  ;;  %v13314_v41 = vld [vmem:[#allocation137_spill] sm:$0xff] }
 0x2db   : > { %v3651_v1 = vsel %vm287_vm0, %v3648_v45, %v3650_v29  ;;  %v13312_v43 = vunpack.i.l.bf16 %v13311_v42  ;;  %v13313_v22 = vunpack.i.h.bf16 %v13311_v42  ;;  %v13315_v34 = vunpack.i.h.bf16 %v13314_v41  ;;  %v5853_v45 = vpop.permute.xlu0 %5852 }
 0x2dc   : > { %v3358_v16 = vsel %vm2198_vm7, %v13316_v57, %v5845_v40  ;;  %v3360_v32 = vsel %vm2198_vm7, %v3330_v3, %v5850_v26  ;;  %v13318_v47 = vunpack.i.h.bf16 %v13317_v6  ;;  %v13319_v37 = vunpack.i.l.bf16 %v13314_v41  ;;  %6147 = vrot.lane.b32.xlu1 %v6146_v2, %s6362_s18  ;;  %v5868_v2 = vpop.permute.xlu1 %5867  ;;  %v13327_v26 = vld [vmem:[#allocation189_spill] sm:$0xff] }
 0x2dd   : > { %v3526_v53 = vsel %vm2297_vm10, %v3478_v7, %v13312_v43  ;;  %v3527_v17 = vsel %vm2297_vm10, %v3479_v14, %v13313_v22  ;;  %v3407_v31 = vsel %vm2231_vm8, %v3359_v52, %v13315_v34  ;;  %v6156_v29 = vpack.i.bf16 %v3691_v55, %v3689_v11  ;;  %6142 = vrot.lane.b32.xlu0 %v6141_v8, %s6362_s18  ;;  %v13331_v34 = vld [vmem:[#allocation60_spill] sm:$0xff]  ;;  %v13332_v57 = vld [vmem:[#allocation41_spill] sm:$0xff] }
 0x2de   : > { %v3455_v20 = vsel %vm2264_vm9, %v3407_v31, %v13318_v47  ;;  %v3406_v56 = vsel %vm2231_vm8, %v3358_v16, %v13319_v37  ;;  %v3384_v48 = vsel %vm2198_vm7, %v3338_v50, %v5844_v58  ;;  %v13320_v25 = vunpack.i.l.bf16 %v13317_v6  ;;  %v13333_v47 = vld [vmem:[#allocation144_spill] sm:$0xff] }
 0x2df   : > { %v5855_v39 = vunpack.i.h.bf16 %v5853_v45  ;;  %v5854_v12 = vunpack.i.l.bf16 %v5853_v45  ;;  %v13322_v46 = vunpack.i.h.bf16 %v13321_v51  ;;  %v13323_v38 = vunpack.i.l.bf16 %v13321_v51  ;;  %v5863_v14 = vpop.permute.xlu0 %5862 }
 0x2e0   : > { %v3454_v19 = vsel %vm2264_vm9, %v3406_v56, %v13320_v25  ;;  %v5860_v59 = vunpack.i.h.bf16 %v5858_v15  ;;  %v5859_v10 = vunpack.i.l.bf16 %v5858_v15  ;;  %v13325_v0 = vunpack.i.l.bf16 %v13324_v62  ;;  %6157 = vrot.lane.b32.xlu1 %v6156_v29, %s6362_s18  ;;  %v5878_v3 = vpop.permute.xlu1 %5877 }
 0x2e1   : > { %v3503_v23 = vsel %vm2297_vm10, %v3455_v20, %v13322_v46  ;;  %v3502_v9 = vsel %vm2297_vm10, %v3454_v19, %v13323_v38  ;;  %v3408_v49 = vsel %vm2231_vm8, %v3360_v32, %v5855_v39  ;;  %v3432_v33 = vsel %vm2231_vm8, %v3384_v48, %v5854_v12  ;;  %6152 = vrot.lane.b32.xlu0 %v6151_v18, %s6362_s18 }
 0x2e2   : > { %v3574_v11 = vsel %vm2330_vm11, %v3526_v53, %v13325_v0  ;;  %v13326_v54 = vunpack.i.h.bf16 %v13324_v62  ;;  %v5830_v28 = vunpack.i.h.bf16 %v10811_v60  ;;  %v5870_v7 = vunpack.i.h.bf16 %v5868_v2 }
 0x2e3   : > { %v5869_v35 = vunpack.i.l.bf16 %v5868_v2  ;;  %v6161_v63 = vpack.i.bf16 %v3651_v1, %v10885_v30  ;;  %v5865_v27 = vunpack.i.h.bf16 %v5863_v14  ;;  %v5864_v8 = vunpack.i.l.bf16 %v5863_v14  ;;  %v5873_v43 = vpop.permute.xlu0 %5872 }
 0x2e4   : > { %v3575_v61 = vsel %vm2330_vm11, %v3527_v17, %v13326_v54  ;;  %v13328_v4 = vunpack.i.l.bf16 %v13327_v26  ;;  %v13329_v40 = vunpack.i.h.bf16 %v13327_v26  ;;  %v3456_v55 = vsel %vm2264_vm9, %v3408_v49, %v5860_v59  ;;  %v13330_v17 = vld [vmem:[#allocation78_spill] sm:$0xff] }
 0x2e5   : > { %v3480_v60 = vsel %vm2264_vm9, %v3432_v33, %v5859_v10  ;;  %v3692_v50 = vrot.slane %v3574_v11, 1  ;;  %v3693_v44 = vrot.slane %v3575_v61, 1  ;;  %v3504_v30 = vsel %vm2297_vm10, %v3456_v55, %v5865_v27  ;;  %6162 = vrot.lane.b32.xlu0 %v6161_v63, %s6362_s18  ;;  %v13342_v33 = vld [vmem:[#allocation49_spill] sm:$0xff]  ;;  %v13343_v11 = vld [vmem:[#allocation136_spill] sm:$0xff] }
 0x2e6   : > { %v3550_v13 = vsel %vm2330_vm11, %v3502_v9, %v13328_v4  ;;  %v3551_v58 = vsel %vm2330_vm11, %v3503_v23, %v13329_v40  ;;  %v3528_v52 = vsel %vm2297_vm10, %v3480_v60, %v5864_v8  ;;  %v5880_v5 = vunpack.i.h.bf16 %v5878_v3  ;;  %v13339_v9 = vld [vmem:[#allocation177_spill] sm:$0xff]  ;;  %v13347_v4 = vld [vmem:[#allocation50_spill] sm:$0xff] }
 0x2e7   : > { %v5879_v15 = vunpack.i.l.bf16 %v5878_v3  ;;  %v3552_v1 = vsel %vm2330_vm11, %v3504_v30, %v5870_v7  ;;  %v3576_v42 = vsel %vm2330_vm11, %v3528_v52, %v5869_v35  ;;  %v3652_v53 = vrot.slane %v3550_v13, 1  ;;  %v5883_v46 = vpop.permute.xlu0 %5882  ;;  %v13345_v27 = vld [vmem:[#allocation153_spill] sm:$0xff] }
 0x2e8   : > { %v3653_v22 = vrot.slane %v3551_v58, 1  ;;  %v3309_v18 = vsel %vm2132_vm5, %v13330_v17, %v5699_v24  ;;  %v3317_v41 = vsel %vm2132_vm5, %v10586_v36, %v5830_v28  ;;  %v3386_v16 = vsel %vm2198_vm7, %v13332_v57, %v5880_v5  ;;  %v5888_v24 = vpop.permute.xlu1 %5887  ;;  %v13336_v36 = vld [vmem:[#allocation161_spill] sm:$0xff] }
 0x2e9   : > { %v3385_v31 = vsel %vm2198_vm7, %v13331_v34, %v5879_v15  ;;  %v3655_v32 = vrot.slane %v3552_v1, 1  ;;  %v3695_v6 = vrot.slane %v3576_v42, 1  ;;  %v13334_v20 = vunpack.i.l.bf16 %v13333_v47  ;;  %v13349_v30 = vld [vmem:[#allocation169_spill] sm:$0xff] }
 0x2ea   : > { %v13335_v21 = vunpack.i.h.bf16 %v13333_v47  ;;  %v13337_v45 = vunpack.i.l.bf16 %v13336_v36  ;;  %v13338_v48 = vunpack.i.h.bf16 %v13336_v36  ;;  %v5875_v19 = vunpack.i.h.bf16 %v5873_v43 }
 0x2eb   : > { %v3433_v37 = vsel %vm2231_vm8, %v3385_v31, %v13334_v20  ;;  %v5889_v39 = vunpack.i.l.bf16 %v5888_v24  ;;  %v5874_v12 = vunpack.i.l.bf16 %v5873_v43  ;;  %v5890_v51 = vunpack.i.h.bf16 %v5888_v24  ;;  %v13356_v24 = vld [vmem:[#allocation188_spill] sm:$0xff] }
 0x2ec   : > { %v3434_v56 = vsel %vm2231_vm8, %v3386_v16, %v13335_v21  ;;  %v3481_v29 = vsel %vm2264_vm9, %v3433_v37, %v13337_v45  ;;  %v3694_v23 = vsel %vm287_vm0, %v3692_v50, %v3693_v44  ;;  %v3654_v38 = vsel %vm287_vm0, %v3652_v53, %v3653_v22  ;;  %v5898_v14 = vpop.permute.xlu1 %5897  ;;  %v13353_v16 = vld [vmem:[#allocation196_spill] sm:$0xff] }
 0x2ed   : > { %v3482_v25 = vsel %vm2264_vm9, %v3434_v56, %v13338_v48  ;;  %v13340_v59 = vunpack.i.l.bf16 %v13339_v9  ;;  %v13341_v2 = vunpack.i.h.bf16 %v13339_v9  ;;  %v3362_v62 = vsel %vm2198_vm7, %v13342_v33, %v5889_v39 }
 0x2ee   : > { %v5885_v0 = vunpack.i.h.bf16 %v5883_v46  ;;  %v13344_v54 = vunpack.i.h.bf16 %v13343_v11  ;;  %v5884_v28 = vunpack.i.l.bf16 %v5883_v46  ;;  %v3696_v7 = vsel %vm287_vm0, %v3693_v44, %v3695_v6  ;;  %v5893_v44 = vpop.permute.xlu0 %5892 }
 0x2ef   : > { %v3529_v10 = vsel %vm2297_vm10, %v3481_v29, %v13340_v59  ;;  %v3530_v49 = vsel %vm2297_vm10, %v3482_v25, %v13341_v2  ;;  %v3656_v35 = vsel %vm287_vm0, %v3653_v22, %v3655_v32  ;;  %v3331_v63 = vsel %vm2165_vm6, %v3309_v18, %v5875_v19  ;;  %v13359_v25 = vld [vmem:[#allocation29_spill] sm:$0xff] }
 0x2f0   : > { %v3410_v61 = vsel %vm2231_vm8, %v3362_v62, %v13344_v54  ;;  %v13346_v8 = vunpack.i.h.bf16 %v13345_v27  ;;  %v3361_v13 = vsel %vm2198_vm7, %v13347_v4, %v5885_v0  ;;  %v6166_v40 = vpack.i.bf16 %v3696_v7, %v3694_v23  ;;  %v5908_v34 = vpop.permute.xlu1 %5907  ;;  %v13360_v62 = vld [vmem:[#allocation89_spill] sm:$0xff] }
 0x2f1   : > { %v3339_v58 = vsel %vm2165_vm6, %v3317_v41, %v5874_v12  ;;  %v3363_v55 = vsel %vm2198_vm7, %v3331_v63, %v5890_v51  ;;  %v13348_v60 = vunpack.i.l.bf16 %v13343_v11  ;;  %v6171_v50 = vpack.i.bf16 %v3656_v35, %v3654_v38  ;;  %v13362_v11 = vld [vmem:[#allocation107_spill] sm:$0xff] }
 0x2f2   : > { %v3458_v26 = vsel %vm2264_vm9, %v3410_v61, %v13346_v8  ;;  %v13350_v52 = vunpack.i.h.bf16 %v13349_v30  ;;  %v13351_v15 = vunpack.i.l.bf16 %v13345_v27  ;;  %6167 = vrot.lane.b32.xlu1 %v6166_v40, %s6362_s18  ;;  %v5895_v42 = vunpack.i.h.bf16 %v5893_v44  ;;  %v5903_v56 = vpop.permute.xlu0 %5902  ;;  %v13365_v27 = vld [vmem:[#allocation90_spill] sm:$0xff] }
 0x2f3   : > { %v3409_v3 = vsel %vm2231_vm8, %v3361_v13, %v13348_v60  ;;  %v5894_v43 = vunpack.i.l.bf16 %v5893_v44  ;;  %v13352_v53 = vunpack.i.l.bf16 %v13349_v30  ;;  %v3387_v17 = vsel %vm2198_vm7, %v3339_v58, %v5884_v28  ;;  %6172 = vrot.lane.b32.xlu0 %v6171_v50, %s6362_s18  ;;  %v13364_v28 = vld [vmem:[#allocation19_spill] sm:$0xff]  ;;  %v13368_v13 = vld [vmem:[#allocation92_spill] sm:$0xff] }
 0x2f4   : > { %v3506_v5 = vsel %vm2297_vm10, %v3458_v26, %v13350_v52  ;;  %v3457_v1 = vsel %vm2264_vm9, %v3409_v3, %v13351_v15  ;;  %v5900_v18 = vunpack.i.h.bf16 %v5898_v14  ;;  %v5899_v41 = vunpack.i.l.bf16 %v5898_v14  ;;  %v11031_v38 = vpop.permute.xlu1 %5917  ;;  %v13367_v26 = vld [vmem:[#allocation181_spill] sm:$0xff]  ;;  %v13370_v3 = vld [vmem:[#allocation182_spill] sm:$0xff]  ;;  %v13371_v44 = vld [vmem:[#allocation67_spill] sm:$0xff] }
 0x2f5   : > { %v3505_v22 = vsel %vm2297_vm10, %v3457_v1, %v13352_v53  ;;  %v3411_v31 = vsel %vm2231_vm8, %v3363_v55, %v5895_v42  ;;  %v3435_v57 = vsel %vm2231_vm8, %v3387_v17, %v5894_v43  ;;  %v13354_v32 = vunpack.i.l.bf16 %v13353_v16  ;;  %v13372_v52 = vld [vmem:[#allocation94_spill] sm:$0xff]  ;;  %v13373_v17 = vld [vmem:[#allocation97_spill] sm:$0xff] }
 0x2f6   : > { %v13355_v47 = vunpack.i.h.bf16 %v13353_v16  ;;  %v5910_v37 = vunpack.i.h.bf16 %v5908_v34  ;;  %v5909_v21 = vunpack.i.l.bf16 %v5908_v34  ;;  %v13357_v36 = vunpack.i.l.bf16 %v13356_v24  ;;  %v11045_v63 = vpop.permute.xlu0 %5912  ;;  %v13374_v16 = vld [vmem:[#allocation44_spill] sm:$0xff] }
 0x2f7   : > { %v3577_v6 = vsel %vm2330_vm11, %v3529_v10, %v13354_v32  ;;  %v13358_v29 = vunpack.i.h.bf16 %v13356_v24  ;;  %v5280_v19 = vunpack.i.h.bf16 %v13359_v25  ;;  %v5279_v39 = vunpack.i.l.bf16 %v13359_v25 }
 0x2f8   : > { %v3578_v20 = vsel %vm2330_vm11, %v3530_v49, %v13355_v47  ;;  %v3553_v45 = vsel %vm2330_vm11, %v3505_v22, %v13357_v36  ;;  %v5905_v12 = vunpack.i.h.bf16 %v5903_v56  ;;  %v5904_v51 = vunpack.i.l.bf16 %v5903_v56  ;;  %v11069_v1 = vpop.permute.xlu1 %5927  ;;  %v13377_v56 = vld [vmem:[#allocation14_spill] sm:$0xff] }
 0x2f9   : > { %v3554_v48 = vsel %vm2330_vm11, %v3506_v5, %v13358_v29  ;;  %v3459_v46 = vsel %vm2264_vm9, %v3411_v31, %v5900_v18  ;;  %v3483_v23 = vsel %vm2264_vm9, %v3435_v57, %v5899_v41  ;;  %v3697_v9 = vrot.slane %v3577_v6, 1  ;;  %v13375_v6 = vld [vmem:[#allocation96_spill] sm:$0xff] }
 0x2fa   : > { %v3698_v59 = vrot.slane %v3578_v20, 1  ;;  %v3507_v10 = vsel %vm2297_vm10, %v3459_v46, %v5905_v12  ;;  %v3531_v2 = vsel %vm2297_vm10, %v3483_v23, %v5904_v51  ;;  %v3657_v49 = vrot.slane %v3553_v45, 1  ;;  %v11077_v34 = vpop.permute.xlu0 %5922  ;;  %v13378_v45 = vld [vmem:[#allocation150_spill] sm:$0xff] }
 0x2fb   : > { %v3658_v33 = vrot.slane %v3554_v48, 1  ;;  %v13361_v0 = vunpack.i.l.bf16 %v13360_v62  ;;  %v13363_v61 = vunpack.i.h.bf16 %v13360_v62  ;;  %v3555_v35 = vsel %vm2330_vm11, %v3507_v10, %v5910_v37  ;;  %v13376_v37 = vld [vmem:[#allocation98_spill] sm:$0xff] }
 0x2fc   : > { %v3579_v14 = vsel %vm2330_vm11, %v3531_v2, %v5909_v21  ;;  %v13366_v8 = vunpack.i.l.bf16 %v13365_v27  ;;  %v5274_v40 = vunpack.i.l.bf16 %v13368_v13  ;;  %v3660_v58 = vrot.slane %v3555_v35, 1  ;;  %v11095_v25 = vpop.permute.xlu1 %5937  ;;  %v13380_v51 = vld [vmem:[#allocation106_spill] sm:$0xff] }
 0x2fd   : > { %v2434_v54 = vsel %vm2429_vm14, %v13362_v11, %v13361_v0  ;;  %v2435_v7 = vsel %vm2429_vm14, %v13364_v28, %v13363_v61  ;;  %v3700_v55 = vrot.slane %v3579_v14, 1  ;;  %v13369_v60 = vunpack.i.h.bf16 %v13365_v27  ;;  %v13382_v10 = vld [vmem:[#allocation18_spill] sm:$0xff]  ;;  %v13384_v11 = vld [vmem:[#allocation103_spill] sm:$0xff]  ;;  %v13385_v28 = vld [vmem:[#allocation104_spill] sm:$0xff] }
 0x2fe   : > { %v11051_v4 = vsel %vm2429_vm14, %v13367_v26, %v13366_v8  ;;  %v11062_v30 = vsel %vm2429_vm14, %v13371_v44, %v5279_v39  ;;  %v11066_v5 = vsel %vm2429_vm14, %v13372_v52, %v5280_v19  ;;  %v5275_v15 = vunpack.i.h.bf16 %v13368_v13  ;;  %v13379_v19 = vld [vmem:[#allocation102_spill] sm:$0xff]  ;;  %v11111_v0 = vpop.permute.xlu0 %5932  ;;  %v13386_v14 = vld [vmem:[#allocation195_spill] sm:$0xff] }
 0x2ff   : > { %v11058_v50 = vsel %vm2429_vm14, %v13370_v3, %v13369_v60  ;;  %v3699_v42 = vsel %vm287_vm0, %v3697_v9, %v3698_v59  ;;  %v3701_v43 = vsel %vm287_vm0, %v3698_v59, %v3700_v55  ;;  %v3659_v53 = vsel %vm287_vm0, %v3657_v49, %v3658_v33  ;;  %v13381_v9 = vld [vmem:[#allocation192_spill] sm:$0xff]  ;;  %v13383_v49 = vld [vmem:[#allocation109_spill] sm:$0xff]  ;;  %v13387_v26 = vld [vmem:[#allocation110_spill] sm:$0xff] }
 0x300   : > { %v3661_v22 = vsel %vm287_vm0, %v3658_v33, %v3660_v58  ;;  %v5290_v18 = vunpack.i.h.bf16 %v13373_v17  ;;  %v5289_v41 = vunpack.i.l.bf16 %v13373_v17  ;;  %v6176_v31 = vpack.i.bf16 %v3701_v43, %v3699_v42  ;;  %v13390_v55 = vld [vmem:[#allocation11_spill] sm:$0xff]  ;;  %v13392_v3 = vld [vmem:[#allocation184_spill] sm:$0xff]  ;;  %v11139_v52 = vpop.permute.xlu1 %5947 }
 0x301   : > { %v6181_v57 = vpack.i.bf16 %v3661_v22, %v3659_v53  ;;  %v11081_v32 = vsel %vm2429_vm14, %v13374_v16, %v5274_v40  ;;  %v5285_v47 = vunpack.i.h.bf16 %v13375_v6  ;;  %v5284_v20 = vunpack.i.l.bf16 %v13375_v6  ;;  %v13388_v40 = vld [vmem:[#allocation38_spill] sm:$0xff]  ;;  %v13395_v43 = vld [vmem:[#allocation55_spill] sm:$0xff]  ;;  %v13397_v22 = vld [vmem:[#allocation68_spill] sm:$0xff] }
 0x302   : > { %v5294_v21 = vunpack.i.l.bf16 %v13376_v37  ;;  %v11088_v24 = vsel %vm2429_vm14, %v13377_v56, %v5275_v15  ;;  %v5295_v36 = vunpack.i.h.bf16 %v13376_v37  ;;  %v5320_v29 = vunpack.i.h.bf16 %v13378_v45  ;;  %6177 = vrot.lane.b32.xlu1 %v6176_v31, %s6362_s18  ;;  %v13393_v15 = vld [vmem:[#allocation112_spill] sm:$0xff]  ;;  %v13402_v16 = vld [vmem:[#allocation13_spill] sm:$0xff]  ;;  %v11165_v37 = vpop.permute.xlu0 %5942  ;;  %v13404_v56 = vld [vmem:[#allocation123_spill] sm:$0xff] }
 0x303   : > { %v5319_v48 = vunpack.i.l.bf16 %v13378_v45  ;;  %6182 = vrot.lane.b32.xlu0 %v6181_v57, %s6362_s18  ;;  %v5315_v39 = vunpack.i.h.bf16 %v13379_v19  ;;  %v5314_v12 = vunpack.i.l.bf16 %v13379_v19  ;;  %v5330_v46 = vunpack.i.h.bf16 %v13380_v51  ;;  %v13405_v45 = vld [vmem:[#allocation115_spill] sm:$0xff] }
 0x304   : > { %v5329_v23 = vunpack.i.l.bf16 %v13380_v51  ;;  %v11103_v59 = vsel %vm2429_vm14, %v13381_v9, %v5289_v41  ;;  %v11107_v2 = vsel %vm2429_vm14, %v13382_v10, %v5290_v18  ;;  %v5325_v33 = vunpack.i.h.bf16 %v13383_v49  ;;  %v13399_v18 = vld [vmem:[#allocation113_spill] sm:$0xff]  ;;  %v5958_v51 = vpop.permute.xlu1 %5957  ;;  %v13406_v10 = vld [vmem:[#allocation47_spill] sm:$0xff] }
 0x305   : > { %v5324_v62 = vunpack.i.l.bf16 %v13383_v49  ;;  %v11115_v61 = vsel %vm2429_vm14, %v13384_v11, %v5284_v20  ;;  %v11119_v35 = vsel %vm2429_vm14, %v13385_v28, %v5285_v47  ;;  %v11123_v27 = vsel %vm2429_vm14, %v13386_v14, %v5294_v21  ;;  %v13403_v47 = vld [vmem:[#allocation36_spill] sm:$0xff] }
 0x306   : > { %v5940_v8 = vunpack.i.h.bf16 %v11095_v25  ;;  %v11128_v13 = vsel %vm2429_vm14, %v13387_v26, %v5295_v36  ;;  %v11132_v58 = vsel %vm13389_vm1, %v13388_v40, %v5319_v48  ;;  %v11136_v60 = vsel %vm13391_vm2, %v13390_v55, %v5320_v29  ;;  %vm13398_vm14 = vmmov %vm13389_vm1  ;;  %v6312_v26 = vld [vmem:[%s6420_s25 + $0x190] sm:$0xf]  ;;  %v6313_v40 = vld [vmem:[%s6420_s25 + $0x188] sm:$0xff] }
 0x307   : > { %v5645_v44 = vunpack.i.h.bf16 %v13392_v3  ;;  %v11143_v42 = vsel %vm13394_vm12, %v13393_v15, %v5314_v12  ;;  %v11147_v53 = vsel %vm13396_vm13, %v13395_v43, %v5315_v39  ;;  %v11151_v17 = vsel %vm13398_vm14, %v13397_v22, %v5329_v23  ;;  %vm13401_vm2 = vmmov %vm13389_vm1  ;;  %v6314_v55 = vld [vmem:[%s6420_s25 + $0x180] sm:$0xff] }
 0x308   : > { %v11155_v41 = vsel %vm13400_vm3, %v13399_v18, %v5330_v46  ;;  %v11158_v31 = vsel %vm13389_vm1, %v2434_v54, %v5324_v62  ;;  %v11161_v57 = vsel %vm13401_vm2, %v2435_v7, %v5325_v33  ;;  %v5335_v6 = vunpack.i.h.bf16 %v13402_v16  ;;  %v6311_v54 = vld [vmem:[%s6420_s25 + $0xd0] sm:$0xf]  ;;  %v5968_v18 = vpop.permute.xlu1 %5967  ;;  %vm13423_vm12 = vmmov %vm13389_vm1 }
 0x309   : > { %v5670_v20 = vunpack.i.h.bf16 %v13403_v47  ;;  %v5669_v21 = vunpack.i.l.bf16 %v13403_v47  ;;  %v5665_v36 = vunpack.i.h.bf16 %v13404_v56  ;;  %v3364_v29 = vsel %vm2198_vm7, %v13405_v45, %v5940_v8  ;;  %v5953_v8 = vpop.permute.xlu0 %5952  ;;  %v13410_v56 = vld [vmem:[#allocation156_spill] sm:$0xff]  ;;  %vm13425_vm13 = vmmov %vm13389_vm1 }
 0x30a   : > { %v5944_v48 = vunpack.i.l.bf16 %v11165_v37  ;;  %v3288_v7 = vsel %vm2099_vm4, %v6311_v54, %v5645_v44  ;;  %v5920_v19 = vunpack.i.h.bf16 %v11031_v38  ;;  %v5919_v39 = vunpack.i.l.bf16 %v11031_v38  ;;  %v13407_v38 = vld [vmem:[#allocation139_spill] sm:$0xff]  ;;  %vm13426_vm14 = vmmov %vm13389_vm1 }
 0x30b   : > { %v5915_v12 = vunpack.i.h.bf16 %v11045_v63  ;;  %v5914_v46 = vunpack.i.l.bf16 %v11045_v63  ;;  %v5930_v23 = vunpack.i.h.bf16 %v11069_v1  ;;  %v5929_v9 = vunpack.i.l.bf16 %v11069_v1  ;;  %vm13427_vm3 = vmmov %vm13389_vm1 }
 0x30c   : > { %v3365_v49 = vsel %vm2198_vm7, %v13406_v10, %v5944_v48  ;;  %v5925_v33 = vunpack.i.h.bf16 %v11077_v34  ;;  %v5924_v62 = vunpack.i.l.bf16 %v11077_v34  ;;  %v5939_v11 = vunpack.i.l.bf16 %v11095_v25  ;;  %v13413_v10 = vld [vmem:[#allocation172_spill] sm:$0xff]  ;;  %vm13428_vm2 = vmmov %vm13389_vm1 }
 0x30d   : > { %v13408_v28 = vunpack.i.l.bf16 %v13407_v38  ;;  %v3298_v63 = vsel %vm2099_vm4, %v6312_v26, %v5670_v20  ;;  %v3297_v1 = vsel %vm2099_vm4, %v6313_v40, %v5669_v21  ;;  %v3296_v3 = vsel %vm2099_vm4, %v6314_v55, %v5665_v36 }
 0x30e   : > { %v5934_v44 = vunpack.i.l.bf16 %v11111_v0  ;;  %v3310_v34 = vsel %vm2132_vm5, %v3288_v7, %v5920_v19  ;;  %v3320_v25 = vsel %vm2132_vm5, %v3298_v63, %v5919_v39  ;;  %v5935_v15 = vunpack.i.h.bf16 %v11111_v0  ;;  %v5963_v7 = vpop.permute.xlu0 %5962 }
 0x30f   : > { %v3412_v14 = vsel %vm2231_vm8, %v3364_v29, %v13408_v28  ;;  %v13409_v43 = vunpack.i.h.bf16 %v13407_v38  ;;  %v3319_v47 = vsel %vm2132_vm5, %v3297_v1, %v5915_v12  ;;  %v3318_v20 = vsel %vm2132_vm5, %v3296_v3, %v5914_v46 }
 0x310   : > { %v3342_v21 = vsel %vm2165_vm6, %v3320_v25, %v5929_v9  ;;  %v13411_v36 = vunpack.i.l.bf16 %v13410_v56  ;;  %v3332_v29 = vsel %vm2165_vm6, %v3310_v34, %v5930_v23  ;;  %v3340_v48 = vsel %vm2165_vm6, %v3318_v20, %v5924_v62 }
 0x311   : > { %v3413_v22 = vsel %vm2231_vm8, %v3365_v49, %v13409_v43  ;;  %v3341_v0 = vsel %vm2165_vm6, %v3319_v47, %v5925_v33  ;;  %v3390_v54 = vsel %vm2198_vm7, %v3342_v21, %v5939_v11  ;;  %v3388_v19 = vsel %vm2198_vm7, %v3340_v48, %v5934_v44  ;;  %v5978_v11 = vpop.permute.xlu1 %5977 }
 0x312   : > { %v3460_v45 = vsel %vm2264_vm9, %v3412_v14, %v13411_v36  ;;  %v5950_v39 = vunpack.i.h.bf16 %v11139_v52  ;;  %v5949_v12 = vunpack.i.l.bf16 %v11139_v52  ;;  %v13412_v46 = vunpack.i.h.bf16 %v13410_v56  ;;  %v5973_v44 = vpop.permute.xlu0 %5972  ;;  %v13416_v56 = vld [vmem:[#allocation191_spill] sm:$0xff] }
 0x313   : > { %v13414_v49 = vunpack.i.l.bf16 %v13413_v10  ;;  %v3389_v62 = vsel %vm2198_vm7, %v3341_v0, %v5935_v15  ;;  %v5960_v33 = vunpack.i.h.bf16 %v5958_v51  ;;  %v5959_v38 = vunpack.i.l.bf16 %v5958_v51 }
 0x314   : > { %v3461_v9 = vsel %vm2264_vm9, %v3413_v22, %v13412_v46  ;;  %v5945_v28 = vunpack.i.h.bf16 %v11165_v37  ;;  %v5955_v14 = vunpack.i.h.bf16 %v5953_v8  ;;  %v5970_v26 = vunpack.i.h.bf16 %v5968_v18 }
 0x315   : > { %v3508_v23 = vsel %vm2297_vm10, %v3460_v45, %v13414_v49  ;;  %v5969_v63 = vunpack.i.l.bf16 %v5968_v18  ;;  %v13415_v52 = vunpack.i.h.bf16 %v13413_v10  ;;  %v5954_v1 = vunpack.i.l.bf16 %v5953_v8  ;;  %v11229_v47 = vpop.permute.xlu1 %5987 }
 0x316   : > { %v5980_v55 = vunpack.i.h.bf16 %v5978_v11  ;;  %v5979_v3 = vunpack.i.l.bf16 %v5978_v11  ;;  %v3436_v34 = vsel %vm2231_vm8, %v3388_v19, %v5949_v12  ;;  %v3437_v25 = vsel %vm2231_vm8, %v3389_v62, %v5950_v39  ;;  %v5983_v39 = vpop.permute.xlu0 %5982 }
 0x317   : > { %v3509_v40 = vsel %vm2297_vm10, %v3461_v9, %v13415_v52  ;;  %v5965_v15 = vunpack.i.h.bf16 %v5963_v7  ;;  %v5964_v51 = vunpack.i.l.bf16 %v5963_v7  ;;  %v3484_v43 = vsel %vm2264_vm9, %v3436_v34, %v5959_v38  ;;  %v13419_v52 = vld [vmem:[#allocation42_spill] sm:$0xff]  ;;  %v13420_v34 = vld [vmem:[#allocation51_spill] sm:$0xff] }
 0x318   : > { %v3485_v37 = vsel %vm2264_vm9, %v3437_v25, %v5960_v33  ;;  %v5975_v22 = vunpack.i.h.bf16 %v5973_v44  ;;  %v5974_v18 = vunpack.i.l.bf16 %v5973_v44  ;;  %v3366_v20 = vsel %vm2198_vm7, %v3332_v29, %v5945_v28 }
 0x319   : > { %v3532_v8 = vsel %vm2297_vm10, %v3484_v43, %v5969_v63  ;;  %v3533_v21 = vsel %vm2297_vm10, %v3485_v37, %v5970_v26  ;;  %v13417_v36 = vunpack.i.h.bf16 %v13416_v56  ;;  %v3414_v48 = vsel %vm2231_vm8, %v3366_v20, %v5955_v14  ;;  %v11245_v62 = vpop.permute.xlu1 %5997 }
 0x31a   : > { %v3438_v0 = vsel %vm2231_vm8, %v3390_v54, %v5954_v1  ;;  %v3580_v7 = vsel %vm2330_vm11, %v3532_v8, %v5979_v3  ;;  %v3581_v19 = vsel %vm2330_vm11, %v3533_v21, %v5980_v55  ;;  %v3462_v12 = vsel %vm2264_vm9, %v3414_v48, %v5965_v15  ;;  %v11254_v3 = vpop.permute.xlu0 %5992  ;;  %v13422_v8 = vld [vmem:[#allocation63_spill] sm:$0xff] }
 0x31b   : > { %v3557_v45 = vsel %vm2330_vm11, %v3509_v40, %v13417_v36  ;;  %v3486_v29 = vsel %vm2264_vm9, %v3438_v0, %v5964_v51  ;;  %v5985_v46 = vunpack.i.h.bf16 %v5983_v39  ;;  %v5984_v9 = vunpack.i.l.bf16 %v5983_v39  ;;  %v13421_v51 = vld [vmem:[#allocation59_spill] sm:$0xff] }
 0x31c   : > { %v3510_v10 = vsel %vm2297_vm10, %v3462_v12, %v5975_v22  ;;  %v3534_v49 = vsel %vm2297_vm10, %v3486_v29, %v5974_v18  ;;  %v13418_v33 = vunpack.i.l.bf16 %v13416_v56  ;;  %v3663_v38 = vrot.slane %v3557_v45, 1  ;;  %v13424_v0 = vld [vmem:[#allocation99_spill] sm:$0xff] }
 0x31d   : > { %v3702_v11 = vrot.slane %v3580_v7, 1  ;;  %v3703_v28 = vrot.slane %v3581_v19, 1  ;;  %v3558_v14 = vsel %vm2330_vm11, %v3510_v10, %v5985_v46  ;;  %v3582_v26 = vsel %vm2330_vm11, %v3534_v49, %v5984_v9  ;;  %v11261_v22 = vpop.permute.xlu1 %6007  ;;  %v13430_v49 = vld [vmem:[#allocation73_spill] sm:$0xff] }
 0x31e   : > { %v3556_v54 = vsel %vm2330_vm11, %v3508_v23, %v13418_v33  ;;  %v5334_v63 = vunpack.i.l.bf16 %v13402_v16  ;;  %v5360_v40 = vunpack.i.h.bf16 %v13419_v52  ;;  %v3665_v1 = vrot.slane %v3558_v14, 1  ;;  %v11274_v19 = vpop.permute.xlu0 %6002  ;;  %v13431_v33 = vld [vmem:[#allocation43_spill] sm:$0xff] }
 0x31f   : > { %v3705_v55 = vrot.slane %v3582_v26, 1  ;;  %v5359_v44 = vunpack.i.l.bf16 %v13419_v52  ;;  %v5355_v25 = vunpack.i.h.bf16 %v13420_v34  ;;  %v5354_v23 = vunpack.i.l.bf16 %v13420_v34 }
 0x320   : > { %v3662_v15 = vrot.slane %v3556_v54, 1  ;;  %v5370_v43 = vunpack.i.h.bf16 %v13421_v51  ;;  %v5369_v37 = vunpack.i.l.bf16 %v13421_v51  ;;  %v3666_v20 = vsel %vm287_vm0, %v3663_v38, %v3665_v1 }
 0x321   : > { %v3706_v18 = vsel %vm287_vm0, %v3703_v28, %v3705_v55  ;;  %v5365_v21 = vunpack.i.h.bf16 %v13422_v8  ;;  %v5364_v56 = vunpack.i.l.bf16 %v13422_v8  ;;  %v3704_v36 = vsel %vm287_vm0, %v3702_v11, %v3703_v28  ;;  %v13435_v28 = vld [vmem:[#allocation116_spill] sm:$0xff] }
 0x322   : > { %v3664_v45 = vsel %vm287_vm0, %v3662_v15, %v3663_v38  ;;  %v11271_v48 = vsel %vm13423_vm12, %v11051_v4, %v5334_v63  ;;  %v5649_v7 = vunpack.i.l.bf16 %v13424_v0  ;;  %v6186_v39 = vpack.i.bf16 %v3706_v18, %v3704_v36  ;;  %vm13429_vm12 = vmmov %vm13389_vm1  ;;  %v6315_v63 = vld [vmem:[%s6420_s25 + $0xe8] sm:$0xf]  ;;  %v6013_v1 = vpop.permute.xlu0 %6012  ;;  %v6317_v15 = vld [vmem:[%s6420_s25 + $0x1a0] sm:$0xff] }
 0x323   : > { %v6191_v12 = vpack.i.bf16 %v3666_v20, %v3664_v45  ;;  %v11278_v29 = vsel %vm13425_vm13, %v11062_v30, %v5359_v44  ;;  %v11282_v46 = vsel %vm13426_vm14, %v11066_v5, %v5360_v40  ;;  %v11286_v9 = vsel %vm13427_vm3, %v11081_v32, %v5354_v23  ;;  %v6018_v32 = vpop.permute.xlu1 %6017  ;;  %vm13432_vm13 = vmmov %vm13389_vm1  ;;  %v13439_v36 = vld [vmem:[#allocation15_spill] sm:$0xff] }
 0x324   : > { %v11290_v4 = vsel %vm13389_vm1, %v11088_v24, %v5355_v25  ;;  %v11294_v10 = vsel %vm13428_vm2, %v11103_v59, %v5369_v37  ;;  %v11298_v30 = vsel %vm13429_vm12, %v11107_v2, %v5370_v43  ;;  %v5679_v5 = vunpack.i.l.bf16 %v13430_v49  ;;  %6187 = vrot.lane.b32.xlu1 %v6186_v39, %s6362_s18  ;;  %vm13433_vm14 = vmmov %vm13389_vm1  ;;  %v13434_v2 = vld [vmem:[#allocation39_spill] sm:$0xff]  ;;  %v6316_v25 = vld [vmem:[%s6420_s25 + $0x1a8] sm:$0xf] }
 0x325   : > { %v5675_v54 = vunpack.i.h.bf16 %v13431_v33  ;;  %6192 = vrot.lane.b32.xlu0 %v6191_v12, %s6362_s18  ;;  %v11306_v24 = vsel %vm13432_vm13, %v11115_v61, %v5364_v56  ;;  %v11310_v59 = vsel %vm13433_vm14, %v11119_v35, %v5365_v21  ;;  %v6019_v11 = vunpack.i.l.bf16 %v6018_v32  ;;  %v13436_v35 = vld [vmem:[#allocation34_spill] sm:$0xff] }
 0x326   : > { %v5400_v14 = vunpack.i.h.bf16 %v13435_v28  ;;  %v5399_v26 = vunpack.i.l.bf16 %v13435_v28  ;;  %v3289_v52 = vsel %vm2099_vm4, %v6315_v63, %v5649_v7  ;;  %v5674_v40 = vunpack.i.l.bf16 %v13431_v33  ;;  %v13437_v37 = vld [vmem:[#allocation138_spill] sm:$0xff]  ;;  %v13459_v28 = vld [vmem:[#allocation45_spill] sm:$0xff] }
 0x327   : > { %v5990_v61 = vunpack.i.h.bf16 %v11229_v47  ;;  %v5989_v55 = vunpack.i.l.bf16 %v11229_v47  ;;  %v3368_v44 = vsel %vm2198_vm7, %v13436_v35, %v6019_v11  ;;  %v6015_v34 = vunpack.i.h.bf16 %v6013_v1  ;;  %v6028_v8 = vpop.permute.xlu1 %6027  ;;  %v6318_v7 = vld [vmem:[%s6420_s25 + $0x198] sm:$0xff]  ;;  %v6023_v11 = vpop.permute.xlu0 %6022 }
 0x328   : > { %v3301_v23 = vsel %vm2099_vm4, %v6316_v25, %v5679_v5  ;;  %v3300_v51 = vsel %vm2099_vm4, %v6317_v15, %v5675_v54  ;;  %v5999_v43 = vunpack.i.l.bf16 %v11245_v62  ;;  %v13438_v18 = vunpack.i.h.bf16 %v13437_v37 }
 0x329   : > { %v6000_v21 = vunpack.i.h.bf16 %v11245_v62  ;;  %v5995_v47 = vunpack.i.h.bf16 %v11254_v3  ;;  %v5994_v56 = vunpack.i.l.bf16 %v11254_v3  ;;  %v3367_v45 = vsel %vm2198_vm7, %v13439_v36, %v6015_v34  ;;  %v13441_v3 = vld [vmem:[#allocation155_spill] sm:$0xff] }
 0x32a   : > { %v3416_v20 = vsel %vm2231_vm8, %v3368_v44, %v13438_v18  ;;  %v3299_v39 = vsel %vm2099_vm4, %v6318_v7, %v5674_v40  ;;  %v6009_v12 = vunpack.i.l.bf16 %v11261_v22  ;;  %v6005_v5 = vunpack.i.h.bf16 %v11274_v19 }
 0x32b   : > { %v13440_v33 = vunpack.i.l.bf16 %v13437_v37  ;;  %v3321_v62 = vsel %vm2132_vm5, %v3299_v39, %v5989_v55  ;;  %v3322_v63 = vsel %vm2132_vm5, %v3300_v51, %v5990_v61  ;;  %v13442_v35 = vunpack.i.h.bf16 %v13441_v3  ;;  %v6038_v36 = vpop.permute.xlu1 %6037  ;;  %v13444_v39 = vld [vmem:[#allocation171_spill] sm:$0xff] }
 0x32c   : > { %v13443_v34 = vunpack.i.l.bf16 %v13441_v3  ;;  %v3343_v25 = vsel %vm2165_vm6, %v3321_v62, %v5999_v43  ;;  %v6010_v15 = vunpack.i.h.bf16 %v11261_v22  ;;  %v6004_v37 = vunpack.i.l.bf16 %v11274_v19  ;;  %v13447_v3 = vld [vmem:[#allocation190_spill] sm:$0xff] }
 0x32d   : > { %v3415_v54 = vsel %vm2231_vm8, %v3367_v45, %v13440_v33  ;;  %v3464_v44 = vsel %vm2264_vm9, %v3416_v20, %v13442_v35  ;;  %v6020_v18 = vunpack.i.h.bf16 %v6018_v32  ;;  %v3344_v55 = vsel %vm2165_vm6, %v3322_v63, %v6000_v21  ;;  %v6033_v32 = vpop.permute.xlu0 %6032 }
 0x32e   : > { %v3463_v40 = vsel %vm2264_vm9, %v3415_v54, %v13443_v34  ;;  %v3311_v61 = vsel %vm2132_vm5, %v3289_v52, %v5995_v47  ;;  %v3323_v51 = vsel %vm2132_vm5, %v3301_v23, %v5994_v56  ;;  %v6014_v45 = vunpack.i.l.bf16 %v6013_v1 }
 0x32f   : > { %v3391_v20 = vsel %vm2198_vm7, %v3343_v25, %v6009_v12  ;;  %v3333_v7 = vsel %vm2165_vm6, %v3311_v61, %v6005_v5  ;;  %v13445_v33 = vunpack.i.h.bf16 %v13444_v39  ;;  %v13446_v22 = vunpack.i.l.bf16 %v13444_v39  ;;  %v6048_v12 = vpop.permute.xlu1 %6047 }
 0x330   : > { %v6030_v54 = vunpack.i.h.bf16 %v6028_v8  ;;  %v6029_v21 = vunpack.i.l.bf16 %v6028_v8  ;;  %v6025_v62 = vunpack.i.h.bf16 %v6023_v11  ;;  %v6024_v52 = vunpack.i.l.bf16 %v6023_v11 }
 0x331   : > { %v3512_v43 = vsel %vm2297_vm10, %v3464_v44, %v13445_v33  ;;  %v3511_v19 = vsel %vm2297_vm10, %v3463_v40, %v13446_v22  ;;  %v3392_v23 = vsel %vm2198_vm7, %v3344_v55, %v6010_v15  ;;  %v3345_v1 = vsel %vm2165_vm6, %v3323_v51, %v6004_v37  ;;  %v6043_v37 = vpop.permute.xlu0 %6042 }
 0x332   : > { %v3369_v47 = vsel %vm2198_vm7, %v3333_v7, %v6020_v18  ;;  %v6040_v56 = vunpack.i.h.bf16 %v6038_v36  ;;  %v3393_v5 = vsel %vm2198_vm7, %v3345_v1, %v6014_v45  ;;  %v6039_v63 = vunpack.i.l.bf16 %v6038_v36 }
 0x333   : > { %v13448_v35 = vunpack.i.l.bf16 %v13447_v3  ;;  %v13449_v34 = vunpack.i.h.bf16 %v13447_v3  ;;  %v6035_v11 = vunpack.i.h.bf16 %v6033_v32  ;;  %v6034_v40 = vunpack.i.l.bf16 %v6033_v32  ;;  %v6058_v39 = vpop.permute.xlu1 %6057 }
 0x334   : > { %v6050_v25 = vunpack.i.h.bf16 %v6048_v12  ;;  %v6049_v15 = vunpack.i.l.bf16 %v6048_v12  ;;  %v3417_v18 = vsel %vm2231_vm8, %v3369_v47, %v6030_v54  ;;  %v3441_v55 = vsel %vm2231_vm8, %v3393_v5, %v6029_v21 }
 0x335   : > { %v3559_v44 = vsel %vm2330_vm11, %v3511_v19, %v13448_v35  ;;  %v3560_v8 = vsel %vm2330_vm11, %v3512_v43, %v13449_v34  ;;  %v3439_v61 = vsel %vm2231_vm8, %v3391_v20, %v6024_v52  ;;  %v3440_v36 = vsel %vm2231_vm8, %v3392_v23, %v6025_v62  ;;  %v6053_v62 = vpop.permute.xlu0 %6052 }
 0x336   : > { %v3465_v51 = vsel %vm2264_vm9, %v3417_v18, %v6040_v56  ;;  %v6045_v45 = vunpack.i.h.bf16 %v6043_v37  ;;  %v6044_v7 = vunpack.i.l.bf16 %v6043_v37  ;;  %v3668_v33 = vrot.slane %v3560_v8, 1 }
 0x337   : > { %v3489_v43 = vsel %vm2264_vm9, %v3441_v55, %v6039_v63  ;;  %v6060_v22 = vunpack.i.h.bf16 %v6058_v39  ;;  %v6059_v19 = vunpack.i.l.bf16 %v6058_v39  ;;  %v3667_v32 = vrot.slane %v3559_v44, 1  ;;  %v11388_v35 = vpop.permute.xlu1 %6067  ;;  %v13450_v44 = vld [vmem:[#allocation122_spill] sm:$0xff] }
 0x338   : > { %v3487_v1 = vsel %vm2264_vm9, %v3439_v61, %v6034_v40  ;;  %v3488_v54 = vsel %vm2264_vm9, %v3440_v36, %v6035_v11  ;;  %v3513_v21 = vsel %vm2297_vm10, %v3465_v51, %v6050_v25  ;;  %v3537_v20 = vsel %vm2297_vm10, %v3489_v43, %v6049_v15  ;;  %v13451_v25 = vld [vmem:[#allocation124_spill] sm:$0xff]  ;;  %v13453_v43 = vld [vmem:[#allocation130_spill] sm:$0xff] }
 0x339   : > { %v3561_v52 = vsel %vm2330_vm11, %v3513_v21, %v6060_v22  ;;  %v3585_v23 = vsel %vm2330_vm11, %v3537_v20, %v6059_v19  ;;  %v6055_v47 = vunpack.i.h.bf16 %v6053_v62  ;;  %v6054_v56 = vunpack.i.l.bf16 %v6053_v62  ;;  %v11395_v55 = vpop.permute.xlu0 %6062  ;;  %v13452_v51 = vld [vmem:[#allocation72_spill] sm:$0xff] }
 0x33a   : > { %v3535_v12 = vsel %vm2297_vm10, %v3487_v1, %v6044_v7  ;;  %v3536_v5 = vsel %vm2297_vm10, %v3488_v54, %v6045_v45  ;;  %v3670_v63 = vrot.slane %v3561_v52, 1  ;;  %v3710_v3 = vrot.slane %v3585_v23, 1  ;;  %v13456_v62 = vld [vmem:[#allocation140_spill] sm:$0xff] }
 0x33b   : > { %v5395_v34 = vunpack.i.h.bf16 %v13450_v44  ;;  %v5394_v8 = vunpack.i.l.bf16 %v13450_v44  ;;  %v3583_v11 = vsel %vm2330_vm11, %v3535_v12, %v6054_v56  ;;  %v3584_v40 = vsel %vm2330_vm11, %v3536_v5, %v6055_v47  ;;  %v11403_v19 = vpop.permute.xlu1 %6077  ;;  %v13461_v12 = vld [vmem:[#allocation117_spill] sm:$0xff] }
 0x33c   : > { %v5440_v15 = vunpack.i.h.bf16 %v13451_v25  ;;  %v3707_v37 = vrot.slane %v3583_v11, 1  ;;  %v3708_v18 = vrot.slane %v3584_v40, 1  ;;  %v3671_v61 = vsel %vm287_vm0, %v3668_v33, %v3670_v63 }
 0x33d   : > { %v5439_v36 = vunpack.i.l.bf16 %v13451_v25  ;;  %v5435_v45 = vunpack.i.h.bf16 %v13452_v51  ;;  %v5434_v7 = vunpack.i.l.bf16 %v13452_v51  ;;  %v3669_v39 = vsel %vm287_vm0, %v3667_v32, %v3668_v33 }
 0x33e   : > { %v5474_v22 = vunpack.i.l.bf16 %v13453_v43  ;;  %v3709_v1 = vsel %vm287_vm0, %v3707_v37, %v3708_v18  ;;  %v3711_v54 = vsel %vm287_vm0, %v3708_v18, %v3710_v3  ;;  %v6201_v21 = vpack.i.bf16 %v3671_v61, %v3669_v39 }
 0x33f   : > { %vm13454_vm3 = vcmask 424960   ;;  %v5475_v32 = vunpack.i.h.bf16 %v13453_v43  ;;  %v5519_v52 = vunpack.i.l.bf16 %v13456_v62  ;;  %v5520_v56 = vunpack.i.h.bf16 %v13456_v62 }
 0x340   : > { %v11411_v20 = vsel %vm13454_vm3, %v11132_v58, %v5399_v26  ;;  %vm13455_vm1 = vmmov %vm13454_vm3  ;;  %v11426_v58 = vpop.permute.xlu0 %6072  ;;  %v6196_v26 = vpack.i.bf16 %v3711_v54, %v3709_v1  ;;  %6202 = vrot.lane.b32.xlu0 %v6201_v21, %s6362_s18  ;;  %v5515_v5 = vunpack.i.h.bf16 %v13461_v12  ;;  %v5514_v63 = vunpack.i.l.bf16 %v13461_v12  ;;  %v13473_v1 = vld [vmem:[#allocation37_spill] sm:$0xff] }
 0x341   : > { %v11417_v33 = vsel %vm13455_vm1, %v11136_v60, %v5400_v14  ;;  %vm13457_vm2 = vmmov %vm13455_vm1  ;;  %v5404_v60 = vunpack.i.l.bf16 %v13459_v28  ;;  %v2513_v3 = vsel %vm13455_vm1, %v11290_v4, %v5435_v45  ;;  %v5650_v4 = vunpack.i.h.bf16 %v13424_v0 }
 0x342   : > { %v2496_v23 = vsel %vm13457_vm2, %v11143_v42, %v5394_v8  ;;  %vm13458_vm12 = vmmov %vm13455_vm1  ;;  %vm13464_vm2 = vcmask 457728   ;;  %6197 = vrot.lane.b32.xlu1 %v6196_v26, %s6362_s18  ;;  %v5680_v25 = vunpack.i.h.bf16 %v13430_v49  ;;  %v6070_v49 = vunpack.i.h.bf16 %v11388_v35  ;;  %v6321_v26 = vld [vmem:[%s6420_s25 + $0x1c0] sm:$0xf] }
 0x343   : > { %v2497_v47 = vsel %vm13458_vm12, %v11147_v53, %v5395_v34  ;;  %vm13460_vm13 = vmmov %vm13455_vm1  ;;  %v11441_v44 = vsel %vm13464_vm2, %v2496_v23, %v5474_v22  ;;  %v11444_v34 = vpop.permute.xlu1 %6087  ;;  %v6069_v43 = vunpack.i.l.bf16 %v11388_v35  ;;  %v5600_v54 = vunpack.i.h.bf16 %v13473_v1 }
 0x344   : > { %v2514_v14 = vsel %vm13460_vm13, %v11278_v29, %v5439_v36  ;;  %vm13462_vm14 = vmmov %vm13455_vm1  ;;  %v6083_v18 = vpop.permute.xlu0 %6082  ;;  %v6090_v36 = vunpack.i.h.bf16 %v11444_v34  ;;  %v5599_v21 = vunpack.i.l.bf16 %v13473_v1 }
 0x345   : > { %v2515_v42 = vsel %vm13462_vm14, %v11282_v46, %v5440_v15  ;;  %vm13463_vm3 = vmmov %vm13455_vm1  ;;  %v13467_v46 = vld [vmem:[#allocation100_spill] sm:$0xff]  ;;  %v13469_v15 = vld [vmem:[#allocation127_spill] sm:$0xff] }
 0x346   : > { %v2512_v53 = vsel %vm13463_vm3, %v11286_v9, %v5434_v7  ;;  %vm13465_vm12 = vmmov %vm13464_vm2  ;;  %v5595_v11 = vunpack.i.h.bf16 %v13467_v46  ;;  %v5594_v9 = vunpack.i.l.bf16 %v13467_v46  ;;  %v5685_v37 = vunpack.i.h.bf16 %v13469_v15  ;;  %v13472_v7 = vld [vmem:[#allocation33_spill] sm:$0xff] }
 0x347   : > { %v11447_v29 = vsel %vm13465_vm12, %v2497_v47, %v5475_v32  ;;  %vm13466_vm13 = vmmov %vm13464_vm2  ;;  %v5684_v61 = vunpack.i.l.bf16 %v13469_v15  ;;  %v5555_v39 = vunpack.i.h.bf16 %v13472_v7  ;;  %v5554_v0 = vunpack.i.l.bf16 %v13472_v7  ;;  %v6098_v22 = vpop.permute.xlu1 %6097  ;;  %v6320_v47 = vld [vmem:[%s6420_s25 + $0x1b0] sm:$0xff] }
 0x348   : > { %v11450_v8 = vsel %vm13466_vm13, %v2514_v14, %v5519_v52  ;;  %vm13468_vm14 = vmmov %vm13464_vm2  ;;  %v6319_v52 = vld [vmem:[%s6420_s25 + $0x100] sm:$0xf]  ;;  %v3304_v35 = vsel %vm2099_vm4, %v6321_v26, %v5685_v37  ;;  %v6064_v14 = vunpack.i.l.bf16 %v11395_v55  ;;  %v6093_v12 = vpop.permute.xlu0 %6092  ;;  %v6079_v37 = vunpack.i.l.bf16 %v11403_v19 }
 0x349   : > { %v11455_v40 = vsel %vm13468_vm14, %v2515_v42, %v5520_v56  ;;  %vm13470_vm3 = vmmov %vm13464_vm2  ;;  %v3290_v23 = vsel %vm2099_vm4, %v6319_v52, %v5650_v4  ;;  %v3302_v56 = vsel %vm2099_vm4, %v6320_v47, %v5680_v25  ;;  %v6065_v42 = vunpack.i.h.bf16 %v11395_v55  ;;  %v13476_v52 = vld [vmem:[#allocation141_spill] sm:$0xff] }
 0x34a   : > { %v2545_v51 = vsel %vm13470_vm3, %v2512_v53, %v5514_v63  ;;  %vm13471_vm1 = vmmov %vm13464_vm2  ;;  %v13474_v53 = vld [vmem:[#allocation3_spill] sm:$0xff]  ;;  %v6094_v46 = vunpack.i.l.bf16 %v6093_v12  ;;  %v6080_v4 = vunpack.i.h.bf16 %v11403_v19  ;;  %v6074_v25 = vunpack.i.l.bf16 %v11426_v58 }
 0x34b   : > { %v2546_v45 = vsel %vm13471_vm1, %v2513_v3, %v5515_v5  ;;  %v11471_v32 = vsel %vm2561_vm15, %v2545_v51, %v5594_v9  ;;  %v6322_v5 = vld [vmem:[%s6420_s25 + $0x1b8] sm:$0xff]  ;;  %v3370_v3 = vsel %vm2198_vm7, %v13474_v53, %v6090_v36  ;;  %v3326_v9 = vsel %vm2132_vm5, %v3304_v35, %v6069_v43  ;;  %v6108_v15 = vpop.permute.xlu1 %6107  ;;  %vm13510_vm3 = vmmov %vm13471_vm1 }
 0x34c   : > { %v11474_v62 = vsel %vm2561_vm15, %v2546_v45, %v5595_v11  ;;  %v3303_v63 = vsel %vm2099_vm4, %v6322_v5, %v5684_v61  ;;  %v3312_v11 = vsel %vm2132_vm5, %v3290_v23, %v6070_v49  ;;  %v6075_v51 = vunpack.i.h.bf16 %v11426_v58  ;;  %v13475_v45 = vld [vmem:[#allocation12_spill] sm:$0xff]  ;;  %v6103_v35 = vpop.permute.xlu0 %6102  ;;  %v13479_v53 = vld [vmem:[#allocation158_spill] sm:$0xff] }
 0x34d   : > { %v6084_v61 = vunpack.i.l.bf16 %v6083_v18  ;;  %v3371_v55 = vsel %vm2198_vm7, %v13475_v45, %v6094_v46  ;;  %v3324_v36 = vsel %vm2132_vm5, %v3302_v56, %v6064_v14  ;;  %v13477_v47 = vunpack.i.l.bf16 %v13476_v52 }
 0x34e   : > { %v6085_v43 = vunpack.i.h.bf16 %v6083_v18  ;;  %v13478_v23 = vunpack.i.h.bf16 %v13476_v52  ;;  %v3325_v19 = vsel %vm2132_vm5, %v3303_v63, %v6065_v42  ;;  %v6100_v5 = vunpack.i.h.bf16 %v6098_v22 }
 0x34f   : > { %v3418_v49 = vsel %vm2231_vm8, %v3370_v3, %v13477_v47  ;;  %v6099_v58 = vunpack.i.l.bf16 %v6098_v22  ;;  %v13480_v38 = vunpack.i.h.bf16 %v13479_v53  ;;  %v3334_v56 = vsel %vm2165_vm6, %v3312_v11, %v6080_v4  ;;  %v6118_v18 = vpop.permute.xlu1 %6117  ;;  %v13482_v11 = vld [vmem:[#allocation174_spill] sm:$0xff] }
 0x350   : > { %v3419_v26 = vsel %vm2231_vm8, %v3371_v55, %v13478_v23  ;;  %v3346_v14 = vsel %vm2165_vm6, %v3324_v36, %v6074_v25  ;;  %v6110_v45 = vunpack.i.h.bf16 %v6108_v15  ;;  %v6109_v3 = vunpack.i.l.bf16 %v6108_v15  ;;  %v6113_v47 = vpop.permute.xlu0 %6112 }
 0x351   : > { %v3467_v46 = vsel %vm2264_vm9, %v3419_v26, %v13480_v38  ;;  %vm3813_vm4 = vcmask 523264   ;;  %vm3891_vm2 = vcmask 818176   ;;  %v3348_v55 = vsel %vm2165_vm6, %v3326_v9, %v6079_v37 }
 0x352   : > { %v3347_v52 = vsel %vm2165_vm6, %v3325_v19, %v6075_v51  ;;  %v13481_v63 = vunpack.i.l.bf16 %v13479_v53  ;;  %v3394_v42 = vsel %vm2198_vm7, %v3346_v14, %v6084_v61  ;;  %v13483_v4 = vunpack.i.h.bf16 %v13482_v11  ;;  %vm11549_vm5 = vmpackc.low %vm3891_vm2, %vm3891_vm2 }
 0x353   : > { %v3395_v38 = vsel %vm2198_vm7, %v3347_v52, %v6085_v43  ;;  %v6120_v15 = vunpack.i.h.bf16 %v6118_v18  ;;  %v6119_v36 = vunpack.i.l.bf16 %v6118_v18  ;;  %v6089_v23 = vunpack.i.l.bf16 %v11444_v34  ;;  %v6128_v53 = vpop.permute.xlu1 %6127  ;;  %v13485_v52 = vld [vmem:[#allocation193_spill] sm:$0xff] }
 0x354   : > { %v3466_v22 = vsel %vm2264_vm9, %v3418_v49, %v13481_v63  ;;  %v3515_v25 = vsel %vm2297_vm10, %v3467_v46, %v13483_v4  ;;  %v3442_v9 = vsel %vm2231_vm8, %v3394_v42, %v6099_v58  ;;  %v3443_v37 = vsel %vm2231_vm8, %v3395_v38, %v6100_v5 }
 0x355   : > { %v6095_v51 = vunpack.i.h.bf16 %v6093_v12  ;;  %v13484_v49 = vunpack.i.l.bf16 %v13482_v11  ;;  %v3490_v43 = vsel %vm2264_vm9, %v3442_v9, %v6109_v3  ;;  %v3491_v26 = vsel %vm2264_vm9, %v3443_v37, %v6110_v45 }
 0x356   : > { %v6105_v19 = vunpack.i.h.bf16 %v6103_v35  ;;  %v6104_v46 = vunpack.i.l.bf16 %v6103_v35  ;;  %v6130_v14 = vunpack.i.h.bf16 %v6128_v53  ;;  %v6129_v18 = vunpack.i.l.bf16 %v6128_v53 }
 0x357   : > { %v3514_v61 = vsel %vm2297_vm10, %v3466_v22, %v13484_v49  ;;  %v13486_v34 = vunpack.i.h.bf16 %v13485_v52  ;;  %v3538_v5 = vsel %vm2297_vm10, %v3490_v43, %v6119_v36  ;;  %v3539_v12 = vsel %vm2297_vm10, %v3491_v26, %v6120_v15  ;;  %v6123_v22 = vpop.permute.xlu0 %6122 }
 0x358   : > { %v6115_v63 = vunpack.i.h.bf16 %v6113_v47  ;;  %v6114_v42 = vunpack.i.l.bf16 %v6113_v47  ;;  %v3396_v3 = vsel %vm2198_vm7, %v3348_v55, %v6089_v23  ;;  %v3372_v45 = vsel %vm2198_vm7, %v3334_v56, %v6095_v51 }
 0x359   : > { %v3563_v58 = vsel %vm2330_vm11, %v3515_v25, %v13486_v34  ;;  %v3586_v38 = vsel %vm2330_vm11, %v3538_v5, %v6129_v18  ;;  %v3587_v35 = vsel %vm2330_vm11, %v3539_v12, %v6130_v14  ;;  %v3420_v11 = vsel %vm2231_vm8, %v3372_v45, %v6105_v19  ;;  %v6138_v25 = vpop.permute.xlu1 %6137 }
 0x35a   : > { %v6125_v4 = vunpack.i.h.bf16 %v6123_v22  ;;  %v6124_v9 = vunpack.i.l.bf16 %v6123_v22  ;;  %v13487_v36 = vunpack.i.l.bf16 %v13485_v52  ;;  %v3444_v47 = vsel %vm2231_vm8, %v3396_v3, %v6104_v46  ;;  %vm13498_vm8 = vmmov %vm13471_vm1 }
 0x35b   : > { %v6140_v37 = vunpack.i.h.bf16 %v6138_v25  ;;  %v6139_v49 = vunpack.i.l.bf16 %v6138_v25  ;;  %v3673_v55 = vrot.slane %v3563_v58, 1  ;;  %v3468_v56 = vsel %vm2264_vm9, %v3420_v11, %v6115_v63  ;;  %v6133_v26 = vpop.permute.xlu0 %6132 }
 0x35c   : > { %v3562_v15 = vsel %vm2330_vm11, %v3514_v61, %v13487_v36  ;;  %v3492_v23 = vsel %vm2264_vm9, %v3444_v47, %v6114_v42  ;;  %v3712_v51 = vrot.slane %v3586_v38, 1  ;;  %v3713_v43 = vrot.slane %v3587_v35, 1  ;;  %v13490_v47 = vld [vmem:[#allocation125_spill] sm:$0xff]  ;;  %vm13499_vm9 = vmmov %vm13471_vm1 }
 0x35d   : > { %v6135_v19 = vunpack.i.h.bf16 %v6133_v26  ;;  %v6134_v53 = vunpack.i.l.bf16 %v6133_v26  ;;  %v3830_v14 = vsel %vm3813_vm4, %v11471_v32, %v6139_v49  ;;  %v3831_v61 = vsel %vm3813_vm4, %v11474_v62, %v6140_v37  ;;  %v6148_v34 = vpop.permute.xlu1 %6147 }
 0x35e   : > { %v3516_v18 = vsel %vm2297_vm10, %v3468_v56, %v6125_v4  ;;  %v3540_v52 = vsel %vm2297_vm10, %v3492_v23, %v6124_v9  ;;  %v4323_v58 = vpack.c.bf16 %v3831_v61, %v3830_v14  ;;  %v3672_v5 = vrot.slane %v3562_v15, 1  ;;  %vm13500_vm10 = vmmov %vm13471_vm1 }
 0x35f   : > { %v3564_v12 = vsel %vm2330_vm11, %v3516_v18, %v6135_v19  ;;  %v3588_v32 = vsel %vm2330_vm11, %v3540_v52, %v6134_v53  ;;  %v6150_v63 = vunpack.i.h.bf16 %v6148_v34  ;;  %v6149_v42 = vunpack.i.l.bf16 %v6148_v34  ;;  %v6143_v38 = vpop.permute.xlu0 %6142  ;;  %v13492_v19 = vld [vmem:[#allocation8_spill] sm:$0xff]  ;;  %vm13501_vm11 = vmmov %vm13471_vm1 }
 0x360   : > { %v2580_v62 = vsel %vm2561_vm15, %v11450_v8, %v5599_v21  ;;  %v2581_v22 = vsel %vm2561_vm15, %v11455_v40, %v5600_v54  ;;  %v3675_v3 = vrot.slane %v3564_v12, 1  ;;  %v3715_v45 = vrot.slane %v3588_v32, 1  ;;  %4325 = vmatprep.subr.msk.bf16.mxu0 %vm11549_vm5, %v4323_v58  ;;  %4371 = vmatprep.subr.msk.bf16.mxu1 %vm11549_vm5, %v4323_v58  ;;  %v13494_v18 = vld [vmem:[#allocation32_spill] sm:$0xff] }
 0x361   : > { %v6145_v35 = vunpack.i.h.bf16 %v6143_v38  ;;  %v6144_v11 = vunpack.i.l.bf16 %v6143_v38  ;;  %v3714_v4 = vsel %vm287_vm0, %v3712_v51, %v3713_v43  ;;  %v3674_v8 = vsel %vm287_vm0, %v3672_v5, %v3673_v55  ;;  %v13491_v51 = vld [vmem:[#allocation129_spill] sm:$0xff]  ;;  %v6158_v7 = vpop.permute.xlu1 %6157 }
 0x362   : > { %v3833_v1 = vsel %vm3813_vm4, %v2581_v22, %v6150_v63  ;;  %v3832_v21 = vsel %vm3813_vm4, %v2580_v62, %v6149_v42  ;;  %v3716_v40 = vsel %vm287_vm0, %v3713_v43, %v3715_v45  ;;  %v3676_v54 = vsel %vm287_vm0, %v3673_v55, %v3675_v3 }
 0x363   : > { %v6206_v9 = vpack.i.bf16 %v3716_v40, %v3714_v4  ;;  %v6211_v25 = vpack.i.bf16 %v3676_v54, %v3674_v8  ;;  %v2562_v36 = vsel %vm2561_vm15, %v11441_v44, %v5554_v0  ;;  %v2563_v15 = vsel %vm2561_vm15, %v11447_v29, %v5555_v39  ;;  %v6153_v56 = vpop.permute.xlu0 %6152  ;;  %v13493_v39 = vld [vmem:[#allocation147_spill] sm:$0xff]  ;;  %v13503_v40 = vld [vmem:[#allocation57_spill] sm:$0xff] }
 0x364   : > { %v5445_v37 = vunpack.i.h.bf16 %v13490_v47  ;;  %v5444_v49 = vunpack.i.l.bf16 %v13490_v47  ;;  %v3814_v23 = vsel %vm3813_vm4, %v2562_v36, %v6144_v11  ;;  %v3815_v55 = vsel %vm3813_vm4, %v2563_v15, %v6145_v35  ;;  %v13502_v35 = vld [vmem:[#allocation53_spill] sm:$0xff]  ;;  %v13505_v47 = vld [vmem:[#allocation4_spill] sm:$0xff] }
 0x365   : > { %v5480_v43 = vunpack.i.h.bf16 %v13491_v51  ;;  %v5479_v26 = vunpack.i.l.bf16 %v13491_v51  ;;  %v5525_v44 = vunpack.i.h.bf16 %v13492_v19  ;;  %v4329_v0 = vpack.c.bf16 %v3833_v1, %v3832_v21  ;;  %6207 = vrot.lane.b32.xlu1 %v6206_v9, %s6362_s18  ;;  %6212 = vrot.lane.b32.xlu0 %v6211_v25, %s6362_s18  ;;  %v13504_v25 = vld [vmem:[#allocation35_spill] sm:$0xff] }
 0x366   : > { %v5524_v29 = vunpack.i.l.bf16 %v13492_v19  ;;  %v5560_v53 = vunpack.i.h.bf16 %v13493_v39  ;;  %v5559_v14 = vunpack.i.l.bf16 %v13493_v39  ;;  %v4326_v61 = vpack.c.bf16 %v3815_v55, %v3814_v23 }
 0x367   : > { %v5605_v52 = vunpack.i.h.bf16 %v13494_v18  ;;  %v5604_v34 = vunpack.i.l.bf16 %v13494_v18  ;;  %v6155_v58 = vunpack.i.h.bf16 %v6153_v56  ;;  %v6154_v5 = vunpack.i.l.bf16 %v6153_v56  ;;  %v6163_v21 = vpop.permute.xlu0 %6162  ;;  %v13506_v56 = vld [vmem:[#allocation164_spill] sm:$0xff] }
 0x368   : > { %vm13495_vm0 = vcmask 424960   ;;  %v6160_v63 = vunpack.i.h.bf16 %v6158_v7  ;;  %v6159_v42 = vunpack.i.l.bf16 %v6158_v7  ;;  %4328 = vmatpush3.bf16.xpose.msk.msra.mxu0 %vm11549_vm5, %v4326_v61  ;;  %4379 = vmatpush3.bf16.xpose.msk.msra.mxu1 %vm11549_vm5, %v4326_v61  ;;  %v5405_v62 = vunpack.i.h.bf16 %v13459_v28 }
 0x369   : > { %v2500_v12 = vsel %vm13495_vm0, %v11158_v31, %v5404_v60  ;;  %vm13496_vm6 = vmmov %vm13495_vm0  ;;  %v2531_v3 = vsel %vm13498_vm8, %v11411_v20, %v5479_v26  ;;  %v2532_v31 = vsel %vm13499_vm9, %v11417_v33, %v5480_v43  ;;  %4331 = vmatprep.subr.msk.bf16.mxu0 %vm11549_vm5, %v4329_v0  ;;  %4372 = vmatprep.subr.msk.bf16.mxu1 %vm11549_vm5, %v4329_v0  ;;  %v5450_v11 = vunpack.i.h.bf16 %v13502_v35 }
 0x36a   : > { %v2516_v32 = vsel %vm13496_vm6, %v11306_v24, %v5444_v49  ;;  %vm13497_vm7 = vmmov %vm13495_vm0  ;;  %v2564_v28 = vsel %vm2561_vm15, %v2531_v3, %v5559_v14  ;;  %v5449_v4 = vunpack.i.l.bf16 %v13502_v35  ;;  %v5485_v54 = vunpack.i.h.bf16 %v13503_v40 }
 0x36b   : > { %v2517_v22 = vsel %vm13497_vm7, %v11310_v59, %v5445_v37  ;;  %v2549_v24 = vsel %vm13500_vm10, %v2516_v32, %v5524_v29  ;;  %v2565_v59 = vsel %vm2561_vm15, %v2532_v31, %v5560_v53  ;;  %v3816_v33 = vsel %vm3813_vm4, %v2564_v28, %v6154_v5  ;;  %vm13507_vm12 = vmmov %vm13495_vm0  ;;  %v13513_v32 = vld [vmem:[#allocation30_spill] sm:$0xff]  ;;  %v6173_v3 = vpop.permute.xlu0 %6172 }
 0x36c   : > { %v2550_v60 = vsel %vm13501_vm11, %v2517_v22, %v5525_v44  ;;  %v2582_v45 = vsel %vm2561_vm15, %v2549_v24, %v5604_v34  ;;  %v3817_v38 = vsel %vm3813_vm4, %v2565_v59, %v6155_v58  ;;  %v5484_v9 = vunpack.i.l.bf16 %v13503_v40  ;;  %v6168_v44 = vpop.permute.xlu1 %6167  ;;  %vm13508_vm13 = vmmov %vm13495_vm0  ;;  %v13524_v40 = vld [vmem:[#allocation48_spill] sm:$0xff] }
 0x36d   : > { %v2583_v20 = vsel %vm2561_vm15, %v2550_v60, %v5605_v52  ;;  %v3834_v8 = vsel %vm3813_vm4, %v2582_v45, %v6159_v42  ;;  %v5530_v36 = vunpack.i.h.bf16 %v13504_v25  ;;  %v5529_v15 = vunpack.i.l.bf16 %v13504_v25  ;;  %vm13509_vm14 = vmmov %vm13495_vm0  ;;  %v13516_v60 = vld [vmem:[#allocation52_spill] sm:$0xff] }
 0x36e   : > { %v3835_v1 = vsel %vm3813_vm4, %v2583_v20, %v6160_v63  ;;  %v5565_v37 = vunpack.i.h.bf16 %v13505_v47  ;;  %v5564_v49 = vunpack.i.l.bf16 %v13505_v47  ;;  %v5610_v23 = vunpack.i.h.bf16 %v13506_v56  ;;  %vm13511_vm0 = vmmov %vm13471_vm1 }
 0x36f   : > { %v4332_v55 = vpack.c.bf16 %v3817_v38, %v3816_v33  ;;  %v5609_v51 = vunpack.i.l.bf16 %v13506_v56  ;;  %v4335_v43 = vpack.c.bf16 %v3835_v1, %v3834_v8  ;;  %v6165_v26 = vunpack.i.h.bf16 %v6163_v21  ;;  %vm13512_vm6 = vmmov %vm13511_vm0  ;;  %v13519_v33 = vld [vmem:[#allocation5_spill] sm:$0xff] }
 0x370   : > { %v6164_v19 = vunpack.i.l.bf16 %v6163_v21  ;;  %v2501_v0 = vsel %vm13507_vm12, %v11161_v57, %v5405_v62  ;;  %v2518_v7 = vsel %vm13508_vm13, %v11294_v10, %v5449_v4  ;;  %v6170_v29 = vunpack.i.h.bf16 %v6168_v44  ;;  %vm13521_vm10 = vmmov %vm13507_vm12  ;;  %v13523_v21 = vld [vmem:[#allocation146_spill] sm:$0xff] }
 0x371   : > { %v6169_v39 = vunpack.i.l.bf16 %v6168_v44  ;;  %4334 = vmatpush3.bf16.xpose.msk.msra.mxu0 %vm11549_vm5, %v4332_v55  ;;  %4380 = vmatpush3.bf16.xpose.msk.msra.mxu1 %vm11549_vm5, %v4332_v55  ;;  %v5374_v53 = vunpack.i.l.bf16 %v13434_v2  ;;  %v2519_v14 = vsel %vm13509_vm14, %v11298_v30, %v5450_v11  ;;  %v2533_v61 = vsel %vm13510_vm3, %v2500_v12, %v5484_v9  ;;  %v13520_v11 = vld [vmem:[#allocation126_spill] sm:$0xff]  ;;  %vm13522_vm11 = vmmov %vm13521_vm10 }
 0x372   : > { %v2534_v57 = vsel %vm13471_vm1, %v2501_v0, %v5485_v54  ;;  %4337 = vmatprep.subr.msk.bf16.mxu0 %vm11549_vm5, %v4335_v43  ;;  %4373 = vmatprep.subr.msk.bf16.mxu1 %vm11549_vm5, %v4335_v43  ;;  %v2551_v10 = vsel %vm13511_vm0, %v2518_v7, %v5529_v15  ;;  %v2552_v18 = vsel %vm13512_vm6, %v2519_v14, %v5530_v36  ;;  %v5410_v63 = vunpack.i.h.bf16 %v13513_v32  ;;  %vm13525_vm12 = vmmov %vm13511_vm0  ;;  %v13527_v15 = vld [vmem:[#allocation7_spill] sm:$0xff]  ;;  %v13530_v43 = vld [vmem:[#allocation132_spill] sm:$0xff] }
 0x373   : > { %v2566_v52 = vsel %vm2561_vm15, %v2533_v61, %v5564_v49  ;;  %v2567_v34 = vsel %vm2561_vm15, %v2534_v57, %v5565_v37  ;;  %v2584_v30 = vsel %vm2561_vm15, %v2551_v10, %v5609_v51  ;;  %v2585_v58 = vsel %vm2561_vm15, %v2552_v18, %v5610_v23  ;;  %vm13526_vm13 = vmmov %vm13511_vm0 }
 0x374   : > { %v3819_v5 = vsel %vm3813_vm4, %v2567_v34, %v6165_v26  ;;  %v3818_v12 = vsel %vm3813_vm4, %v2566_v52, %v6164_v19  ;;  %v5409_v42 = vunpack.i.l.bf16 %v13513_v32  ;;  %v3837_v62 = vsel %vm3813_vm4, %v2585_v58, %v6170_v29  ;;  %vm13528_vm14 = vmmov %vm13521_vm10  ;;  %v6178_v0 = vpop.permute.xlu1 %6177 }
 0x375   : > { %v3836_v22 = vsel %vm3813_vm4, %v2584_v30, %v6169_v39  ;;  %vm13514_vm7 = vcmask 392192   ;;  %v5490_v28 = vunpack.i.h.bf16 %v13516_v60  ;;  %v5489_v59 = vunpack.i.l.bf16 %v13516_v60  ;;  %vm13529_vm3 = vmmov %vm13521_vm10  ;;  %v6183_v7 = vpop.permute.xlu0 %6182  ;;  %v13532_v39 = vld [vmem:[#allocation93_spill] sm:$0xff]  ;;  %v3846_v60 = vld [vmem:[%s11869_s1] sm:$0xff] }
 0x376   : > { %v2472_v31 = vsel %vm13514_vm7, %v11058_v50, %v5335_v6  ;;  %vm13515_vm8 = vmmov %vm13514_vm7  ;;  %v13517_v45 = vunpack.i.h.bf16 %v13434_v2  ;;  %v5570_v38 = vunpack.i.h.bf16 %v13519_v33  ;;  %v5569_v35 = vunpack.i.l.bf16 %v13519_v33 }
 0x377   : > { %v2487_v24 = vsel %vm13515_vm8, %v11123_v27, %v5374_v53  ;;  %vm13518_vm9 = vmmov %vm13514_vm7  ;;  %v4338_v16 = vpack.c.bf16 %v3819_v5, %v3818_v12  ;;  %v5454_v4 = vunpack.i.l.bf16 %v13520_v11  ;;  %v4341_v50 = vpack.c.bf16 %v3837_v62, %v3836_v22 }
 0x378   : > { %v2488_v20 = vsel %vm13518_vm9, %v11128_v13, %v13517_v45  ;;  %v6175_v6 = vunpack.i.h.bf16 %v6173_v3  ;;  %v6174_v8 = vunpack.i.l.bf16 %v6173_v3  ;;  %v2502_v27 = vsel %vm13521_vm10, %v11151_v17, %v5409_v42  ;;  %vm13531_vm1 = vmmov %vm13511_vm0  ;;  %v3849_v45 = vld [vmem:[%s11869_s1 + $0x18] sm:$0xff] }
 0x379   : > { %v2503_v1 = vsel %vm13522_vm11, %v11155_v41, %v5410_v63  ;;  %v5455_v2 = vunpack.i.h.bf16 %v13520_v11  ;;  %v5534_v13 = vunpack.i.l.bf16 %v13523_v21  ;;  %4340 = vmatpush3.bf16.xpose.msk.msra.mxu0 %vm11549_vm5, %v4338_v16  ;;  %4381 = vmatpush3.bf16.xpose.msk.msra.mxu1 %vm11549_vm5, %v4338_v16  ;;  %v5415_v54 = vunpack.i.h.bf16 %v13524_v40  ;;  %vm13533_vm6 = vmmov %vm13529_vm3 }
 0x37a   : > { %v2535_v9 = vsel %vm13525_vm12, %v2502_v27, %v5489_v59  ;;  %v2536_v25 = vsel %vm13526_vm13, %v2503_v1, %v5490_v28  ;;  %v5535_v17 = vunpack.i.h.bf16 %v13523_v21  ;;  %4343 = vmatprep.subr.msk.bf16.mxu0 %vm11549_vm5, %v4341_v50  ;;  %4374 = vmatprep.subr.msk.bf16.mxu1 %vm11549_vm5, %v4341_v50  ;;  %v5615_v47 = vunpack.i.h.bf16 %v13527_v15  ;;  %vm13534_vm7 = vmmov %vm13529_vm3  ;;  %v3847_v28 = vld [vmem:[%s11869_s1 + $0x8] sm:$0xff]  ;;  %v3848_v59 = vld [vmem:[%s11869_s1 + $0x10] sm:$0xff] }
 0x37b   : > { %v2568_v41 = vsel %vm2561_vm15, %v2535_v9, %v5569_v35  ;;  %v2569_v36 = vsel %vm2561_vm15, %v2536_v25, %v5570_v38  ;;  %v5614_v37 = vunpack.i.l.bf16 %v13527_v15  ;;  %v5414_v49 = vunpack.i.l.bf16 %v13524_v40  ;;  %vm13535_vm8 = vmmov %vm13511_vm0  ;;  %v13537_v50 = vld [vmem:[#allocation166_spill] sm:$0xff]  ;;  %v13539_v1 = vld [vmem:[#allocation64_spill] sm:$0xff] }
 0x37c   : > { %v2520_v56 = vsel %vm13528_vm14, %v2487_v24, %v5454_v4  ;;  %v3821_v23 = vsel %vm3813_vm4, %v2569_v36, %v6175_v6  ;;  %v3820_v55 = vsel %vm3813_vm4, %v2568_v41, %v6174_v8  ;;  %v2521_v51 = vsel %vm13529_vm3, %v2488_v20, %v5455_v2  ;;  %vm13536_vm9 = vmmov %vm13511_vm0  ;;  %v3850_v20 = vld [vmem:[%s11869_s1 + $0x20] sm:$0xff]  ;;  %v13540_v21 = vld [vmem:[#allocation149_spill] sm:$0xff] }
 0x37d   : > { %v5495_v26 = vunpack.i.h.bf16 %v13530_v43  ;;  %v5494_v19 = vunpack.i.l.bf16 %v13530_v43  ;;  %v2553_v44 = vsel %vm13531_vm1, %v2520_v56, %v5534_v13  ;;  %v2554_v29 = vsel %vm13511_vm0, %v2521_v51, %v5535_v17  ;;  %v13538_v8 = vld [vmem:[#allocation91_spill] sm:$0xff]  ;;  %v3851_v9 = vld [vmem:[%s11869_s1 + $0x28] sm:$0xff]  ;;  %v3852_v25 = vld [vmem:[%s11869_s1 + $0x30] sm:$0xff] }
 0x37e   : > { %v5575_v53 = vunpack.i.h.bf16 %v13532_v39  ;;  %v6180_v14 = vunpack.i.h.bf16 %v6178_v0  ;;  %v6179_v61 = vunpack.i.l.bf16 %v6178_v0  ;;  %v5574_v57 = vunpack.i.l.bf16 %v13532_v39  ;;  %v3853_v17 = vld [vmem:[%s11869_s1 + $0x38] sm:$0xff]  ;;  %v3854_v41 = vld [vmem:[%s11869_s1 + $0x40] sm:$0xff]  ;;  %v3855_v36 = vld [vmem:[%s11869_s1 + $0x48] sm:$0xff] }
 0x37f   : > { %v2586_v10 = vsel %vm2561_vm15, %v2553_v44, %v5614_v37  ;;  %v2587_v18 = vsel %vm2561_vm15, %v2554_v29, %v5615_v47  ;;  %v4344_v52 = vpack.c.bf16 %v3821_v23, %v3820_v55  ;;  %v6185_v58 = vunpack.i.h.bf16 %v6183_v7  ;;  %v3856_v15 = vld [vmem:[%s11869_s1 + $0x50] sm:$0xff]  ;;  %v3857_v23 = vld [vmem:[%s11869_s1 + $0x58] sm:$0xff]  ;;  %v13544_v39 = vld [vmem:[#allocation108_spill] sm:$0xff] }
 0x380   : > { %v3839_v34 = vsel %vm3813_vm4, %v2587_v18, %v6180_v14  ;;  %v3838_v30 = vsel %vm3813_vm4, %v2586_v10, %v6179_v61  ;;  %v6184_v5 = vunpack.i.l.bf16 %v6183_v7  ;;  %v2504_v12 = vsel %vm13533_vm6, %v11271_v48, %v5414_v49  ;;  %v13541_v43 = vld [vmem:[#allocation101_spill] sm:$0xff]  ;;  %v13543_v7 = vld [vmem:[#allocation46_spill] sm:$0xff]  ;;  %v3858_v61 = vld [vmem:[%s11869_s1 + $0x60] sm:$0xf] }
 0x381   : > { %v2505_v32 = vsel %vm13534_vm7, %v2472_v31, %v5415_v54  ;;  %v4347_v63 = vpack.c.bf16 %v3839_v34, %v3838_v30  ;;  %4346 = vmatpush3.bf16.xpose.msk.msra.mxu0 %vm11549_vm5, %v4344_v52  ;;  %4382 = vmatpush3.bf16.xpose.msk.msra.mxu1 %vm11549_vm5, %v4344_v52  ;;  %v2537_v42 = vsel %vm13535_vm8, %v2504_v12, %v5494_v19  ;;  %v13542_v19 = vld [vmem:[#allocation10_spill] sm:$0xff] }
 0x382   : > { %v2538_v62 = vsel %vm13536_vm9, %v2505_v32, %v5495_v26  ;;  %v2570_v22 = vsel %vm2561_vm15, %v2537_v42, %v5574_v57  ;;  %v13546_v12 = vld [vmem:[#allocation26_spill] sm:$0xff] }
 0x383   : > { %v2571_v3 = vsel %vm2561_vm15, %v2538_v62, %v5575_v53  ;;  %4349 = vmatprep.subr.msk.bf16.mxu0 %vm11549_vm5, %v4347_v63  ;;  %4375 = vmatprep.subr.msk.bf16.mxu1 %vm11549_vm5, %v4347_v63  ;;  %v3822_v31 = vsel %vm3813_vm4, %v2570_v22, %v6184_v5  ;;  %v13547_v63 = vld [vmem:[#allocation163_spill] sm:$0xff]  ;;  %vm4104_vm15 = vcmask 7168  }
 0x384   : > { %v3823_v48 = vsel %vm3813_vm4, %v2571_v3, %v6185_v58  ;;  %v13545_v58 = vld [vmem:[#allocation40_spill] sm:$0xff]  ;;  %v13548_v62 = vld [vmem:[#allocation95_spill] sm:$0xff] }
 0x385   : > { %v4350_v24 = vpack.c.bf16 %v3823_v48, %v3822_v31 }
 0x389   : > { %4352 = vmatpush3.bf16.xpose.msk.msra.mxu0 %vm11549_vm5, %v4350_v24  ;;  %4383 = vmatpush3.bf16.xpose.msk.msra.mxu1 %vm11549_vm5, %v4350_v24 }
 0x38e   : > { %3859 = vxpose.xlu1.b32.start [1/13] (short) (narrow) %v3846_v60, 24 }
 0x392   : > { %3860 = vxpose.xlu1.b32.cont [2/13] (short) (narrow) %v3847_v28, 24 }
 0x396   : > { %3861 = vxpose.xlu1.b32.cont [3/13] (short) (narrow) %v3848_v59, 24  ;;  %v6188_v33 = vpop.permute.xlu1 %6187 }
 0x397   : > { %v6193_v38 = vpop.permute.xlu0 %6192  ;;  %v6190_v35 = vunpack.i.h.bf16 %v6188_v33  ;;  %v6189_v16 = vunpack.i.l.bf16 %v6188_v33 }
 0x398   : > { %v6195_v11 = vunpack.i.h.bf16 %v6193_v38  ;;  %v6194_v4 = vunpack.i.l.bf16 %v6193_v38 }
 0x399   : > { %v3841_v6 = vsel %vm3813_vm4, %v13537_v50, %v6190_v35  ;;  %v3840_v27 = vsel %vm3813_vm4, %v13538_v8, %v6189_v16 }
 0x39a   : > { %3862 = vxpose.xlu1.b32.cont [4/13] (short) (narrow) %v3849_v45, 24  ;;  %v3825_v2 = vsel %vm3813_vm4, %v13539_v1, %v6195_v11  ;;  %v3824_v13 = vsel %vm3813_vm4, %v13540_v21, %v6194_v4  ;;  %v4353_v40 = vpack.c.bf16 %v3841_v6, %v3840_v27 }
 0x39b   : > { %v4356_v54 = vpack.c.bf16 %v3825_v2, %v3824_v13 }
 0x39c   : > { %4355 = vmatprep.subr.msk.bf16.mxu0 %vm11549_vm5, %v4353_v40  ;;  %4376 = vmatprep.subr.msk.bf16.mxu1 %vm11549_vm5, %v4353_v40 }
 0x39d   : > { %4358 = vmatpush3.bf16.xpose.msk.msra.mxu0 %vm11549_vm5, %v4356_v54  ;;  %4384 = vmatpush3.bf16.xpose.msk.msra.mxu1 %vm11549_vm5, %v4356_v54 }
 0x39e   : > { %3863 = vxpose.xlu1.b32.cont [5/13] (short) (narrow) %v3850_v20, 24 }
 0x3a2   : > { %3864 = vxpose.xlu1.b32.cont [6/13] (short) (narrow) %v3851_v9, 24 }
 0x3a6   : > { %3865 = vxpose.xlu1.b32.cont [7/13] (short) (narrow) %v3852_v25, 24 }
 0x3aa   : > { %3866 = vxpose.xlu1.b32.cont [8/13] (short) (narrow) %v3853_v17, 24 }
 0x3ae   : > { %3867 = vxpose.xlu1.b32.cont [9/13] (short) (narrow) %v3854_v41, 24 }
 0x3b2   : > { %3868 = vxpose.xlu1.b32.cont [10/13] (short) (narrow) %v3855_v36, 24  ;;  %v6203_v47 = vpop.permute.xlu0 %6202 }
 0x3b3   : > { %v6205_v37 = vunpack.i.h.bf16 %v6203_v47  ;;  %v6204_v49 = vunpack.i.l.bf16 %v6203_v47 }
 0x3b4   : > { %v6198_v56 = vpop.permute.xlu1 %6197 }
 0x3b5   : > { %v6200_v55 = vunpack.i.h.bf16 %v6198_v56  ;;  %v6199_v51 = vunpack.i.l.bf16 %v6198_v56  ;;  %v3827_v26 = vsel %vm3813_vm4, %v13541_v43, %v6205_v37  ;;  %v3826_v44 = vsel %vm3813_vm4, %v13542_v19, %v6204_v49 }
 0x3b6   : > { %3869 = vxpose.xlu1.b32.cont [11/13] (short) (narrow) %v3856_v15, 24  ;;  %v4362_v0 = vpack.c.bf16 %v3827_v26, %v3826_v44 }
 0x3b7   : > { %v3843_v29 = vsel %vm3813_vm4, %v13543_v7, %v6200_v55  ;;  %v3842_v53 = vsel %vm3813_vm4, %v13544_v39, %v6199_v51 }
 0x3b8   : > { %v4359_v14 = vpack.c.bf16 %v3843_v29, %v3842_v53 }
 0x3ba   : > { %3870 = vxpose.xlu1.b32.cont [12/13] (short) (narrow) %v3857_v23, 24  ;;  %4361 = vmatprep.subr.msk.bf16.mxu0 %vm11549_vm5, %v4359_v14 }
 0x3bb   : > { %4377 = vmatprep.subr.msk.bf16.mxu1 %vm11549_vm5, %v4359_v14  ;;  %4364 = vmatpush3.bf16.xpose.msk.msra.mxu0 %vm11549_vm5, %v4362_v0 }
 0x3bc   : > { %4385 = vmatpush3.bf16.xpose.msk.msra.mxu1 %vm11549_vm5, %v4362_v0 }
 0x3be   : > { %3871 = vxpose.xlu1.b32.end [13/13] (short) (narrow) %v3858_v61, 24 }
 0x3d7   : > { %v6208_v57 = vpop.permute.xlu1 %6207  ;;  %v6213_v10 = vpop.permute.xlu0 %6212 }
 0x3d8   : > { %v6210_v18 = vunpack.i.h.bf16 %v6208_v57  ;;  %v6209_v52 = vunpack.i.l.bf16 %v6208_v57  ;;  %v6215_v34 = vunpack.i.h.bf16 %v6213_v10  ;;  %v6214_v30 = vunpack.i.l.bf16 %v6213_v10 }
 0x3da   : > { %v3845_v5 = vsel %vm3813_vm4, %v13545_v58, %v6210_v18  ;;  %v3844_v32 = vsel %vm3813_vm4, %v13546_v12, %v6209_v52  ;;  %v3829_v42 = vsel %vm3813_vm4, %v13547_v63, %v6215_v34  ;;  %v3828_v22 = vsel %vm3813_vm4, %v13548_v62, %v6214_v30 }
 0x3db   : > { %v4365_v3 = vpack.c.bf16 %v3845_v5, %v3844_v32  ;;  %v4368_v48 = vpack.c.bf16 %v3829_v42, %v3828_v22  ;;  %vm4108_vm4 = vcmask 15360  }
 0x3dd   : > { %4367 = vmatprep.subr.msk.bf16.mxu0 %vm11549_vm5, %v4365_v3  ;;  %4378 = vmatprep.subr.msk.bf16.mxu1 %vm11549_vm5, %v4365_v3 }
 0x3de   : > { %4370 = vmatpush3.bf16.xpose.msk.msra.mxu0 %vm11549_vm5, %v4368_v48  ;;  %4386 = vmatpush3.bf16.xpose.msk.msra.mxu1 %vm11549_vm5, %v4368_v48 }
 0x40e   : > { %v3875_v31 = vpop.trf.xlu1 }
 0x40f   : > { %4317 = vmatprep.mubr.msk.f32.mxu0 %vm3891_vm2, %v3875_v31 }
 0x410   : > { %4318 = vmatmul.mubr.msk.f32.vlgmr.msra.gmra.mrb[0].mxu0 %vm3891_vm2, %v3875_v31 }
 0x412   : > { %v3876_v24 = vpop.trf.xlu1 }
 0x413   : > { %4319 = vmatprep.mubr.msk.f32.mxu1 %vm3891_vm2, %v3876_v24 }
 0x414   : > { %4320 = vmatmul.mubr.msk.f32.vlgmr.msra.gmra.mrb[0].mxu1 %vm3891_vm2, %v3876_v24 }
 0x416   : > { %v3877_v60 = vpop.trf.xlu1 }
 0x417   : > { %4321 = vmatprep.mubr.msk.f32.mxu1 %vm3891_vm2, %v3877_v60 }
 0x418   : > { %4322 = vmatmul.mubr.msk.f32.gmra.mrb[2].mxu1 %vm3891_vm2, %v3877_v60 }
 0x4e3   : > { %v4063_v28 = vpop.f32.mrb[0].mxu0 }
 0x4e4   : > { %v4089_v46 = vmul.f32 %v4063_v28, %v4063_v28  ;;  %4112 = vst [vmem:[%s11834_s30] sm:$0xff] %v4063_v28  ;;  %v4065_v59 = vpop.f32.mrb[1].mxu0 }
 0x4e5   : > { %v4080_v45 = vadd.f32 %v4065_v59, %v4063_v28  ;;  %v4090_v20 = vmul.f32 %v4065_v59, %v4065_v59  ;;  %4113 = vst [vmem:[%s11834_s30 + $0x8] sm:$0xff] %v4065_v59 }
 0x4e7   : > { %v4095_v33 = vadd.f32 %v4090_v20, %v4089_v46  ;;  %v4069_v38 = vpop.f32.mrb[0].mxu1  ;;  %4081 = vadd.xlane.f32.xlu0 %v4080_v45 }
 0x4e8   : > { %v4091_v35 = vmul.f32 %v4069_v38, %v4069_v38  ;;  %4114 = vst [vmem:[%s11834_s30 + $0x10] sm:$0xff] %v4069_v38  ;;  %v4071_v16 = vpop.f32.mrb[1].mxu1 }
 0x4e9   : > { %v4083_v11 = vadd.f32 %v4071_v16, %v4069_v38  ;;  %v4092_v4 = vmul.f32 %v4071_v16, %v4071_v16  ;;  %4115 = vst [vmem:[%s11834_s30 + $0x18] sm:$0xff] %v4071_v16 }
 0x4eb   : > { %v4075_v50 = vpop.f32.mrb[2].mxu1  ;;  %4084 = vadd.xlane.f32.xlu0 %v4083_v11  ;;  %v4098_v6 = vadd.f32 %v4092_v4, %v4091_v35  ;;  %v4145_v47 = vld [vmem:[%s11834_s30] sm:$0xff] (%p6408_p4) }
 0x4ec   : > { %v4093_v8 = vmul.f32 %v4075_v50, %v4075_v50  ;;  %4116 = vst [vmem:[%s11834_s30 + $0x20] sm:$0xff] %v4075_v50  ;;  %v4077_v27 = vpop.f32.mrb[3].mxu1  ;;  %v4147_v37 = vld [vmem:[%s11834_s30 + $0x8] sm:$0xff] (%p6408_p4)  ;;  %4146 = vst [vmem:[%s4132_s9] sm:$0xff] (%p6408_p4), %v4145_v47 }
 0x4ed   : > { %v4086_v1 = vadd.f32 %v4077_v27, %v4075_v50  ;;  %v4094_v2 = vmul.f32 %v4077_v27, %v4077_v27  ;;  %4117 = vst [vmem:[%s11834_s30 + $0x28] sm:$0xff] %v4077_v27  ;;  %4148 = vst [vmem:[%s4132_s9 + $0x8] sm:$0xff] (%p6408_p4), %v4147_v37 }
 0x4ef   : > { %v4101_v21 = vadd.f32 %v4094_v2, %v4093_v8  ;;  %4087 = vadd.xlane.f32.xlu0 %v4086_v1  ;;  %v4149_v49 = vld [vmem:[%s11834_s30 + $0x10] sm:$0xff] (%p6408_p4) }
 0x4f0   : > { %v4151_v56 = vld [vmem:[%s11834_s30 + $0x18] sm:$0xff] (%p6408_p4)  ;;  %4150 = vst [vmem:[%s4132_s9 + $0x20] sm:$0xff] (%p6408_p4), %v4149_v49 }
 0x4f1   : > { %4152 = vst [vmem:[%s4132_s9 + $0x28] sm:$0xff] (%p6408_p4), %v4151_v56 }
 0x4f3   : > { %4096 = vadd.xlane.f32.xlu0 %v4095_v33  ;;  %v4153_v23 = vld [vmem:[%s11834_s30 + $0x20] sm:$0xff] (%p6408_p4) }
 0x4f4   : > { %v4155_v55 = vld [vmem:[%s11834_s30 + $0x28] sm:$0xff] (%p6408_p4)  ;;  %4154 = vst [vmem:[%s4132_s9 + $0x40] sm:$0xff] (%p6408_p4), %v4153_v23 }
 0x4f5   : > { %4156 = vst [vmem:[%s4132_s9 + $0x48] sm:$0xff] (%p6408_p4), %v4155_v55 }
 0x4f7   : > { %4099 = vadd.xlane.f32.xlu0 %v4098_v6 }
 0x4fb   : > { %4102 = vadd.xlane.f32.xlu0 %v4101_v21 }
 0x574   : > { %v4082_v13 = vpop.xlane.xlu0 %4081 }
 0x578   : > { %v4085_v40 = vpop.xlane.xlu0 %4084 }
 0x57c   : > { %v4088_v54 = vpop.xlane.xlu0 %4087 }
 0x580   : > { %v4097_v9 = vpop.xlane.xlu0 %4096 }
 0x581   : > { %v4105_v25 = vsel %vm4104_vm15, %v4082_v13, %v4097_v9 }
 0x582   : > { %4109 = vst.msk [vmem:[%s178_s6] sm:$0xff] %vm4108_vm4, %v4105_v25 }
 0x584   : > { %v4100_v17 = vpop.xlane.xlu0 %4099  ;;  %4129 = sbr.rel (!%p6408_p4) target bundleno = 1419 (0x58b), region = 32 }
 0x585   : > { %v4106_v41 = vsel %vm4104_vm15, %v4085_v40, %v4100_v17 }
 0x586   : > { %4110 = vst.msk [vmem:[%s178_s6 + $0x8] sm:$0xff] %vm4108_vm4, %v4106_v41 }
 0x588   : > { %v4103_v36 = vpop.xlane.xlu0 %4102 }
 0x589   : > { %v4107_v15 = vsel %vm4104_vm15, %v4088_v54, %v4103_v36 }
 0x58a   : > { %4111 = vst.msk [vmem:[%s178_s6 + $0x10] sm:$0xff] %vm4108_vm4, %v4107_v15 }
 0x58b PF: > { %p11_p8 = scmp.ge.s32.totalorder %s6398_s16, 4   ;;  %s13549_s12 = smov %s6341_s13 }
 0x58c   : > { %s13550_s13 = smov %s6406_s19  ;;  %s13551_s14 = smov %s6398_s16 }
 0x58d   :  { %13 = sbr.rel (!%p11_p8) target bundleno = 2 (0x2), region = 93 }

</bundles_post_ra>
